<compile_context>
chip_gen: v7x
topology: tpu7x:2x2x1
jax: 0.10.0
libtpu: 0.0.40
codegen_flags: <defaults>
</compile_context>

<pallas_src>
import functools
import math

import jax
import jax.numpy as jnp
from jax.experimental import pallas as pl
from jax.experimental.pallas import tpu as pltpu


def _round_up(n, m):
    return ((n + m - 1) // m) * m


def _tile(a, n, axis):
    return a if n == 1 else jnp.concatenate([a] * n, axis=axis)


def _layer_norm(x, g, b, eps=1e-5):
    mu = jnp.mean(x, axis=-1, keepdims=True)
    xc = x - mu
    var = jnp.mean(xc * xc, axis=-1, keepdims=True)
    return xc * jax.lax.rsqrt(var + eps) * g + b


# ----------------------------------------------------------------------------
# Kernel: one (batch element, layer) grid step
# ----------------------------------------------------------------------------
def _dp_kernel(
        # per-batch inputs
        x_ref, xm_col_ref, xm_row_ref, prompt_ref, pm_col_ref, pm_row_ref,
        # constant weights / packing constants
        pre_w_ref, pre_b_ref,
        kbm_s_ref, vbm_s_ref, seg_s_ref,
        kbm_c_ref, vbm_c_ref, seg_c_ref,
        expand_ref,
        # per-layer (streamed) weights
        sa_w_ref, sa_b_ref, ca_w_ref, ca_b_ref,
        ln_g_ref, ln_b_ref,
        ffn_w1_ref, ffn_b1_ref, ffn_w2_ref, ffn_b2_ref,
        # constant projection
        proj_w_ref, proj_b_ref,
        # output
        out_ref,
        # scratch (persist across the layer axis)
        h_scr, prm_scr,
        *, n_heads, group_size):
    l = pl.program_id(1)
    H, G = n_heads, group_size
    NG = H // G
    T, C = h_scr.shape
    Tp = prm_scr.shape[0]
    D = C // H
    GD = G * D
    inv_sqrt_d = 1.0 / math.sqrt(D)

    xm_c = xm_col_ref[0]                       # (T, 1)
    xm_r = xm_row_ref[0]                       # (1, T)
    pm_r = pm_row_ref[0]                       # (1, Tp)

    # ---- phase 0 (l == 0): pre 1x1 conv + masks into persistent scratch ----
    @pl.when(l == 0)
    def _pre():
        x_in = x_ref[0].astype(jnp.bfloat16)                      # (T, Cin)
        h0 = jnp.dot(x_in, pre_w_ref[...],
                     preferred_element_type=jnp.float32) + pre_b_ref[...]
        h_scr[...] = h0 * xm_c
        prm_scr[...] = (prompt_ref[0] * pm_col_ref[0]).astype(jnp.bfloat16)

    # additive key-padding biases (0 valid / -1e9 pad), tiled across the group
    xbias = _tile((xm_r - 1.0) * 1e9, G, axis=1)                  # (1, G*T)
    pbias = _tile((pm_r - 1.0) * 1e9, G, axis=1)                  # (1, G*Tp)
    expand = expand_ref[...]                                      # (G, GD)

    def attention(xq_bf, kv_bf, S, kbias, kbm_ref, vbm_ref, seg_ref,
                  w_ref, b_ref):
        wq, wkT, wv, wo = w_ref[0, 0], w_ref[0, 1], w_ref[0, 2], w_ref[0, 3]
        bq, bv, bo = b_ref[0, 0], b_ref[0, 2], b_ref[0, 3]
        q = jnp.dot(xq_bf, wq, preferred_element_type=jnp.float32) + bq
        q = (q * inv_sqrt_d).astype(jnp.bfloat16)                 # (T, C)
        # K arrives already transposed via an NT-form matmul (wkT is the
        # pre-transposed k weight) -> no (S, C) XLU transpose.  The key bias
        # is omitted: it adds the same constant to every logit of a query row
        # and cancels under softmax.
        kT = jax.lax.dot_general(wkT, kv_bf, (((1,), (1,)), ((), ())),
                                 preferred_element_type=jnp.float32)
        kT = kT.astype(jnp.bfloat16)                              # (C, S)
        v = jnp.dot(kv_bf, wv,
                    preferred_element_type=jnp.float32).astype(jnp.bfloat16)
        kbm = kbm_ref[...]                                        # (GD, G*S)
        vbm = vbm_ref[...]                                        # (G*S, GD)
        seg = seg_ref[...]                                        # (G*S, G)
        ctx_parts = []
        for g in range(NG):
            kT_g = kT[g * GD:(g + 1) * GD, :]                     # (GD, S)
            v_g = v[:, g * GD:(g + 1) * GD]                       # (S, GD)
            # block-diagonal packed K and [V | seg] (bf16, G copies not H)
            kb = _tile(kT_g, G, axis=1) * kbm                     # (GD, G*S)
            vb = jnp.concatenate([_tile(v_g, G, axis=0) * vbm, seg],
                                 axis=1)                          # (G*S, GD+G)
            qg = q[:, g * GD:(g + 1) * GD]                        # (T, GD)
            s = jnp.dot(qg, kb,
                        preferred_element_type=jnp.float32) + kbias
            # per-row max across the group's segments (shift-invariant per
            # head segment, so a shared max is mathematically valid)
            p = jnp.exp(s - jnp.max(s, axis=-1, keepdims=True))   # (T, G*S)
            ca = jnp.dot(p.astype(jnp.bfloat16), vb,
                         preferred_element_type=jnp.float32)      # (T, GD+G)
            recip = pl.reciprocal(ca[:, GD:] + 1e-9, approx=True)  # (T, G)
            scale = jnp.dot(recip, expand,
                            preferred_element_type=jnp.float32)   # (T, GD)
            ctx_parts.append(ca[:, :GD] * scale)
        ctx = ctx_parts[0] if NG == 1 else jnp.concatenate(ctx_parts, axis=1)
        ctx = ctx + bv                # value bias, applied post-normalisation
        return jnp.dot(ctx.astype(jnp.bfloat16), wo,
                       preferred_element_type=jnp.float32) + bo

    # ---- one encoder block (self-attn -> cross-attn -> FFN, post-LN) -------
    h = h_scr[...]
    h_bf = h.astype(jnp.bfloat16)
    a = attention(h_bf, h_bf, T, xbias, kbm_s_ref, vbm_s_ref, seg_s_ref,
                  sa_w_ref, sa_b_ref)
    h = _layer_norm(h + a, ln_g_ref[0, 0], ln_b_ref[0, 0])
    h_bf = h.astype(jnp.bfloat16)
    a = attention(h_bf, prm_scr[...], Tp, pbias, kbm_c_ref, vbm_c_ref,
                  seg_c_ref, ca_w_ref, ca_b_ref)
    h = _layer_norm(h + a, ln_g_ref[0, 1], ln_b_ref[0, 1])
    f = jnp.dot(h.astype(jnp.bfloat16), ffn_w1_ref[0],
                preferred_element_type=jnp.float32) + ffn_b1_ref[0]
    f = jnp.maximum(f, 0.0)
    f = jnp.dot(f.astype(jnp.bfloat16), ffn_w2_ref[0],
                preferred_element_type=jnp.float32) + ffn_b2_ref[0]
    h = _layer_norm(h + f, ln_g_ref[0, 2], ln_b_ref[0, 2])
    h_scr[...] = h

    # ---- final 1x1 projection to out_channels, mask, (O, T) layout ---------
    @pl.when(l == pl.num_programs(1) - 1)
    def _proj():
        y = jax.lax.dot_general(proj_w_ref[...], h.astype(jnp.bfloat16),
                                (((1,), (1,)), ((), ())),
                                preferred_element_type=jnp.float32)  # (O, T)
        out_ref[0] = ((y + proj_b_ref[...]) * xm_r).astype(out_ref.dtype)


# ----------------------------------------------------------------------------
# Wrapper: masks, padding, packing constants, one fused pallas_call
# ----------------------------------------------------------------------------
def duration_predictor_forward(params, x, x_lengths, prompt, prompt_lengths,
                               *, n_heads, head_group_size=None):
    B, Cin, T0 = x.shape
    _, C, Tp0 = prompt.shape
    L = params["sa_w"].shape[0]
    assert params["sa_w"].shape[-1] == C
    F = params["ffn_w1"].shape[-1]
    O = params["proj_w"].shape[0]
    H = n_heads
    assert C % H == 0
    D = C // H

    # head grouping: pack G heads per MXU call so packed-K width G*D stays
    # near one 128-lane tile instead of blowing FLOPs up by H x.
    if head_group_size is None:
        G = max(1, min(H, 128 // max(D, 1)))
        while H % G:
            G -= 1
    else:
        G = int(head_group_size)
    assert G >= 1 and H % G == 0
    GD = G * D

    # lane-dense time axes: pad to multiples of 128 (masked; sliced off below)
    T = _round_up(T0, 128)
    Tp = _round_up(Tp0, 128)

    f32, bf16 = jnp.float32, jnp.bfloat16

    x_btc = jnp.transpose(x, (0, 2, 1)).astype(f32)
    x_btc = jnp.pad(x_btc, ((0, 0), (0, T - T0), (0, 0)))
    p_btc = jnp.transpose(prompt, (0, 2, 1)).astype(f32)
    p_btc = jnp.pad(p_btc, ((0, 0), (0, Tp - Tp0), (0, 0)))

    xv = (jnp.arange(T)[None, :] < x_lengths[:, None]).astype(f32)
    pv = (jnp.arange(Tp)[None, :] < prompt_lengths[:, None]).astype(f32)
    xm_col, xm_row = xv[:, :, None], xv[:, None, :]
    pm_col, pm_row = pv[:, :, None], pv[:, None, :]

    # block-diagonal head-packing constants (hoisted out of the kernel)
    def pack_consts(S):
        rk = jnp.arange(GD)[:, None] // D
        ck = jnp.arange(G * S)[None, :] // S
        kbm = (rk == ck).astype(bf16)                      # (GD, G*S)
        rv = jnp.arange(G * S)[:, None] // S
        cv = jnp.arange(GD)[None, :] // D
        vbm = (rv == cv).astype(bf16)                      # (G*S, GD)
        seg = (rv == jnp.arange(G)[None, :]).astype(bf16)  # (G*S, G)
        return kbm, vbm, seg

    kbm_s, vbm_s, seg_s = pack_consts(T)
    kbm_c, vbm_c, seg_c = pack_consts(Tp)
    expand = (jnp.arange(G)[:, None] ==
              jnp.arange(GD)[None, :] // D).astype(f32)    # (G, GD)

    # pre-transpose the K projection so the kernel uses an NT-form matmul
    def prep_attn_w(w):
        wkT = jnp.swapaxes(w[:, 1:2], -1, -2)
        return jnp.concatenate([w[:, 0:1], wkT, w[:, 2:4]], axis=1).astype(bf16)

    sa_w = prep_attn_w(params["sa_w"])
    ca_w = prep_attn_w(params["ca_w"])

    def per_b(shape):
        z = (0,) * (len(shape) - 1)
        return pl.BlockSpec((1,) + shape[1:], lambda b, l, _z=z: (b,) + _z)

    def per_l(shape):
        z = (0,) * (len(shape) - 1)
        return pl.BlockSpec((1,) + shape[1:], lambda b, l, _z=z: (l,) + _z)

    def const(shape):
        z = (0,) * len(shape)
        # NOTE: could add pipeline_mode=pl.Buffered(1) to single-buffer these
        # index-invariant blocks on VMEM-tight chips (v7x).
        return pl.BlockSpec(shape, lambda b, l, _z=z: _z)

    in_specs = [
        per_b((B, T, Cin)), per_b((B, T, 1)), per_b((B, 1, T)),
        per_b((B, Tp, C)), per_b((B, Tp, 1)), per_b((B, 1, Tp)),
        const((Cin, C)), const((1, C)),
        const((GD, G * T)), const((G * T, GD)), const((G * T, G)),
        const((GD, G * Tp)), const((G * Tp, GD)), const((G * Tp, G)),
        const((G, GD)),
        per_l((L, 4, C, C)), per_l((L, 4, 1, C)),
        per_l((L, 4, C, C)), per_l((L, 4, 1, C)),
        per_l((L, 3, 1, C)), per_l((L, 3, 1, C)),
        per_l((L, C, F)), per_l((L, 1, F)),
        per_l((L, F, C)), per_l((L, 1, C)),
        const((O, C)), const((O, 1)),
    ]

    # coarse VMEM budget (one layer of weights double-buffered + activations +
    # packed-KV intermediates), clamped to v7x's 64 MiB physical VMEM.
    bf, fl = 2, 4
    per_layer_w = (2 * 4 * C * C + C * F + F * C) * bf \
        + (2 * 4 * C + 3 * 2 * C + F + C) * fl
    const_in = (Cin * C + GD * G * (T + Tp) + G * (T + Tp) * (GD + G)
                + O * C) * bf + (C + G * GD + O) * fl
    per_b_in = (T * Cin + Tp * C + 2 * (T + Tp) + O * T) * fl
    scratch_b = T * C * fl + Tp * C * bf
    transient = (3 * T * G * T + 8 * T * C + T * F + C * max(T, Tp)) * fl
    vmem_est = 2 * (per_layer_w + const_in + per_b_in) \
        + scratch_b + transient + (4 << 20)
    vmem_limit = int(min(64 * 2 ** 20, max(16 * 2 ** 20, vmem_est)))

    grid_spec = pltpu.PrefetchScalarGridSpec(
        num_scalar_prefetch=0,
        grid=(B, L),
        in_specs=in_specs,
        out_specs=pl.BlockSpec((1, O, T), lambda b, l: (b, 0, 0)),
        scratch_shapes=[pltpu.VMEM((T, C), jnp.float32),    # running h
                        pltpu.VMEM((Tp, C), jnp.bfloat16)],  # masked prompt
    )

    kernel = functools.partial(_dp_kernel, n_heads=H, group_size=G)
    out = pl.pallas_call(
        kernel,
        out_shape=jax.ShapeDtypeStruct((B, O, T), jnp.float32),
        grid_spec=grid_spec,
        compiler_params=pltpu.CompilerParams(
            dimension_semantics=("parallel", "arbitrary"),
            vmem_limit_bytes=vmem_limit),
    )(x_btc, xm_col, xm_row, p_btc, pm_col, pm_row,
      params["pre_w"].astype(bf16), params["pre_b"],
      kbm_s, vbm_s, seg_s, kbm_c, vbm_c, seg_c, expand,
      sa_w, params["sa_b"], ca_w, params["ca_b"],
      params["ln_g"], params["ln_b"],
      params["ffn_w1"].astype(bf16), params["ffn_b1"],
      params["ffn_w2"].astype(bf16), params["ffn_b2"],
      params["proj_w"].astype(bf16), params["proj_b"])
    return out[:, :, :T0]


# ----------------------------------------------------------------------------
# Parameters
# ----------------------------------------------------------------------------
def init_params(key, *, in_channels, hidden, ffn_channels, out_channels,
                n_layers):
    L, C, F = n_layers, hidden, ffn_channels
    ks = jax.random.split(key, 12)

    def nrm(k, shape, scale=0.02):
        return jax.random.normal(k, shape, jnp.float32) * scale

    return {
        "pre_w": nrm(ks[0], (in_channels, C)),
        "pre_b": nrm(ks[1], (1, C)),
        "sa_w": nrm(ks[2], (L, 4, C, C)),            # [wq, wk, wv, wo]
        "sa_b": nrm(ks[3], (L, 4, 1, C)),
        "ca_w": nrm(ks[4], (L, 4, C, C)),
        "ca_b": nrm(ks[5], (L, 4, 1, C)),
        "ln_g": jnp.ones((L, 3, 1, C), jnp.float32),
        "ln_b": jnp.zeros((L, 3, 1, C), jnp.float32),
        "ffn_w1": nrm(ks[6], (L, C, F)),
        "ffn_b1": nrm(ks[7], (L, 1, F)),
        "ffn_w2": nrm(ks[8], (L, F, C)),
        "ffn_b2": nrm(ks[9], (L, 1, C)),
        "proj_w": nrm(ks[10], (out_channels, C)),
        "proj_b": nrm(ks[11], (out_channels, 1)),
    }


# ----------------------------------------------------------------------------
if __name__ == "__main__":
    # small shapes consistent with the module (defaults scaled down)
    B, T, Tp = 2, 16, 8
    in_channels = 64
    hidden_channels = 32
    ffn_channels = 128
    out_channels = 1
    n_heads = 8
    n_layers = 2

    key = jax.random.PRNGKey(0)
    pkey, dkey = jax.random.split(key)
    params = init_params(pkey, in_channels=in_channels, hidden=hidden_channels,
                         ffn_channels=ffn_channels, out_channels=out_channels,
                         n_layers=n_layers)

    k1, k2 = jax.random.split(dkey)
    x = jax.random.normal(k1, (B, in_channels, T), jnp.float32)
    prompt = jax.random.normal(k2, (B, hidden_channels, Tp), jnp.float32)
    x_lengths = jnp.array([T, 11], dtype=jnp.int32)
    prompt_lengths = jnp.array([Tp, 5], dtype=jnp.int32)

    # head_group_size=4 forces the 2-group packed-attention path even at these
    # tiny dims (auto selection would pick a single group here).
    y = duration_predictor_forward(params, x, x_lengths, prompt, prompt_lengths,
                                   n_heads=n_heads, head_group_size=4)
    jax.block_until_ready(y)

    assert y.shape == (B, out_channels, T)
    assert bool(jnp.all(jnp.isfinite(y)))
    # frames beyond x_lengths must be zeroed by x_mask
    assert float(jnp.max(jnp.abs(y[1, :, 11:]))) == 0.0
    print("KERNEL_OK")
</pallas_src>

<mosaic_0001>
module attributes {stable_mosaic.version = 11 : i64} {
  func.func @_dp_kernel(%arg0: i32, %arg1: i32, %arg2: memref<1x128x64xf32, #tpu.memory_space<vmem>>, %arg3: memref<1x128x1xf32, #tpu.memory_space<vmem>>, %arg4: memref<1x1x128xf32, #tpu.memory_space<vmem>>, %arg5: memref<1x128x32xf32, #tpu.memory_space<vmem>>, %arg6: memref<1x128x1xf32, #tpu.memory_space<vmem>>, %arg7: memref<1x1x128xf32, #tpu.memory_space<vmem>>, %arg8: memref<64x32xbf16, #tpu.memory_space<vmem>>, %arg9: memref<1x32xf32, #tpu.memory_space<vmem>>, %arg10: memref<16x512xbf16, #tpu.memory_space<vmem>>, %arg11: memref<512x16xbf16, #tpu.memory_space<vmem>>, %arg12: memref<512x4xbf16, #tpu.memory_space<vmem>>, %arg13: memref<16x512xbf16, #tpu.memory_space<vmem>>, %arg14: memref<512x16xbf16, #tpu.memory_space<vmem>>, %arg15: memref<512x4xbf16, #tpu.memory_space<vmem>>, %arg16: memref<4x16xf32, #tpu.memory_space<vmem>>, %arg17: memref<1x4x32x32xbf16, #tpu.memory_space<vmem>>, %arg18: memref<1x4x1x32xf32, #tpu.memory_space<vmem>>, %arg19: memref<1x4x32x32xbf16, #tpu.memory_space<vmem>>, %arg20: memref<1x4x1x32xf32, #tpu.memory_space<vmem>>, %arg21: memref<1x3x1x32xf32, #tpu.memory_space<vmem>>, %arg22: memref<1x3x1x32xf32, #tpu.memory_space<vmem>>, %arg23: memref<1x32x128xbf16, #tpu.memory_space<vmem>>, %arg24: memref<1x1x128xf32, #tpu.memory_space<vmem>>, %arg25: memref<1x128x32xbf16, #tpu.memory_space<vmem>>, %arg26: memref<1x1x32xf32, #tpu.memory_space<vmem>>, %arg27: memref<1x32xbf16, #tpu.memory_space<vmem>>, %arg28: memref<1x1xf32, #tpu.memory_space<vmem>>, %arg29: memref<1x1x128xf32, #tpu.memory_space<vmem>>, %arg30: memref<128x32xf32, #tpu.memory_space<vmem>>, %arg31: memref<128x32xbf16, #tpu.memory_space<vmem>>) attributes {dimension_semantics = [#tpu.dimension_semantics<parallel>, #tpu.dimension_semantics<arbitrary>], iteration_bounds = array<i64: 2, 2>, scalar_prefetch = 0 : i64, scratch_operands = 2 : i64, tpu.core_type = #tpu.core_type<tc>, window_params = [{transform_indices = @transform_0, window_bounds = array<i64: 1, 128, 64>}, {transform_indices = @transform_1, window_bounds = array<i64: 1, 128, 1>}, {transform_indices = @transform_2, window_bounds = array<i64: 1, 1, 128>}, {transform_indices = @transform_3, window_bounds = array<i64: 1, 128, 32>}, {transform_indices = @transform_4, window_bounds = array<i64: 1, 128, 1>}, {transform_indices = @transform_5, window_bounds = array<i64: 1, 1, 128>}, {pipeline_mode = #tpu.pipeline_mode<synchronous>, transform_indices = @transform_6, window_bounds = array<i64: 64, 32>}, {pipeline_mode = #tpu.pipeline_mode<synchronous>, transform_indices = @transform_7, window_bounds = array<i64: 1, 32>}, {pipeline_mode = #tpu.pipeline_mode<synchronous>, transform_indices = @transform_8, window_bounds = array<i64: 16, 512>}, {pipeline_mode = #tpu.pipeline_mode<synchronous>, transform_indices = @transform_9, window_bounds = array<i64: 512, 16>}, {pipeline_mode = #tpu.pipeline_mode<synchronous>, transform_indices = @transform_10, window_bounds = array<i64: 512, 4>}, {pipeline_mode = #tpu.pipeline_mode<synchronous>, transform_indices = @transform_11, window_bounds = array<i64: 16, 512>}, {pipeline_mode = #tpu.pipeline_mode<synchronous>, transform_indices = @transform_12, window_bounds = array<i64: 512, 16>}, {pipeline_mode = #tpu.pipeline_mode<synchronous>, transform_indices = @transform_13, window_bounds = array<i64: 512, 4>}, {pipeline_mode = #tpu.pipeline_mode<synchronous>, transform_indices = @transform_14, window_bounds = array<i64: 4, 16>}, {transform_indices = @transform_15, window_bounds = array<i64: 1, 4, 32, 32>}, {transform_indices = @transform_16, window_bounds = array<i64: 1, 4, 1, 32>}, {transform_indices = @transform_17, window_bounds = array<i64: 1, 4, 32, 32>}, {transform_indices = @transform_18, window_bounds = array<i64: 1, 4, 1, 32>}, {transform_indices = @transform_19, window_bounds = array<i64: 1, 3, 1, 32>}, {transform_indices = @transform_20, window_bounds = array<i64: 1, 3, 1, 32>}, {transform_indices = @transform_21, window_bounds = array<i64: 1, 32, 128>}, {transform_indices = @transform_22, window_bounds = array<i64: 1, 1, 128>}, {transform_indices = @transform_23, window_bounds = array<i64: 1, 128, 32>}, {transform_indices = @transform_24, window_bounds = array<i64: 1, 1, 32>}, {pipeline_mode = #tpu.pipeline_mode<synchronous>, transform_indices = @transform_25, window_bounds = array<i64: 1, 32>}, {pipeline_mode = #tpu.pipeline_mode<synchronous>, transform_indices = @transform_26, window_bounds = array<i64: 1, 1>}, {transform_indices = @transform_27, window_bounds = array<i64: 1, 1, 128>}]} {
    %c0 = arith.constant 0 : index
    %c0_0 = arith.constant 0 : index
    %c0_1 = arith.constant 0 : index
    %0 = vector.load %arg3[%c0, %c0_0, %c0_1] : memref<1x128x1xf32, #tpu.memory_space<vmem>>, vector<1x128x1xf32>
    %1 = vector.shape_cast %0 : vector<1x128x1xf32> to vector<128x1xf32>
    %c0_2 = arith.constant 0 : index
    %c0_3 = arith.constant 0 : index
    %c0_4 = arith.constant 0 : index
    %2 = vector.load %arg4[%c0_2, %c0_3, %c0_4] : memref<1x1x128xf32, #tpu.memory_space<vmem>>, vector<1x1x128xf32>
    %3 = vector.shape_cast %2 : vector<1x1x128xf32> to vector<1x128xf32>
    %c0_5 = arith.constant 0 : index
    %c0_6 = arith.constant 0 : index
    %c0_7 = arith.constant 0 : index
    %4 = vector.load %arg7[%c0_5, %c0_6, %c0_7] : memref<1x1x128xf32, #tpu.memory_space<vmem>>, vector<1x1x128xf32>
    %5 = vector.shape_cast %4 : vector<1x1x128xf32> to vector<1x128xf32>
    %c0_i32 = arith.constant 0 : i32
    %6 = arith.cmpi eq, %arg1, %c0_i32 : i32
    %7 = arith.extui %6 : i1 to i32
    %c0_i32_8 = arith.constant 0 : i32
    %8 = arith.cmpi ne, %7, %c0_i32_8 : i32
    scf.if %8 {
      %c0_170 = arith.constant 0 : index
      %c0_171 = arith.constant 0 : index
      %c0_172 = arith.constant 0 : index
      %289 = vector.load %arg2[%c0_170, %c0_171, %c0_172] : memref<1x128x64xf32, #tpu.memory_space<vmem>>, vector<1x128x64xf32>
      %290 = vector.shape_cast %289 : vector<1x128x64xf32> to vector<128x64xf32>
      %291 = arith.truncf %290 : vector<128x64xf32> to vector<128x64xbf16>
      %c0_173 = arith.constant 0 : index
      %c0_174 = arith.constant 0 : index
      %292 = vector.load %arg8[%c0_173, %c0_174] : memref<64x32xbf16, #tpu.memory_space<vmem>>, vector<64x32xbf16>
      %cst_175 = arith.constant dense<0.000000e+00> : vector<128x32xf32>
      %293 = tpu.matmul %291, %292, %cst_175 {dimension_numbers = #tpu.dot_dimension_numbers<[1], [0], [0], [1], [0, 0, 1, 1], [], []>} : vector<128x64xbf16>, vector<64x32xbf16>, vector<128x32xf32> -> vector<128x32xf32>
      %c0_176 = arith.constant 0 : index
      %c0_177 = arith.constant 0 : index
      %294 = vector.load %arg9[%c0_176, %c0_177] : memref<1x32xf32, #tpu.memory_space<vmem>>, vector<1x32xf32>
      %295 = vector.broadcast %294 : vector<1x32xf32> to vector<128x32xf32>
      %296 = arith.addf %293, %295 : vector<128x32xf32>
      %297 = vector.broadcast %1 : vector<128x1xf32> to vector<128x32xf32>
      %298 = arith.mulf %296, %297 : vector<128x32xf32>
      %c0_178 = arith.constant 0 : index
      %c0_179 = arith.constant 0 : index
      %299 = vector.load %arg30[%c0_178, %c0_179] : memref<128x32xf32, #tpu.memory_space<vmem>>, vector<128x32xf32>
      tpu.vector_store %arg30[%c0_178, %c0_179], %298 {strides = array<i32>} : memref<128x32xf32, #tpu.memory_space<vmem>>, vector<128x32xf32>,
      %c0_180 = arith.constant 0 : index
      %c0_181 = arith.constant 0 : index
      %c0_182 = arith.constant 0 : index
      %300 = vector.load %arg5[%c0_180, %c0_181, %c0_182] : memref<1x128x32xf32, #tpu.memory_space<vmem>>, vector<1x128x32xf32>
      %301 = vector.shape_cast %300 : vector<1x128x32xf32> to vector<128x32xf32>
      %c0_183 = arith.constant 0 : index
      %c0_184 = arith.constant 0 : index
      %c0_185 = arith.constant 0 : index
      %302 = vector.load %arg6[%c0_183, %c0_184, %c0_185] : memref<1x128x1xf32, #tpu.memory_space<vmem>>, vector<1x128x1xf32>
      %303 = vector.shape_cast %302 : vector<1x128x1xf32> to vector<128x1xf32>
      %304 = vector.broadcast %303 : vector<128x1xf32> to vector<128x32xf32>
      %305 = arith.mulf %301, %304 : vector<128x32xf32>
      %306 = arith.truncf %305 : vector<128x32xf32> to vector<128x32xbf16>
      %c0_186 = arith.constant 0 : index
      %c0_187 = arith.constant 0 : index
      %307 = vector.load %arg31[%c0_186, %c0_187] : memref<128x32xbf16, #tpu.memory_space<vmem>>, vector<128x32xbf16>
      tpu.vector_store %arg31[%c0_186, %c0_187], %306 {strides = array<i32>} : memref<128x32xbf16, #tpu.memory_space<vmem>>, vector<128x32xbf16>,
    } else {
    }
    %cst = arith.constant 1.000000e+00 : f32
    %9 = vector.broadcast %cst : f32 to vector<1x128xf32>
    %10 = arith.subf %3, %9 : vector<1x128xf32>
    %cst_9 = arith.constant 1.000000e+09 : f32
    %11 = vector.broadcast %cst_9 : f32 to vector<1x128xf32>
    %12 = arith.mulf %10, %11 : vector<1x128xf32>
    %13 = tpu.concatenate %12, %12, %12, %12 in 1 : vector<1x128xf32>, vector<1x128xf32>, vector<1x128xf32>, vector<1x128xf32> -> vector<1x512xf32>
    %cst_10 = arith.constant 1.000000e+00 : f32
    %14 = vector.broadcast %cst_10 : f32 to vector<1x128xf32>
    %15 = arith.subf %5, %14 : vector<1x128xf32>
    %cst_11 = arith.constant 1.000000e+09 : f32
    %16 = vector.broadcast %cst_11 : f32 to vector<1x128xf32>
    %17 = arith.mulf %15, %16 : vector<1x128xf32>
    %18 = tpu.concatenate %17, %17, %17, %17 in 1 : vector<1x128xf32>, vector<1x128xf32>, vector<1x128xf32>, vector<1x128xf32> -> vector<1x512xf32>
    %c0_12 = arith.constant 0 : index
    %c0_13 = arith.constant 0 : index
    %19 = vector.load %arg16[%c0_12, %c0_13] : memref<4x16xf32, #tpu.memory_space<vmem>>, vector<4x16xf32>
    %c0_14 = arith.constant 0 : index
    %c0_15 = arith.constant 0 : index
    %20 = vector.load %arg30[%c0_14, %c0_15] : memref<128x32xf32, #tpu.memory_space<vmem>>, vector<128x32xf32>
    %21 = arith.truncf %20 : vector<128x32xf32> to vector<128x32xbf16>
    %c0_16 = arith.constant 0 : index
    %c0_17 = arith.constant 0 : index
    %c0_18 = arith.constant 0 : index
    %c0_19 = arith.constant 0 : index
    %22 = vector.load %arg17[%c0_16, %c0_17, %c0_18, %c0_19] : memref<1x4x32x32xbf16, #tpu.memory_space<vmem>>, vector<1x1x32x32xbf16>
    %23 = vector.shape_cast %22 : vector<1x1x32x32xbf16> to vector<32x32xbf16>
    %c0_20 = arith.constant 0 : index
    %c1 = arith.constant 1 : index
    %c0_21 = arith.constant 0 : index
    %c0_22 = arith.constant 0 : index
    %24 = vector.load %arg17[%c0_20, %c1, %c0_21, %c0_22] : memref<1x4x32x32xbf16, #tpu.memory_space<vmem>>, vector<1x1x32x32xbf16>
    %25 = vector.shape_cast %24 : vector<1x1x32x32xbf16> to vector<32x32xbf16>
    %c0_23 = arith.constant 0 : index
    %c2 = arith.constant 2 : index
    %c0_24 = arith.constant 0 : index
    %c0_25 = arith.constant 0 : index
    %26 = vector.load %arg17[%c0_23, %c2, %c0_24, %c0_25] : memref<1x4x32x32xbf16, #tpu.memory_space<vmem>>, vector<1x1x32x32xbf16>
    %27 = vector.shape_cast %26 : vector<1x1x32x32xbf16> to vector<32x32xbf16>
    %c0_26 = arith.constant 0 : index
    %c3 = arith.constant 3 : index
    %c0_27 = arith.constant 0 : index
    %c0_28 = arith.constant 0 : index
    %28 = vector.load %arg17[%c0_26, %c3, %c0_27, %c0_28] : memref<1x4x32x32xbf16, #tpu.memory_space<vmem>>, vector<1x1x32x32xbf16>
    %29 = vector.shape_cast %28 : vector<1x1x32x32xbf16> to vector<32x32xbf16>
    %c0_29 = arith.constant 0 : index
    %c0_30 = arith.constant 0 : index
    %c0_31 = arith.constant 0 : index
    %c0_32 = arith.constant 0 : index
    %30 = vector.load %arg18[%c0_29, %c0_30, %c0_31, %c0_32] : memref<1x4x1x32xf32, #tpu.memory_space<vmem>>, vector<1x1x1x32xf32>
    %31 = vector.shape_cast %30 : vector<1x1x1x32xf32> to vector<1x32xf32>
    %c0_33 = arith.constant 0 : index
    %c2_34 = arith.constant 2 : index
    %c0_35 = arith.constant 0 : index
    %c0_36 = arith.constant 0 : index
    %32 = vector.load %arg18[%c0_33, %c2_34, %c0_35, %c0_36] : memref<1x4x1x32xf32, #tpu.memory_space<vmem>>, vector<1x1x1x32xf32>
    %33 = vector.shape_cast %32 : vector<1x1x1x32xf32> to vector<1x32xf32>
    %c0_37 = arith.constant 0 : index
    %c3_38 = arith.constant 3 : index
    %c0_39 = arith.constant 0 : index
    %c0_40 = arith.constant 0 : index
    %34 = vector.load %arg18[%c0_37, %c3_38, %c0_39, %c0_40] : memref<1x4x1x32xf32, #tpu.memory_space<vmem>>, vector<1x1x1x32xf32>
    %35 = vector.shape_cast %34 : vector<1x1x1x32xf32> to vector<1x32xf32>
    %cst_41 = arith.constant dense<0.000000e+00> : vector<128x32xf32>
    %36 = tpu.matmul %21, %23, %cst_41 {dimension_numbers = #tpu.dot_dimension_numbers<[1], [0], [0], [1], [0, 0, 1, 1], [], []>} : vector<128x32xbf16>, vector<32x32xbf16>, vector<128x32xf32> -> vector<128x32xf32>
    %37 = vector.broadcast %31 : vector<1x32xf32> to vector<128x32xf32>
    %38 = arith.addf %36, %37 : vector<128x32xf32>
    %cst_42 = arith.constant 5.000000e-01 : f32
    %39 = vector.broadcast %cst_42 : f32 to vector<128x32xf32>
    %40 = arith.mulf %38, %39 : vector<128x32xf32>
    %41 = arith.truncf %40 : vector<128x32xf32> to vector<128x32xbf16>
    %cst_43 = arith.constant dense<0.000000e+00> : vector<32x128xf32>
    %42 = tpu.matmul %25, %21, %cst_43 {dimension_numbers = #tpu.dot_dimension_numbers<[1], [1], [0], [0], [0, 0, 1, 0], [], []>} : vector<32x32xbf16>, vector<128x32xbf16>, vector<32x128xf32> -> vector<32x128xf32>
    %43 = arith.truncf %42 : vector<32x128xf32> to vector<32x128xbf16>
    %cst_44 = arith.constant dense<0.000000e+00> : vector<128x32xf32>
    %44 = tpu.matmul %21, %27, %cst_44 {dimension_numbers = #tpu.dot_dimension_numbers<[1], [0], [0], [1], [0, 0, 1, 1], [], []>} : vector<128x32xbf16>, vector<32x32xbf16>, vector<128x32xf32> -> vector<128x32xf32>
    %45 = arith.truncf %44 : vector<128x32xf32> to vector<128x32xbf16>
    %c0_45 = arith.constant 0 : index
    %c0_46 = arith.constant 0 : index
    %46 = vector.load %arg10[%c0_45, %c0_46] : memref<16x512xbf16, #tpu.memory_space<vmem>>, vector<16x512xbf16>
    %c0_47 = arith.constant 0 : index
    %c0_48 = arith.constant 0 : index
    %47 = vector.load %arg11[%c0_47, %c0_48] : memref<512x16xbf16, #tpu.memory_space<vmem>>, vector<512x16xbf16>
    %c0_49 = arith.constant 0 : index
    %c0_50 = arith.constant 0 : index
    %48 = vector.load %arg12[%c0_49, %c0_50] : memref<512x4xbf16, #tpu.memory_space<vmem>>, vector<512x4xbf16>
    %49 = vector.extract_strided_slice %43 {offsets = [0, 0], sizes = [16, 128], strides = [1, 1]} : vector<32x128xbf16> to vector<16x128xbf16>
    %50 = vector.extract_strided_slice %45 {offsets = [0, 0], sizes = [128, 16], strides = [1, 1]} : vector<128x32xbf16> to vector<128x16xbf16>
    %51 = tpu.concatenate %49, %49, %49, %49 in 1 : vector<16x128xbf16>, vector<16x128xbf16>, vector<16x128xbf16>, vector<16x128xbf16> -> vector<16x512xbf16>
    %52 = arith.mulf %51, %46 : vector<16x512xbf16>
    %53 = tpu.concatenate %50, %50, %50, %50 in 0 : vector<128x16xbf16>, vector<128x16xbf16>, vector<128x16xbf16>, vector<128x16xbf16> -> vector<512x16xbf16>
    %54 = arith.mulf %53, %47 : vector<512x16xbf16>
    %55 = tpu.concatenate %54, %48 in 1 : vector<512x16xbf16>, vector<512x4xbf16> -> vector<512x20xbf16>
    %56 = vector.extract_strided_slice %41 {offsets = [0, 0], sizes = [128, 16], strides = [1, 1]} : vector<128x32xbf16> to vector<128x16xbf16>
    %cst_51 = arith.constant dense<0.000000e+00> : vector<128x512xf32>
    %57 = tpu.matmul %56, %52, %cst_51 {dimension_numbers = #tpu.dot_dimension_numbers<[1], [0], [0], [1], [0, 0, 1, 1], [], []>} : vector<128x16xbf16>, vector<16x512xbf16>, vector<128x512xf32> -> vector<128x512xf32>
    %58 = vector.broadcast %13 : vector<1x512xf32> to vector<128x512xf32>
    %59 = arith.addf %57, %58 : vector<128x512xf32>
    %cst_52 = arith.constant dense<0xFF800000> : vector<128xf32>
    %60 = vector.multi_reduction <maximumf>, %59, %cst_52 [1] : vector<128x512xf32> to vector<128xf32>
    %61 = vector.shape_cast %60 : vector<128xf32> to vector<128x1xf32>
    %62 = vector.broadcast %61 : vector<128x1xf32> to vector<128x512xf32>
    %63 = arith.subf %59, %62 : vector<128x512xf32>
    %64 = math.exp %63 : vector<128x512xf32>
    %65 = arith.truncf %64 : vector<128x512xf32> to vector<128x512xbf16>
    %cst_53 = arith.constant dense<0.000000e+00> : vector<128x20xf32>
    %66 = tpu.matmul %65, %55, %cst_53 {dimension_numbers = #tpu.dot_dimension_numbers<[1], [0], [0], [1], [0, 0, 1, 1], [], []>} : vector<128x512xbf16>, vector<512x20xbf16>, vector<128x20xf32> -> vector<128x20xf32>
    %67 = vector.extract_strided_slice %66 {offsets = [0, 16], sizes = [128, 4], strides = [1, 1]} : vector<128x20xf32> to vector<128x4xf32>
    %cst_54 = arith.constant 9.99999971E-10 : f32
    %68 = vector.broadcast %cst_54 : f32 to vector<128x4xf32>
    %69 = arith.addf %67, %68 : vector<128x4xf32>
    %70 = tpu.reciprocal %69 {approx = true} : vector<128x4xf32> -> vector<128x4xf32>
    %cst_55 = arith.constant dense<0.000000e+00> : vector<128x16xf32>
    %71 = tpu.matmul %70, %19, %cst_55 {dimension_numbers = #tpu.dot_dimension_numbers<[1], [0], [0], [1], [0, 0, 1, 1], [], []>} : vector<128x4xf32>, vector<4x16xf32>, vector<128x16xf32> -> vector<128x16xf32>
    %72 = vector.extract_strided_slice %66 {offsets = [0, 0], sizes = [128, 16], strides = [1, 1]} : vector<128x20xf32> to vector<128x16xf32>
    %73 = arith.mulf %72, %71 : vector<128x16xf32>
    %74 = vector.extract_strided_slice %43 {offsets = [16, 0], sizes = [16, 128], strides = [1, 1]} : vector<32x128xbf16> to vector<16x128xbf16>
    %75 = vector.extract_strided_slice %45 {offsets = [0, 16], sizes = [128, 16], strides = [1, 1]} : vector<128x32xbf16> to vector<128x16xbf16>
    %76 = tpu.concatenate %74, %74, %74, %74 in 1 : vector<16x128xbf16>, vector<16x128xbf16>, vector<16x128xbf16>, vector<16x128xbf16> -> vector<16x512xbf16>
    %77 = arith.mulf %76, %46 : vector<16x512xbf16>
    %78 = tpu.concatenate %75, %75, %75, %75 in 0 : vector<128x16xbf16>, vector<128x16xbf16>, vector<128x16xbf16>, vector<128x16xbf16> -> vector<512x16xbf16>
    %79 = arith.mulf %78, %47 : vector<512x16xbf16>
    %80 = tpu.concatenate %79, %48 in 1 : vector<512x16xbf16>, vector<512x4xbf16> -> vector<512x20xbf16>
    %81 = vector.extract_strided_slice %41 {offsets = [0, 16], sizes = [128, 16], strides = [1, 1]} : vector<128x32xbf16> to vector<128x16xbf16>
    %cst_56 = arith.constant dense<0.000000e+00> : vector<128x512xf32>
    %82 = tpu.matmul %81, %77, %cst_56 {dimension_numbers = #tpu.dot_dimension_numbers<[1], [0], [0], [1], [0, 0, 1, 1], [], []>} : vector<128x16xbf16>, vector<16x512xbf16>, vector<128x512xf32> -> vector<128x512xf32>
    %83 = vector.broadcast %13 : vector<1x512xf32> to vector<128x512xf32>
    %84 = arith.addf %82, %83 : vector<128x512xf32>
    %cst_57 = arith.constant dense<0xFF800000> : vector<128xf32>
    %85 = vector.multi_reduction <maximumf>, %84, %cst_57 [1] : vector<128x512xf32> to vector<128xf32>
    %86 = vector.shape_cast %85 : vector<128xf32> to vector<128x1xf32>
    %87 = vector.broadcast %86 : vector<128x1xf32> to vector<128x512xf32>
    %88 = arith.subf %84, %87 : vector<128x512xf32>
    %89 = math.exp %88 : vector<128x512xf32>
    %90 = arith.truncf %89 : vector<128x512xf32> to vector<128x512xbf16>
    %cst_58 = arith.constant dense<0.000000e+00> : vector<128x20xf32>
    %91 = tpu.matmul %90, %80, %cst_58 {dimension_numbers = #tpu.dot_dimension_numbers<[1], [0], [0], [1], [0, 0, 1, 1], [], []>} : vector<128x512xbf16>, vector<512x20xbf16>, vector<128x20xf32> -> vector<128x20xf32>
    %92 = vector.extract_strided_slice %91 {offsets = [0, 16], sizes = [128, 4], strides = [1, 1]} : vector<128x20xf32> to vector<128x4xf32>
    %cst_59 = arith.constant 9.99999971E-10 : f32
    %93 = vector.broadcast %cst_59 : f32 to vector<128x4xf32>
    %94 = arith.addf %92, %93 : vector<128x4xf32>
    %95 = tpu.reciprocal %94 {approx = true} : vector<128x4xf32> -> vector<128x4xf32>
    %cst_60 = arith.constant dense<0.000000e+00> : vector<128x16xf32>
    %96 = tpu.matmul %95, %19, %cst_60 {dimension_numbers = #tpu.dot_dimension_numbers<[1], [0], [0], [1], [0, 0, 1, 1], [], []>} : vector<128x4xf32>, vector<4x16xf32>, vector<128x16xf32> -> vector<128x16xf32>
    %97 = vector.extract_strided_slice %91 {offsets = [0, 0], sizes = [128, 16], strides = [1, 1]} : vector<128x20xf32> to vector<128x16xf32>
    %98 = arith.mulf %97, %96 : vector<128x16xf32>
    %99 = tpu.concatenate %73, %98 in 1 : vector<128x16xf32>, vector<128x16xf32> -> vector<128x32xf32>
    %100 = vector.broadcast %33 : vector<1x32xf32> to vector<128x32xf32>
    %101 = arith.addf %99, %100 : vector<128x32xf32>
    %102 = arith.truncf %101 : vector<128x32xf32> to vector<128x32xbf16>
    %cst_61 = arith.constant dense<0.000000e+00> : vector<128x32xf32>
    %103 = tpu.matmul %102, %29, %cst_61 {dimension_numbers = #tpu.dot_dimension_numbers<[1], [0], [0], [1], [0, 0, 1, 1], [], []>} : vector<128x32xbf16>, vector<32x32xbf16>, vector<128x32xf32> -> vector<128x32xf32>
    %104 = vector.broadcast %35 : vector<1x32xf32> to vector<128x32xf32>
    %105 = arith.addf %103, %104 : vector<128x32xf32>
    %106 = arith.addf %20, %105 : vector<128x32xf32>
    %c0_62 = arith.constant 0 : index
    %c0_63 = arith.constant 0 : index
    %c0_64 = arith.constant 0 : index
    %c0_65 = arith.constant 0 : index
    %107 = vector.load %arg21[%c0_62, %c0_63, %c0_64, %c0_65] : memref<1x3x1x32xf32, #tpu.memory_space<vmem>>, vector<1x1x1x32xf32>
    %108 = vector.shape_cast %107 : vector<1x1x1x32xf32> to vector<1x32xf32>
    %c0_66 = arith.constant 0 : index
    %c0_67 = arith.constant 0 : index
    %c0_68 = arith.constant 0 : index
    %c0_69 = arith.constant 0 : index
    %109 = vector.load %arg22[%c0_66, %c0_67, %c0_68, %c0_69] : memref<1x3x1x32xf32, #tpu.memory_space<vmem>>, vector<1x1x1x32xf32>
    %110 = vector.shape_cast %109 : vector<1x1x1x32xf32> to vector<1x32xf32>
    %cst_70 = arith.constant dense<0.000000e+00> : vector<128xf32>
    %111 = vector.multi_reduction <add>, %106, %cst_70 [1] : vector<128x32xf32> to vector<128xf32>
    %112 = vector.shape_cast %111 : vector<128xf32> to vector<128x1xf32>
    %cst_71 = arith.constant 3.200000e+01 : f32
    %113 = vector.broadcast %cst_71 : f32 to vector<128x1xf32>
    %114 = arith.divf %112, %113 : vector<128x1xf32>
    %115 = vector.broadcast %114 : vector<128x1xf32> to vector<128x32xf32>
    %116 = arith.subf %106, %115 : vector<128x32xf32>
    %117 = arith.mulf %116, %116 : vector<128x32xf32>
    %cst_72 = arith.constant dense<0.000000e+00> : vector<128xf32>
    %118 = vector.multi_reduction <add>, %117, %cst_72 [1] : vector<128x32xf32> to vector<128xf32>
    %119 = vector.shape_cast %118 : vector<128xf32> to vector<128x1xf32>
    %cst_73 = arith.constant 3.200000e+01 : f32
    %120 = vector.broadcast %cst_73 : f32 to vector<128x1xf32>
    %121 = arith.divf %119, %120 : vector<128x1xf32>
    %cst_74 = arith.constant 9.99999974E-6 : f32
    %122 = vector.broadcast %cst_74 : f32 to vector<128x1xf32>
    %123 = arith.addf %121, %122 : vector<128x1xf32>
    %124 = math.rsqrt %123 : vector<128x1xf32>
    %125 = vector.broadcast %124 : vector<128x1xf32> to vector<128x32xf32>
    %126 = arith.mulf %116, %125 : vector<128x32xf32>
    %127 = vector.broadcast %108 : vector<1x32xf32> to vector<128x32xf32>
    %128 = arith.mulf %126, %127 : vector<128x32xf32>
    %129 = vector.broadcast %110 : vector<1x32xf32> to vector<128x32xf32>
    %130 = arith.addf %128, %129 : vector<128x32xf32>
    %131 = arith.truncf %130 : vector<128x32xf32> to vector<128x32xbf16>
    %c0_75 = arith.constant 0 : index
    %c0_76 = arith.constant 0 : index
    %132 = vector.load %arg31[%c0_75, %c0_76] : memref<128x32xbf16, #tpu.memory_space<vmem>>, vector<128x32xbf16>
    %c0_77 = arith.constant 0 : index
    %c0_78 = arith.constant 0 : index
    %c0_79 = arith.constant 0 : index
    %c0_80 = arith.constant 0 : index
    %133 = vector.load %arg19[%c0_77, %c0_78, %c0_79, %c0_80] : memref<1x4x32x32xbf16, #tpu.memory_space<vmem>>, vector<1x1x32x32xbf16>
    %134 = vector.shape_cast %133 : vector<1x1x32x32xbf16> to vector<32x32xbf16>
    %c0_81 = arith.constant 0 : index
    %c1_82 = arith.constant 1 : index
    %c0_83 = arith.constant 0 : index
    %c0_84 = arith.constant 0 : index
    %135 = vector.load %arg19[%c0_81, %c1_82, %c0_83, %c0_84] : memref<1x4x32x32xbf16, #tpu.memory_space<vmem>>, vector<1x1x32x32xbf16>
    %136 = vector.shape_cast %135 : vector<1x1x32x32xbf16> to vector<32x32xbf16>
    %c0_85 = arith.constant 0 : index
    %c2_86 = arith.constant 2 : index
    %c0_87 = arith.constant 0 : index
    %c0_88 = arith.constant 0 : index
    %137 = vector.load %arg19[%c0_85, %c2_86, %c0_87, %c0_88] : memref<1x4x32x32xbf16, #tpu.memory_space<vmem>>, vector<1x1x32x32xbf16>
    %138 = vector.shape_cast %137 : vector<1x1x32x32xbf16> to vector<32x32xbf16>
    %c0_89 = arith.constant 0 : index
    %c3_90 = arith.constant 3 : index
    %c0_91 = arith.constant 0 : index
    %c0_92 = arith.constant 0 : index
    %139 = vector.load %arg19[%c0_89, %c3_90, %c0_91, %c0_92] : memref<1x4x32x32xbf16, #tpu.memory_space<vmem>>, vector<1x1x32x32xbf16>
    %140 = vector.shape_cast %139 : vector<1x1x32x32xbf16> to vector<32x32xbf16>
    %c0_93 = arith.constant 0 : index
    %c0_94 = arith.constant 0 : index
    %c0_95 = arith.constant 0 : index
    %c0_96 = arith.constant 0 : index
    %141 = vector.load %arg20[%c0_93, %c0_94, %c0_95, %c0_96] : memref<1x4x1x32xf32, #tpu.memory_space<vmem>>, vector<1x1x1x32xf32>
    %142 = vector.shape_cast %141 : vector<1x1x1x32xf32> to vector<1x32xf32>
    %c0_97 = arith.constant 0 : index
    %c2_98 = arith.constant 2 : index
    %c0_99 = arith.constant 0 : index
    %c0_100 = arith.constant 0 : index
    %143 = vector.load %arg20[%c0_97, %c2_98, %c0_99, %c0_100] : memref<1x4x1x32xf32, #tpu.memory_space<vmem>>, vector<1x1x1x32xf32>
    %144 = vector.shape_cast %143 : vector<1x1x1x32xf32> to vector<1x32xf32>
    %c0_101 = arith.constant 0 : index
    %c3_102 = arith.constant 3 : index
    %c0_103 = arith.constant 0 : index
    %c0_104 = arith.constant 0 : index
    %145 = vector.load %arg20[%c0_101, %c3_102, %c0_103, %c0_104] : memref<1x4x1x32xf32, #tpu.memory_space<vmem>>, vector<1x1x1x32xf32>
    %146 = vector.shape_cast %145 : vector<1x1x1x32xf32> to vector<1x32xf32>
    %cst_105 = arith.constant dense<0.000000e+00> : vector<128x32xf32>
    %147 = tpu.matmul %131, %134, %cst_105 {dimension_numbers = #tpu.dot_dimension_numbers<[1], [0], [0], [1], [0, 0, 1, 1], [], []>} : vector<128x32xbf16>, vector<32x32xbf16>, vector<128x32xf32> -> vector<128x32xf32>
    %148 = vector.broadcast %142 : vector<1x32xf32> to vector<128x32xf32>
    %149 = arith.addf %147, %148 : vector<128x32xf32>
    %cst_106 = arith.constant 5.000000e-01 : f32
    %150 = vector.broadcast %cst_106 : f32 to vector<128x32xf32>
    %151 = arith.mulf %149, %150 : vector<128x32xf32>
    %152 = arith.truncf %151 : vector<128x32xf32> to vector<128x32xbf16>
    %cst_107 = arith.constant dense<0.000000e+00> : vector<32x128xf32>
    %153 = tpu.matmul %136, %132, %cst_107 {dimension_numbers = #tpu.dot_dimension_numbers<[1], [1], [0], [0], [0, 0, 1, 0], [], []>} : vector<32x32xbf16>, vector<128x32xbf16>, vector<32x128xf32> -> vector<32x128xf32>
    %154 = arith.truncf %153 : vector<32x128xf32> to vector<32x128xbf16>
    %cst_108 = arith.constant dense<0.000000e+00> : vector<128x32xf32>
    %155 = tpu.matmul %132, %138, %cst_108 {dimension_numbers = #tpu.dot_dimension_numbers<[1], [0], [0], [1], [0, 0, 1, 1], [], []>} : vector<128x32xbf16>, vector<32x32xbf16>, vector<128x32xf32> -> vector<128x32xf32>
    %156 = arith.truncf %155 : vector<128x32xf32> to vector<128x32xbf16>
    %c0_109 = arith.constant 0 : index
    %c0_110 = arith.constant 0 : index
    %157 = vector.load %arg13[%c0_109, %c0_110] : memref<16x512xbf16, #tpu.memory_space<vmem>>, vector<16x512xbf16>
    %c0_111 = arith.constant 0 : index
    %c0_112 = arith.constant 0 : index
    %158 = vector.load %arg14[%c0_111, %c0_112] : memref<512x16xbf16, #tpu.memory_space<vmem>>, vector<512x16xbf16>
    %c0_113 = arith.constant 0 : index
    %c0_114 = arith.constant 0 : index
    %159 = vector.load %arg15[%c0_113, %c0_114] : memref<512x4xbf16, #tpu.memory_space<vmem>>, vector<512x4xbf16>
    %160 = vector.extract_strided_slice %154 {offsets = [0, 0], sizes = [16, 128], strides = [1, 1]} : vector<32x128xbf16> to vector<16x128xbf16>
    %161 = vector.extract_strided_slice %156 {offsets = [0, 0], sizes = [128, 16], strides = [1, 1]} : vector<128x32xbf16> to vector<128x16xbf16>
    %162 = tpu.concatenate %160, %160, %160, %160 in 1 : vector<16x128xbf16>, vector<16x128xbf16>, vector<16x128xbf16>, vector<16x128xbf16> -> vector<16x512xbf16>
    %163 = arith.mulf %162, %157 : vector<16x512xbf16>
    %164 = tpu.concatenate %161, %161, %161, %161 in 0 : vector<128x16xbf16>, vector<128x16xbf16>, vector<128x16xbf16>, vector<128x16xbf16> -> vector<512x16xbf16>
    %165 = arith.mulf %164, %158 : vector<512x16xbf16>
    %166 = tpu.concatenate %165, %159 in 1 : vector<512x16xbf16>, vector<512x4xbf16> -> vector<512x20xbf16>
    %167 = vector.extract_strided_slice %152 {offsets = [0, 0], sizes = [128, 16], strides = [1, 1]} : vector<128x32xbf16> to vector<128x16xbf16>
    %cst_115 = arith.constant dense<0.000000e+00> : vector<128x512xf32>
    %168 = tpu.matmul %167, %163, %cst_115 {dimension_numbers = #tpu.dot_dimension_numbers<[1], [0], [0], [1], [0, 0, 1, 1], [], []>} : vector<128x16xbf16>, vector<16x512xbf16>, vector<128x512xf32> -> vector<128x512xf32>
    %169 = vector.broadcast %18 : vector<1x512xf32> to vector<128x512xf32>
    %170 = arith.addf %168, %169 : vector<128x512xf32>
    %cst_116 = arith.constant dense<0xFF800000> : vector<128xf32>
    %171 = vector.multi_reduction <maximumf>, %170, %cst_116 [1] : vector<128x512xf32> to vector<128xf32>
    %172 = vector.shape_cast %171 : vector<128xf32> to vector<128x1xf32>
    %173 = vector.broadcast %172 : vector<128x1xf32> to vector<128x512xf32>
    %174 = arith.subf %170, %173 : vector<128x512xf32>
    %175 = math.exp %174 : vector<128x512xf32>
    %176 = arith.truncf %175 : vector<128x512xf32> to vector<128x512xbf16>
    %cst_117 = arith.constant dense<0.000000e+00> : vector<128x20xf32>
    %177 = tpu.matmul %176, %166, %cst_117 {dimension_numbers = #tpu.dot_dimension_numbers<[1], [0], [0], [1], [0, 0, 1, 1], [], []>} : vector<128x512xbf16>, vector<512x20xbf16>, vector<128x20xf32> -> vector<128x20xf32>
    %178 = vector.extract_strided_slice %177 {offsets = [0, 16], sizes = [128, 4], strides = [1, 1]} : vector<128x20xf32> to vector<128x4xf32>
    %cst_118 = arith.constant 9.99999971E-10 : f32
    %179 = vector.broadcast %cst_118 : f32 to vector<128x4xf32>
    %180 = arith.addf %178, %179 : vector<128x4xf32>
    %181 = tpu.reciprocal %180 {approx = true} : vector<128x4xf32> -> vector<128x4xf32>
    %cst_119 = arith.constant dense<0.000000e+00> : vector<128x16xf32>
    %182 = tpu.matmul %181, %19, %cst_119 {dimension_numbers = #tpu.dot_dimension_numbers<[1], [0], [0], [1], [0, 0, 1, 1], [], []>} : vector<128x4xf32>, vector<4x16xf32>, vector<128x16xf32> -> vector<128x16xf32>
    %183 = vector.extract_strided_slice %177 {offsets = [0, 0], sizes = [128, 16], strides = [1, 1]} : vector<128x20xf32> to vector<128x16xf32>
    %184 = arith.mulf %183, %182 : vector<128x16xf32>
    %185 = vector.extract_strided_slice %154 {offsets = [16, 0], sizes = [16, 128], strides = [1, 1]} : vector<32x128xbf16> to vector<16x128xbf16>
    %186 = vector.extract_strided_slice %156 {offsets = [0, 16], sizes = [128, 16], strides = [1, 1]} : vector<128x32xbf16> to vector<128x16xbf16>
    %187 = tpu.concatenate %185, %185, %185, %185 in 1 : vector<16x128xbf16>, vector<16x128xbf16>, vector<16x128xbf16>, vector<16x128xbf16> -> vector<16x512xbf16>
    %188 = arith.mulf %187, %157 : vector<16x512xbf16>
    %189 = tpu.concatenate %186, %186, %186, %186 in 0 : vector<128x16xbf16>, vector<128x16xbf16>, vector<128x16xbf16>, vector<128x16xbf16> -> vector<512x16xbf16>
    %190 = arith.mulf %189, %158 : vector<512x16xbf16>
    %191 = tpu.concatenate %190, %159 in 1 : vector<512x16xbf16>, vector<512x4xbf16> -> vector<512x20xbf16>
    %192 = vector.extract_strided_slice %152 {offsets = [0, 16], sizes = [128, 16], strides = [1, 1]} : vector<128x32xbf16> to vector<128x16xbf16>
    %cst_120 = arith.constant dense<0.000000e+00> : vector<128x512xf32>
    %193 = tpu.matmul %192, %188, %cst_120 {dimension_numbers = #tpu.dot_dimension_numbers<[1], [0], [0], [1], [0, 0, 1, 1], [], []>} : vector<128x16xbf16>, vector<16x512xbf16>, vector<128x512xf32> -> vector<128x512xf32>
    %194 = vector.broadcast %18 : vector<1x512xf32> to vector<128x512xf32>
    %195 = arith.addf %193, %194 : vector<128x512xf32>
    %cst_121 = arith.constant dense<0xFF800000> : vector<128xf32>
    %196 = vector.multi_reduction <maximumf>, %195, %cst_121 [1] : vector<128x512xf32> to vector<128xf32>
    %197 = vector.shape_cast %196 : vector<128xf32> to vector<128x1xf32>
    %198 = vector.broadcast %197 : vector<128x1xf32> to vector<128x512xf32>
    %199 = arith.subf %195, %198 : vector<128x512xf32>
    %200 = math.exp %199 : vector<128x512xf32>
    %201 = arith.truncf %200 : vector<128x512xf32> to vector<128x512xbf16>
    %cst_122 = arith.constant dense<0.000000e+00> : vector<128x20xf32>
    %202 = tpu.matmul %201, %191, %cst_122 {dimension_numbers = #tpu.dot_dimension_numbers<[1], [0], [0], [1], [0, 0, 1, 1], [], []>} : vector<128x512xbf16>, vector<512x20xbf16>, vector<128x20xf32> -> vector<128x20xf32>
    %203 = vector.extract_strided_slice %202 {offsets = [0, 16], sizes = [128, 4], strides = [1, 1]} : vector<128x20xf32> to vector<128x4xf32>
    %cst_123 = arith.constant 9.99999971E-10 : f32
    %204 = vector.broadcast %cst_123 : f32 to vector<128x4xf32>
    %205 = arith.addf %203, %204 : vector<128x4xf32>
    %206 = tpu.reciprocal %205 {approx = true} : vector<128x4xf32> -> vector<128x4xf32>
    %cst_124 = arith.constant dense<0.000000e+00> : vector<128x16xf32>
    %207 = tpu.matmul %206, %19, %cst_124 {dimension_numbers = #tpu.dot_dimension_numbers<[1], [0], [0], [1], [0, 0, 1, 1], [], []>} : vector<128x4xf32>, vector<4x16xf32>, vector<128x16xf32> -> vector<128x16xf32>
    %208 = vector.extract_strided_slice %202 {offsets = [0, 0], sizes = [128, 16], strides = [1, 1]} : vector<128x20xf32> to vector<128x16xf32>
    %209 = arith.mulf %208, %207 : vector<128x16xf32>
    %210 = tpu.concatenate %184, %209 in 1 : vector<128x16xf32>, vector<128x16xf32> -> vector<128x32xf32>
    %211 = vector.broadcast %144 : vector<1x32xf32> to vector<128x32xf32>
    %212 = arith.addf %210, %211 : vector<128x32xf32>
    %213 = arith.truncf %212 : vector<128x32xf32> to vector<128x32xbf16>
    %cst_125 = arith.constant dense<0.000000e+00> : vector<128x32xf32>
    %214 = tpu.matmul %213, %140, %cst_125 {dimension_numbers = #tpu.dot_dimension_numbers<[1], [0], [0], [1], [0, 0, 1, 1], [], []>} : vector<128x32xbf16>, vector<32x32xbf16>, vector<128x32xf32> -> vector<128x32xf32>
    %215 = vector.broadcast %146 : vector<1x32xf32> to vector<128x32xf32>
    %216 = arith.addf %214, %215 : vector<128x32xf32>
    %217 = arith.addf %130, %216 : vector<128x32xf32>
    %c0_126 = arith.constant 0 : index
    %c1_127 = arith.constant 1 : index
    %c0_128 = arith.constant 0 : index
    %c0_129 = arith.constant 0 : index
    %218 = vector.load %arg21[%c0_126, %c1_127, %c0_128, %c0_129] : memref<1x3x1x32xf32, #tpu.memory_space<vmem>>, vector<1x1x1x32xf32>
    %219 = vector.shape_cast %218 : vector<1x1x1x32xf32> to vector<1x32xf32>
    %c0_130 = arith.constant 0 : index
    %c1_131 = arith.constant 1 : index
    %c0_132 = arith.constant 0 : index
    %c0_133 = arith.constant 0 : index
    %220 = vector.load %arg22[%c0_130, %c1_131, %c0_132, %c0_133] : memref<1x3x1x32xf32, #tpu.memory_space<vmem>>, vector<1x1x1x32xf32>
    %221 = vector.shape_cast %220 : vector<1x1x1x32xf32> to vector<1x32xf32>
    %cst_134 = arith.constant dense<0.000000e+00> : vector<128xf32>
    %222 = vector.multi_reduction <add>, %217, %cst_134 [1] : vector<128x32xf32> to vector<128xf32>
    %223 = vector.shape_cast %222 : vector<128xf32> to vector<128x1xf32>
    %cst_135 = arith.constant 3.200000e+01 : f32
    %224 = vector.broadcast %cst_135 : f32 to vector<128x1xf32>
    %225 = arith.divf %223, %224 : vector<128x1xf32>
    %226 = vector.broadcast %225 : vector<128x1xf32> to vector<128x32xf32>
    %227 = arith.subf %217, %226 : vector<128x32xf32>
    %228 = arith.mulf %227, %227 : vector<128x32xf32>
    %cst_136 = arith.constant dense<0.000000e+00> : vector<128xf32>
    %229 = vector.multi_reduction <add>, %228, %cst_136 [1] : vector<128x32xf32> to vector<128xf32>
    %230 = vector.shape_cast %229 : vector<128xf32> to vector<128x1xf32>
    %cst_137 = arith.constant 3.200000e+01 : f32
    %231 = vector.broadcast %cst_137 : f32 to vector<128x1xf32>
    %232 = arith.divf %230, %231 : vector<128x1xf32>
    %cst_138 = arith.constant 9.99999974E-6 : f32
    %233 = vector.broadcast %cst_138 : f32 to vector<128x1xf32>
    %234 = arith.addf %232, %233 : vector<128x1xf32>
    %235 = math.rsqrt %234 : vector<128x1xf32>
    %236 = vector.broadcast %235 : vector<128x1xf32> to vector<128x32xf32>
    %237 = arith.mulf %227, %236 : vector<128x32xf32>
    %238 = vector.broadcast %219 : vector<1x32xf32> to vector<128x32xf32>
    %239 = arith.mulf %237, %238 : vector<128x32xf32>
    %240 = vector.broadcast %221 : vector<1x32xf32> to vector<128x32xf32>
    %241 = arith.addf %239, %240 : vector<128x32xf32>
    %242 = arith.truncf %241 : vector<128x32xf32> to vector<128x32xbf16>
    %c0_139 = arith.constant 0 : index
    %c0_140 = arith.constant 0 : index
    %c0_141 = arith.constant 0 : index
    %243 = vector.load %arg23[%c0_139, %c0_140, %c0_141] : memref<1x32x128xbf16, #tpu.memory_space<vmem>>, vector<1x32x128xbf16>
    %244 = vector.shape_cast %243 : vector<1x32x128xbf16> to vector<32x128xbf16>
    %cst_142 = arith.constant dense<0.000000e+00> : vector<128x128xf32>
    %245 = tpu.matmul %242, %244, %cst_142 {dimension_numbers = #tpu.dot_dimension_numbers<[1], [0], [0], [1], [0, 0, 1, 1], [], []>} : vector<128x32xbf16>, vector<32x128xbf16>, vector<128x128xf32> -> vector<128x128xf32>
    %c0_143 = arith.constant 0 : index
    %c0_144 = arith.constant 0 : index
    %c0_145 = arith.constant 0 : index
    %246 = vector.load %arg24[%c0_143, %c0_144, %c0_145] : memref<1x1x128xf32, #tpu.memory_space<vmem>>, vector<1x1x128xf32>
    %247 = vector.shape_cast %246 : vector<1x1x128xf32> to vector<1x128xf32>
    %248 = vector.broadcast %247 : vector<1x128xf32> to vector<128x128xf32>
    %249 = arith.addf %245, %248 : vector<128x128xf32>
    %cst_146 = arith.constant 0.000000e+00 : f32
    %250 = vector.broadcast %cst_146 : f32 to vector<128x128xf32>
    %251 = arith.maximumf %249, %250 : vector<128x128xf32>
    %252 = arith.truncf %251 : vector<128x128xf32> to vector<128x128xbf16>
    %c0_147 = arith.constant 0 : index
    %c0_148 = arith.constant 0 : index
    %c0_149 = arith.constant 0 : index
    %253 = vector.load %arg25[%c0_147, %c0_148, %c0_149] : memref<1x128x32xbf16, #tpu.memory_space<vmem>>, vector<1x128x32xbf16>
    %254 = vector.shape_cast %253 : vector<1x128x32xbf16> to vector<128x32xbf16>
    %cst_150 = arith.constant dense<0.000000e+00> : vector<128x32xf32>
    %255 = tpu.matmul %252, %254, %cst_150 {dimension_numbers = #tpu.dot_dimension_numbers<[1], [0], [0], [1], [0, 0, 1, 1], [], []>} : vector<128x128xbf16>, vector<128x32xbf16>, vector<128x32xf32> -> vector<128x32xf32>
    %c0_151 = arith.constant 0 : index
    %c0_152 = arith.constant 0 : index
    %c0_153 = arith.constant 0 : index
    %256 = vector.load %arg26[%c0_151, %c0_152, %c0_153] : memref<1x1x32xf32, #tpu.memory_space<vmem>>, vector<1x1x32xf32>
    %257 = vector.shape_cast %256 : vector<1x1x32xf32> to vector<1x32xf32>
    %258 = vector.broadcast %257 : vector<1x32xf32> to vector<128x32xf32>
    %259 = arith.addf %255, %258 : vector<128x32xf32>
    %260 = arith.addf %241, %259 : vector<128x32xf32>
    %c0_154 = arith.constant 0 : index
    %c2_155 = arith.constant 2 : index
    %c0_156 = arith.constant 0 : index
    %c0_157 = arith.constant 0 : index
    %261 = vector.load %arg21[%c0_154, %c2_155, %c0_156, %c0_157] : memref<1x3x1x32xf32, #tpu.memory_space<vmem>>, vector<1x1x1x32xf32>
    %262 = vector.shape_cast %261 : vector<1x1x1x32xf32> to vector<1x32xf32>
    %c0_158 = arith.constant 0 : index
    %c2_159 = arith.constant 2 : index
    %c0_160 = arith.constant 0 : index
    %c0_161 = arith.constant 0 : index
    %263 = vector.load %arg22[%c0_158, %c2_159, %c0_160, %c0_161] : memref<1x3x1x32xf32, #tpu.memory_space<vmem>>, vector<1x1x1x32xf32>
    %264 = vector.shape_cast %263 : vector<1x1x1x32xf32> to vector<1x32xf32>
    %cst_162 = arith.constant dense<0.000000e+00> : vector<128xf32>
    %265 = vector.multi_reduction <add>, %260, %cst_162 [1] : vector<128x32xf32> to vector<128xf32>
    %266 = vector.shape_cast %265 : vector<128xf32> to vector<128x1xf32>
    %cst_163 = arith.constant 3.200000e+01 : f32
    %267 = vector.broadcast %cst_163 : f32 to vector<128x1xf32>
    %268 = arith.divf %266, %267 : vector<128x1xf32>
    %269 = vector.broadcast %268 : vector<128x1xf32> to vector<128x32xf32>
    %270 = arith.subf %260, %269 : vector<128x32xf32>
    %271 = arith.mulf %270, %270 : vector<128x32xf32>
    %cst_164 = arith.constant dense<0.000000e+00> : vector<128xf32>
    %272 = vector.multi_reduction <add>, %271, %cst_164 [1] : vector<128x32xf32> to vector<128xf32>
    %273 = vector.shape_cast %272 : vector<128xf32> to vector<128x1xf32>
    %cst_165 = arith.constant 3.200000e+01 : f32
    %274 = vector.broadcast %cst_165 : f32 to vector<128x1xf32>
    %275 = arith.divf %273, %274 : vector<128x1xf32>
    %cst_166 = arith.constant 9.99999974E-6 : f32
    %276 = vector.broadcast %cst_166 : f32 to vector<128x1xf32>
    %277 = arith.addf %275, %276 : vector<128x1xf32>
    %278 = math.rsqrt %277 : vector<128x1xf32>
    %279 = vector.broadcast %278 : vector<128x1xf32> to vector<128x32xf32>
    %280 = arith.mulf %270, %279 : vector<128x32xf32>
    %281 = vector.broadcast %262 : vector<1x32xf32> to vector<128x32xf32>
    %282 = arith.mulf %280, %281 : vector<128x32xf32>
    %283 = vector.broadcast %264 : vector<1x32xf32> to vector<128x32xf32>
    %284 = arith.addf %282, %283 : vector<128x32xf32>
    %c0_167 = arith.constant 0 : index
    %c0_168 = arith.constant 0 : index
    %285 = vector.load %arg30[%c0_167, %c0_168] : memref<128x32xf32, #tpu.memory_space<vmem>>, vector<128x32xf32>
    tpu.vector_store %arg30[%c0_167, %c0_168], %284 {strides = array<i32>} : memref<128x32xf32, #tpu.memory_space<vmem>>, vector<128x32xf32>,
    %c1_i32 = arith.constant 1 : i32
    %286 = arith.cmpi eq, %arg1, %c1_i32 : i32
    %287 = arith.extui %286 : i1 to i32
    %c0_i32_169 = arith.constant 0 : i32
    %288 = arith.cmpi ne, %287, %c0_i32_169 : i32
    scf.if %288 {
      %c0_170 = arith.constant 0 : index
      %c0_171 = arith.constant 0 : index
      %289 = vector.load %arg27[%c0_170, %c0_171] : memref<1x32xbf16, #tpu.memory_space<vmem>>, vector<1x32xbf16>
      %290 = arith.truncf %284 : vector<128x32xf32> to vector<128x32xbf16>
      %cst_172 = arith.constant dense<0.000000e+00> : vector<1x128xf32>
      %291 = tpu.matmul %289, %290, %cst_172 {dimension_numbers = #tpu.dot_dimension_numbers<[1], [1], [0], [0], [0, 0, 1, 0], [], []>} : vector<1x32xbf16>, vector<128x32xbf16>, vector<1x128xf32> -> vector<1x128xf32>
      %c0_173 = arith.constant 0 : index
      %c0_174 = arith.constant 0 : index
      %292 = vector.load %arg28[%c0_173, %c0_174] : memref<1x1xf32, #tpu.memory_space<vmem>>, vector<1x1xf32>
      %293 = vector.broadcast %292 : vector<1x1xf32> to vector<1x128xf32>
      %294 = arith.addf %291, %293 : vector<1x128xf32>
      %295 = arith.mulf %294, %3 : vector<1x128xf32>
      %c0_175 = arith.constant 0 : index
      %c0_176 = arith.constant 0 : index
      %c0_177 = arith.constant 0 : index
      %296 = vector.load %arg29[%c0_175, %c0_176, %c0_177] : memref<1x1x128xf32, #tpu.memory_space<vmem>>, vector<1x1x128xf32>
      %297 = vector.shape_cast %296 : vector<1x1x128xf32> to vector<1x128xf32>
      %298 = vector.shape_cast %295 : vector<1x128xf32> to vector<1x1x128xf32>
      tpu.vector_store %arg29[%c0_175, %c0_176, %c0_177], %298 {strides = array<i32>} : memref<1x1x128xf32, #tpu.memory_space<vmem>>, vector<1x1x128xf32>,
    } else {
    }
    return
  }
  func.func @transform_0(%arg0: i32, %arg1: i32) -> (i32, i32, i32) {
    %c0_i32 = arith.constant 0 : i32
    %c0_i32_0 = arith.constant 0 : i32
    %c0_i32_1 = arith.constant 0 : i32
    return %arg0, %c0_i32, %c0_i32_0 : i32, i32, i32
  }
  func.func @transform_1(%arg0: i32, %arg1: i32) -> (i32, i32, i32) {
    %c0_i32 = arith.constant 0 : i32
    %c0_i32_0 = arith.constant 0 : i32
    %c0_i32_1 = arith.constant 0 : i32
    return %arg0, %c0_i32, %c0_i32_0 : i32, i32, i32
  }
  func.func @transform_2(%arg0: i32, %arg1: i32) -> (i32, i32, i32) {
    %c0_i32 = arith.constant 0 : i32
    %c0_i32_0 = arith.constant 0 : i32
    %c0_i32_1 = arith.constant 0 : i32
    return %arg0, %c0_i32, %c0_i32_0 : i32, i32, i32
  }
  func.func @transform_3(%arg0: i32, %arg1: i32) -> (i32, i32, i32) {
    %c0_i32 = arith.constant 0 : i32
    %c0_i32_0 = arith.constant 0 : i32
    %c0_i32_1 = arith.constant 0 : i32
    return %arg0, %c0_i32, %c0_i32_0 : i32, i32, i32
  }
  func.func @transform_4(%arg0: i32, %arg1: i32) -> (i32, i32, i32) {
    %c0_i32 = arith.constant 0 : i32
    %c0_i32_0 = arith.constant 0 : i32
    %c0_i32_1 = arith.constant 0 : i32
    return %arg0, %c0_i32, %c0_i32_0 : i32, i32, i32
  }
  func.func @transform_5(%arg0: i32, %arg1: i32) -> (i32, i32, i32) {
    %c0_i32 = arith.constant 0 : i32
    %c0_i32_0 = arith.constant 0 : i32
    %c0_i32_1 = arith.constant 0 : i32
    return %arg0, %c0_i32, %c0_i32_0 : i32, i32, i32
  }
  func.func @transform_6(%arg0: i32, %arg1: i32) -> (i32, i32) {
    %c0_i32 = arith.constant 0 : i32
    %c0_i32_0 = arith.constant 0 : i32
    %c0_i32_1 = arith.constant 0 : i32
    return %c0_i32, %c0_i32_0 : i32, i32
  }
  func.func @transform_7(%arg0: i32, %arg1: i32) -> (i32, i32) {
    %c0_i32 = arith.constant 0 : i32
    %c0_i32_0 = arith.constant 0 : i32
    %c0_i32_1 = arith.constant 0 : i32
    return %c0_i32, %c0_i32_0 : i32, i32
  }
  func.func @transform_8(%arg0: i32, %arg1: i32) -> (i32, i32) {
    %c0_i32 = arith.constant 0 : i32
    %c0_i32_0 = arith.constant 0 : i32
    %c0_i32_1 = arith.constant 0 : i32
    return %c0_i32, %c0_i32_0 : i32, i32
  }
  func.func @transform_9(%arg0: i32, %arg1: i32) -> (i32, i32) {
    %c0_i32 = arith.constant 0 : i32
    %c0_i32_0 = arith.constant 0 : i32
    %c0_i32_1 = arith.constant 0 : i32
    return %c0_i32, %c0_i32_0 : i32, i32
  }
  func.func @transform_10(%arg0: i32, %arg1: i32) -> (i32, i32) {
    %c0_i32 = arith.constant 0 : i32
    %c0_i32_0 = arith.constant 0 : i32
    %c0_i32_1 = arith.constant 0 : i32
    return %c0_i32, %c0_i32_0 : i32, i32
  }
  func.func @transform_11(%arg0: i32, %arg1: i32) -> (i32, i32) {
    %c0_i32 = arith.constant 0 : i32
    %c0_i32_0 = arith.constant 0 : i32
    %c0_i32_1 = arith.constant 0 : i32
    return %c0_i32, %c0_i32_0 : i32, i32
  }
  func.func @transform_12(%arg0: i32, %arg1: i32) -> (i32, i32) {
    %c0_i32 = arith.constant 0 : i32
    %c0_i32_0 = arith.constant 0 : i32
    %c0_i32_1 = arith.constant 0 : i32
    return %c0_i32, %c0_i32_0 : i32, i32
  }
  func.func @transform_13(%arg0: i32, %arg1: i32) -> (i32, i32) {
    %c0_i32 = arith.constant 0 : i32
    %c0_i32_0 = arith.constant 0 : i32
    %c0_i32_1 = arith.constant 0 : i32
    return %c0_i32, %c0_i32_0 : i32, i32
  }
  func.func @transform_14(%arg0: i32, %arg1: i32) -> (i32, i32) {
    %c0_i32 = arith.constant 0 : i32
    %c0_i32_0 = arith.constant 0 : i32
    %c0_i32_1 = arith.constant 0 : i32
    return %c0_i32, %c0_i32_0 : i32, i32
  }
  func.func @transform_15(%arg0: i32, %arg1: i32) -> (i32, i32, i32, i32) {
    %c0_i32 = arith.constant 0 : i32
    %c0_i32_0 = arith.constant 0 : i32
    %c0_i32_1 = arith.constant 0 : i32
    %c0_i32_2 = arith.constant 0 : i32
    return %arg1, %c0_i32, %c0_i32_0, %c0_i32_1 : i32, i32, i32, i32
  }
  func.func @transform_16(%arg0: i32, %arg1: i32) -> (i32, i32, i32, i32) {
    %c0_i32 = arith.constant 0 : i32
    %c0_i32_0 = arith.constant 0 : i32
    %c0_i32_1 = arith.constant 0 : i32
    %c0_i32_2 = arith.constant 0 : i32
    return %arg1, %c0_i32, %c0_i32_0, %c0_i32_1 : i32, i32, i32, i32
  }
  func.func @transform_17(%arg0: i32, %arg1: i32) -> (i32, i32, i32, i32) {
    %c0_i32 = arith.constant 0 : i32
    %c0_i32_0 = arith.constant 0 : i32
    %c0_i32_1 = arith.constant 0 : i32
    %c0_i32_2 = arith.constant 0 : i32
    return %arg1, %c0_i32, %c0_i32_0, %c0_i32_1 : i32, i32, i32, i32
  }
  func.func @transform_18(%arg0: i32, %arg1: i32) -> (i32, i32, i32, i32) {
    %c0_i32 = arith.constant 0 : i32
    %c0_i32_0 = arith.constant 0 : i32
    %c0_i32_1 = arith.constant 0 : i32
    %c0_i32_2 = arith.constant 0 : i32
    return %arg1, %c0_i32, %c0_i32_0, %c0_i32_1 : i32, i32, i32, i32
  }
  func.func @transform_19(%arg0: i32, %arg1: i32) -> (i32, i32, i32, i32) {
    %c0_i32 = arith.constant 0 : i32
    %c0_i32_0 = arith.constant 0 : i32
    %c0_i32_1 = arith.constant 0 : i32
    %c0_i32_2 = arith.constant 0 : i32
    return %arg1, %c0_i32, %c0_i32_0, %c0_i32_1 : i32, i32, i32, i32
  }
  func.func @transform_20(%arg0: i32, %arg1: i32) -> (i32, i32, i32, i32) {
    %c0_i32 = arith.constant 0 : i32
    %c0_i32_0 = arith.constant 0 : i32
    %c0_i32_1 = arith.constant 0 : i32
    %c0_i32_2 = arith.constant 0 : i32
    return %arg1, %c0_i32, %c0_i32_0, %c0_i32_1 : i32, i32, i32, i32
  }
  func.func @transform_21(%arg0: i32, %arg1: i32) -> (i32, i32, i32) {
    %c0_i32 = arith.constant 0 : i32
    %c0_i32_0 = arith.constant 0 : i32
    %c0_i32_1 = arith.constant 0 : i32
    return %arg1, %c0_i32, %c0_i32_0 : i32, i32, i32
  }
  func.func @transform_22(%arg0: i32, %arg1: i32) -> (i32, i32, i32) {
    %c0_i32 = arith.constant 0 : i32
    %c0_i32_0 = arith.constant 0 : i32
    %c0_i32_1 = arith.constant 0 : i32
    return %arg1, %c0_i32, %c0_i32_0 : i32, i32, i32
  }
  func.func @transform_23(%arg0: i32, %arg1: i32) -> (i32, i32, i32) {
    %c0_i32 = arith.constant 0 : i32
    %c0_i32_0 = arith.constant 0 : i32
    %c0_i32_1 = arith.constant 0 : i32
    return %arg1, %c0_i32, %c0_i32_0 : i32, i32, i32
  }
  func.func @transform_24(%arg0: i32, %arg1: i32) -> (i32, i32, i32) {
    %c0_i32 = arith.constant 0 : i32
    %c0_i32_0 = arith.constant 0 : i32
    %c0_i32_1 = arith.constant 0 : i32
    return %arg1, %c0_i32, %c0_i32_0 : i32, i32, i32
  }
  func.func @transform_25(%arg0: i32, %arg1: i32) -> (i32, i32) {
    %c0_i32 = arith.constant 0 : i32
    %c0_i32_0 = arith.constant 0 : i32
    %c0_i32_1 = arith.constant 0 : i32
    return %c0_i32, %c0_i32_0 : i32, i32
  }
  func.func @transform_26(%arg0: i32, %arg1: i32) -> (i32, i32) {
    %c0_i32 = arith.constant 0 : i32
    %c0_i32_0 = arith.constant 0 : i32
    %c0_i32_1 = arith.constant 0 : i32
    return %c0_i32, %c0_i32_0 : i32, i32
  }
  func.func @transform_27(%arg0: i32, %arg1: i32) -> (i32, i32, i32) {
    %c0_i32 = arith.constant 0 : i32
    %c0_i32_0 = arith.constant 0 : i32
    %c0_i32_1 = arith.constant 0 : i32
    return %arg0, %c0_i32, %c0_i32_0 : i32, i32, i32
  }
}

</mosaic_0001>

<bundles_post_ra>
// kernel: tpu_custom_call.1
= control target key start
LH: loop header
LB: loop body
LE: loop exit
PB: predicated region body
PF: predicated region fallthrough
CT: control target
= control target key end

     0   :  { %s18677_s0 = inlined_call_operand.vmem [shape: f32[2,128,64], index: 0, kind: input, shape index: {}]   ;;  %s18678_s1 = inlined_call_operand.vmem [shape: f32[2,128,1], index: 1, kind: input, shape index: {}]   ;;  %s18679_s2 = inlined_call_operand.vmem [shape: f32[2,1,128], index: 2, kind: input, shape index: {}]   ;;  %s18680_s3 = inlined_call_operand.vmem [shape: f32[2,128,32], index: 3, kind: input, shape index: {}]   ;;  %s18681_s4 = inlined_call_operand.vmem [shape: f32[2,128,1], index: 4, kind: input, shape index: {}]   ;;  %s18682_s5 = inlined_call_operand.vmem [shape: f32[2,1,128], index: 5, kind: input, shape index: {}]   ;;  %s18683_s6 = inlined_call_operand.vmem [shape: bf16[64,32], index: 6, kind: input, shape index: {}]   ;;  %s18684_s7 = inlined_call_operand.vmem [shape: f32[1,32], index: 7, kind: input, shape index: {}]   ;;  %s18685_s8 = inlined_call_operand.vmem [shape: bf16[16,512], index: 8, kind: input, shape index: {}]   ;;  %s18686_s9 = inlined_call_operand.vmem [shape: bf16[512,16], index: 9, kind: input, shape index: {}]   ;;  %s18687_s10 = inlined_call_operand.vmem [shape: bf16[512,4], index: 10, kind: input, shape index: {}]   ;;  %s18688_s11 = inlined_call_operand.vmem [shape: bf16[16,512], index: 11, kind: input, shape index: {}]   ;;  %s18689_s12 = inlined_call_operand.vmem [shape: bf16[512,16], index: 12, kind: input, shape index: {}]   ;;  %s18690_s13 = inlined_call_operand.vmem [shape: bf16[512,4], index: 13, kind: input, shape index: {}]   ;;  %s18691_s14 = inlined_call_operand.vmem [shape: f32[4,16], index: 14, kind: input, shape index: {}]   ;;  %s18692_s15 = inlined_call_operand.vmem [shape: bf16[2,4,32,32], index: 15, kind: input, shape index: {}]   ;;  %s18693_s16 = inlined_call_operand.vmem [shape: f32[2,4,1,32], index: 16, kind: input, shape index: {}]   ;;  %s18694_s17 = inlined_call_operand.vmem [shape: bf16[2,4,32,32], index: 17, kind: input, shape index: {}]   ;;  %s18695_s18 = inlined_call_operand.vmem [shape: f32[2,4,1,32], index: 18, kind: input, shape index: {}]   ;;  %s18696_s19 = inlined_call_operand.vmem [shape: f32[2,3,1,32], index: 19, kind: input, shape index: {}]   ;;  %s18697_s20 = inlined_call_operand.vmem [shape: f32[2,3,1,32], index: 20, kind: input, shape index: {}]   ;;  %s18698_s21 = inlined_call_operand.vmem [shape: bf16[2,32,128], index: 21, kind: input, shape index: {}]   ;;  %s18699_s22 = inlined_call_operand.vmem [shape: f32[2,1,128], index: 22, kind: input, shape index: {}]   ;;  %s18700_s23 = inlined_call_operand.vmem [shape: bf16[2,128,32], index: 23, kind: input, shape index: {}]   ;;  %s18701_s24 = inlined_call_operand.vmem [shape: f32[2,1,32], index: 24, kind: input, shape index: {}]   ;;  %s18702_s25 = inlined_call_operand.vmem [shape: bf16[1,32], index: 25, kind: input, shape index: {}]   ;;  %s18703_s26 = inlined_call_operand.<no memory space> [shape: f32[1,1], index: 26, kind: input, shape index: {}]   ;;  %s18704_s27 = inlined_call_operand.hbm [shape: f32[2,1,128], index: 27, kind: output, shape index: {}]  }
   0x1   :  { %18969 = sst [smem:[#allocation107_spill]] %s18677_s0  ;;  %v32_v0 = vstv %s18703_s26 }
   0x2   :  { %18970 = sst [smem:[#allocation108_spill]] %s18678_s1  ;;  %33 = vst [vmem:[#allocation4] sm:$0x1] %v32_v0 }
   0x3   :  { %18971 = sst [smem:[#allocation109_spill]] %s18679_s2 }
   0x4   :  { %18972 = sst [smem:[#allocation110_spill]] %s18680_s3 }
   0x5   :  { %18973 = sst [smem:[#allocation111_spill]] %s18681_s4 }
   0x6   :  { %18974 = sst [smem:[#allocation112_spill]] %s18682_s5 }
   0x7   :  { %18975 = sst [smem:[#allocation113_spill]] %s18683_s6 }
   0x8   :  { %18976 = sst [smem:[#allocation114_spill]] %s18684_s7 }
   0x9   :  { %18977 = sst [smem:[#allocation115_spill]] %s18685_s8 }
   0xa   :  { %18978 = sst [smem:[#allocation116_spill]] %s18686_s9 }
   0xb   :  { %18979 = sst [smem:[#allocation117_spill]] %s18687_s10 }
   0xc   :  { %18980 = sst [smem:[#allocation118_spill]] %s18688_s11 }
   0xd   :  { %18981 = sst [smem:[#allocation119_spill]] %s18689_s12 }
   0xe   :  { %18982 = sst [smem:[#allocation120_spill]] %s18690_s13 }
   0xf   :  { %18983 = sst [smem:[#allocation121_spill]] %s18691_s14 }
  0x10   :  { %18984 = sst [smem:[#allocation122_spill]] %s18692_s15 }
  0x11   :  { %18985 = sst [smem:[#allocation123_spill]] %s18693_s16 }
  0x12   :  { %18986 = sst [smem:[#allocation124_spill]] %s18694_s17 }
  0x13   :  { %18987 = sst [smem:[#allocation125_spill]] %s18695_s18 }
  0x14   :  { %18988 = sst [smem:[#allocation126_spill]] %s18696_s19 }
  0x15   :  { %18989 = sst [smem:[#allocation127_spill]] %s18702_s25 }
  0x16   :  { %18990 = sst [smem:[#allocation128_spill]] %s18704_s27 }
  0x17   :  { %34 = vsyncpa [#allocation6], 0 }
  0x18   :  { %36 = vsyncpa [#allocation6 + $0x1], 0  ;;  %s13504_s8 = smov 0   ;;  %s13506_s30 = smov 0  }
  0x19   :  { %s13508_s9 = smov 0   ;;  %s13510_s5 = smov 0  }
  0x1a   :  { %s13512_s28 = smov 0   ;;  %s13514_s0 = smov 0  }
  0x1b   :  { %s13516_s10 = smov 0   ;;  %s13518_s29 = smov 0  }
  0x1c LB: > { %18991 = sst [smem:[#allocation8_spill]] %s13323_s8  ;;  %s10641_s26 = sadd.s32 4294967295, %s13351_s29   ;;  %s13351_s29 = sphi %s13518_s29, %s42_s29   ;;  %s13347_s10 = sphi %s13516_s10, %s19553_s10   ;;  %s13343_s0 = sphi %s13514_s0, %s19552_s0   ;;  %s13339_s28 = sphi %s13512_s28, %s19551_s28   ;;  %s13335_s5 = sphi %s13510_s5, %s19550_s5   ;;  %s13331_s9 = sphi %s13508_s9, %s19549_s9   ;;  %s13327_s30 = sphi %s13506_s30, %s19555_s30   ;;  %s13323_s8 = sphi %s13504_s8, %s19554_s8  }
  0x1d   : > { %18992 = sst [smem:[#allocation9_spill]] %s13331_s9  ;;  %s10642_s1 = sadd.s32 4294967294, %s13351_s29  }
  0x1e   : > { %18993 = sst [smem:[#allocation10_spill]] %s13339_s28  ;;  %s51_s6 = sadd.s32 1, %s13343_s0 }
  0x1f   : > { %18994 = sst [smem:[#allocation11_spill]] %s13343_s0  ;;  %p52_p0 = scmp.ge.s32.totalorder %s51_s6, 2 }
  0x20   : > { %18995 = sst [smem:[#allocation12_spill]] %s13347_s10  ;;  %s54_s11 = sadd.s32 1, %s13347_s10 }
  0x21   : > { %18996 = sst [smem:[#allocation13_spill]] %s13351_s29  ;;  %p718_p1 = scmp.ne.s32.totalorder %s13331_s9, %s13327_s30 }
  0x22   : > { %p719_p2 = scmp.eq.s32.totalorder %s10641_s26, 3  ;;  %s19557_s6 = smov (%p52_p0, %s51_s6), 0 }
  0x23   : > { %18997 = sst [smem:[#allocation14_spill]] %s19557_s6  ;;  %s19559_s11 = smov (!%p52_p0, %s54_s11), %s13347_s10 }
  0x24   : > { %p13553_p3 = por %p719_p2, %p718_p1  ;;  %p724_p4 = scmp.ne.s32.totalorder %s13327_s30, %s13323_s8 }
  0x25   : > { %p56_p5 = scmp.ge.s32.totalorder %s19559_s11, 2  ;;  %p725_p6 = scmp.eq.s32.totalorder %s10642_s1, 3 }
  0x26   : > { %s18998_s2 = scalar_select %p13553_p3, 1, 0 }
  0x27   : > { %p10645_p7 = scmp.ge.s32.totalorder %s13351_s29, 1  ;;  %p892_p8 = scmp.lt.s32.totalorder %s13351_s29, 5 }
  0x28   : > { %18999 = sst [smem:[#allocation15_spill]] %s18998_s2  ;;  %s19561_s11 = smov (%p56_p5, %s19559_s11), 0 }
  0x29   : > { %19000 = sst [smem:[#allocation16_spill]] %s19561_s11  ;;  %p13563_p9 = por %p725_p6, %p724_p4 }
  0x2a   : > { %p893_p10 = pnand %p10645_p7, %p892_p8  ;;  %s705_s7 = ssub.s32 %s13347_s10, %s19561_s11 }
  0x2b   : > { %s19001_s3 = scalar_select %p13563_p9, 1, 0 }
  0x2c   : > { %s708_s4 = sadd.s32 1, %s13331_s9  ;;  %p706_p11 = scmp.eq.s32.totalorder %s705_s7, 0 }
  0x2d   : > { %19002 = sst [smem:[#allocation17_spill]] %s19001_s3  ;;  %896 = sbr.rel (%p893_p10) target bundleno = 6912 (0x1b00), region = 128 }
  0x2e   : > { %s13571_s26 = scalar_select %p706_p11, %s13331_s9, %s708_s4  }
  0x30   : > { %19003 = sst [smem:[#allocation18_spill]] %s13571_s26 }
  0x34   : > { %p1026_p12 = scmp.lt.s32.totalorder %s13339_s28, 1  ;;  %p1052_p13 = scmp.lt.s32.totalorder %s13335_s5, 1 }
  0x35   : > { %s19004_s10 = sld [smem:[#allocation109_spill]]  ;;  %s19005_s8 = sld [smem:[#allocation107_spill]] }
  0x36   : > { %s13577_s6 = scalar_select %p1026_p12, %s13339_s28, 1 }
  0x37   : > { %s13580_s0 = scalar_select %p1052_p13, %s13335_s5, 1 }
  0x38   : > { %s11085_s7 = sshll.u32 %s13577_s6, 7  ;;  %s19006_s2 = sld [smem:[#allocation108_spill]] }
  0x39   : > { %s19009_s29 = sld [smem:[#allocation111_spill]]  ;;  %s11089_s13 = sshll.u32 %s13580_s0, 6 }
  0x3a   : > { %s19011_s15 = sld [smem:[#allocation122_spill]]  ;;  %s19012_s16 = sld [smem:[#allocation123_spill]] }
  0x3b   : > { %s1038_s26 = scalar_lea.vmem %s19004_s10, %s13577_s6  ;;  %s13590_s1 = scalar_lea.vmem %s19005_s8, %s11085_s7 }
  0x3c   : > { %v13597_v1 = vld [vmem:[%s1038_s26] sm:$0x1]  ;;  %s19008_s8 = sld [smem:[#allocation110_spill]]  ;;  %s19010_s26 = sld [smem:[#allocation112_spill]] }
  0x3d   : > { %19007 = vst [vmem:[#allocation19_spill] sm:$0xff] %v13597_v1  ;;  %s19013_s17 = sld [smem:[#allocation124_spill]]  ;;  %s19015_s18 = sld [smem:[#allocation125_spill]] }
  0x3e   : > { %s13595_s28 = scalar_lea.vmem %s19006_s2, %s11085_s7  ;;  %s12186_s25 = smul.u32 3, %s13580_s0 }
  0x3f   : > { %s13607_s2 = scalar_lea.vmem %s19009_s29, %s11085_s7  ;;  %v1095_v2 = vld [vmem:[%s13595_s28] sm:$0xff]  ;;  %v1096_v3 = vld [vmem:[%s13595_s28 + $0x8] sm:$0xff]  ;;  %v1097_v4 = vld [vmem:[%s13595_s28 + $0x10] sm:$0xff]  ;;  %s19018_s19 = sld [smem:[#allocation126_spill]] }
  0x40   : > { %v1098_v5 = vld [vmem:[%s13595_s28 + $0x18] sm:$0xff]  ;;  %v1099_v6 = vld [vmem:[%s13595_s28 + $0x20] sm:$0xff]  ;;  %v1100_v7 = vld [vmem:[%s13595_s28 + $0x28] sm:$0xff]  ;;  %s13623_s9 = scalar_lea.vmem %s19011_s15, %s11089_s13  ;;  %p10664_p0 = scmp.ne.s32.totalorder %s13335_s5, 0 }
  0x41   : > { %v13627_v8 = vld [vmem:[%s13595_s28 + $0x30] sm:$0xff]  ;;  %v13630_v9 = vld [vmem:[%s13595_s28 + $0x38] sm:$0xff]  ;;  %v13633_v10 = vld [vmem:[%s13595_s28 + $0x40] sm:$0xff]  ;;  %v13353_v20 = vmov (!%p10664_p0), 0   ;;  %vm1180_vm0 = vcmask (!%p10664_p0), 523264   ;;  %vm1398_vm1 = vcmask (!%p10664_p0), 261120  }
  0x42   : > { %s13602_s11 = scalar_lea.vmem %s19008_s8, %s11085_s7  ;;  %s1051_s12 = scalar_lea.vmem %s19010_s26, %s13577_s6  ;;  %v13646_v11 = vld [vmem:[%s13595_s28 + $0x48] sm:$0xff]  ;;  %v13649_v12 = vld [vmem:[%s13595_s28 + $0x50] sm:$0xff]  ;;  %v13652_v13 = vld [vmem:[%s13595_s28 + $0x58] sm:$0xff]  ;;  %12266 = vset.pattern.permute.xlu1 (!%p10664_p0), %v13353_v20  ;;  %12265 = vset.pattern.permute.xlu0 (!%p10664_p0), %v13353_v20 }
  0x43   : > { %s10656_s8 = sshll.u32 %s13580_s0, 2  ;;  %s13643_s4 = scalar_lea.vmem %s19013_s17, %s11089_s13  ;;  %v13661_v14 = vld [vmem:[%s13595_s28 + $0x60] sm:$0xff]  ;;  %v13664_v15 = vld [vmem:[%s13595_s28 + $0x68] sm:$0xff]  ;;  %v13667_v16 = vld [vmem:[%s13595_s28 + $0x70] sm:$0xff]  ;;  %1314 = vperm.xlu1 (!%p10664_p0), %12266, %v1097_v4   ;;  %1304 = vperm.xlu0 (!%p10664_p0), %12265, %v1095_v2  }
  0x44   : > { %s13638_s3 = scalar_lea.vmem %s19012_s16, %s10656_s8  ;;  %19014 = sst [smem:[#allocation20_spill]] %s13643_s4  ;;  %v13675_v17 = vld [vmem:[%s13595_s28 + $0x78] sm:$0xff]  ;;  %v13677_v18 = vld [vmem:[%s1051_s12] sm:$0x1]  ;;  %v1118_v23 = vld [vmem:[%s13590_s1 + $0x8] sm:$0xff] (!%p10664_p0) }
  0x45   : > { %s13657_s10 = scalar_lea.vmem %s19015_s18, %s10656_s8  ;;  %s11091_s6 = sshll.u32 %s13580_s0, 4  ;;  %19017 = vst [vmem:[#allocation22_spill] sm:$0xff] %v13677_v18  ;;  %v1117_v22 = vld [vmem:[%s13590_s1] sm:$0xff] (!%p10664_p0)  ;;  %v1126_v27 = vld [vmem:[%s13590_s1 + $0x48] sm:$0xff] (!%p10664_p0)  ;;  %v1119_v30 = vld [vmem:[%s13590_s1 + $0x10] sm:$0xff] (!%p10664_p0) }
  0x46   : > { %19016 = sst [smem:[#allocation21_spill]] %s13657_s10  ;;  %s13682_s8 = scalar_lea.vmem %s19018_s19, %s12186_s25  ;;  %v1125_v24 = vld [vmem:[%s13590_s1 + $0x40] sm:$0xff] (!%p10664_p0)  ;;  %v1133_v26 = vpack.c.bf16 (!%p10664_p0), %v1118_v23, %v1117_v22  ;;  %v1120_v31 = vld [vmem:[%s13590_s1 + $0x18] sm:$0xff] (!%p10664_p0)  ;;  %v1127_v32 = vld [vmem:[%s13590_s1 + $0x50] sm:$0xff] (!%p10664_p0) }
  0x47   : > { %s13687_s18 = scalar_lea.vmem %s18697_s20, %s12186_s25  ;;  %s13692_s14 = scalar_lea.vmem %s18698_s21, %s11091_s6  ;;  %1319 = vperm.xlu1 (!%p10664_p0), %12266, %v1098_v5   ;;  %1309 = vperm.xlu0 (!%p10664_p0), %12265, %v1096_v3   ;;  %v1137_v28 = vpack.c.bf16 (!%p10664_p0), %v1126_v27, %v1125_v24  ;;  %v1128_v33 = vld [vmem:[%s13590_s1 + $0x58] sm:$0xff] (!%p10664_p0)  ;;  %v1121_v34 = vld [vmem:[%s13590_s1 + $0x20] sm:$0xff] (!%p10664_p0)  ;;  %v1122_v35 = vld [vmem:[%s13590_s1 + $0x28] sm:$0xff] (!%p10664_p0)  ;;  %v1134_v38 = vpack.c.bf16 (!%p10664_p0), %v1120_v31, %v1119_v30 }
  0x48   : > { %s13697_s12 = scalar_lea.vmem %s18700_s23, %s11089_s13  ;;  %s19019_s26 = sand.u32 1, %s13327_s30   ;;  %11808 = vmatprep.mubr.msk.bf16.mxu0 (!%p10664_p0), %vm1180_vm0, %v1133_v26  ;;  %v1129_v36 = vld [vmem:[%s13590_s1 + $0x60] sm:$0xff] (!%p10664_p0)  ;;  %v1130_v37 = vld [vmem:[%s13590_s1 + $0x68] sm:$0xff] (!%p10664_p0)  ;;  %v1138_v39 = vpack.c.bf16 (!%p10664_p0), %v1128_v33, %v1127_v32  ;;  %v1135_v40 = vpack.c.bf16 (!%p10664_p0), %v1122_v35, %v1121_v34  ;;  %v1123_v42 = vld [vmem:[%s13590_s1 + $0x30] sm:$0xff] (!%p10664_p0) }
  0x49   : > { %s13705_s19 = scalar_lea.vmem [#allocation5], %s19019_s26  ;;  %1116 = sbr.rel (%p10664_p0) target bundleno = 325 (0x145), region = 132  ;;  %11816 = vmatprep.mubr.msk.bf16.mxu1 (!%p10664_p0), %vm1180_vm0, %v1137_v28  ;;  %v1139_v41 = vpack.c.bf16 (!%p10664_p0), %v1130_v37, %v1129_v36  ;;  %v1124_v43 = vld [vmem:[%s13590_s1 + $0x38] sm:$0xff] (!%p10664_p0)  ;;  %v1131_v44 = vld [vmem:[%s13590_s1 + $0x70] sm:$0xff] (!%p10664_p0)  ;;  %v1431_v48 = vld [vmem:[%s13607_s2] sm:$0xff] (!%p10664_p0) }
  0x4a   : > { %s19020_s4 = sld [smem:[#allocation113_spill]] (!%p10664_p0)  ;;  %v1132_v45 = vld [vmem:[%s13590_s1 + $0x78] sm:$0xff] (!%p10664_p0)  ;;  %v1136_v46 = vpack.c.bf16 (!%p10664_p0), %v1124_v43, %v1123_v42  ;;  %v1433_v49 = vld [vmem:[%s13607_s2 + $0x10] sm:$0xff] (!%p10664_p0)  ;;  %v1432_v50 = vld [vmem:[%s13607_s2 + $0x8] sm:$0xff] (!%p10664_p0)  ;;  %s19021_s28 = sld [smem:[#allocation114_spill]] (!%p10664_p0) }
  0x4b   : > { %1329 = vperm.xlu1 (!%p10664_p0), %12266, %v1100_v7   ;;  %1324 = vperm.xlu0 (!%p10664_p0), %12265, %v1099_v6   ;;  %v1140_v47 = vpack.c.bf16 (!%p10664_p0), %v1132_v45, %v1131_v44  ;;  %v1435_v51 = vld [vmem:[%s13607_s2 + $0x20] sm:$0xff] (!%p10664_p0)  ;;  %v1434_v52 = vld [vmem:[%s13607_s2 + $0x18] sm:$0xff] (!%p10664_p0)  ;;  %v1437_v53 = vld [vmem:[%s13607_s2 + $0x30] sm:$0xff] (!%p10664_p0) }
  0x4c   : > { %v1436_v54 = vld [vmem:[%s13607_s2 + $0x28] sm:$0xff] (!%p10664_p0)  ;;  %v1439_v55 = vld [vmem:[%s13607_s2 + $0x40] sm:$0xff] (!%p10664_p0)  ;;  %v1438_v56 = vld [vmem:[%s13607_s2 + $0x38] sm:$0xff] (!%p10664_p0) }
  0x4d   : > { %v1441_v57 = vld [vmem:[%s13607_s2 + $0x50] sm:$0xff] (!%p10664_p0)  ;;  %v1440_v58 = vld [vmem:[%s13607_s2 + $0x48] sm:$0xff] (!%p10664_p0)  ;;  %v1443_v59 = vld [vmem:[%s13607_s2 + $0x60] sm:$0xff] (!%p10664_p0) }
  0x4e   : > { %v1442_v60 = vld [vmem:[%s13607_s2 + $0x58] sm:$0xff] (!%p10664_p0)  ;;  %v1445_v61 = vld [vmem:[%s13607_s2 + $0x70] sm:$0xff] (!%p10664_p0)  ;;  %v1444_v62 = vld [vmem:[%s13607_s2 + $0x68] sm:$0xff] (!%p10664_p0) }
  0x4f   : > { %1339 = vperm.xlu1 (!%p10664_p0), %12266, %v13630_v9   ;;  %1334 = vperm.xlu0 (!%p10664_p0), %12265, %v13627_v8   ;;  %v1446_v63 = vld [vmem:[%s13607_s2 + $0x78] sm:$0xff] (!%p10664_p0)  ;;  %v1419_v28 = vld [vmem:[%s13602_s11 + $0x20] sm:$0xff] (!%p10664_p0)  ;;  %v1420_v32 = vld [vmem:[%s13602_s11 + $0x28] sm:$0xff] (!%p10664_p0) }
  0x50   : > { %v12267_v19 = vld [vmem:[%s19020_s4] sm:$0xff]   ;;  %v12268_v21 = vld [vmem:[%s19020_s4 + $0x8] sm:$0xff]   ;;  %v12269_v25 = vld [vmem:[%s19020_s4 + $0x10] sm:$0xff]  }
  0x51   : > { %11800 = vmatprep.subr.bf16.mxu0 %v12267_v19  ;;  %12160 = vmatprep.subr.bf16.mxu1 %v12267_v19  ;;  %v12270_v29 = vld [vmem:[%s19020_s4 + $0x18] sm:$0xff]   ;;  %v1421_v35 = vld [vmem:[%s13602_s11 + $0x30] sm:$0xff]  ;;  %v1423_v42 = vld [vmem:[%s13602_s11 + $0x40] sm:$0xff] }
  0x52   : > { %11801 = vmatpush3.bf16.msra.mxu0 %v12267_v19  ;;  %12164 = vmatpush3.bf16.msra.mxu1 %v12267_v19  ;;  %v1416_v19 = vld [vmem:[%s13602_s11 + $0x8] sm:$0xff] }
  0x53   : > { %11802 = vmatprep.subr.bf16.mxu0 %v12268_v21  ;;  %12161 = vmatprep.subr.bf16.mxu1 %v12268_v21 }
  0x54   : > { %1349 = vperm.xlu1 %12266, %v13646_v11   ;;  %1344 = vperm.xlu0 %12265, %v13633_v10  }
  0x56   : > { %11803 = vmatpush3.bf16.msra.mxu0 %v12268_v21  ;;  %12165 = vmatpush3.bf16.msra.mxu1 %v12268_v21  ;;  %v1417_v21 = vld [vmem:[%s13602_s11 + $0x10] sm:$0xff] }
  0x57   : > { %11804 = vmatprep.subr.bf16.mxu0 %v12269_v25  ;;  %12162 = vmatprep.subr.bf16.mxu1 %v12269_v25 }
  0x58   : > { %1359 = vperm.xlu1 %12266, %v13652_v13   ;;  %1354 = vperm.xlu0 %12265, %v13649_v12  }
  0x5a   : > { %11805 = vmatpush3.bf16.msra.mxu0 %v12269_v25  ;;  %12166 = vmatpush3.bf16.msra.mxu1 %v12269_v25  ;;  %v1418_v25 = vld [vmem:[%s13602_s11 + $0x18] sm:$0xff] }
  0x5b   : > { %11806 = vmatprep.subr.bf16.mxu0 %v12270_v29  ;;  %12163 = vmatprep.subr.bf16.mxu1 %v12270_v29 }
  0x5c   : > { %1369 = vperm.xlu1 %12266, %v13664_v15   ;;  %1364 = vperm.xlu0 %12265, %v13661_v14   ;;  %v1415_v15 = vld [vmem:[%s13602_s11] sm:$0xff] }
  0x5e   : > { %11807 = vmatpush3.bf16.msra.mxu0 %v12270_v29  ;;  %12167 = vmatpush3.bf16.msra.mxu1 %v12270_v29 }
  0x60   : > { %1449 = vperm.xlu1 %12266, %v1431_v48   ;;  %1374 = vperm.xlu0 %12265, %v13667_v16  }
  0x61   : > { %11809 = vmatmul.mubr.msk.bf16.vlgmr.msra.gmra.mrb[0].mxu0 %vm1180_vm0, %v1134_v38  ;;  %11817 = vmatmul.mubr.msk.bf16.vlgmr.msra.gmra.mrb[0].mxu1 %vm1180_vm0, %v1138_v39  ;;  %v1422_v39 = vld [vmem:[%s13602_s11 + $0x38] sm:$0xff] }
  0x62   : > { %11812 = vmatprep.mubr.msk.bf16.mxu0 %vm1180_vm0, %v1135_v40  ;;  %11820 = vmatprep.mubr.msk.bf16.mxu1 %vm1180_vm0, %v1139_v41 }
  0x64   : > { %1459 = vperm.xlu1 %12266, %v1433_v49   ;;  %1454 = vperm.xlu0 %12265, %v1432_v50   ;;  %v1425_v49 = vld [vmem:[%s13602_s11 + $0x50] sm:$0xff] }
  0x68   : > { %1469 = vperm.xlu1 %12266, %v1435_v51   ;;  %1464 = vperm.xlu0 %12265, %v1434_v52  }
  0x69   : > { %11813 = vmatmul.mubr.msk.bf16.gmra.mrb[4].mxu0 %vm1180_vm0, %v1136_v46  ;;  %11821 = vmatmul.mubr.msk.bf16.gmra.mrb[4].mxu1 %vm1180_vm0, %v1140_v47  ;;  %v1424_v46 = vld [vmem:[%s13602_s11 + $0x48] sm:$0xff] }
  0x6c   : > { %1479 = vperm.xlu1 %12266, %v1437_v53   ;;  %1474 = vperm.xlu0 %12265, %v1436_v54   ;;  %v1426_v53 = vld [vmem:[%s13602_s11 + $0x58] sm:$0xff] }
  0x70   : > { %1489 = vperm.xlu1 %12266, %v1439_v55   ;;  %1484 = vperm.xlu0 %12265, %v1438_v56  }
  0x74   : > { %1499 = vperm.xlu1 %12266, %v1441_v57   ;;  %1494 = vperm.xlu0 %12265, %v1440_v58  }
  0x78   : > { %1509 = vperm.xlu1 %12266, %v1443_v59   ;;  %1504 = vperm.xlu0 %12265, %v1442_v60   ;;  %v1427_v59 = vld [vmem:[%s13602_s11 + $0x60] sm:$0xff]  ;;  %v1428_v60 = vld [vmem:[%s13602_s11 + $0x68] sm:$0xff] }
  0x7c   : > { %1519 = vperm.xlu1 %12266, %v1445_v61   ;;  %1514 = vperm.xlu0 %12265, %v1444_v62  }
  0x80   : > { %1379 = vperm.xlu1 %12266, %v13675_v17   ;;  %1524 = vperm.xlu0 %12265, %v1446_v63  }
  0xc2   : > { %v13770_v0 = vpop.permute.xlu1 %1314  ;;  %v13772_v2 = vpop.permute.xlu0 %1304 }
  0xc6   : > { %v13774_v3 = vpop.permute.xlu1 %1319  ;;  %v13776_v4 = vpop.permute.xlu0 %1309 }
  0xca   : > { %v13778_v5 = vpop.permute.xlu1 %1329  ;;  %v13780_v6 = vpop.permute.xlu0 %1324 }
  0xce   : > { %v13782_v7 = vpop.permute.xlu1 %1339  ;;  %v13784_v8 = vpop.permute.xlu0 %1334 }
  0xd3   : > { %v13786_v9 = vpop.permute.xlu1 %1349  ;;  %v13788_v10 = vpop.permute.xlu0 %1344 }
  0xd7   : > { %v13790_v11 = vpop.permute.xlu1 %1359  ;;  %v13792_v12 = vpop.permute.xlu0 %1354 }
  0xdb   : > { %v13794_v13 = vpop.permute.xlu1 %1369  ;;  %v13796_v14 = vpop.permute.xlu0 %1364 }
  0xdf   : > { %v1450_v16 = vpop.permute.xlu1 %1449  ;;  %v13799_v17 = vpop.permute.xlu0 %1374 }
  0xe0   : > { %v1527_v20 = vmul.f32 %v1450_v16, %v1415_v15  ;;  %v1429_v16 = vld [vmem:[%s13602_s11 + $0x70] sm:$0xff] }
  0xe3   : > { %v1460_v22 = vpop.permute.xlu1 %1459  ;;  %v1455_v23 = vpop.permute.xlu0 %1454 }
  0xe4   : > { %v1528_v24 = vmul.f32 %v1455_v23, %v1416_v19  ;;  %v1529_v26 = vmul.f32 %v1460_v22, %v1417_v21 }
  0xe6   : > { %v1543_v27 = vpack.c.bf16 %v1528_v24, %v1527_v20  ;;  %v1430_v20 = vld [vmem:[%s13602_s11 + $0x78] sm:$0xff] }
  0xe7   : > { %v1470_v29 = vpop.permute.xlu1 %1469  ;;  %v1465_v30 = vpop.permute.xlu0 %1464 }
  0xe8   : > { %1551 = vst.msk [vmem:[#allocation3] sm:$0xff] %vm1398_vm1, %v1543_v27  ;;  %v1530_v31 = vmul.f32 %v1465_v30, %v1418_v25  ;;  %v1531_v33 = vmul.f32 %v1470_v29, %v1419_v28 }
  0xea   : > { %v1544_v34 = vpack.c.bf16 %v1530_v31, %v1529_v26  ;;  %v10665_v26 = vld [vmem:[%s19021_s28] ss:$0 sm:$0xff] }
  0xeb   : > { %v1480_v36 = vpop.permute.xlu1 %1479  ;;  %v1475_v37 = vpop.permute.xlu0 %1474 }
  0xec   : > { %1552 = vst.msk [vmem:[#allocation3 + $0x8] sm:$0xff] %vm1398_vm1, %v1544_v34  ;;  %v1532_v38 = vmul.f32 %v1475_v37, %v1420_v32  ;;  %v1533_v40 = vmul.f32 %v1480_v36, %v1421_v35 }
  0xee   : > { %v1545_v41 = vpack.c.bf16 %v1532_v38, %v1531_v33 }
  0xef   : > { %v1490_v43 = vpop.permute.xlu1 %1489  ;;  %v1485_v44 = vpop.permute.xlu0 %1484 }
  0xf0   : > { %1553 = vst.msk [vmem:[#allocation3 + $0x10] sm:$0xff] %vm1398_vm1, %v1545_v41  ;;  %v1534_v45 = vmul.f32 %v1485_v44, %v1422_v39  ;;  %v1535_v47 = vmul.f32 %v1490_v43, %v1423_v42 }
  0xf2   : > { %v1546_v48 = vpack.c.bf16 %v1534_v45, %v1533_v40 }
  0xf3   : > { %v1500_v50 = vpop.permute.xlu1 %1499  ;;  %v1495_v51 = vpop.permute.xlu0 %1494 }
  0xf4   : > { %1554 = vst.msk [vmem:[#allocation3 + $0x18] sm:$0xff] %vm1398_vm1, %v1546_v48  ;;  %v1536_v52 = vmul.f32 %v1495_v51, %v1424_v46  ;;  %v1537_v54 = vmul.f32 %v1500_v50, %v1425_v49 }
  0xf6   : > { %v1547_v55 = vpack.c.bf16 %v1536_v52, %v1535_v47 }
  0xf7   : > { %v1510_v56 = vpop.permute.xlu1 %1509  ;;  %v1505_v57 = vpop.permute.xlu0 %1504 }
  0xf8   : > { %1555 = vst.msk [vmem:[#allocation3 + $0x20] sm:$0xff] %vm1398_vm1, %v1547_v55  ;;  %v1538_v58 = vmul.f32 %v1505_v57, %v1426_v53  ;;  %v1539_v63 = vmul.f32 %v1510_v56, %v1427_v59 }
  0xfa   : > { %v1548_v61 = vpack.c.bf16 %v1538_v58, %v1537_v54 }
  0xfb   : > { %v1515_v62 = vpop.permute.xlu0 %1514  ;;  %v1520_v19 = vpop.permute.xlu1 %1519 }
  0xfc   : > { %1556 = vst.msk [vmem:[#allocation3 + $0x28] sm:$0xff] %vm1398_vm1, %v1548_v61  ;;  %v1540_v15 = vmul.f32 %v1515_v62, %v1428_v60  ;;  %v1541_v23 = vmul.f32 %v1520_v19, %v1429_v16 }
  0xfe   : > { %v1549_v21 = vpack.c.bf16 %v1540_v15, %v1539_v63 }
  0xff   : > { %v1525_v22 = vpop.permute.xlu0 %1524  ;;  %v1380_v59 = vpop.permute.xlu1 %1379 }
 0x100   : > { %1557 = vst.msk [vmem:[#allocation3 + $0x30] sm:$0xff] %vm1398_vm1, %v1549_v21  ;;  %v1542_v24 = vmul.f32 %v1525_v22, %v1430_v20 }
 0x102   : > { %v1550_v25 = vpack.c.bf16 %v1542_v24, %v1541_v23 }
 0x104   : > { %1558 = vst.msk [vmem:[#allocation3 + $0x38] sm:$0xff] %vm1398_vm1, %v1550_v25 }
 0x134   : > { %v11810_v27 = vpop.f32.mrb[0].mxu0  ;;  %v11818_v28 = vpop.f32.mrb[0].mxu1 }
 0x135   : > { %v1248_v29 = vadd.f32 %v11810_v27, %v10665_v26  ;;  %v1280_v30 = vadd.f32 %v11818_v28, %v10665_v26  ;;  %v1239_v31 = vpop.f32.mrb[1].mxu0  ;;  %v1271_v32 = vpop.f32.mrb[1].mxu1 }
 0x136   : > { %v1240_v33 = vadd.f32 %v10665_v26, %v1239_v31  ;;  %v1272_v34 = vadd.f32 %v10665_v26, %v1271_v32  ;;  %v11811_v35 = vpop.f32.mrb[2].mxu0  ;;  %v11819_v36 = vpop.f32.mrb[2].mxu1 }
 0x137   : > { %v1384_v37 = vmul.f32 %v13770_v0, %v1248_v29  ;;  %v1392_v38 = vmul.f32 %v13792_v12, %v1280_v30  ;;  %v1251_v39 = vadd.f32 %v11811_v35, %v10665_v26  ;;  %v1283_v40 = vadd.f32 %v11819_v36, %v10665_v26  ;;  %v1242_v41 = vpop.f32.mrb[3].mxu0  ;;  %v1274_v42 = vpop.f32.mrb[3].mxu1 }
 0x138   : > { %v1382_v43 = vmul.f32 %v13772_v2, %v1240_v33  ;;  %v1390_v44 = vmul.f32 %v13788_v10, %v1272_v34  ;;  %v1243_v45 = vadd.f32 %v10665_v26, %v1242_v41  ;;  %v1275_v46 = vadd.f32 %v10665_v26, %v1274_v42 }
 0x139   : > { %1401 = vst.msk [vmem:[#allocation2 + $0x10] sm:$0xff] %vm1398_vm1, %v1384_v37  ;;  %1409 = vst.msk [vmem:[#allocation2 + $0x50] sm:$0xff] %vm1398_vm1, %v1392_v38  ;;  %v1385_v47 = vmul.f32 %v13774_v3, %v1251_v39  ;;  %v1393_v0 = vmul.f32 %v13790_v11, %v1283_v40 }
 0x13a   : > { %1399 = vst.msk [vmem:[#allocation2] sm:$0xff] %vm1398_vm1, %v1382_v43  ;;  %1407 = vst.msk [vmem:[#allocation2 + $0x40] sm:$0xff] %vm1398_vm1, %v1390_v44  ;;  %v1383_v12 = vmul.f32 %v13776_v4, %v1243_v45  ;;  %v1391_v2 = vmul.f32 %v13786_v9, %v1275_v46 }
 0x13b   : > { %1402 = vst.msk [vmem:[#allocation2 + $0x18] sm:$0xff] %vm1398_vm1, %v1385_v47  ;;  %1410 = vst.msk [vmem:[#allocation2 + $0x58] sm:$0xff] %vm1398_vm1, %v1393_v0 }
 0x13c   : > { %1400 = vst.msk [vmem:[#allocation2 + $0x8] sm:$0xff] %vm1398_vm1, %v1383_v12  ;;  %1408 = vst.msk [vmem:[#allocation2 + $0x48] sm:$0xff] %vm1398_vm1, %v1391_v2  ;;  %v11814_v10 = vpop.f32.mrb[4].mxu0  ;;  %v11822_v3 = vpop.f32.mrb[4].mxu1 }
 0x13d   : > { %v1264_v48 = vadd.f32 %v11814_v10, %v10665_v26  ;;  %v1296_v11 = vadd.f32 %v11822_v3, %v10665_v26  ;;  %v1255_v49 = vpop.f32.mrb[5].mxu0  ;;  %v1287_v50 = vpop.f32.mrb[5].mxu1 }
 0x13e   : > { %v1256_v51 = vadd.f32 %v10665_v26, %v1255_v49  ;;  %v1288_v52 = vadd.f32 %v10665_v26, %v1287_v50  ;;  %v11815_v53 = vpop.f32.mrb[6].mxu0  ;;  %v11823_v4 = vpop.f32.mrb[6].mxu1 }
 0x13f   : > { %v1388_v9 = vmul.f32 %v13784_v8, %v1264_v48  ;;  %v1396_v54 = vmul.f32 %v13799_v17, %v1296_v11  ;;  %v1267_v55 = vadd.f32 %v11815_v53, %v10665_v26  ;;  %v1299_v56 = vadd.f32 %v11823_v4, %v10665_v26  ;;  %v1258_v57 = vpop.f32.mrb[7].mxu0  ;;  %v1290_v58 = vpop.f32.mrb[7].mxu1 }
 0x140   : > { %v1386_v60 = vmul.f32 %v13780_v6, %v1256_v51  ;;  %v1394_v61 = vmul.f32 %v13796_v14, %v1288_v52  ;;  %v1259_v62 = vadd.f32 %v10665_v26, %v1258_v57  ;;  %v1291_v63 = vadd.f32 %v10665_v26, %v1290_v58 }
 0x141   : > { %1405 = vst.msk [vmem:[#allocation2 + $0x30] sm:$0xff] %vm1398_vm1, %v1388_v9  ;;  %1413 = vst.msk [vmem:[#allocation2 + $0x70] sm:$0xff] %vm1398_vm1, %v1396_v54  ;;  %v1389_v15 = vmul.f32 %v13782_v7, %v1267_v55  ;;  %v1397_v8 = vmul.f32 %v1380_v59, %v1299_v56 }
 0x142   : > { %1403 = vst.msk [vmem:[#allocation2 + $0x20] sm:$0xff] %vm1398_vm1, %v1386_v60  ;;  %1411 = vst.msk [vmem:[#allocation2 + $0x60] sm:$0xff] %vm1398_vm1, %v1394_v61  ;;  %v1387_v17 = vmul.f32 %v13778_v5, %v1259_v62  ;;  %v1395_v16 = vmul.f32 %v13794_v13, %v1291_v63 }
 0x143   : > { %1406 = vst.msk [vmem:[#allocation2 + $0x38] sm:$0xff] %vm1398_vm1, %v1389_v15  ;;  %1414 = vst.msk [vmem:[#allocation2 + $0x78] sm:$0xff] %vm1398_vm1, %v1397_v8 }
 0x144   : > { %1404 = vst.msk [vmem:[#allocation2 + $0x28] sm:$0xff] %vm1398_vm1, %v1387_v17  ;;  %1412 = vst.msk [vmem:[#allocation2 + $0x68] sm:$0xff] %vm1398_vm1, %v1395_v16 }
 0x145 PF: > { %v1564_v6 = vld [vmem:[#allocation2] sm:$0xff]  ;;  %v1565_v7 = vld [vmem:[#allocation2 + $0x8] sm:$0xff]  ;;  %vm1630_vm2 = vcmask 261120   ;;  %v1566_v14 = vld [vmem:[#allocation2 + $0x10] sm:$0xff]  ;;  %v18727_v3 = vmov 0   ;;  %s19022_s26 = sld [smem:[#allocation117_spill]] }
 0x146   : > { %v1580_v19 = vpack.c.bf16 %v1565_v7, %v1564_v6  ;;  %v1567_v20 = vld [vmem:[#allocation2 + $0x18] sm:$0xff]  ;;  %v1572_v24 = vld [vmem:[#allocation2 + $0x40] sm:$0xff]  ;;  %v1573_v26 = vld [vmem:[#allocation2 + $0x48] sm:$0xff]  ;;  %s18841_s13 = smov 16   ;;  %s19035_s17 = sld [smem:[#allocation115_spill]]  ;;  %vm2564_vm3 = vcmask 130048  }
 0x147   : > { %v13858_v21 = vpack.c.bf16 %v1567_v20, %v1566_v14  ;;  %v1574_v27 = vld [vmem:[#allocation2 + $0x50] sm:$0xff]  ;;  %v1575_v28 = vld [vmem:[#allocation2 + $0x58] sm:$0xff]  ;;  %v12271_v33 = vld [vmem:[%s13623_s9] sm:$0xff]   ;;  %v1584_v37 = vpack.c.bf16 %v1573_v26, %v1572_v24  ;;  %s19044_s28 = sld [smem:[#allocation116_spill]]  ;;  %vm3558_vm4 = vcmask 1043456   ;;  %s19096_s2 = sld [smem:[#allocation121_spill]] }
 0x148   : > { %v1570_v13 = vld [vmem:[#allocation2 + $0x30] sm:$0xff]  ;;  %12170 = vmatprep.subr.msk.bf16.mxu1 %vm1630_vm2, %v1580_v19  ;;  %v1632_v25 = vsel %vm1630_vm2, %v1580_v19, 0  ;;  %11828 = vmatprep.mubr.msk.bf16.mxu0 %vm1630_vm2, %v1580_v19  ;;  %v12272_v34 = vld [vmem:[%s13623_s9 + $0x8] sm:$0xff]   ;;  %v1585_v38 = vpack.c.bf16 %v1575_v28, %v1574_v27  ;;  %v12275_v43 = vld [vmem:[%s13623_s9 + $0x20] sm:$0xff]   ;;  %vm3525_vm5 = vcmask 31744   ;;  %s19279_s15 = sld [smem:[#allocation118_spill]] }
 0x149   : > { %v1568_v5 = vld [vmem:[#allocation2 + $0x20] sm:$0xff]  ;;  %11845 = vmatpush3.bf16.xpose.msra.mxu1 %v1632_v25  ;;  %v1578_v31 = vld [vmem:[#allocation2 + $0x70] sm:$0xff]  ;;  %v1635_v40 = vsel %vm1630_vm2, %v13858_v21, 0  ;;  %11824 = vmatprep.subr.bf16.mxu0 %v12271_v33  ;;  %v1644_v46 = vsel %vm1630_vm2, %v1584_v37, 0  ;;  %v12276_v2 = vld [vmem:[%s13623_s9 + $0x28] sm:$0xff]   ;;  %s19281_s6 = sld [smem:[#allocation120_spill]] }
 0x14a   : > { %v1571_v23 = vld [vmem:[#allocation2 + $0x38] sm:$0xff]  ;;  %v1576_v29 = vld [vmem:[#allocation2 + $0x60] sm:$0xff]  ;;  %12171 = vmatprep.subr.msk.bf16.mxu1 %vm1630_vm2, %v13858_v21  ;;  %v12273_v39 = vld [vmem:[%s13623_s9 + $0x10] sm:$0xff]   ;;  %11825 = vmatpush3.bf16.msra.mxu0 %v12271_v33  ;;  %v1647_v47 = vsel %vm1630_vm2, %v1585_v38, 0  ;;  %s19311_s16 = sld [smem:[#allocation119_spill]]  ;;  %s19332_s4 = smov 16  }
 0x14b   : > { %v1569_v22 = vld [vmem:[#allocation2 + $0x28] sm:$0xff]  ;;  %v1579_v32 = vld [vmem:[#allocation2 + $0x78] sm:$0xff]  ;;  %v1583_v36 = vpack.c.bf16 %v1571_v23, %v1570_v13  ;;  %11860 = vmatprep.mubr.msk.bf16.mxu1 %vm1630_vm2, %v12273_v39  ;;  %11826 = vmatprep.subr.bf16.mxu0 %v12272_v34  ;;  %v12283_v48 = vld [vmem:[%s19022_s26 + $0x40] sm:$0xff]   ;;  %p11080_p1 = scmp.ne.s32.totalorder %s13335_s5, 1 }
 0x14c   : > { %v1577_v30 = vld [vmem:[#allocation2 + $0x68] sm:$0xff]  ;;  %v1582_v35 = vpack.c.bf16 %v1569_v22, %v1568_v5  ;;  %v1587_v42 = vpack.c.bf16 %v1579_v32, %v1578_v31  ;;  %v12274_v10 = vld [vmem:[%s13623_s9 + $0x18] sm:$0xff]   ;;  %v12284_v11 = vld [vmem:[%s19022_s26] sm:$0xff]   ;;  %2516 = vrot.lane.b32.xlu0 %v12283_v48, %s18841_s13  ;;  %vm13358_vm6 = vmmov (!%p11080_p1), 0  }
 0x14d   : > { %v1586_v41 = vpack.c.bf16 %v1577_v30, %v1576_v29  ;;  %v1641_v45 = vsel %vm1630_vm2, %v1583_v36, 0  ;;  %2500 = vrot.lane.b32.xlu1 %v12284_v11, %s18841_s13  ;;  %v12285_v49 = vld [vmem:[%s19022_s26 + $0xc0] sm:$0xff]   ;;  %v12287_v51 = vld [vmem:[%s19022_s26 + $0x48] sm:$0xff]   ;;  %v12291_v9 = vld [vmem:[%s19022_s26 + $0x50] sm:$0xff]   ;;  %s19045_s11 = smov %s19044_s28 }
 0x14e   : > { %v1638_v44 = vsel %vm1630_vm2, %v1582_v35, 0  ;;  %v1653_v12 = vsel %vm1630_vm2, %v1587_v42, 0  ;;  %11827 = vmatpush3.bf16.msra.mxu0 %v12272_v34  ;;  %v12286_v50 = vld [vmem:[%s19022_s26 + $0x80] sm:$0xff]   ;;  %v12288_v52 = vld [vmem:[%s19022_s26 + $0xc8] sm:$0xff]   ;;  %v12292_v54 = vld [vmem:[%s19022_s26 + $0xd0] sm:$0xff]  }
 0x14f   : > { %v1650_v0 = vsel %vm1630_vm2, %v1586_v41, 0  ;;  %11864 = vmatprep.subr.bf16.mxu0 %v12275_v43  ;;  %v12289_v53 = vld [vmem:[%s19022_s26 + $0x8] sm:$0xff]   ;;  %v12293_v55 = vld [vmem:[%s19022_s26 + $0x10] sm:$0xff]   ;;  %v12295_v57 = vld [vmem:[%s19022_s26 + $0x58] sm:$0xff]  }
 0x150   : > { %2548 = vrot.lane.b32.xlu0 %v12285_v49, %s18841_s13  ;;  %v12290_v4 = vld [vmem:[%s19022_s26 + $0x88] sm:$0xff]   ;;  %v12294_v56 = vld [vmem:[%s19022_s26 + $0x90] sm:$0xff]   ;;  %v12296_v58 = vld [vmem:[%s19022_s26 + $0xd8] sm:$0xff]  }
 0x151   : > { %11847 = vmatpush3.bf16.xpose.msra.mxu1 %v1635_v40  ;;  %11829 = vmatmul.mubr.msk.bf16.vlgmr.msra.gmra.mrb[0].mxu0 %vm1630_vm2, %v13858_v21  ;;  %v12297_v59 = vld [vmem:[%s19022_s26 + $0x18] sm:$0xff]   ;;  %v12299_v61 = vld [vmem:[%s19022_s26 + $0x60] sm:$0xff]   ;;  %v12303_v7 = vld [vmem:[%s19022_s26 + $0x68] sm:$0xff]  }
 0x152   : > { %12172 = vmatprep.subr.msk.bf16.mxu1 %vm1630_vm2, %v1582_v35  ;;  %11832 = vmatprep.mubr.msk.bf16.mxu0 %vm1630_vm2, %v1582_v35  ;;  %v12298_v60 = vld [vmem:[%s19022_s26 + $0x98] sm:$0xff]   ;;  %v12300_v62 = vld [vmem:[%s19022_s26 + $0xe0] sm:$0xff]   ;;  %v12304_v14 = vld [vmem:[%s19022_s26 + $0xe8] sm:$0xff]  }
 0x153   : > { %11865 = vmatpush3.bf16.msra.mxu0 %v12275_v43  ;;  %2532 = vrot.lane.b32.xlu1 %v12286_v50, %s18841_s13  ;;  %v12301_v63 = vld [vmem:[%s19022_s26 + $0x20] sm:$0xff]   ;;  %v12305_v25 = vld [vmem:[%s19022_s26 + $0x28] sm:$0xff]   ;;  %v12307_v33 = vld [vmem:[%s19022_s26 + $0x70] sm:$0xff]  }
 0x154   : > { %11866 = vmatprep.subr.bf16.mxu0 %v12276_v2  ;;  %2518 = vrot.lane.b32.xlu0 %v12287_v51, %s18841_s13  ;;  %v12302_v15 = vld [vmem:[%s19022_s26 + $0xa0] sm:$0xff]   ;;  %v12306_v26 = vld [vmem:[%s19022_s26 + $0xa8] sm:$0xff]   ;;  %v12308_v34 = vld [vmem:[%s19022_s26 + $0xf0] sm:$0xff]  }
 0x155   : > { %v13985_v8 = vld [vmem:[%s13638_s3] ss:$0 sm:$0xff]  ;;  %v12309_v43 = vld [vmem:[%s19022_s26 + $0x30] sm:$0xff]   ;;  %v12312_v48 = vld [vmem:[%s19022_s26 + $0xf8] sm:$0xff]  }
 0x157   : > { %11867 = vmatpush3.bf16.msra.mxu0 %v12276_v2  ;;  %2550 = vrot.lane.b32.xlu1 %v12288_v52, %s18841_s13 }
 0x158   : > { %2502 = vrot.lane.b32.xlu0 %v12289_v53, %s18841_s13 }
 0x159   : > { %11849 = vmatpush3.bf16.xpose.msra.mxu1 %v1638_v44  ;;  %11833 = vmatmul.mubr.msk.bf16.gmra.mrb[4].mxu0 %vm1630_vm2, %v1583_v36  ;;  %v12310_v44 = vld [vmem:[%s19022_s26 + $0xb0] sm:$0xff]  }
 0x15a   : > { %12173 = vmatprep.subr.msk.bf16.mxu1 %vm1630_vm2, %v1583_v36  ;;  %11836 = vmatprep.mubr.msk.bf16.mxu0 %vm1630_vm2, %v1584_v37 }
 0x15b   : > { %2534 = vrot.lane.b32.xlu1 %v12290_v4, %s18841_s13 }
 0x15c   : > { %2520 = vrot.lane.b32.xlu0 %v12291_v9, %s18841_s13 }
 0x15f   : > { %2552 = vrot.lane.b32.xlu1 %v12292_v54, %s18841_s13 }
 0x160   : > { %2504 = vrot.lane.b32.xlu0 %v12293_v55, %s18841_s13 }
 0x161   : > { %11851 = vmatpush3.bf16.xpose.msra.mxu1 %v1641_v45  ;;  %11837 = vmatmul.mubr.msk.bf16.gmra.mrb[8].mxu0 %vm1630_vm2, %v1585_v38 }
 0x162   : > { %12174 = vmatprep.subr.msk.bf16.mxu1 %vm1630_vm2, %v1584_v37  ;;  %11840 = vmatprep.mubr.msk.bf16.mxu0 %vm1630_vm2, %v1586_v41 }
 0x163   : > { %2536 = vrot.lane.b32.xlu1 %v12294_v56, %s18841_s13 }
 0x164   : > { %2522 = vrot.lane.b32.xlu0 %v12295_v57, %s18841_s13 }
 0x167   : > { %2554 = vrot.lane.b32.xlu1 %v12296_v58, %s18841_s13 }
 0x168   : > { %2506 = vrot.lane.b32.xlu0 %v12297_v59, %s18841_s13 }
 0x169   : > { %11853 = vmatpush3.bf16.xpose.msra.mxu1 %v1644_v46  ;;  %11841 = vmatmul.mubr.msk.bf16.gmra.mrb[12].mxu0 %vm1630_vm2, %v1587_v42 }
 0x16a   : > { %12175 = vmatprep.subr.msk.bf16.mxu1 %vm1630_vm2, %v1585_v38  ;;  %11868 = vmatprep.mubr.msk.bf16.mxu0 %vm1630_vm2, %v1580_v19 }
 0x16b   : > { %2538 = vrot.lane.b32.xlu1 %v12298_v60, %s18841_s13 }
 0x16c   : > { %2524 = vrot.lane.b32.xlu0 %v12299_v61, %s18841_s13 }
 0x16f   : > { %2556 = vrot.lane.b32.xlu1 %v12300_v62, %s18841_s13 }
 0x170   : > { %2508 = vrot.lane.b32.xlu0 %v12301_v63, %s18841_s13 }
 0x171   : > { %11855 = vmatpush3.bf16.xpose.msra.mxu1 %v1647_v47  ;;  %11869 = vmatmul.mubr.msk.bf16.vlgmr.msra.gmra.mrb[16].mxu0 %vm1630_vm2, %v13858_v21 }
 0x172   : > { %12176 = vmatprep.subr.msk.bf16.mxu1 %vm1630_vm2, %v1586_v41  ;;  %11872 = vmatprep.mubr.msk.bf16.mxu0 %vm1630_vm2, %v1582_v35 }
 0x173   : > { %2540 = vrot.lane.b32.xlu1 %v12302_v15, %s18841_s13 }
 0x174   : > { %2526 = vrot.lane.b32.xlu0 %v12303_v7, %s18841_s13 }
 0x177   : > { %2558 = vrot.lane.b32.xlu1 %v12304_v14, %s18841_s13 }
 0x178   : > { %2510 = vrot.lane.b32.xlu0 %v12305_v25, %s18841_s13 }
 0x179   : > { %11857 = vmatpush3.bf16.xpose.msra.mxu1 %v1650_v0  ;;  %11873 = vmatmul.mubr.msk.bf16.gmra.mrb[20].mxu0 %vm1630_vm2, %v1583_v36 }
 0x17a   : > { %12177 = vmatprep.subr.msk.bf16.mxu1 %vm1630_vm2, %v1587_v42  ;;  %11876 = vmatprep.mubr.msk.bf16.mxu0 %vm1630_vm2, %v1584_v37 }
 0x17b   : > { %2542 = vrot.lane.b32.xlu1 %v12306_v26, %s18841_s13 }
 0x17c   : > { %2528 = vrot.lane.b32.xlu0 %v12307_v33, %s18841_s13 }
 0x17f   : > { %2560 = vrot.lane.b32.xlu1 %v12308_v34, %s18841_s13 }
 0x180   : > { %2512 = vrot.lane.b32.xlu0 %v12309_v43, %s18841_s13 }
 0x181   : > { %11859 = vmatpush3.bf16.xpose.msra.mxu1 %v1653_v12  ;;  %11877 = vmatmul.mubr.msk.bf16.gmra.mrb[24].mxu0 %vm1630_vm2, %v1585_v38 }
 0x182   : > { %11880 = vmatprep.mubr.msk.bf16.mxu0 %vm1630_vm2, %v1586_v41 }
 0x183   : > { %2544 = vrot.lane.b32.xlu1 %v12310_v44, %s18841_s13 }
 0x187   : > { %2562 = vrot.lane.b32.xlu1 %v12312_v48, %s18841_s13 }
 0x188   : > { %11861 = vmatmul.mubr.msk.bf16.vlgmr.msra.gmra.mrb[0].mxu1 %vm1630_vm2, %v12274_v10  ;;  %v12311_v10 = vld [vmem:[%s19022_s26 + $0x78] sm:$0xff]  }
 0x189   : > { %11881 = vmatmul.mubr.msk.bf16.gmra.mrb[28].mxu0 %vm1630_vm2, %v1587_v42  ;;  %2866 = vmatprep.mubr.bf16.mxu1 %v18727_v3 }
 0x18a   : > { %2753 = vmatprep.mubr.bf16.mxu0 %v18727_v3  ;;  %2530 = vrot.lane.b32.xlu0 %v12311_v10, %s18841_s13 }
 0x224   : > { %v11830_v17 = vpop.f32.mrb[0].mxu0 }
 0x225   : > { %v1698_v16 = vadd.f32 %v11830_v17, %v13985_v8  ;;  %v1689_v6 = vpop.f32.mrb[1].mxu0 }
 0x226   : > { %v1690_v19 = vadd.f32 %v13985_v8, %v1689_v6  ;;  %v11831_v20 = vpop.f32.mrb[2].mxu0 }
 0x227   : > { %v1754_v21 = vmul.f32 0.5, %v1698_v16  ;;  %v1701_v5 = vadd.f32 %v11831_v20, %v13985_v8  ;;  %v1692_v22 = vpop.f32.mrb[3].mxu0 }
 0x228   : > { %v1752_v13 = vmul.f32 0.5, %v1690_v19  ;;  %v1693_v23 = vadd.f32 %v13985_v8, %v1692_v22 }
 0x229   : > { %v1755_v24 = vmul.f32 0.5, %v1701_v5 }
 0x22a   : > { %v1753_v27 = vmul.f32 0.5, %v1693_v23 }
 0x22b   : > { %v14007_v28 = vpack.c.bf16 %v1755_v24, %v1754_v21 }
 0x22c   : > { %v14009_v29 = vpack.c.bf16 %v1753_v27, %v1752_v13  ;;  %v11834_v30 = vpop.f32.mrb[4].mxu0 }
 0x22d   : > { %19023 = vst [vmem:[#allocation23_spill] sm:$0xff] %v14007_v28  ;;  %v1714_v31 = vadd.f32 %v11834_v30, %v13985_v8  ;;  %v1705_v32 = vpop.f32.mrb[5].mxu0 }
 0x22e   : > { %19024 = vst [vmem:[#allocation24_spill] sm:$0xff] %v14009_v29  ;;  %v1706_v35 = vadd.f32 %v13985_v8, %v1705_v32  ;;  %v11835_v36 = vpop.f32.mrb[6].mxu0 }
 0x22f   : > { %v1758_v37 = vmul.f32 0.5, %v1714_v31  ;;  %v1717_v38 = vadd.f32 %v11835_v36, %v13985_v8  ;;  %v1708_v39 = vpop.f32.mrb[7].mxu0  ;;  %v14077_v36 = vld [vmem:[%s19035_s17 + $0x4] ss:$16 sps:$4 sm:$0xff]  }
 0x230   : > { %v1756_v40 = vmul.f32 0.5, %v1706_v35  ;;  %v1709_v41 = vadd.f32 %v13985_v8, %v1708_v39  ;;  %v14072_v35 = vld [vmem:[%s19035_s17] ss:$16 sps:$4 sm:$0xff]   ;;  %19037 = vst [vmem:[#allocation36_spill] sm:$0xff] %v14077_v36 }
 0x231   : > { %v1759_v42 = vmul.f32 0.5, %v1717_v38  ;;  %19036 = vst [vmem:[#allocation35_spill] sm:$0xff] %v14072_v35 }
 0x232   : > { %v1757_v45 = vmul.f32 0.5, %v1709_v41  ;;  %v14089_v41 = vld [vmem:[%s19035_s17 + $0xc] ss:$16 sps:$4 sm:$0xff]  }
 0x233   : > { %v14031_v46 = vpack.c.bf16 %v1759_v42, %v1758_v37  ;;  %19040 = vst [vmem:[#allocation39_spill] sm:$0xff] %v14089_v41 }
 0x234   : > { %v14033_v47 = vpack.c.bf16 %v1757_v45, %v1756_v40  ;;  %v11838_v0 = vpop.f32.mrb[8].mxu0  ;;  %v14084_v40 = vld [vmem:[%s19035_s17 + $0x8] ss:$16 sps:$4 sm:$0xff]  }
 0x235   : > { %19025 = vst [vmem:[#allocation25_spill] sm:$0xff] %v14031_v46  ;;  %v1730_v12 = vadd.f32 %v11838_v0, %v13985_v8  ;;  %v1721_v2 = vpop.f32.mrb[9].mxu0  ;;  %19039 = vst [vmem:[#allocation38_spill] sm:$0xff] %v14084_v40 }
 0x236   : > { %19026 = vst [vmem:[#allocation26_spill] sm:$0xff] %v14033_v47  ;;  %v1722_v11 = vadd.f32 %v13985_v8, %v1721_v2  ;;  %v11839_v49 = vpop.f32.mrb[10].mxu0 }
 0x237   : > { %v1762_v50 = vmul.f32 0.5, %v1730_v12  ;;  %v1733_v51 = vadd.f32 %v11839_v49, %v13985_v8  ;;  %v1724_v52 = vpop.f32.mrb[11].mxu0 }
 0x238   : > { %v1760_v53 = vmul.f32 0.5, %v1722_v11  ;;  %v1725_v4 = vadd.f32 %v13985_v8, %v1724_v52 }
 0x239   : > { %v1763_v9 = vmul.f32 0.5, %v1733_v51 }
 0x23a   : > { %v1761_v54 = vmul.f32 0.5, %v1725_v4 }
 0x23b   : > { %v14049_v55 = vpack.c.bf16 %v1763_v9, %v1762_v50 }
 0x23c   : > { %v14051_v56 = vpack.c.bf16 %v1761_v54, %v1760_v53  ;;  %v11842_v57 = vpop.f32.mrb[12].mxu0 }
 0x23d   : > { %19027 = vst [vmem:[#allocation27_spill] sm:$0xff] %v14049_v55  ;;  %v1746_v58 = vadd.f32 %v11842_v57, %v13985_v8  ;;  %v1737_v59 = vpop.f32.mrb[13].mxu0 }
 0x23e   : > { %19028 = vst [vmem:[#allocation28_spill] sm:$0xff] %v14051_v56  ;;  %v1738_v60 = vadd.f32 %v13985_v8, %v1737_v59  ;;  %v11843_v61 = vpop.f32.mrb[14].mxu0  ;;  %v12315_v59 = vld [vmem:[%s19045_s11] sm:$0xff]  }
 0x23f   : > { %v1766_v62 = vmul.f32 0.5, %v1746_v58  ;;  %v1749_v63 = vadd.f32 %v11843_v61, %v13985_v8  ;;  %v1740_v15 = vpop.f32.mrb[15].mxu0  ;;  %v12313_v58 = vld [vmem:[%s19044_s28 + $0x40] sm:$0xff]   ;;  %s18839_s28 = smov 112  }
 0x240   : > { %v1764_v17 = vmul.f32 0.5, %v1738_v60  ;;  %v1741_v16 = vadd.f32 %v13985_v8, %v1740_v15 }
 0x241   : > { %v1767_v6 = vmul.f32 0.5, %v1749_v63  ;;  %v14133_v63 = vpop.permute.xlu1 %2500 }
 0x242   : > { %v1765_v7 = vmul.f32 0.5, %v1741_v16  ;;  %19047 = vst [vmem:[#allocation44_spill] sm:$0xff] %v14133_v63 }
 0x243   : > { %v14057_v14 = vpack.c.bf16 %v1767_v6, %v1766_v62  ;;  %v14131_v62 = vpop.permute.xlu0 %2516  ;;  %v12316_v6 = vld [vmem:[%s19045_s11 + $0x80] sm:$0xff]  }
 0x244   : > { %v14059_v19 = vpack.c.bf16 %v1765_v7, %v1764_v17  ;;  %v11870_v20 = vpop.f32.mrb[16].mxu0  ;;  %19046 = vst [vmem:[#allocation43_spill] sm:$0xff] %v14131_v62  ;;  %v12314_v17 = vld [vmem:[%s19045_s11 + $0xc0] sm:$0xff]  }
 0x245   : > { %19029 = vst [vmem:[#allocation29_spill] sm:$0xff] %v14057_v14  ;;  %v1889_v21 = vpop.f32.mrb[17].mxu0 }
 0x246   : > { %19030 = vst [vmem:[#allocation30_spill] sm:$0xff] %v14059_v19  ;;  %v11871_v5 = vpop.f32.mrb[18].mxu0 }
 0x247   : > { %v14061_v22 = vpack.c.bf16 %v11871_v5, %v11870_v20  ;;  %v1892_v13 = vpop.f32.mrb[19].mxu0  ;;  %v12318_v5 = vld [vmem:[%s19045_s11 + $0xc8] sm:$0xff]  }
 0x248   : > { %v14063_v23 = vpack.c.bf16 %v1892_v13, %v1889_v21  ;;  %v12317_v21 = vld [vmem:[%s19045_s11 + $0x48] sm:$0xff]   ;;  %v14159_v13 = vpop.permute.xlu0 %2548 }
 0x249   : > { %19031 = vst [vmem:[#allocation31_spill] sm:$0xff] %v14061_v22  ;;  %19048 = vst [vmem:[#allocation45_spill] sm:$0xff] %v14159_v13 }
 0x24a   : > { %19032 = vst [vmem:[#allocation32_spill] sm:$0xff] %v14063_v23  ;;  %v2316_v60 = vmul.bf16 %v12313_v58, %v14063_v23  ;;  %v2308_v61 = vmul.bf16 %v12315_v59, %v14063_v23  ;;  %v2332_v7 = vmul.bf16 %v12314_v17, %v14063_v23  ;;  %v2324_v20 = vmul.bf16 %v12316_v6, %v14063_v23  ;;  %v12322_v6 = vld [vmem:[%s19045_s11 + $0xd0] sm:$0xff]  }
 0x24c   : > { %v11874_v24 = vpop.f32.mrb[20].mxu0  ;;  %v2599_v15 = vsel %vm2564_vm3, %v2316_v60, %v14131_v62  ;;  %v2567_v16 = vsel %vm2564_vm3, %v2308_v61, %v14133_v63 }
 0x24d   : > { %v1905_v25 = vpop.f32.mrb[21].mxu0 }
 0x24e   : > { %v11875_v26 = vpop.f32.mrb[22].mxu0 }
 0x24f   : > { %v14065_v27 = vpack.c.bf16 %v11875_v26, %v11874_v24  ;;  %v1908_v8 = vpop.f32.mrb[23].mxu0  ;;  %v14161_v24 = vpop.permute.xlu1 %2532  ;;  %v2663_v26 = vsel %vm2564_vm3, %v2332_v7, %v14159_v13  ;;  %v12323_v7 = vld [vmem:[%s19045_s11 + $0x10] sm:$0xff]  }
 0x250   : > { %v14067_v30 = vpack.c.bf16 %v1908_v8, %v1905_v25  ;;  %19049 = vst [vmem:[#allocation46_spill] sm:$0xff] %v14161_v24  ;;  %v12319_v25 = vld [vmem:[%s19045_s11 + $0x8] sm:$0xff]   ;;  %v2631_v8 = vsel %vm2564_vm3, %v2324_v20, %v14161_v24  ;;  %v12324_v20 = vld [vmem:[%s19045_s11 + $0x90] sm:$0xff]  }
 0x251   : > { %19033 = vst [vmem:[#allocation33_spill] sm:$0xff] %v14065_v27 }
 0x252   : > { %19034 = vst [vmem:[#allocation34_spill] sm:$0xff] %v14067_v30 }
 0x254   : > { %v11878_v31 = vpop.f32.mrb[24].mxu0 }
 0x255   : > { %v1921_v32 = vpop.f32.mrb[25].mxu0 }
 0x256   : > { %v11879_v33 = vpop.f32.mrb[26].mxu0 }
 0x257   : > { %v14079_v37 = vpack.c.bf16 %v11879_v33, %v11878_v31  ;;  %v1924_v38 = vpop.f32.mrb[27].mxu0  ;;  %v2317_v31 = vmul.bf16 %v12317_v21, %v14061_v22  ;;  %v12320_v33 = vld [vmem:[%s19045_s11 + $0x88] sm:$0xff]  }
 0x258   : > { %v14091_v42 = vpack.c.bf16 %v1924_v38, %v1921_v32  ;;  %v2333_v32 = vmul.bf16 %v12318_v5, %v14061_v22  ;;  %v14181_v38 = vpop.permute.xlu1 %2550 }
 0x259   : > { %19038 = vst [vmem:[#allocation37_spill] sm:$0xff] %v14079_v37  ;;  %19051 = vst [vmem:[#allocation48_spill] sm:$0xff] %v14181_v38 }
 0x25a   : > { %19041 = vst [vmem:[#allocation40_spill] sm:$0xff] %v14091_v42 }
 0x25b   : > { %v11862_v34 = vpop.f32.mrb[0].mxu1 }
 0x25c   : > { %v1826_v39 = vpop.f32.mrb[1].mxu1  ;;  %v11882_v12 = vpop.f32.mrb[28].mxu0 }
 0x25d   : > { %v11863_v43 = vpop.f32.mrb[2].mxu1  ;;  %v1937_v53 = vpop.f32.mrb[29].mxu0 }
 0x25e   : > { %v14093_v44 = vpack.c.bf16 %v11863_v43, %v11862_v34  ;;  %v1829_v45 = vpop.f32.mrb[3].mxu1  ;;  %v11883_v4 = vpop.f32.mrb[30].mxu0 }
 0x25f   : > { %v1841_v0 = vpack.c.bf16 %v1829_v45, %v1826_v39  ;;  %v14107_v9 = vpack.c.bf16 %v11883_v4, %v11882_v12  ;;  %v1940_v54 = vpop.f32.mrb[31].mxu0  ;;  %v14179_v34 = vpop.permute.xlu0 %2518  ;;  %v2309_v39 = vmul.bf16 %v12319_v25, %v14061_v22  ;;  %v2667_v45 = vsel %vm2564_vm3, %v2333_v32, %v14181_v38 }
 0x260   : > { %19042 = vst [vmem:[#allocation41_spill] sm:$0xff] %v14093_v44  ;;  %v14109_v57 = vpack.c.bf16 %v1940_v54, %v1937_v53  ;;  %19050 = vst [vmem:[#allocation47_spill] sm:$0xff] %v14179_v34  ;;  %v2603_v43 = vsel %vm2564_vm3, %v2317_v31, %v14179_v34  ;;  %v2326_v31 = vmul.bf16 %v12324_v20, %v14067_v30 }
 0x261   : > { %v2113_v49 = vmul.bf16 %v14077_v36, %v1841_v0  ;;  %v2115_v50 = vmul.bf16 %v14089_v41, %v1841_v0  ;;  %v2112_v51 = vmul.bf16 %v14072_v35, %v1841_v0  ;;  %v2114_v52 = vmul.bf16 %v14084_v40, %v1841_v0 }
 0x262   : > { %19043 = vst [vmem:[#allocation42_spill] sm:$0xff] %v14109_v57  ;;  %v2325_v0 = vmul.bf16 %v12320_v33, %v14061_v22 }
 0x263   : > { %2721 = vmatprep.subr.bf16.mxu0 %v2113_v49  ;;  %2834 = vmatprep.subr.bf16.mxu1 %v2115_v50  ;;  %v14191_v12 = vpop.permute.xlu0 %2502  ;;  %v14193_v49 = vpop.permute.xlu1 %2534 }
 0x264   : > { %2722 = vmatpush1.bf16.msra.mxu0 %v2112_v51  ;;  %2835 = vmatpush1.bf16.msra.mxu1 %v2114_v52  ;;  %19052 = vst [vmem:[#allocation49_spill] sm:$0xff] %v14191_v12  ;;  %19053 = vst [vmem:[#allocation50_spill] sm:$0xff] %v14193_v49  ;;  %v2571_v50 = vsel %vm2564_vm3, %v2309_v39, %v14191_v12  ;;  %v2635_v51 = vsel %vm2564_vm3, %v2325_v0, %v14193_v49  ;;  %v12325_v39 = vld [vmem:[%s19045_s11 + $0x58] sm:$0xff]  }
 0x265   : > { %11135 = vmatprep.subr.bf16.mxu0 %v2599_v15  ;;  %11199 = vmatprep.subr.bf16.mxu1 %v2663_v26  ;;  %v2334_v26 = vmul.bf16 %v12322_v6, %v14067_v30 }
 0x267   : > { %10787 = vmatmul.mubr.msk.bf16.vlgmr.msra.gmra.mrb[32].mxu0 %vm2564_vm3, %v14009_v29  ;;  %10795 = vmatmul.mubr.msk.bf16.vlgmr.msra.gmra.mrb[4].mxu1 %vm2564_vm3, %v14009_v29  ;;  %v14203_v52 = vpop.permute.xlu0 %2520  ;;  %v14205_v53 = vpop.permute.xlu1 %2552  ;;  %v12344_v29 = vld [vmem:[%s19022_s26 + $0x38] sm:$0xff]  }
 0x268   : > { %2763 = vmatprep.mubr.bf16.mxu0 %v18727_v3  ;;  %2876 = vmatprep.mubr.bf16.mxu1 %v18727_v3  ;;  %19054 = vst [vmem:[#allocation51_spill] sm:$0xff] %v14203_v52  ;;  %19055 = vst [vmem:[#allocation52_spill] sm:$0xff] %v14205_v53  ;;  %v2671_v33 = vsel %vm2564_vm3, %v2334_v26, %v14205_v53 }
 0x269   : > { %11136 = vmatpush3.bf16.msra.mxu0 %v2567_v16  ;;  %11200 = vmatpush3.bf16.msra.mxu1 %v2631_v8  ;;  %v12321_v16 = vld [vmem:[%s19045_s11 + $0x50] sm:$0xff]   ;;  %v2310_v8 = vmul.bf16 %v12323_v7, %v14067_v30 }
 0x26a   : > { %11137 = vmatprep.subr.bf16.mxu0 %v2603_v43  ;;  %11201 = vmatprep.subr.bf16.mxu1 %v2667_v45  ;;  %v2318_v25 = vmul.bf16 %v12321_v16, %v14067_v30  ;;  %v12326_v43 = vld [vmem:[%s19045_s11 + $0xd8] sm:$0xff]   ;;  %v2319_v16 = vmul.bf16 %v12325_v39, %v14065_v27 }
 0x26b   : > { %v14209_v4 = vpop.permute.xlu0 %2504  ;;  %v14211_v54 = vpop.permute.xlu1 %2536  ;;  %v2335_v6 = vmul.bf16 %v12326_v43, %v14065_v27 }
 0x26c   : > { %19056 = vst [vmem:[#allocation53_spill] sm:$0xff] %v14209_v4  ;;  %19057 = vst [vmem:[#allocation54_spill] sm:$0xff] %v14211_v54  ;;  %v2607_v32 = vsel %vm2564_vm3, %v2318_v25, %v14203_v52  ;;  %v2575_v45 = vsel %vm2564_vm3, %v2310_v8, %v14209_v4  ;;  %v2639_v0 = vsel %vm2564_vm3, %v2326_v31, %v14211_v54 }
 0x26d   : > { %11138 = vmatpush3.bf16.msra.mxu0 %v2571_v50  ;;  %11202 = vmatpush3.bf16.msra.mxu1 %v2635_v51  ;;  %v12327_v50 = vld [vmem:[%s19045_s11 + $0x18] sm:$0xff]  }
 0x26e   : > { %11139 = vmatprep.subr.bf16.mxu0 %v2607_v32  ;;  %11203 = vmatprep.subr.bf16.mxu1 %v2671_v33  ;;  %v12328_v51 = vld [vmem:[%s19045_s11 + $0x98] sm:$0xff]   ;;  %v2311_v7 = vmul.bf16 %v12327_v50, %v14065_v27  ;;  %v12329_v32 = vld [vmem:[%s19045_s11 + $0x60] sm:$0xff]  }
 0x26f   : > { %10788 = vmatmul.mubr.msk.bf16.gmra.mrb[36].mxu0 %vm2564_vm3, %v14007_v28  ;;  %10796 = vmatmul.mubr.msk.bf16.gmra.mrb[8].mxu1 %vm2564_vm3, %v14007_v28  ;;  %v14217_v58 = vpop.permute.xlu0 %2522  ;;  %v14219_v59 = vpop.permute.xlu1 %2554  ;;  %v2327_v20 = vmul.bf16 %v12328_v51, %v14065_v27  ;;  %v12330_v33 = vld [vmem:[%s19045_s11 + $0xe0] sm:$0xff]   ;;  %v2320_v50 = vmul.bf16 %v12329_v32, %v14091_v42  ;;  %v12333_v32 = vld [vmem:[%s19045_s11 + $0x68] sm:$0xff]  }
 0x270   : > { %2773 = vmatprep.mubr.bf16.mxu0 %v18727_v3  ;;  %2886 = vmatprep.mubr.bf16.mxu1 %v18727_v3  ;;  %19058 = vst [vmem:[#allocation55_spill] sm:$0xff] %v14217_v58  ;;  %19059 = vst [vmem:[#allocation56_spill] sm:$0xff] %v14219_v59  ;;  %v2611_v8 = vsel %vm2564_vm3, %v2319_v16, %v14217_v58  ;;  %v2675_v31 = vsel %vm2564_vm3, %v2335_v6, %v14219_v59 }
 0x271   : > { %11140 = vmatpush3.bf16.msra.mxu0 %v2575_v45  ;;  %11204 = vmatpush3.bf16.msra.mxu1 %v2639_v0  ;;  %v12331_v45 = vld [vmem:[%s19045_s11 + $0x20] sm:$0xff]   ;;  %v2336_v51 = vmul.bf16 %v12330_v33, %v14091_v42  ;;  %v12334_v33 = vld [vmem:[%s19045_s11 + $0xe8] sm:$0xff]  }
 0x272   : > { %11141 = vmatprep.subr.bf16.mxu0 %v2611_v8  ;;  %11205 = vmatprep.subr.bf16.mxu1 %v2675_v31  ;;  %v12332_v0 = vld [vmem:[%s19045_s11 + $0xa0] sm:$0xff]   ;;  %v2312_v16 = vmul.bf16 %v12331_v45, %v14091_v42  ;;  %v12335_v45 = vld [vmem:[%s19045_s11 + $0x28] sm:$0xff]  }
 0x273   : > { %v14223_v60 = vpop.permute.xlu0 %2506  ;;  %v14225_v61 = vpop.permute.xlu1 %2538  ;;  %v2328_v6 = vmul.bf16 %v12332_v0, %v14091_v42  ;;  %v12336_v0 = vld [vmem:[%s19045_s11 + $0xa8] sm:$0xff]  }
 0x274   : > { %19060 = vst [vmem:[#allocation57_spill] sm:$0xff] %v14223_v60  ;;  %19061 = vst [vmem:[#allocation58_spill] sm:$0xff] %v14225_v61  ;;  %v2579_v39 = vsel %vm2564_vm3, %v2311_v7, %v14223_v60  ;;  %v2643_v43 = vsel %vm2564_vm3, %v2327_v20, %v14225_v61 }
 0x275   : > { %11142 = vmatpush3.bf16.msra.mxu0 %v2579_v39  ;;  %11206 = vmatpush3.bf16.msra.mxu1 %v2643_v43 }
 0x277   : > { %10789 = vmatmul.mubr.msk.bf16.gmra.mrb[40].mxu0 %vm2564_vm3, %v14033_v47  ;;  %10797 = vmatmul.mubr.msk.bf16.gmra.mrb[12].mxu1 %vm2564_vm3, %v14033_v47  ;;  %v14233_v15 = vpop.permute.xlu0 %2524  ;;  %v14235_v17 = vpop.permute.xlu1 %2556 }
 0x278   : > { %2783 = vmatprep.mubr.bf16.mxu0 %v18727_v3  ;;  %2896 = vmatprep.mubr.bf16.mxu1 %v18727_v3  ;;  %19062 = vst [vmem:[#allocation59_spill] sm:$0xff] %v14233_v15  ;;  %19063 = vst [vmem:[#allocation60_spill] sm:$0xff] %v14235_v17  ;;  %v2615_v8 = vsel %vm2564_vm3, %v2320_v50, %v14233_v15  ;;  %v2679_v31 = vsel %vm2564_vm3, %v2336_v51, %v14235_v17 }
 0x279   : > { %11143 = vmatprep.subr.bf16.mxu0 %v2615_v8  ;;  %11207 = vmatprep.subr.bf16.mxu1 %v2679_v31  ;;  %v2321_v50 = vmul.bf16 %v12333_v32, %v14079_v37  ;;  %v2337_v51 = vmul.bf16 %v12334_v33, %v14079_v37  ;;  %v2313_v8 = vmul.bf16 %v12335_v45, %v14079_v37 }
 0x27b   : > { %v14253_v21 = vpop.permute.xlu0 %2508  ;;  %v14255_v5 = vpop.permute.xlu1 %2540 }
 0x27c   : > { %19064 = vst [vmem:[#allocation61_spill] sm:$0xff] %v14253_v21  ;;  %19065 = vst [vmem:[#allocation62_spill] sm:$0xff] %v14255_v5  ;;  %v2583_v39 = vsel %vm2564_vm3, %v2312_v16, %v14253_v21  ;;  %v2647_v43 = vsel %vm2564_vm3, %v2328_v6, %v14255_v5  ;;  %v2329_v16 = vmul.bf16 %v12336_v0, %v14079_v37  ;;  %v12340_v0 = vld [vmem:[%s19045_s11 + $0xb0] sm:$0xff]  }
 0x27d   : > { %11144 = vmatpush3.bf16.msra.mxu0 %v2583_v39  ;;  %11208 = vmatpush3.bf16.msra.mxu1 %v2647_v43  ;;  %v12337_v39 = vld [vmem:[%s19045_s11 + $0x70] sm:$0xff]  }
 0x27e   : > { %v12338_v43 = vld [vmem:[%s19045_s11 + $0xf0] sm:$0xff]  }
 0x27f   : > { %10790 = vmatmul.mubr.msk.bf16.gmra.mrb[44].mxu0 %vm2564_vm3, %v14031_v46  ;;  %10798 = vmatmul.mubr.msk.bf16.gmra.mrb[16].mxu1 %vm2564_vm3, %v14031_v46  ;;  %v14285_v25 = vpop.permute.xlu0 %2526  ;;  %v14287_v26 = vpop.permute.xlu1 %2558 }
 0x280   : > { %2793 = vmatprep.mubr.bf16.mxu0 %v18727_v3  ;;  %2906 = vmatprep.mubr.bf16.mxu1 %v18727_v3  ;;  %19066 = vst [vmem:[#allocation63_spill] sm:$0xff] %v14285_v25  ;;  %19067 = vst [vmem:[#allocation64_spill] sm:$0xff] %v14287_v26  ;;  %v2619_v11 = vsel %vm2564_vm3, %v2321_v50, %v14285_v25  ;;  %v2322_v50 = vmul.bf16 %v12337_v39, %v14109_v57 }
 0x281   : > { %11145 = vmatprep.subr.bf16.mxu0 %v2619_v11 }
 0x283   : > { %v14313_v7 = vpop.permute.xlu0 %2510  ;;  %v14315_v20 = vpop.permute.xlu1 %2542 }
 0x284   : > { %19068 = vst [vmem:[#allocation65_spill] sm:$0xff] %v14313_v7  ;;  %19069 = vst [vmem:[#allocation66_spill] sm:$0xff] %v14315_v20  ;;  %v2587_v32 = vsel %vm2564_vm3, %v2313_v8, %v14313_v7  ;;  %v2651_v33 = vsel %vm2564_vm3, %v2329_v16, %v14315_v20  ;;  %v12341_v8 = vld [vmem:[%s19045_s11 + $0x78] sm:$0xff]  }
 0x285   : > { %11146 = vmatpush3.bf16.msra.mxu0 %v2587_v32  ;;  %v12342_v16 = vld [vmem:[%s19045_s11 + $0xf8] sm:$0xff]  }
 0x286   : > { %v2339_v10 = vmul.bf16 %v12342_v16, %v14107_v9 }
 0x287   : > { %10791 = vmatmul.mubr.msk.bf16.gmra.mrb[48].mxu0 %vm2564_vm3, %v14051_v56  ;;  %10799 = vmatmul.mubr.msk.bf16.gmra.mrb[20].mxu1 %vm2564_vm3, %v14051_v56  ;;  %v14341_v31 = vpop.permute.xlu0 %2528  ;;  %v14343_v6 = vpop.permute.xlu1 %2560 }
 0x288   : > { %2803 = vmatprep.mubr.bf16.mxu0 %v18727_v3  ;;  %2916 = vmatprep.mubr.bf16.mxu1 %v18727_v3  ;;  %19070 = vst [vmem:[#allocation67_spill] sm:$0xff] %v14341_v31  ;;  %19071 = vst [vmem:[#allocation68_spill] sm:$0xff] %v14343_v6  ;;  %v2623_v48 = vsel %vm2564_vm3, %v2322_v50, %v14341_v31 }
 0x289   : > { %11147 = vmatprep.subr.bf16.mxu0 %v2623_v48  ;;  %v10678_v48 = vadd.f32 -1.0, %v13597_v1 }
 0x28b   : > { %v14359_v45 = vpop.permute.xlu0 %2512  ;;  %v14361_v11 = vpop.permute.xlu1 %2544 }
 0x28c   : > { %19072 = vst [vmem:[#allocation69_spill] sm:$0xff] %v14359_v45  ;;  %19073 = vst [vmem:[#allocation70_spill] sm:$0xff] %v14361_v11 }
 0x28f   : > { %10792 = vmatmul.mubr.msk.bf16.gmra.mrb[52].mxu0 %vm2564_vm3, %v14049_v55  ;;  %10800 = vmatmul.mubr.msk.bf16.gmra.mrb[24].mxu1 %vm2564_vm3, %v14049_v55  ;;  %v14385_v2 = vpop.permute.xlu0 %2530  ;;  %v14387_v18 = vpop.permute.xlu1 %2562 }
 0x290   : > { %2813 = vmatprep.mubr.bf16.mxu0 %v18727_v3  ;;  %2926 = vmatprep.mubr.bf16.mxu1 %v18727_v3  ;;  %19074 = vst [vmem:[#allocation71_spill] sm:$0xff] %v14385_v2  ;;  %19075 = vst [vmem:[#allocation72_spill] sm:$0xff] %v14387_v18 }
 0x297   : > { %10793 = vmatmul.mubr.msk.bf16.gmra.mrb[56].mxu0 %vm2564_vm3, %v14059_v19  ;;  %10801 = vmatmul.mubr.msk.bf16.gmra.mrb[28].mxu1 %vm2564_vm3, %v14059_v19 }
 0x298   : > { %2823 = vmatprep.mubr.bf16.mxu0 %v18727_v3  ;;  %2936 = vmatprep.mubr.bf16.mxu1 %v18727_v3  ;;  %v2683_v3 = vsel %vm2564_vm3, %v2337_v51, %v14287_v26  ;;  %v2338_v51 = vmul.bf16 %v12338_v43, %v14109_v57  ;;  %v2323_v43 = vmul.bf16 %v12341_v8, %v14107_v9  ;;  %v2693_v8 = vlaneseq }
 0x299   : > { %11209 = vmatprep.subr.bf16.mxu1 %v2683_v3  ;;  %v12339_v3 = vld [vmem:[%s19045_s11 + $0x30] sm:$0xff]  }
 0x29a   : > { %11210 = vmatpush3.bf16.msra.mxu1 %v2651_v33  ;;  %v2314_v32 = vmul.bf16 %v12339_v3, %v14109_v57  ;;  %v2330_v33 = vmul.bf16 %v12340_v0, %v14109_v57  ;;  %v2687_v39 = vsel %vm2564_vm3, %v2338_v51, %v14343_v6  ;;  %v2627_v50 = vsel %vm2564_vm3, %v2323_v43, %v14385_v2 }
 0x29b   : > { %11211 = vmatprep.subr.bf16.mxu1 %v2687_v39  ;;  %v2691_v51 = vsel %vm2564_vm3, %v2339_v10, %v14387_v18  ;;  %v2694_v16 = vshrl.u32 %v2693_v8, 7  ;;  %v1560_v39 = vmul.f32 1e+09, %v10678_v48 }
 0x29c   : > { %v2591_v3 = vsel %vm2564_vm3, %v2314_v32, %v14359_v45  ;;  %v2655_v0 = vsel %vm2564_vm3, %v2330_v33, %v14361_v11 }
 0x29d   : > { %11148 = vmatpush3.bf16.msra.mxu0 %v2591_v3  ;;  %v14398_v6 = vsub.s32 0, %v2694_v16 }
 0x29e   : > { %11212 = vmatpush3.bf16.msra.mxu1 %v2655_v0  ;;  %11149 = vmatprep.subr.bf16.mxu0 %v2627_v50 }
 0x29f   : > { %10794 = vmatmul.mubr.msk.bf16.gmra.mrb[60].mxu0 %vm2564_vm3, %v14057_v14  ;;  %10802 = vmatmul.mubr.msk.bf16.gmra.mrb[32].mxu1 %vm2564_vm3, %v14057_v14  ;;  %19076 = vst [vmem:[#allocation73_spill] sm:$0xff] %v14398_v6  ;;  %v14401_v32 = vrot.slane %v1560_v39, %v14398_v6 }
 0x2a0   : > { %11213 = vmatprep.subr.bf16.mxu1 %v2691_v51 }
 0x2a1   : > { %19077 = vst [vmem:[#allocation74_spill] sm:$0xff] %v14401_v32 }
 0x33a   : > { %v2755_v33 = vpop.f32.mrb[32].mxu0  ;;  %v2868_v3 = vpop.f32.mrb[4].mxu1 }
 0x33b   : > { %v14404_v0 = vadd.f32 %v2755_v33, %v14401_v32  ;;  %v2757_v43 = vpop.f32.mrb[33].mxu0  ;;  %v2870_v2 = vpop.f32.mrb[5].mxu1  ;;  %v14416_v1 = vadd.f32 %v2868_v3, %v14401_v32 }
 0x33c   : > { %v14407_v10 = vadd.f32 %v2757_v43, %v14401_v32  ;;  %v2759_v50 = vpop.f32.mrb[34].mxu0  ;;  %v2872_v51 = vpop.f32.mrb[6].mxu1  ;;  %v14424_v43 = vadd.f32 %v2870_v2, %v14401_v32 }
 0x33d   : > { %v14410_v8 = vadd.f32 %v2759_v50, %v14401_v32  ;;  %v2761_v48 = vpop.f32.mrb[35].mxu0  ;;  %v2874_v16 = vpop.f32.mrb[7].mxu1  ;;  %v14421_v6 = vadd.f32 %v2872_v51, %v14401_v32 }
 0x33e   : > { %v14413_v39 = vadd.f32 %v2761_v48, %v14401_v32  ;;  %v2947_v33 = vmax.f32 %v14404_v0, %v14407_v10  ;;  %v14431_v3 = vadd.f32 %v2874_v16, %v14401_v32 }
 0x340   : > { %v2948_v50 = vmax.f32 %v2947_v33, %v14416_v1  ;;  %v2952_v18 = vmax.f32 %v14410_v8, %v14413_v39 }
 0x342   : > { %v2765_v11 = vpop.f32.mrb[36].mxu0  ;;  %v2949_v48 = vmax.f32 %v2948_v50, %v14424_v43  ;;  %v2878_v45 = vpop.f32.mrb[8].mxu1  ;;  %v2953_v31 = vmax.f32 %v2952_v18, %v14421_v6 }
 0x343   : > { %v14435_v51 = vadd.f32 %v2765_v11, %v14401_v32  ;;  %v2767_v20 = vpop.f32.mrb[37].mxu0  ;;  %v2880_v2 = vpop.f32.mrb[9].mxu1  ;;  %v14448_v11 = vadd.f32 %v2878_v45, %v14401_v32 }
 0x344   : > { %v14438_v7 = vadd.f32 %v2767_v20, %v14401_v32  ;;  %v2769_v33 = vpop.f32.mrb[38].mxu0  ;;  %2950 = vmax.xlane.f32.xlu0 %v2949_v48  ;;  %v2954_v26 = vmax.f32 %v2953_v31, %v14431_v3  ;;  %v2882_v25 = vpop.f32.mrb[10].mxu1  ;;  %v14456_v31 = vadd.f32 %v2880_v2, %v14401_v32 }
 0x345   : > { %v14442_v50 = vadd.f32 %v2769_v33, %v14401_v32  ;;  %v2771_v16 = vpop.f32.mrb[39].mxu0  ;;  %v2884_v5 = vpop.f32.mrb[11].mxu1  ;;  %v14453_v48 = vadd.f32 %v2882_v25, %v14401_v32 }
 0x346   : > { %v14445_v18 = vadd.f32 %v2771_v16, %v14401_v32  ;;  %2955 = vmax.xlane.f32.xlu1 %v2954_v26  ;;  %v2957_v20 = vmax.f32 %v14435_v51, %v14438_v7  ;;  %v14463_v26 = vadd.f32 %v2884_v5, %v14401_v32 }
 0x348   : > { %v2958_v33 = vmax.f32 %v2957_v20, %v14448_v11  ;;  %v2962_v21 = vmax.f32 %v14442_v50, %v14445_v18 }
 0x34a   : > { %v2775_v16 = vpop.f32.mrb[40].mxu0  ;;  %v2959_v17 = vmax.f32 %v2958_v33, %v14456_v31  ;;  %v2888_v45 = vpop.f32.mrb[12].mxu1  ;;  %v2963_v15 = vmax.f32 %v2962_v21, %v14453_v48 }
 0x34b   : > { %v14467_v25 = vadd.f32 %v2775_v16, %v14401_v32  ;;  %v2777_v61 = vpop.f32.mrb[41].mxu0  ;;  %v2890_v2 = vpop.f32.mrb[13].mxu1  ;;  %v14480_v16 = vadd.f32 %v2888_v45, %v14401_v32 }
 0x34c   : > { %v14470_v60 = vadd.f32 %v2777_v61, %v14401_v32  ;;  %v2779_v20 = vpop.f32.mrb[42].mxu0  ;;  %2960 = vmax.xlane.f32.xlu0 %v2959_v17  ;;  %v2964_v59 = vmax.f32 %v2963_v15, %v14463_v26  ;;  %v2892_v58 = vpop.f32.mrb[14].mxu1  ;;  %v14488_v15 = vadd.f32 %v2890_v2, %v14401_v32 }
 0x34d   : > { %v14474_v33 = vadd.f32 %v2779_v20, %v14401_v32  ;;  %v2781_v5 = vpop.f32.mrb[43].mxu0  ;;  %v2894_v54 = vpop.f32.mrb[15].mxu1  ;;  %19078 = vst [vmem:[#allocation75_spill] sm:$0xff] %v14480_v16  ;;  %v14485_v17 = vadd.f32 %v2892_v58, %v14401_v32 }
 0x34e   : > { %v14477_v21 = vadd.f32 %v2781_v5, %v14401_v32  ;;  %2965 = vmax.xlane.f32.xlu1 %v2964_v59  ;;  %v2967_v61 = vmax.f32 %v14467_v25, %v14470_v60  ;;  %v14495_v59 = vadd.f32 %v2894_v54, %v14401_v32 }
 0x350   : > { %v2968_v20 = vmax.f32 %v2967_v61, %v14480_v16  ;;  %v2972_v4 = vmax.f32 %v14474_v33, %v14477_v21 }
 0x352   : > { %v2785_v5 = vpop.f32.mrb[44].mxu0  ;;  %v2969_v53 = vmax.f32 %v2968_v20, %v14488_v15  ;;  %v2898_v45 = vpop.f32.mrb[16].mxu1  ;;  %v2973_v52 = vmax.f32 %v2972_v4, %v14485_v17 }
 0x353   : > { %v14499_v58 = vadd.f32 %v2785_v5, %v14401_v32  ;;  %v2787_v49 = vpop.f32.mrb[45].mxu0  ;;  %v2900_v2 = vpop.f32.mrb[17].mxu1  ;;  %v14512_v5 = vadd.f32 %v2898_v45, %v14401_v32 }
 0x354   : > { %v14502_v12 = vadd.f32 %v2787_v49, %v14401_v32  ;;  %v2789_v61 = vpop.f32.mrb[46].mxu0  ;;  %2970 = vmax.xlane.f32.xlu0 %v2969_v53  ;;  %v2974_v38 = vmax.f32 %v2973_v52, %v14495_v59  ;;  %v2902_v34 = vpop.f32.mrb[18].mxu1  ;;  %v14520_v52 = vadd.f32 %v2900_v2, %v14401_v32 }
 0x355   : > { %19079 = vst [vmem:[#allocation76_spill] sm:$0xff] %v14499_v58  ;;  %v14506_v20 = vadd.f32 %v2789_v61, %v14401_v32  ;;  %v2791_v54 = vpop.f32.mrb[47].mxu0  ;;  %v2904_v24 = vpop.f32.mrb[19].mxu1  ;;  %19083 = vst [vmem:[#allocation80_spill] sm:$0xff] %v14512_v5  ;;  %v14517_v53 = vadd.f32 %v2902_v34, %v14401_v32 }
 0x356   : > { %19080 = vst [vmem:[#allocation77_spill] sm:$0xff] %v14502_v12  ;;  %v14509_v4 = vadd.f32 %v2791_v54, %v14401_v32  ;;  %2975 = vmax.xlane.f32.xlu1 %v2974_v38  ;;  %v2977_v49 = vmax.f32 %v14499_v58, %v14502_v12  ;;  %19085 = vst [vmem:[#allocation82_spill] sm:$0xff] %v14520_v52  ;;  %v14527_v45 = vadd.f32 %v2904_v24, %v14401_v32 }
 0x357   : > { %19081 = vst [vmem:[#allocation78_spill] sm:$0xff] %v14506_v20  ;;  %19084 = vst [vmem:[#allocation81_spill] sm:$0xff] %v14517_v53 }
 0x358   : > { %19082 = vst [vmem:[#allocation79_spill] sm:$0xff] %v14509_v4  ;;  %v2978_v61 = vmax.f32 %v2977_v49, %v14512_v5  ;;  %v2982_v63 = vmax.f32 %v14506_v20, %v14509_v4  ;;  %19086 = vst [vmem:[#allocation83_spill] sm:$0xff] %v14527_v45 }
 0x35a   : > { %v2979_v54 = vmax.f32 %v2978_v61, %v14520_v52  ;;  %v2983_v38 = vmax.f32 %v2982_v63, %v14517_v53  ;;  %v2795_v13 = vpop.f32.mrb[48].mxu0  ;;  %v2908_v62 = vpop.f32.mrb[20].mxu1 }
 0x35b   : > { %v2797_v57 = vpop.f32.mrb[49].mxu0  ;;  %v2910_v34 = vpop.f32.mrb[21].mxu1  ;;  %v14542_v52 = vadd.f32 %v2795_v13, %v14401_v32 }
 0x35c   : > { %2980 = vmax.xlane.f32.xlu0 %v2979_v54  ;;  %v2984_v2 = vmax.f32 %v2983_v38, %v14527_v45  ;;  %v2799_v37 = vpop.f32.mrb[50].mxu0  ;;  %v2912_v42 = vpop.f32.mrb[22].mxu1  ;;  %v12343_v54 = vld [vmem:[%s19022_s26 + $0xb8] sm:$0xff]   ;;  %v14545_v16 = vadd.f32 %v2797_v57, %v14401_v32 }
 0x35d   : > { %v2801_v49 = vpop.f32.mrb[51].mxu0  ;;  %v2914_v27 = vpop.f32.mrb[23].mxu1  ;;  %v14548_v45 = vadd.f32 %v2799_v37, %v14401_v32 }
 0x35e   : > { %2985 = vmax.xlane.f32.xlu1 %v2984_v2  ;;  %19087 = vst [vmem:[#allocation84_spill] sm:$0xff] %v14545_v16  ;;  %v2987_v4 = vmax.f32 %v14542_v52, %v14545_v16 }
 0x35f   : > { %19088 = vst [vmem:[#allocation85_spill] sm:$0xff] %v14548_v45 }
 0x362   : > { %v2805_v30 = vpop.f32.mrb[52].mxu0  ;;  %v2918_v22 = vpop.f32.mrb[24].mxu1 }
 0x363   : > { %v2807_v61 = vpop.f32.mrb[53].mxu0  ;;  %v2920_v23 = vpop.f32.mrb[25].mxu1  ;;  %v14559_v12 = vadd.f32 %v2805_v30, %v14401_v32 }
 0x364   : > { %v2809_v24 = vpop.f32.mrb[54].mxu0  ;;  %v2922_v40 = vpop.f32.mrb[26].mxu1  ;;  %v14562_v13 = vadd.f32 %v2807_v61, %v14401_v32 }
 0x365   : > { %v2811_v14 = vpop.f32.mrb[55].mxu0  ;;  %v2924_v63 = vpop.f32.mrb[27].mxu1  ;;  %v14580_v61 = vadd.f32 %v2809_v24, %v14401_v32 }
 0x366   : > { %19090 = vst [vmem:[#allocation87_spill] sm:$0xff] %v14562_v13 }
 0x36a   : > { %v2815_v19 = vpop.f32.mrb[56].mxu0  ;;  %v2928_v55 = vpop.f32.mrb[28].mxu1 }
 0x36b   : > { %v2817_v38 = vpop.f32.mrb[57].mxu0  ;;  %v2930_v56 = vpop.f32.mrb[29].mxu1  ;;  %v14565_v57 = vadd.f32 %v2815_v19, %v14401_v32  ;;  %v14583_v19 = vadd.f32 %v2811_v14, %v14401_v32 }
 0x36c   : > { %v2819_v46 = vpop.f32.mrb[58].mxu0  ;;  %v2932_v47 = vpop.f32.mrb[30].mxu1  ;;  %v14568_v37 = vadd.f32 %v2817_v38, %v14401_v32  ;;  %v14586_v38 = vadd.f32 %v2918_v22, %v14401_v32 }
 0x36d   : > { %v2821_v28 = vpop.f32.mrb[59].mxu0  ;;  %v14534_v2 = vpop.f32.mrb[31].mxu1  ;;  %19091 = vst [vmem:[#allocation88_spill] sm:$0xff] %v14565_v57 }
 0x36e   : > { %19092 = vst [vmem:[#allocation89_spill] sm:$0xff] %v14568_v37 }
 0x36f   : > { %2546 = vrot.lane.b32.xlu1 %v12343_v54, %s18841_s13  ;;  %v14551_v54 = vadd.f32 %v2801_v49, %v14401_v32  ;;  %v14571_v49 = vadd.f32 %v2912_v42, %v14401_v32  ;;  %v2997_v42 = vmax.f32 %v14559_v12, %v14562_v13  ;;  %v14607_v13 = vadd.f32 %v2922_v40, %v14401_v32 }
 0x371   : > { %19089 = vst [vmem:[#allocation86_spill] sm:$0xff] %v14551_v54  ;;  %v2992_v30 = vmax.f32 %v14548_v45, %v14551_v54  ;;  %v14596_v54 = vadd.f32 %v2914_v27, %v14401_v32  ;;  %v3002_v27 = vmax.f32 %v14580_v61, %v14583_v19 }
 0x372   : > { %2514 = vrot.lane.b32.xlu0 %v12344_v29, %s18841_s13  ;;  %v2825_v5 = vpop.f32.mrb[60].mxu0  ;;  %v2938_v35 = vpop.f32.mrb[32].mxu1  ;;  %v14554_v29 = vadd.f32 %v2908_v62, %v14401_v32  ;;  %v14574_v62 = vadd.f32 %v2910_v34, %v14401_v32  ;;  %v14591_v34 = vadd.f32 %v2928_v55, %v14401_v32  ;;  %v14610_v55 = vadd.f32 %v2920_v23, %v14401_v32 }
 0x373   : > { %v2827_v53 = vpop.f32.mrb[61].mxu0  ;;  %v2940_v41 = vpop.f32.mrb[33].mxu1  ;;  %v14599_v24 = vadd.f32 %v2825_v5, %v14401_v32  ;;  %v2993_v45 = vmax.f32 %v2992_v30, %v14571_v49  ;;  %v14616_v5 = vadd.f32 %v2819_v46, %v14401_v32  ;;  %v14627_v30 = vadd.f32 %v2938_v35, %v14401_v32 }
 0x374   : > { %v2829_v58 = vpop.f32.mrb[62].mxu0  ;;  %v2942_v20 = vpop.f32.mrb[34].mxu1  ;;  %v2988_v16 = vmax.f32 %v2987_v4, %v14554_v29  ;;  %v3007_v4 = vmax.f32 %v14565_v57, %v14568_v37  ;;  %v14603_v22 = vadd.f32 %v2827_v53, %v14401_v32  ;;  %v2998_v37 = vmax.f32 %v2997_v42, %v14586_v38 }
 0x375   : > { %v2831_v44 = vpop.f32.mrb[63].mxu0  ;;  %v2944_v36 = vpop.f32.mrb[35].mxu1  ;;  %v14622_v53 = vadd.f32 %v2930_v56, %v14401_v32  ;;  %v2994_v23 = vmax.f32 %v2993_v45, %v14596_v54  ;;  %v14632_v46 = vadd.f32 %v2932_v47, %v14401_v32  ;;  %v14636_v57 = vadd.f32 %v2924_v63, %v14401_v32 }
 0x376   : > { %v2989_v14 = vmax.f32 %v2988_v16, %v14574_v62  ;;  %v14619_v16 = vadd.f32 %v2821_v28, %v14401_v32  ;;  %v3008_v40 = vmax.f32 %v3007_v4, %v14591_v34  ;;  %v3017_v42 = vmax.f32 %v14599_v24, %v14603_v22 }
 0x377   : > { %v2999_v28 = vmax.f32 %v2998_v37, %v14610_v55  ;;  %v3003_v56 = vmax.f32 %v3002_v27, %v14607_v13  ;;  %v14640_v4 = vadd.f32 %v2829_v58, %v14401_v32  ;;  %v14644_v45 = vadd.f32 %v2831_v44, %v14401_v32 }
 0x378   : > { %v3009_v35 = vmax.f32 %v3008_v40, %v14622_v53  ;;  %v3012_v47 = vmax.f32 %v14616_v5, %v14619_v16  ;;  %v14649_v37 = vadd.f32 %v2940_v41, %v14401_v32  ;;  %v3018_v63 = vmax.f32 %v3017_v42, %v14627_v30 }
 0x379   : > { %v14654_v58 = vadd.f32 %v2942_v20, %v14401_v32  ;;  %v14658_v27 = vadd.f32 %v14534_v2, %v14401_v32  ;;  %v3022_v40 = vmax.f32 %v14640_v4, %v14644_v45  ;;  %v14666_v42 = vadd.f32 %v2944_v36, %v14401_v32 }
 0x37a   : > { %v3013_v44 = vmax.f32 %v3012_v47, %v14632_v46  ;;  %v3019_v41 = vmax.f32 %v3018_v63, %v14649_v37 }
 0x37b   : > { %v3023_v20 = vmax.f32 %v3022_v40, %v14654_v58 }
 0x37d   : > { %v3024_v2 = vmax.f32 %v3023_v20, %v14666_v42 }
 0x391   : > { %2990 = vmax.xlane.f32.xlu0 %v2989_v14  ;;  %v3004_v14 = vmax.f32 %v3003_v56, %v14636_v57 }
 0x393   : > { %2995 = vmax.xlane.f32.xlu1 %v2994_v23  ;;  %v3014_v23 = vmax.f32 %v3013_v44, %v14658_v27 }
 0x395   : > { %3000 = vmax.xlane.f32.xlu0 %v2999_v28 }
 0x397   : > { %3010 = vmax.xlane.f32.xlu1 %v3009_v35 }
 0x399   : > { %3005 = vmax.xlane.f32.xlu0 %v3004_v14 }
 0x39b   : > { %3020 = vmax.xlane.f32.xlu1 %v3019_v41 }
 0x39d   : > { %3015 = vmax.xlane.f32.xlu0 %v3014_v23 }
 0x3a1   : > { %3025 = vmax.xlane.f32.xlu0 %v3024_v2 }
 0x3d1   : > { %v2951_v28 = vpop.xlane.xlu0 %2950 }
 0x3d2   : > { %v3028_v56 = vsub.f32 %v14407_v10, %v2951_v28  ;;  %v3030_v47 = vsub.f32 %v14424_v43, %v2951_v28  ;;  %v3027_v32 = vsub.f32 %v14404_v0, %v2951_v28  ;;  %v3029_v0 = vsub.f32 %v14416_v1, %v2951_v28 }
 0x3d3   : > { %v2956_v35 = vpop.xlane.xlu1 %2955 }
 0x3d4   : > { %v3032_v63 = vsub.f32 %v14413_v39, %v2956_v35  ;;  %v3034_v14 = vsub.f32 %v14431_v3, %v2956_v35  ;;  %v3093_v44 = vmul.f32 1.442695, %v3028_v56  ;;  %v3097_v36 = vmul.f32 1.442695, %v3030_v47 }
 0x3d5   : > { %v3031_v23 = vsub.f32 %v14410_v8, %v2956_v35  ;;  %v3033_v2 = vsub.f32 %v14421_v6, %v2956_v35  ;;  %v3091_v43 = vmul.f32 1.442695, %v3027_v32 }
 0x3d6   : > { %v3101_v41 = vmul.f32 1.442695, %v3032_v63  ;;  %v3105_v40 = vmul.f32 1.442695, %v3034_v14  ;;  %12437 = vpow2.f32 %v3093_v44 }
 0x3d7   : > { %v3099_v56 = vmul.f32 1.442695, %v3031_v23  ;;  %v3103_v63 = vmul.f32 1.442695, %v3033_v2 }
 0x3d8   : > { %12439 = vpow2.f32 %v3101_v41 }
 0x3d9   : > { %v2961_v20 = vpop.xlane.xlu0 %2960  ;;  %12441 = vpow2.f32 %v3097_v36 }
 0x3da   : > { %12443 = vpow2.f32 %v3105_v40  ;;  %v3036_v39 = vsub.f32 %v14438_v7, %v2961_v20  ;;  %v3038_v8 = vsub.f32 %v14456_v31, %v2961_v20  ;;  %v3035_v6 = vsub.f32 %v14435_v51, %v2961_v20 }
 0x3db   : > { %v2966_v10 = vpop.xlane.xlu1 %2965  ;;  %12445 = vpow2.f32 %v3091_v43 }
 0x3dc   : > { %v3040_v3 = vsub.f32 %v14445_v18, %v2966_v10  ;;  %v3042_v47 = vsub.f32 %v14463_v26, %v2966_v10  ;;  %v3109_v35 = vmul.f32 1.442695, %v3036_v39  ;;  %12447 = vpow2.f32 %v3099_v56 }
 0x3dd   : > { %v3039_v32 = vsub.f32 %v14442_v50, %v2966_v10  ;;  %v3095_v18 = vmul.f32 1.442695, %v3029_v0  ;;  %12449 = vpow2.f32 %v3103_v63  ;;  %v3041_v26 = vsub.f32 %v14453_v48, %v2966_v10 }
 0x3de   : > { %v3117_v14 = vmul.f32 1.442695, %v3040_v3  ;;  %v3121_v44 = vmul.f32 1.442695, %v3042_v47  ;;  %v3113_v28 = vmul.f32 1.442695, %v3038_v8  ;;  %v3037_v48 = vsub.f32 %v14448_v11, %v2961_v20 }
 0x3df   : > { %v3107_v36 = vmul.f32 1.442695, %v3035_v6  ;;  %v3115_v23 = vmul.f32 1.442695, %v3039_v32  ;;  %v3119_v10 = vmul.f32 1.442695, %v3041_v26 }
 0x3e0   : > { %v12438_v1 = vpop.eup %12437  ;;  %12451 = vpow2.f32 %v3117_v14  ;;  %v12345_v3 = vld [vmem:[%s19045_s11 + $0x38] sm:$0xff]   ;;  %v3111_v8 = vmul.f32 1.442695, %v3037_v48 }
 0x3e1   : > { %v14684_v7 = vpop.xlane.xlu0 %2970  ;;  %12453 = vpow2.f32 %v3109_v35  ;;  %v2315_v35 = vmul.bf16 %v12345_v3, %v14107_v9 }
 0x3e2   : > { %v12440_v31 = vpop.eup %12439  ;;  %v3044_v51 = vsub.f32 %v14470_v60, %v14684_v7  ;;  %12455 = vpow2.f32 %v3121_v44  ;;  %v3046_v60 = vsub.f32 %v14488_v15, %v14684_v7  ;;  %v3043_v11 = vsub.f32 %v14467_v25, %v14684_v7 }
 0x3e3   : > { %v2976_v41 = vpop.xlane.xlu1 %2975  ;;  %v12442_v50 = vpop.eup %12441  ;;  %v3220_v43 = vpack.c.bf16 %v12440_v31, %v12438_v1  ;;  %12457 = vpow2.f32 %v3095_v18 }
 0x3e4   : > { %v3048_v40 = vsub.f32 %v14477_v21, %v2976_v41  ;;  %v3050_v2 = vsub.f32 %v14495_v59, %v2976_v41  ;;  %v12444_v39 = vpop.eup %12443  ;;  %12459 = vpow2.f32 %v3113_v28  ;;  %v12346_v59 = vld [vmem:[%s19045_s11 + $0xb8] sm:$0xff]   ;;  %v3125_v20 = vmul.f32 1.442695, %v3044_v51 }
 0x3e5   : > { %3283 = vmatprep.mubr.bf16.mxu0 %v3220_v43  ;;  %v3222_v56 = vpack.c.bf16 %v12444_v39, %v12442_v50  ;;  %12461 = vpow2.f32 %v3107_v36  ;;  %v3047_v0 = vsub.f32 %v14474_v33, %v2976_v41  ;;  %v12446_v15 = vpop.eup %12445  ;;  %v3049_v14 = vsub.f32 %v14485_v17, %v2976_v41  ;;  %v19093_v33 = vld [vmem:[#allocation77_spill] sm:$0xff]  ;;  %v19094_v28 = vld [vmem:[#allocation79_spill] sm:$0xff] }
 0x3e6   : > { %v3133_v21 = vmul.f32 1.442695, %v3048_v40  ;;  %12463 = vpow2.f32 %v3115_v23  ;;  %v3137_v63 = vmul.f32 1.442695, %v3050_v2  ;;  %v12448_v32 = vpop.eup %12447  ;;  %v3129_v44 = vmul.f32 1.442695, %v3046_v60 }
 0x3e7   : > { %3380 = vmatprep.mubr.bf16.mxu1 %v3222_v56  ;;  %12465 = vpow2.f32 %v3119_v10  ;;  %v2331_v25 = vmul.bf16 %v12346_v59, %v14107_v9  ;;  %v12450_v18 = vpop.eup %12449  ;;  %v3123_v26 = vmul.f32 1.442695, %v3043_v11  ;;  %v1563_v41 = vld [vmem:[%s19096_s2] sm:$0xf]  ;;  %v3131_v51 = vmul.f32 1.442695, %v3047_v0 }
 0x3e8   : > { %12467 = vpow2.f32 %v3133_v21  ;;  %v19097_v40 = vld [vmem:[#allocation83_spill] sm:$0xff]  ;;  %v3135_v48 = vmul.f32 1.442695, %v3049_v14  ;;  %v3219_v3 = vpack.c.bf16 %v12448_v32, %v12446_v15  ;;  %v19100_v21 = vld [vmem:[#allocation82_spill] sm:$0xff]  ;;  %v19101_v15 = vld [vmem:[#allocation36_spill] sm:$0xff] }
 0x3e9   : > { %v14702_v47 = vpop.xlane.xlu0 %2980  ;;  %12469 = vpow2.f32 %v3125_v20  ;;  %v19098_v43 = vld [vmem:[#allocation75_spill] sm:$0xff]  ;;  %v19102_v14 = vld [vmem:[#allocation41_spill] sm:$0xff] }
 0x3ea   : > { %v3052_v1 = vsub.f32 %v19093_v33, %v14702_v47  ;;  %v12452_v36 = vpop.eup %12451  ;;  %12471 = vpow2.f32 %v3137_v63  ;;  %v3045_v39 = vsub.f32 %v19098_v43, %v14684_v7  ;;  %v3054_v56 = vsub.f32 %v19100_v21, %v14702_v47  ;;  %v19109_v43 = vld [vmem:[#allocation35_spill] sm:$0xff] }
 0x3eb   : > { %v14706_v6 = vpop.xlane.xlu1 %2985  ;;  %v12454_v2 = vpop.eup %12453  ;;  %12473 = vpow2.f32 %v3111_v8 }
 0x3ec   : > { %v3056_v31 = vsub.f32 %v19094_v28, %v14706_v6  ;;  %v3058_v50 = vsub.f32 %v19097_v40, %v14706_v6  ;;  %v12456_v60 = vpop.eup %12455  ;;  %12475 = vpow2.f32 %v3129_v44  ;;  %v3141_v0 = vmul.f32 1.442695, %v3052_v1  ;;  %v19106_v40 = vld [vmem:[#allocation39_spill] sm:$0xff] }
 0x3ed   : > { %v14714_v17 = vpop.permute.xlu0 %2514  ;;  %v12458_v20 = vpop.eup %12457  ;;  %12477 = vpow2.f32 %v3123_v26  ;;  %v3224_v7 = vpack.c.bf16 %v12452_v36, %v12454_v2  ;;  %v3127_v33 = vmul.f32 1.442695, %v3045_v39 }
 0x3ee   : > { %19095 = vst [vmem:[#allocation77_spill] sm:$0xff] %v14714_v17  ;;  %v2595_v23 = vsel %vm2564_vm3, %v2315_v35, %v14714_v17  ;;  %v3149_v59 = vmul.f32 1.442695, %v3056_v31  ;;  %v12460_v63 = vpop.eup %12459  ;;  %12479 = vpow2.f32 %v3131_v51  ;;  %v3153_v8 = vmul.f32 1.442695, %v3058_v50  ;;  %v19105_v31 = vld [vmem:[#allocation76_spill] sm:$0xff] }
 0x3ef   : > { %v14725_v10 = vpop.permute.xlu1 %2546  ;;  %11150 = vmatpush3.bf16.msra.mxu0 %v2595_v23  ;;  %v19103_v35 = vmul.bf16 %v19101_v15, %v19102_v14  ;;  %v3221_v32 = vpack.c.bf16 %v12450_v18, %v12458_v20  ;;  %v12462_v44 = vpop.eup %12461  ;;  %12481 = vpow2.f32 %v3135_v48  ;;  %v3226_v26 = vpack.c.bf16 %v12456_v60, %v12460_v63  ;;  %v19108_v23 = vld [vmem:[#allocation81_spill] sm:$0xff] }
 0x3f0   : > { %19099 = vst [vmem:[#allocation79_spill] sm:$0xff] %v14725_v10  ;;  %v2659_v11 = vsel %vm2564_vm3, %v2331_v25, %v14725_v10  ;;  %11884 = vmatprep.subr.msk.mxu0 %vm3558_vm4, %v1563_v41  ;;  %v19104_v25 = vld [vmem:[#allocation78_spill] sm:$0xff]  ;;  %v12464_v1 = vpop.eup %12463  ;;  %v3051_v36 = vsub.f32 %v19105_v31, %v14702_v47  ;;  %v3145_v51 = vmul.f32 1.442695, %v3054_v56  ;;  %12483 = vpow2.f32 %v3149_v59 }
 0x3f1   : > { %11214 = vmatpush3.bf16.msra.mxu1 %v2659_v11  ;;  %v3055_v28 = vsub.f32 %v19104_v25, %v14706_v6  ;;  %v19107_v18 = vmul.bf16 %v19106_v40, %v19102_v14  ;;  %v12466_v50 = vpop.eup %12465  ;;  %12485 = vpow2.f32 %v3141_v0  ;;  %v3057_v2 = vsub.f32 %v19108_v23, %v14706_v6 }
 0x3f2   : > { %3284 = vmatmul.mubr.bf16.vlgmr.msra.gmra.mrb[64].mxu0 %v3219_v3  ;;  %4095 = vmatprep.subr.bf16.mxu1 %v19103_v35  ;;  %v12468_v39 = vpop.eup %12467  ;;  %12487 = vpow2.f32 %v3153_v8  ;;  %v19111_v3 = vld [vmem:[#allocation80_spill] sm:$0xff]  ;;  %v3139_v59 = vmul.f32 1.442695, %v3051_v36  ;;  %v3223_v11 = vpack.c.bf16 %v12464_v1, %v12462_v44 }
 0x3f3   : > { %3291 = vmatprep.mubr.bf16.mxu0 %v3224_v7  ;;  %11885 = vmatpush3.msk.msra.mxu0 %vm3558_vm4, %v1563_v41  ;;  %v19110_v41 = vmul.bf16 %v19109_v43, %v19102_v14  ;;  %v12470_v48 = vpop.eup %12469  ;;  %12489 = vpow2.f32 %v3127_v33  ;;  %v3053_v60 = vsub.f32 %v19111_v3, %v14702_v47  ;;  %v3147_v21 = vmul.f32 1.442695, %v3055_v28 }
 0x3f4   : > { %3381 = vmatmul.mubr.bf16.vlgmr.msra.gmra.mrb[36].mxu1 %v3221_v32  ;;  %4208 = vmatprep.subr.bf16.mxu0 %v19107_v18  ;;  %v12472_v56 = vpop.eup %12471  ;;  %12491 = vpow2.f32 %v3145_v51  ;;  %v3151_v0 = vmul.f32 1.442695, %v3057_v2  ;;  %v3228_v6 = vpack.c.bf16 %v12468_v39, %v12470_v48  ;;  %v19112_v48 = vld [vmem:[#allocation84_spill] sm:$0xff] }
 0x3f5   : > { %3388 = vmatprep.mubr.bf16.mxu1 %v3226_v26  ;;  %4096 = vmatpush1.bf16.msra.mxu1 %v19110_v41  ;;  %v12474_v20 = vpop.eup %12473  ;;  %v3143_v35 = vmul.f32 1.442695, %v3053_v60  ;;  %12493 = vpow2.f32 %v3147_v21 }
 0x3f6   : > { %v12476_v7 = vpop.eup %12475  ;;  %v3225_v63 = vpack.c.bf16 %v12466_v50, %v12474_v20  ;;  %12495 = vpow2.f32 %v3139_v59 }
 0x3f7   : > { %v12478_v15 = vpop.eup %12477  ;;  %v3230_v8 = vpack.c.bf16 %v12472_v56, %v12476_v7  ;;  %12497 = vpow2.f32 %v3151_v0  ;;  %v19113_v0 = vld [vmem:[#allocation85_spill] sm:$0xff] }
 0x3f8   : > { %v12480_v32 = vpop.eup %12479  ;;  %12499 = vpow2.f32 %v3143_v35 }
 0x3f9   : > { %v12482_v47 = vpop.eup %12481  ;;  %v3227_v28 = vpack.c.bf16 %v12480_v32, %v12478_v15 }
 0x3fa   : > { %3292 = vmatmul.mubr.bf16.gmra.mrb[68].mxu0 %v3223_v11  ;;  %v12484_v33 = vpop.eup %12483 }
 0x3fb   : > { %3299 = vmatprep.mubr.bf16.mxu0 %v3228_v6  ;;  %v12486_v25 = vpop.eup %12485 }
 0x3fc   : > { %3389 = vmatmul.mubr.bf16.gmra.mrb[40].mxu1 %v3225_v63  ;;  %v12488_v44 = vpop.eup %12487  ;;  %v3232_v1 = vpack.c.bf16 %v12484_v33, %v12486_v25  ;;  %v19114_v63 = vld [vmem:[#allocation86_spill] sm:$0xff]  ;;  %v19115_v25 = vld [vmem:[#allocation87_spill] sm:$0xff] }
 0x3fd   : > { %3396 = vmatprep.mubr.bf16.mxu1 %v3230_v8  ;;  %v12490_v26 = vpop.eup %12489 }
 0x3fe   : > { %v12492_v31 = vpop.eup %12491  ;;  %v3229_v36 = vpack.c.bf16 %v12482_v47, %v12490_v26 }
 0x3ff   : > { %v3234_v51 = vpack.c.bf16 %v12488_v44, %v12492_v31  ;;  %v12494_v40 = vpop.eup %12493 }
 0x400   : > { %v12496_v18 = vpop.eup %12495 }
 0x401   : > { %v12498_v50 = vpop.eup %12497  ;;  %v3231_v23 = vpack.c.bf16 %v12494_v40, %v12496_v18 }
 0x402   : > { %3300 = vmatmul.mubr.bf16.gmra.mrb[72].mxu0 %v3227_v28  ;;  %v12500_v2 = vpop.eup %12499 }
 0x403   : > { %3307 = vmatprep.mubr.bf16.mxu0 %v3232_v1  ;;  %v3233_v43 = vpack.c.bf16 %v12498_v50, %v12500_v2  ;;  %v19116_v2 = vld [vmem:[#allocation88_spill] sm:$0xff] }
 0x404   : > { %3397 = vmatmul.mubr.bf16.gmra.mrb[44].mxu1 %v3229_v36 }
 0x405   : > { %3404 = vmatprep.mubr.bf16.mxu1 %v3234_v51 }
 0x40a   : > { %3308 = vmatmul.mubr.bf16.gmra.mrb[76].mxu0 %v3231_v23 }
 0x40c   : > { %3405 = vmatmul.mubr.bf16.gmra.mrb[48].mxu1 %v3233_v43 }
 0x41e   : > { %v2991_v41 = vpop.xlane.xlu0 %2990 }
 0x41f   : > { %v3059_v39 = vsub.f32 %v14542_v52, %v2991_v41  ;;  %v3060_v3 = vsub.f32 %v19112_v48, %v2991_v41  ;;  %v3061_v60 = vsub.f32 %v14554_v29, %v2991_v41  ;;  %v3062_v21 = vsub.f32 %v14574_v62, %v2991_v41 }
 0x420   : > { %v2996_v56 = vpop.xlane.xlu1 %2995 }
 0x421   : > { %v3155_v59 = vmul.f32 1.442695, %v3059_v39  ;;  %v3157_v11 = vmul.f32 1.442695, %v3060_v3  ;;  %v3159_v20 = vmul.f32 1.442695, %v3061_v60  ;;  %v3063_v6 = vsub.f32 %v19113_v0, %v2996_v56 }
 0x422   : > { %v3161_v7 = vmul.f32 1.442695, %v3062_v21  ;;  %v3064_v15 = vsub.f32 %v19114_v63, %v2996_v56  ;;  %v3065_v35 = vsub.f32 %v14571_v49, %v2996_v56  ;;  %v3066_v8 = vsub.f32 %v14596_v54, %v2996_v56  ;;  %v3001_v52 = vpop.xlane.xlu0 %3000 }
 0x423   : > { %12501 = vpow2.f32 %v3155_v59  ;;  %v3163_v32 = vmul.f32 1.442695, %v3063_v6  ;;  %v3067_v33 = vsub.f32 %v14559_v12, %v3001_v52  ;;  %v3068_v44 = vsub.f32 %v19115_v25, %v3001_v52 }
 0x424   : > { %12503 = vpow2.f32 %v3157_v11  ;;  %v3165_v29 = vmul.f32 1.442695, %v3064_v15  ;;  %v3167_v62 = vmul.f32 1.442695, %v3065_v35  ;;  %v3169_v47 = vmul.f32 1.442695, %v3066_v8  ;;  %v3011_v1 = vpop.xlane.xlu1 %3010 }
 0x425   : > { %12505 = vpow2.f32 %v3159_v20  ;;  %v3069_v49 = vsub.f32 %v14586_v38, %v3001_v52  ;;  %v3070_v54 = vsub.f32 %v14610_v55, %v3001_v52  ;;  %v3171_v26 = vmul.f32 1.442695, %v3067_v33  ;;  %v19117_v55 = vld [vmem:[#allocation89_spill] sm:$0xff] }
 0x426   : > { %12507 = vpow2.f32 %v3161_v7  ;;  %v3006_v28 = vpop.xlane.xlu0 %3005  ;;  %v3173_v36 = vmul.f32 1.442695, %v3068_v44  ;;  %v3075_v43 = vsub.f32 %v19116_v2, %v3011_v1  ;;  %v3076_v39 = vsub.f32 %v19117_v55, %v3011_v1 }
 0x427   : > { %12509 = vpow2.f32 %v3163_v32  ;;  %v3071_v31 = vsub.f32 %v14580_v61, %v3006_v28  ;;  %v3072_v51 = vsub.f32 %v14583_v19, %v3006_v28  ;;  %v3175_v18 = vmul.f32 1.442695, %v3069_v49 }
 0x428   : > { %12511 = vpow2.f32 %v3165_v29  ;;  %v3073_v12 = vsub.f32 %v14607_v13, %v3006_v28  ;;  %v3177_v23 = vmul.f32 1.442695, %v3070_v54  ;;  %v3074_v38 = vsub.f32 %v14636_v57, %v3006_v28 }
 0x429   : > { %12513 = vpow2.f32 %v3167_v62  ;;  %v3179_v48 = vmul.f32 1.442695, %v3071_v31  ;;  %v3077_v19 = vsub.f32 %v14591_v34, %v3011_v1  ;;  %v3181_v60 = vmul.f32 1.442695, %v3072_v51  ;;  %v14771_v34 = vpop.xlane.xlu1 %3020 }
 0x42a   : > { %12515 = vpow2.f32 %v3169_v47  ;;  %v3016_v3 = vpop.xlane.xlu0 %3015  ;;  %v3183_v13 = vmul.f32 1.442695, %v3073_v12  ;;  %v3078_v59 = vsub.f32 %v14622_v53, %v3011_v1  ;;  %v3187_v11 = vmul.f32 1.442695, %v3075_v43 }
 0x42b   : > { %12517 = vpow2.f32 %v3171_v26  ;;  %v3185_v57 = vmul.f32 1.442695, %v3074_v38  ;;  %v3189_v0 = vmul.f32 1.442695, %v3076_v39  ;;  %v3079_v6 = vsub.f32 %v14616_v5, %v3016_v3 }
 0x42c   : > { %12519 = vpow2.f32 %v3173_v36  ;;  %v3191_v15 = vmul.f32 1.442695, %v3077_v19  ;;  %v3080_v35 = vsub.f32 %v14619_v16, %v3016_v3  ;;  %v3081_v52 = vsub.f32 %v14632_v46, %v3016_v3 }
 0x42d   : > { %v12502_v40 = vpop.eup %12501  ;;  %12521 = vpow2.f32 %v3175_v18  ;;  %v3193_v62 = vmul.f32 1.442695, %v3078_v59  ;;  %v3082_v5 = vsub.f32 %v14658_v27, %v3016_v3  ;;  %v3084_v47 = vsub.f32 %v14603_v22, %v14771_v34 }
 0x42e   : > { %v12504_v50 = vpop.eup %12503  ;;  %12523 = vpow2.f32 %v3177_v23  ;;  %v3026_v53 = vpop.xlane.xlu0 %3025  ;;  %v3195_v33 = vmul.f32 1.442695, %v3079_v6  ;;  %v3197_v16 = vmul.f32 1.442695, %v3080_v35  ;;  %v3086_v44 = vsub.f32 %v14649_v37, %v14771_v34 }
 0x42f   : > { %v12506_v41 = vpop.eup %12505  ;;  %12525 = vpow2.f32 %v3179_v48  ;;  %v3088_v25 = vsub.f32 %v14644_v45, %v3026_v53  ;;  %v3199_v28 = vmul.f32 1.442695, %v3081_v52  ;;  %v3201_v27 = vmul.f32 1.442695, %v3082_v5 }
 0x430   : > { %v12508_v61 = vpop.eup %12507  ;;  %12527 = vpow2.f32 %v3181_v60  ;;  %v3090_v54 = vsub.f32 %v14666_v42, %v3026_v53  ;;  %v3205_v22 = vmul.f32 1.442695, %v3084_v47  ;;  %v3087_v1 = vsub.f32 %v14640_v4, %v3026_v53 }
 0x431   : > { %v12510_v21 = vpop.eup %12509  ;;  %12529 = vpow2.f32 %v3183_v13  ;;  %v3083_v45 = vsub.f32 %v14599_v24, %v14771_v34  ;;  %v3213_v36 = vmul.f32 1.442695, %v3088_v25  ;;  %v3089_v37 = vsub.f32 %v14654_v58, %v3026_v53 }
 0x432   : > { %v12512_v56 = vpop.eup %12511  ;;  %v3235_v8 = vpack.c.bf16 %v12510_v21, %v12502_v40  ;;  %12531 = vpow2.f32 %v3185_v57  ;;  %v3209_v40 = vmul.f32 1.442695, %v3086_v44  ;;  %v3217_v12 = vmul.f32 1.442695, %v3090_v54 }
 0x433   : > { %v12514_v20 = vpop.eup %12513  ;;  %v3236_v7 = vpack.c.bf16 %v12512_v56, %v12504_v50  ;;  %12533 = vpow2.f32 %v3187_v11  ;;  %v3085_v50 = vsub.f32 %v14627_v30, %v14771_v34  ;;  %v3211_v4 = vmul.f32 1.442695, %v3087_v1 }
 0x434   : > { %v12516_v63 = vpop.eup %12515  ;;  %v3237_v29 = vpack.c.bf16 %v12514_v20, %v12506_v41  ;;  %12535 = vpow2.f32 %v3189_v0  ;;  %v3203_v43 = vmul.f32 1.442695, %v3083_v45  ;;  %v3215_v41 = vmul.f32 1.442695, %v3089_v37 }
 0x435   : > { %3315 = vmatprep.mubr.bf16.mxu0 %v3236_v7  ;;  %v3238_v32 = vpack.c.bf16 %v12516_v63, %v12508_v61  ;;  %v12518_v46 = vpop.eup %12517  ;;  %12537 = vpow2.f32 %v3191_v15  ;;  %v3207_v3 = vmul.f32 1.442695, %v3085_v50 }
 0x436   : > { %3316 = vmatmul.mubr.bf16.gmra.mrb[80].mxu0 %v3235_v8  ;;  %v12520_v49 = vpop.eup %12519  ;;  %12539 = vpow2.f32 %v3193_v62 }
 0x437   : > { %3412 = vmatprep.mubr.bf16.mxu1 %v3238_v32  ;;  %v12522_v26 = vpop.eup %12521  ;;  %12541 = vpow2.f32 %v3195_v33  ;;  %v19118_v32 = vmov 0  }
 0x438   : > { %3413 = vmatmul.mubr.bf16.gmra.mrb[52].mxu1 %v3237_v29  ;;  %v12524_v31 = vpop.eup %12523  ;;  %12543 = vpow2.f32 %v3197_v16 }
 0x439   : > { %v12526_v51 = vpop.eup %12525  ;;  %12545 = vpow2.f32 %v3199_v28 }
 0x43a   : > { %v12528_v18 = vpop.eup %12527  ;;  %12547 = vpow2.f32 %v3201_v27  ;;  %v3239_v24 = vpack.c.bf16 %v12526_v51, %v12518_v46 }
 0x43b   : > { %v12530_v42 = vpop.eup %12529  ;;  %12549 = vpow2.f32 %v3205_v22  ;;  %v3240_v23 = vpack.c.bf16 %v12528_v18, %v12520_v49 }
 0x43c   : > { %v12532_v2 = vpop.eup %12531  ;;  %12551 = vpow2.f32 %v3213_v36  ;;  %v3241_v39 = vpack.c.bf16 %v12530_v42, %v12522_v26 }
 0x43d   : > { %v12534_v38 = vpop.eup %12533  ;;  %12553 = vpow2.f32 %v3209_v40  ;;  %3323 = vmatprep.mubr.bf16.mxu0 %v3240_v23  ;;  %v3242_v55 = vpack.c.bf16 %v12532_v2, %v12524_v31 }
 0x43e   : > { %v12536_v58 = vpop.eup %12535  ;;  %12555 = vpow2.f32 %v3217_v12  ;;  %3324 = vmatmul.mubr.bf16.gmra.mrb[84].mxu0 %v3239_v24 }
 0x43f   : > { %v12538_v48 = vpop.eup %12537  ;;  %12557 = vpow2.f32 %v3211_v4  ;;  %3420 = vmatprep.mubr.bf16.mxu1 %v3242_v55 }
 0x440   : > { %v12540_v30 = vpop.eup %12539  ;;  %12559 = vpow2.f32 %v3203_v43  ;;  %3421 = vmatmul.mubr.bf16.gmra.mrb[56].mxu1 %v3241_v39 }
 0x441   : > { %v12542_v61 = vpop.eup %12541  ;;  %12561 = vpow2.f32 %v3215_v41 }
 0x442   : > { %v12544_v19 = vpop.eup %12543  ;;  %12563 = vpow2.f32 %v3207_v3  ;;  %v3243_v56 = vpack.c.bf16 %v12542_v61, %v12534_v38 }
 0x443   : > { %v12546_v60 = vpop.eup %12545  ;;  %v3244_v21 = vpack.c.bf16 %v12544_v19, %v12536_v58 }
 0x444   : > { %v12548_v13 = vpop.eup %12547  ;;  %v3245_v20 = vpack.c.bf16 %v12546_v60, %v12538_v48 }
 0x445   : > { %v12550_v59 = vpop.eup %12549  ;;  %3331 = vmatprep.mubr.bf16.mxu0 %v3244_v21  ;;  %v3246_v11 = vpack.c.bf16 %v12548_v13, %v12540_v30 }
 0x446   : > { %v12552_v57 = vpop.eup %12551  ;;  %3332 = vmatmul.mubr.bf16.gmra.mrb[88].mxu0 %v3243_v56 }
 0x447   : > { %v12554_v0 = vpop.eup %12553  ;;  %3428 = vmatprep.mubr.bf16.mxu1 %v3246_v11  ;;  %v3248_v6 = vpack.c.bf16 %v12552_v57, %v12550_v59 }
 0x448   : > { %v12556_v7 = vpop.eup %12555  ;;  %3429 = vmatmul.mubr.bf16.gmra.mrb[60].mxu1 %v3245_v20 }
 0x449   : > { %v12558_v63 = vpop.eup %12557  ;;  %3339 = vmatprep.mubr.bf16.mxu0 %v3248_v6  ;;  %v3250_v15 = vpack.c.bf16 %v12556_v7, %v12554_v0 }
 0x44a   : > { %v12560_v34 = vpop.eup %12559 }
 0x44b   : > { %v12562_v35 = vpop.eup %12561  ;;  %3436 = vmatprep.mubr.bf16.mxu1 %v3250_v15  ;;  %v3247_v8 = vpack.c.bf16 %v12558_v63, %v12560_v34 }
 0x44c   : > { %v12564_v52 = vpop.eup %12563 }
 0x44d   : > { %v3249_v53 = vpack.c.bf16 %v12562_v35, %v12564_v52 }
 0x44e   : > { %3340 = vmatmul.mubr.bf16.gmra.mrb[92].mxu0 %v3247_v8 }
 0x450   : > { %3437 = vmatmul.mubr.bf16.gmra.mrb[64].mxu1 %v3249_v53 }
 0x451   : > { %4127 = vmatprep.mubr.bf16.mxu1 %v19118_v32 }
 0x4c5   : > { %v11151_v29 = vpop.f32.mrb[64].mxu0 }
 0x4c6   : > { %v11152_v62 = vpop.f32.mrb[65].mxu0 }
 0x4c7   : > { %v11153_v5 = vadd.f32 %v11152_v62, %v11151_v29  ;;  %v11154_v47 = vpop.f32.mrb[66].mxu0  ;;  %v11215_v33 = vpop.f32.mrb[36].mxu1 }
 0x4c8   : > { %v11155_v16 = vpop.f32.mrb[67].mxu0  ;;  %v11216_v25 = vpop.f32.mrb[37].mxu1 }
 0x4c9   : > { %v11156_v46 = vadd.f32 %v11155_v16, %v11154_v47  ;;  %v11217_v44 = vadd.f32 %v11216_v25, %v11215_v33  ;;  %v11218_v28 = vpop.f32.mrb[38].mxu1 }
 0x4ca   : > { %v11219_v49 = vpop.f32.mrb[39].mxu1 }
 0x4cb   : > { %v14789_v27 = vadd.f32 %v11217_v44, %v11153_v5  ;;  %v11220_v54 = vadd.f32 %v11219_v49, %v11218_v28 }
 0x4cd   : > { %19119 = vst [vmem:[#allocation83_spill] sm:$0xff] %v14789_v27  ;;  %v3445_v26 = vadd.f32 1e-09, %v14789_v27  ;;  %v14792_v22 = vadd.f32 %v11220_v54, %v11156_v46  ;;  %v11157_v1 = vpop.f32.mrb[68].mxu0 }
 0x4ce   : > { %v11158_v31 = vpop.f32.mrb[69].mxu0 }
 0x4cf   : > { %19120 = vst [vmem:[#allocation75_spill] sm:$0xff] %v14792_v22  ;;  %12565 = vrcp.f32 %v3445_v26  ;;  %v3446_v45 = vadd.f32 1e-09, %v14792_v22  ;;  %v11159_v36 = vadd.f32 %v11158_v31, %v11157_v1  ;;  %v11160_v51 = vpop.f32.mrb[70].mxu0  ;;  %v11221_v40 = vpop.f32.mrb[40].mxu1 }
 0x4d0   : > { %v11161_v37 = vpop.f32.mrb[71].mxu0  ;;  %v11222_v18 = vpop.f32.mrb[41].mxu1 }
 0x4d1   : > { %12567 = vrcp.f32 %v3446_v45  ;;  %v11162_v12 = vadd.f32 %v11161_v37, %v11160_v51  ;;  %v11223_v42 = vadd.f32 %v11222_v18, %v11221_v40  ;;  %v11224_v50 = vpop.f32.mrb[42].mxu1 }
 0x4d2   : > { %v11225_v4 = vpop.f32.mrb[43].mxu1 }
 0x4d3   : > { %v14795_v23 = vadd.f32 %v11223_v42, %v11159_v36  ;;  %v11226_v2 = vadd.f32 %v11225_v4, %v11224_v50 }
 0x4d5   : > { %19121 = vst [vmem:[#allocation82_spill] sm:$0xff] %v14795_v23  ;;  %v3447_v43 = vadd.f32 1e-09, %v14795_v23  ;;  %v14798_v24 = vadd.f32 %v11226_v2, %v11162_v12  ;;  %v11163_v38 = vpop.f32.mrb[72].mxu0 }
 0x4d6   : > { %v11164_v41 = vpop.f32.mrb[73].mxu0 }
 0x4d7   : > { %19122 = vst [vmem:[#allocation36_spill] sm:$0xff] %v14798_v24  ;;  %12569 = vrcp.f32 %v3447_v43  ;;  %v3448_v55 = vadd.f32 1e-09, %v14798_v24  ;;  %v11165_v58 = vadd.f32 %v11164_v41, %v11163_v38  ;;  %v11166_v39 = vpop.f32.mrb[74].mxu0  ;;  %v11227_v48 = vpop.f32.mrb[44].mxu1 }
 0x4d8   : > { %v11167_v3 = vpop.f32.mrb[75].mxu0  ;;  %v11228_v30 = vpop.f32.mrb[45].mxu1 }
 0x4d9   : > { %v12566_v61 = vpop.eup %12565  ;;  %v11168_v19 = vadd.f32 %v11167_v3, %v11166_v39  ;;  %v11229_v60 = vadd.f32 %v11228_v30, %v11227_v48  ;;  %v11230_v21 = vpop.f32.mrb[46].mxu1  ;;  %12571 = vrcp.f32 %v3448_v55 }
 0x4da   : > { %v11231_v13 = vpop.f32.mrb[47].mxu1  ;;  %3493 = vrot.lane.b32.xlu1 %v12566_v61, %s18839_s28 }
 0x4db   : > { %v12568_v56 = vpop.eup %12567  ;;  %v14802_v59 = vadd.f32 %v11229_v60, %v11165_v58  ;;  %v11232_v11 = vadd.f32 %v11231_v13, %v11230_v21 }
 0x4dc   : > { %3495 = vrot.lane.b32.xlu0 %v12568_v56, %s18839_s28 }
 0x4dd   : > { %19123 = vst [vmem:[#allocation41_spill] sm:$0xff] %v14802_v59  ;;  %v3449_v57 = vadd.f32 1e-09, %v14802_v59  ;;  %v14806_v20 = vadd.f32 %v11232_v11, %v11168_v19  ;;  %v11169_v0 = vpop.f32.mrb[76].mxu0 }
 0x4de   : > { %v11170_v6 = vpop.f32.mrb[77].mxu0 }
 0x4df   : > { %19124 = vst [vmem:[#allocation78_spill] sm:$0xff] %v14806_v20  ;;  %12573 = vrcp.f32 %v3449_v57  ;;  %v3450_v7 = vadd.f32 1e-09, %v14806_v20  ;;  %v11171_v63 = vadd.f32 %v11170_v6, %v11169_v0  ;;  %v11172_v15 = vpop.f32.mrb[78].mxu0  ;;  %v11233_v34 = vpop.f32.mrb[48].mxu1 }
 0x4e0   : > { %v11173_v35 = vpop.f32.mrb[79].mxu0  ;;  %v11234_v8 = vpop.f32.mrb[49].mxu1 }
 0x4e1   : > { %v12570_v52 = vpop.eup %12569  ;;  %12575 = vrcp.f32 %v3450_v7  ;;  %v11174_v53 = vadd.f32 %v11173_v35, %v11172_v15  ;;  %v11235_v29 = vadd.f32 %v11234_v8, %v11233_v34  ;;  %v11236_v62 = vpop.f32.mrb[50].mxu1 }
 0x4e2   : > { %v11237_v5 = vpop.f32.mrb[51].mxu1  ;;  %3497 = vrot.lane.b32.xlu1 %v12570_v52, %s18839_s28 }
 0x4e3   : > { %v14810_v47 = vadd.f32 %v11235_v29, %v11171_v63  ;;  %v11238_v33 = vadd.f32 %v11237_v5, %v11236_v62  ;;  %v12572_v16 = vpop.eup %12571 }
 0x4e5   : > { %19125 = vst [vmem:[#allocation76_spill] sm:$0xff] %v14810_v47  ;;  %v3451_v25 = vadd.f32 1e-09, %v14810_v47  ;;  %v14813_v46 = vadd.f32 %v11238_v33, %v11174_v53 }
 0x4e6   : > { %3499 = vrot.lane.b32.xlu1 %v12572_v16, %s18839_s28 }
 0x4e7   : > { %19126 = vst [vmem:[#allocation39_spill] sm:$0xff] %v14813_v46  ;;  %12577 = vrcp.f32 %v3451_v25  ;;  %v3452_v44 = vadd.f32 1e-09, %v14813_v46 }
 0x4e9   : > { %v12574_v28 = vpop.eup %12573  ;;  %12579 = vrcp.f32 %v3452_v44 }
 0x4ea   : > { %3501 = vrot.lane.b32.xlu0 %v12574_v28, %s18839_s28 }
 0x4eb   : > { %v12576_v49 = vpop.eup %12575 }
 0x4ec   : > { %3503 = vrot.lane.b32.xlu1 %v12576_v49, %s18839_s28 }
 0x4f1   : > { %v12578_v54 = vpop.eup %12577 }
 0x4f2   : > { %3505 = vrot.lane.b32.xlu0 %v12578_v54, %s18839_s28 }
 0x4f3   : > { %v12580_v26 = vpop.eup %12579 }
 0x4f4   : > { %3507 = vrot.lane.b32.xlu1 %v12580_v26, %s18839_s28 }
 0x509   : > { %v11175_v1 = vpop.f32.mrb[80].mxu0 }
 0x50a   : > { %v11176_v31 = vpop.f32.mrb[81].mxu0 }
 0x50b   : > { %v11239_v45 = vpop.f32.mrb[52].mxu1  ;;  %v11177_v36 = vadd.f32 %v11176_v31, %v11175_v1  ;;  %v11178_v51 = vpop.f32.mrb[82].mxu0 }
 0x50c   : > { %v11240_v40 = vpop.f32.mrb[53].mxu1  ;;  %v11179_v37 = vpop.f32.mrb[83].mxu0 }
 0x50d   : > { %v11241_v18 = vadd.f32 %v11240_v40, %v11239_v45  ;;  %v11242_v12 = vpop.f32.mrb[54].mxu1  ;;  %v11180_v42 = vadd.f32 %v11179_v37, %v11178_v51 }
 0x50e   : > { %v11243_v50 = vpop.f32.mrb[55].mxu1 }
 0x50f   : > { %v14821_v4 = vadd.f32 %v11241_v18, %v11177_v36  ;;  %v11244_v2 = vadd.f32 %v11243_v50, %v11242_v12 }
 0x511   : > { %19127 = vst [vmem:[#allocation81_spill] sm:$0xff] %v14821_v4  ;;  %v3453_v43 = vadd.f32 1e-09, %v14821_v4  ;;  %v14824_v38 = vadd.f32 %v11244_v2, %v11180_v42  ;;  %v11181_v55 = vpop.f32.mrb[84].mxu0 }
 0x512   : > { %v11182_v58 = vpop.f32.mrb[85].mxu0 }
 0x513   : > { %19128 = vst [vmem:[#allocation35_spill] sm:$0xff] %v14824_v38  ;;  %12581 = vrcp.f32 %v3453_v43  ;;  %v3454_v41 = vadd.f32 1e-09, %v14824_v38  ;;  %v11245_v39 = vpop.f32.mrb[56].mxu1  ;;  %v11183_v48 = vadd.f32 %v11182_v58, %v11181_v55  ;;  %v11184_v3 = vpop.f32.mrb[86].mxu0 }
 0x514   : > { %v11246_v30 = vpop.f32.mrb[57].mxu1  ;;  %v11185_v61 = vpop.f32.mrb[87].mxu0 }
 0x515   : > { %12583 = vrcp.f32 %v3454_v41  ;;  %v11247_v19 = vadd.f32 %v11246_v30, %v11245_v39  ;;  %v11248_v60 = vpop.f32.mrb[58].mxu1  ;;  %v11186_v21 = vadd.f32 %v11185_v61, %v11184_v3 }
 0x516   : > { %v11249_v13 = vpop.f32.mrb[59].mxu1 }
 0x517   : > { %v14827_v56 = vadd.f32 %v11247_v19, %v11183_v48  ;;  %v11250_v11 = vadd.f32 %v11249_v13, %v11248_v60  ;;  %v19135_v19 = vld [vmem:[#allocation24_spill] sm:$0xff]  ;;  %v19136_v60 = vld [vmem:[#allocation23_spill] sm:$0xff]  ;;  %v19138_v13 = vld [vmem:[#allocation25_spill] sm:$0xff] }
 0x519   : > { %19129 = vst [vmem:[#allocation80_spill] sm:$0xff] %v14827_v56  ;;  %v3455_v0 = vadd.f32 1e-09, %v14827_v56  ;;  %v14830_v6 = vadd.f32 %v11250_v11, %v11186_v21  ;;  %v11187_v7 = vpop.f32.mrb[88].mxu0  ;;  %v19137_v21 = vld [vmem:[#allocation26_spill] sm:$0xff]  ;;  %v19139_v11 = vld [vmem:[#allocation28_spill] sm:$0xff] }
 0x51a   : > { %v11188_v63 = vpop.f32.mrb[89].mxu0 }
 0x51b   : > { %19130 = vst [vmem:[#allocation84_spill] sm:$0xff] %v14830_v6  ;;  %12585 = vrcp.f32 %v3455_v0  ;;  %v3456_v34 = vadd.f32 1e-09, %v14830_v6  ;;  %v11251_v35 = vpop.f32.mrb[60].mxu1  ;;  %v11189_v8 = vadd.f32 %v11188_v63, %v11187_v7  ;;  %v11190_v52 = vpop.f32.mrb[90].mxu0  ;;  %v19141_v0 = vld [vmem:[#allocation30_spill] sm:$0xff] }
 0x51c   : > { %v11252_v53 = vpop.f32.mrb[61].mxu1  ;;  %v11191_v29 = vpop.f32.mrb[91].mxu0  ;;  %v19142_v7 = vld [vmem:[#allocation29_spill] sm:$0xff] }
 0x51d   : > { %v12582_v57 = vpop.eup %12581  ;;  %12587 = vrcp.f32 %v3456_v34  ;;  %v11253_v62 = vadd.f32 %v11252_v53, %v11251_v35  ;;  %v11254_v5 = vpop.f32.mrb[62].mxu1  ;;  %v11192_v33 = vadd.f32 %v11191_v29, %v11190_v52  ;;  %v13174_v35 = vld [vmem:[%s19045_s11 + $0xc0] sm:$0xff]  }
 0x51e   : > { %3509 = vrot.lane.b32.xlu0 %v12582_v57, %s18839_s28  ;;  %v11255_v16 = vpop.f32.mrb[63].mxu1  ;;  %v19140_v57 = vld [vmem:[#allocation27_spill] sm:$0xff]  ;;  %v13175_v53 = vld [vmem:[%s19045_s11] sm:$0xff]  }
 0x51f   : > { %v12584_v15 = vpop.eup %12583  ;;  %v14835_v25 = vadd.f32 %v11253_v62, %v11189_v8  ;;  %v11256_v44 = vadd.f32 %v11255_v16, %v11254_v5  ;;  %v19143_v8 = vld [vmem:[#allocation38_spill] sm:$0xff]  ;;  %v13176_v29 = vld [vmem:[%s19045_s11 + $0x80] sm:$0xff]  }
 0x520   : > { %3511 = vrot.lane.b32.xlu1 %v12584_v15, %s18839_s28  ;;  %v13173_v15 = vld [vmem:[%s19045_s11 + $0x40] sm:$0xff]   ;;  %v19144_v52 = vmul.bf16 %v19143_v8, %v19102_v14  ;;  %v13177_v14 = vld [vmem:[%s19045_s11 + $0x48] sm:$0xff]  }
 0x521   : > { %19131 = vst [vmem:[#allocation85_spill] sm:$0xff] %v14835_v25  ;;  %v3457_v28 = vadd.f32 1e-09, %v14835_v25  ;;  %v14838_v49 = vadd.f32 %v11256_v44, %v11192_v33  ;;  %v11193_v54 = vpop.f32.mrb[92].mxu0  ;;  %v13178_v5 = vld [vmem:[%s19045_s11 + $0xc8] sm:$0xff]  }
 0x522   : > { %v11194_v26 = vpop.f32.mrb[93].mxu0  ;;  %v13179_v16 = vld [vmem:[%s19045_s11 + $0x8] sm:$0xff]  }
 0x523   : > { %19132 = vst [vmem:[#allocation86_spill] sm:$0xff] %v14838_v49  ;;  %12589 = vrcp.f32 %v3457_v28  ;;  %v3458_v1 = vadd.f32 1e-09, %v14838_v49  ;;  %v11257_v31 = vpop.f32.mrb[64].mxu1  ;;  %v11195_v45 = vadd.f32 %v11194_v26, %v11193_v54  ;;  %v11196_v36 = vpop.f32.mrb[94].mxu0  ;;  %v13180_v44 = vld [vmem:[%s19045_s11 + $0x88] sm:$0xff]  }
 0x524   : > { %v11258_v51 = vpop.f32.mrb[65].mxu1  ;;  %v11197_v40 = vpop.f32.mrb[95].mxu0  ;;  %v13181_v54 = vld [vmem:[%s19045_s11 + $0x50] sm:$0xff]  }
 0x525   : > { %v12586_v37 = vpop.eup %12585  ;;  %12591 = vrcp.f32 %v3458_v1  ;;  %v11259_v18 = vadd.f32 %v11258_v51, %v11257_v31  ;;  %v11260_v12 = vpop.f32.mrb[66].mxu1  ;;  %v11198_v42 = vadd.f32 %v11197_v40, %v11196_v36  ;;  %v13182_v1 = vld [vmem:[%s19045_s11 + $0xd0] sm:$0xff]   ;;  %v13185_v51 = vld [vmem:[%s19045_s11 + $0x58] sm:$0xff]  }
 0x526   : > { %3513 = vrot.lane.b32.xlu0 %v12586_v37, %s18839_s28  ;;  %v11261_v50 = vpop.f32.mrb[67].mxu1  ;;  %v13183_v31 = vld [vmem:[%s19045_s11 + $0x10] sm:$0xff]   ;;  %v13186_v37 = vld [vmem:[%s19045_s11 + $0xd8] sm:$0xff]  }
 0x527   : > { %v12588_v2 = vpop.eup %12587  ;;  %v14842_v43 = vadd.f32 %v11259_v18, %v11195_v45  ;;  %v11262_v41 = vadd.f32 %v11261_v50, %v11260_v12  ;;  %v13184_v45 = vld [vmem:[%s19045_s11 + $0x90] sm:$0xff]   ;;  %v13187_v18 = vld [vmem:[%s19045_s11 + $0x18] sm:$0xff]   ;;  %v13190_v50 = vld [vmem:[%s19045_s11 + $0xe0] sm:$0xff]  }
 0x528   : > { %3515 = vrot.lane.b32.xlu1 %v12588_v2, %s18839_s28  ;;  %v13188_v12 = vld [vmem:[%s19045_s11 + $0x98] sm:$0xff]   ;;  %v13191_v2 = vld [vmem:[%s19045_s11 + $0x20] sm:$0xff]  }
 0x529   : > { %19133 = vst [vmem:[#allocation87_spill] sm:$0xff] %v14842_v43  ;;  %v3459_v55 = vadd.f32 1e-09, %v14842_v43  ;;  %v14846_v58 = vadd.f32 %v11262_v41, %v11198_v42  ;;  %v13189_v42 = vld [vmem:[%s19045_s11 + $0x60] sm:$0xff]  }
 0x52a   : > { %v13192_v41 = vld [vmem:[%s19045_s11 + $0xa0] sm:$0xff]  }
 0x52b   : > { %19134 = vst [vmem:[#allocation88_spill] sm:$0xff] %v14846_v58  ;;  %12593 = vrcp.f32 %v3459_v55  ;;  %v3460_v39 = vadd.f32 1e-09, %v14846_v58  ;;  %v13193_v55 = vld [vmem:[%s19045_s11 + $0x68] sm:$0xff]  }
 0x52d   : > { %v12590_v48 = vpop.eup %12589  ;;  %12595 = vrcp.f32 %v3460_v39  ;;  %v13194_v39 = vld [vmem:[%s19045_s11 + $0xe8] sm:$0xff]  }
 0x52e   : > { %3517 = vrot.lane.b32.xlu0 %v12590_v48, %s18839_s28  ;;  %v13195_v48 = vld [vmem:[%s19045_s11 + $0x28] sm:$0xff]  }
 0x52f   : > { %v12592_v3 = vpop.eup %12591 }
 0x530   : > { %3519 = vrot.lane.b32.xlu1 %v12592_v3, %s18839_s28  ;;  %v13196_v3 = vld [vmem:[%s19045_s11 + $0xa8] sm:$0xff]  }
 0x535   : > { %v12594_v30 = vpop.eup %12593 }
 0x536   : > { %3521 = vrot.lane.b32.xlu0 %v12594_v30, %s18839_s28  ;;  %v13197_v30 = vld [vmem:[%s19045_s11 + $0x70] sm:$0xff]  }
 0x537   : > { %v12596_v61 = vpop.eup %12595 }
 0x538   : > { %3523 = vrot.lane.b32.xlu1 %v12596_v61, %s18839_s28  ;;  %v13198_v61 = vld [vmem:[%s19045_s11 + $0xf0] sm:$0xff]  }
 0x53a   : > { %4055 = vrot.lane.b32.xlu0 %v19135_v19, %s18839_s28  ;;  %v13199_v19 = vld [vmem:[%s19045_s11 + $0x30] sm:$0xff]  }
 0x53c   : > { %4057 = vrot.lane.b32.xlu1 %v19136_v60, %s18839_s28  ;;  %v13200_v60 = vld [vmem:[%s19045_s11 + $0xb0] sm:$0xff]  }
 0x53e   : > { %4059 = vrot.lane.b32.xlu0 %v19137_v21, %s18839_s28  ;;  %v13201_v21 = vld [vmem:[%s19045_s11 + $0x78] sm:$0xff]  }
 0x540   : > { %4061 = vrot.lane.b32.xlu1 %v19138_v13, %s18839_s28  ;;  %v13202_v13 = vld [vmem:[%s19045_s11 + $0xf8] sm:$0xff]  }
 0x542   : > { %4063 = vrot.lane.b32.xlu0 %v19139_v11, %s18839_s28  ;;  %v13203_v11 = vld [vmem:[%s19045_s11 + $0x38] sm:$0xff]  }
 0x544   : > { %4065 = vrot.lane.b32.xlu1 %v19140_v57, %s18839_s28  ;;  %v13204_v57 = vld [vmem:[%s19045_s11 + $0xb8] sm:$0xff]  }
 0x546   : > { %4067 = vrot.lane.b32.xlu0 %v19141_v0, %s18839_s28 }
 0x548   : > { %4069 = vrot.lane.b32.xlu1 %v19142_v7, %s18839_s28 }
 0x54a   : > { %3743 = vrot.lane.b32.xlu0 %v13173_v15, %s18841_s13 }
 0x54c   : > { %v3494_v63 = vpop.permute.xlu1 %3493  ;;  %3775 = vrot.lane.b32.xlu1 %v13174_v35, %s18841_s13 }
 0x54d   : > { %11886 = vmatprep.mubr.msk.f32.mxu0 %vm3525_vm5, %v3494_v63 }
 0x54e   : > { %v3496_v34 = vpop.permute.xlu0 %3495  ;;  %3727 = vrot.lane.b32.xlu0 %v13175_v53, %s18841_s13 }
 0x54f   : > { %11887 = vmatmul.mubr.msk.f32.vlgmr.msra.gmra.mrb[96].mxu0 %vm3525_vm5, %v3496_v34 }
 0x550   : > { %4209 = vmatpush1.bf16.msra.mxu0 %v19144_v52  ;;  %3759 = vrot.lane.b32.xlu1 %v13176_v29, %s18841_s13 }
 0x552   : > { %3745 = vrot.lane.b32.xlu0 %v13177_v14, %s18841_s13 }
 0x554   : > { %v3498_v62 = vpop.permute.xlu1 %3497  ;;  %3777 = vrot.lane.b32.xlu1 %v13178_v5, %s18841_s13 }
 0x555   : > { %11889 = vmatprep.mubr.msk.f32.mxu0 %vm3525_vm5, %v3498_v62 }
 0x556   : > { %3729 = vrot.lane.b32.xlu0 %v13179_v16, %s18841_s13 }
 0x558   : > { %v3500_v33 = vpop.permute.xlu1 %3499  ;;  %3761 = vrot.lane.b32.xlu1 %v13180_v44, %s18841_s13 }
 0x559   : > { %11890 = vmatmul.mubr.msk.f32.gmra.mrb[98].mxu0 %vm3525_vm5, %v3500_v33 }
 0x55a   : > { %3747 = vrot.lane.b32.xlu0 %v13181_v54, %s18841_s13  ;;  %v19145_v54 = vld [vmem:[#allocation32_spill] sm:$0xff] }
 0x55c   : > { %v3502_v28 = vpop.permute.xlu0 %3501  ;;  %3779 = vrot.lane.b32.xlu1 %v13182_v1, %s18841_s13 }
 0x55d   : > { %11892 = vmatprep.mubr.msk.f32.mxu0 %vm3525_vm5, %v3502_v28 }
 0x55e   : > { %v3504_v26 = vpop.permute.xlu1 %3503  ;;  %3731 = vrot.lane.b32.xlu0 %v13183_v31, %s18841_s13 }
 0x55f   : > { %11893 = vmatmul.mubr.msk.f32.gmra.mrb[100].mxu0 %vm3525_vm5, %v3504_v26 }
 0x560   : > { %3763 = vrot.lane.b32.xlu1 %v13184_v45, %s18841_s13 }
 0x562   : > { %3749 = vrot.lane.b32.xlu0 %v13185_v51, %s18841_s13 }
 0x564   : > { %v3506_v36 = vpop.permute.xlu0 %3505  ;;  %3781 = vrot.lane.b32.xlu1 %v13186_v37, %s18841_s13 }
 0x565   : > { %11895 = vmatprep.mubr.msk.f32.mxu0 %vm3525_vm5, %v3506_v36 }
 0x566   : > { %v3508_v40 = vpop.permute.xlu1 %3507  ;;  %3733 = vrot.lane.b32.xlu0 %v13187_v18, %s18841_s13  ;;  %v19146_v18 = vld [vmem:[#allocation31_spill] sm:$0xff] }
 0x567   : > { %11896 = vmatmul.mubr.msk.f32.gmra.mrb[102].mxu0 %vm3525_vm5, %v3508_v40 }
 0x568   : > { %3765 = vrot.lane.b32.xlu1 %v13188_v12, %s18841_s13 }
 0x56a   : > { %3751 = vrot.lane.b32.xlu0 %v13189_v42, %s18841_s13 }
 0x56c   : > { %3783 = vrot.lane.b32.xlu1 %v13190_v50, %s18841_s13 }
 0x56e   : > { %3735 = vrot.lane.b32.xlu0 %v13191_v2, %s18841_s13 }
 0x570   : > { %3767 = vrot.lane.b32.xlu1 %v13192_v41, %s18841_s13 }
 0x572   : > { %3753 = vrot.lane.b32.xlu0 %v13193_v55, %s18841_s13 }
 0x574   : > { %3785 = vrot.lane.b32.xlu1 %v13194_v39, %s18841_s13 }
 0x576   : > { %3737 = vrot.lane.b32.xlu0 %v13195_v48, %s18841_s13 }
 0x578   : > { %3769 = vrot.lane.b32.xlu1 %v13196_v3, %s18841_s13  ;;  %v19147_v3 = vld [vmem:[#allocation34_spill] sm:$0xff] }
 0x57a   : > { %3755 = vrot.lane.b32.xlu0 %v13197_v30, %s18841_s13 }
 0x57c   : > { %3787 = vrot.lane.b32.xlu1 %v13198_v61, %s18841_s13 }
 0x57e   : > { %3739 = vrot.lane.b32.xlu0 %v13199_v19, %s18841_s13 }
 0x580   : > { %3771 = vrot.lane.b32.xlu1 %v13200_v60, %s18841_s13 }
 0x582   : > { %3757 = vrot.lane.b32.xlu0 %v13201_v21, %s18841_s13 }
 0x584   : > { %3789 = vrot.lane.b32.xlu1 %v13202_v13, %s18841_s13 }
 0x586   : > { %3741 = vrot.lane.b32.xlu0 %v13203_v11, %s18841_s13 }
 0x588   : > { %3773 = vrot.lane.b32.xlu1 %v13204_v57, %s18841_s13 }
 0x590   : > { %v3510_v0 = vpop.permute.xlu0 %3509 }
 0x591   : > { %11898 = vmatprep.mubr.msk.f32.mxu0 %vm3525_vm5, %v3510_v0  ;;  %v19148_v0 = vld [vmem:[#allocation33_spill] sm:$0xff] }
 0x592   : > { %v3512_v7 = vpop.permute.xlu1 %3511 }
 0x593   : > { %11899 = vmatmul.mubr.msk.f32.gmra.mrb[104].mxu0 %vm3525_vm5, %v3512_v7 }
 0x598   : > { %v3514_v63 = vpop.permute.xlu0 %3513 }
 0x599   : > { %11901 = vmatprep.mubr.msk.f32.mxu0 %vm3525_vm5, %v3514_v63 }
 0x59a   : > { %v3516_v15 = vpop.permute.xlu1 %3515 }
 0x59b   : > { %11902 = vmatmul.mubr.msk.f32.gmra.mrb[106].mxu0 %vm3525_vm5, %v3516_v15 }
 0x5a0   : > { %v3518_v34 = vpop.permute.xlu0 %3517 }
 0x5a1   : > { %11904 = vmatprep.mubr.msk.f32.mxu0 %vm3525_vm5, %v3518_v34 }
 0x5a2   : > { %v3520_v35 = vpop.permute.xlu1 %3519 }
 0x5a3   : > { %11905 = vmatmul.mubr.msk.f32.gmra.mrb[108].mxu0 %vm3525_vm5, %v3520_v35 }
 0x5a8   : > { %v3522_v8 = vpop.permute.xlu0 %3521 }
 0x5a9   : > { %11907 = vmatprep.mubr.msk.f32.mxu0 %vm3525_vm5, %v3522_v8 }
 0x5aa   : > { %v3524_v52 = vpop.permute.xlu1 %3523 }
 0x5ab   : > { %11908 = vmatmul.mubr.msk.f32.gmra.mrb[110].mxu0 %vm3525_vm5, %v3524_v52 }
 0x5ac   : > { %v4056_v53 = vpop.permute.xlu0 %4055  ;;  %4240 = vmatprep.mubr.bf16.mxu0 %v19118_v32 }
 0x5ad   : > { %10820 = vmatmul.mubr.msk.bf16.vlgmr.msra.gmra.mrb[68].mxu1 %vm2564_vm3, %v4056_v53 }
 0x5ae   : > { %v4058_v29 = vpop.permute.xlu1 %4057  ;;  %4137 = vmatprep.mubr.bf16.mxu1 %v19118_v32 }
 0x5af   : > { %10828 = vmatmul.mubr.msk.bf16.vlgmr.msra.gmra.mrb[112].mxu0 %vm2564_vm3, %v4056_v53 }
 0x5b0   : > { %v4060_v62 = vpop.permute.xlu0 %4059  ;;  %4250 = vmatprep.mubr.bf16.mxu0 %v19118_v32 }
 0x5b2   : > { %v4062_v14 = vpop.permute.xlu1 %4061 }
 0x5b4   : > { %v4064_v5 = vpop.permute.xlu0 %4063 }
 0x5b5   : > { %10821 = vmatmul.mubr.msk.bf16.gmra.mrb[72].mxu1 %vm2564_vm3, %v4058_v29 }
 0x5b6   : > { %v4066_v33 = vpop.permute.xlu1 %4065  ;;  %4147 = vmatprep.mubr.bf16.mxu1 %v19118_v32 }
 0x5b7   : > { %10829 = vmatmul.mubr.msk.bf16.gmra.mrb[116].mxu0 %vm2564_vm3, %v4058_v29  ;;  %v19149_v29 = vld [vmem:[#allocation40_spill] sm:$0xff] }
 0x5b8   : > { %v15024_v16 = vpop.permute.xlu0 %4067  ;;  %4260 = vmatprep.mubr.bf16.mxu0 %v19118_v32 }
 0x5ba   : > { %v15027_v44 = vpop.permute.xlu1 %4069 }
 0x5bc   : > { %v3744_v28 = vpop.permute.xlu0 %3743 }
 0x5bd   : > { %v3831_v26 = vmul.bf16 %v3744_v28, %v19145_v54  ;;  %10822 = vmatmul.mubr.msk.bf16.gmra.mrb[76].mxu1 %vm2564_vm3, %v4060_v62 }
 0x5be   : > { %v3776_v1 = vpop.permute.xlu1 %3775  ;;  %4157 = vmatprep.mubr.bf16.mxu1 %v19118_v32 }
 0x5bf   : > { %v3847_v31 = vmul.bf16 %v3776_v1, %v19145_v54  ;;  %10830 = vmatmul.mubr.msk.bf16.gmra.mrb[120].mxu0 %vm2564_vm3, %v4060_v62  ;;  %3903 = vrot.lane.b32.xlu0 %v3831_v26, %s18839_s28 }
 0x5c0   : > { %v3728_v45 = vpop.permute.xlu0 %3727  ;;  %4270 = vmatprep.mubr.bf16.mxu0 %v19118_v32 }
 0x5c1   : > { %v3823_v36 = vmul.bf16 %v3728_v45, %v19145_v54  ;;  %3935 = vrot.lane.b32.xlu1 %v3847_v31, %s18839_s28  ;;  %v19150_v31 = vld [vmem:[#allocation37_spill] sm:$0xff] }
 0x5c2   : > { %v3760_v51 = vpop.permute.xlu1 %3759 }
 0x5c3   : > { %v3839_v40 = vmul.bf16 %v3760_v51, %v19145_v54  ;;  %3887 = vrot.lane.b32.xlu0 %v3823_v36, %s18839_s28 }
 0x5c4   : > { %v3746_v37 = vpop.permute.xlu0 %3745 }
 0x5c5   : > { %v3832_v12 = vmul.bf16 %v3746_v37, %v19146_v18  ;;  %3919 = vrot.lane.b32.xlu1 %v3839_v40, %s18839_s28  ;;  %10823 = vmatmul.mubr.msk.bf16.gmra.mrb[80].mxu1 %vm2564_vm3, %v4062_v14 }
 0x5c6   : > { %v3778_v42 = vpop.permute.xlu1 %3777  ;;  %4167 = vmatprep.mubr.bf16.mxu1 %v19118_v32 }
 0x5c7   : > { %v3848_v50 = vmul.bf16 %v3778_v42, %v19146_v18  ;;  %10831 = vmatmul.mubr.msk.bf16.gmra.mrb[124].mxu0 %vm2564_vm3, %v4062_v14  ;;  %3905 = vrot.lane.b32.xlu0 %v3832_v12, %s18839_s28  ;;  %v19151_v42 = vld [vmem:[#allocation42_spill] sm:$0xff] }
 0x5c8   : > { %v3730_v2 = vpop.permute.xlu0 %3729  ;;  %4280 = vmatprep.mubr.bf16.mxu0 %v19118_v32 }
 0x5c9   : > { %v3824_v41 = vmul.bf16 %v3730_v2, %v19146_v18  ;;  %3937 = vrot.lane.b32.xlu1 %v3848_v50, %s18839_s28 }
 0x5ca   : > { %v3762_v55 = vpop.permute.xlu1 %3761 }
 0x5cb   : > { %v3840_v39 = vmul.bf16 %v3762_v55, %v19146_v18  ;;  %3889 = vrot.lane.b32.xlu0 %v3824_v41, %s18839_s28 }
 0x5cc   : > { %v3748_v48 = vpop.permute.xlu0 %3747 }
 0x5cd   : > { %v3833_v30 = vmul.bf16 %v3748_v48, %v19147_v3  ;;  %3921 = vrot.lane.b32.xlu1 %v3840_v39, %s18839_s28  ;;  %10824 = vmatmul.mubr.msk.bf16.gmra.mrb[84].mxu1 %vm2564_vm3, %v4064_v5 }
 0x5ce   : > { %v3780_v61 = vpop.permute.xlu1 %3779  ;;  %4177 = vmatprep.mubr.bf16.mxu1 %v19118_v32 }
 0x5cf   : > { %v3849_v19 = vmul.bf16 %v3780_v61, %v19147_v3  ;;  %10832 = vmatmul.mubr.msk.bf16.gmra.mrb[128].mxu0 %vm2564_vm3, %v4064_v5  ;;  %3907 = vrot.lane.b32.xlu0 %v3833_v30, %s18839_s28 }
 0x5d0   : > { %v3732_v60 = vpop.permute.xlu0 %3731  ;;  %4290 = vmatprep.mubr.bf16.mxu0 %v19118_v32 }
 0x5d1   : > { %v3825_v21 = vmul.bf16 %v3732_v60, %v19147_v3  ;;  %3939 = vrot.lane.b32.xlu1 %v3849_v19, %s18839_s28 }
 0x5d2   : > { %v3764_v13 = vpop.permute.xlu1 %3763 }
 0x5d3   : > { %v3841_v11 = vmul.bf16 %v3764_v13, %v19147_v3  ;;  %3891 = vrot.lane.b32.xlu0 %v3825_v21, %s18839_s28 }
 0x5d4   : > { %v3750_v57 = vpop.permute.xlu0 %3749 }
 0x5d5   : > { %v3834_v7 = vmul.bf16 %v3750_v57, %v19148_v0  ;;  %3923 = vrot.lane.b32.xlu1 %v3841_v11, %s18839_s28  ;;  %10825 = vmatmul.mubr.msk.bf16.gmra.mrb[88].mxu1 %vm2564_vm3, %v4066_v33 }
 0x5d6   : > { %v3782_v63 = vpop.permute.xlu1 %3781  ;;  %4187 = vmatprep.mubr.bf16.mxu1 %v19118_v32 }
 0x5d7   : > { %v3850_v15 = vmul.bf16 %v3782_v63, %v19148_v0  ;;  %10833 = vmatmul.mubr.msk.bf16.gmra.mrb[132].mxu0 %vm2564_vm3, %v4066_v33  ;;  %3909 = vrot.lane.b32.xlu0 %v3834_v7, %s18839_s28 }
 0x5d8   : > { %v3734_v34 = vpop.permute.xlu0 %3733  ;;  %4300 = vmatprep.mubr.bf16.mxu0 %v19118_v32 }
 0x5d9   : > { %v3826_v35 = vmul.bf16 %v3734_v34, %v19148_v0  ;;  %3941 = vrot.lane.b32.xlu1 %v3850_v15, %s18839_s28  ;;  %v19158_v34 = vld [vmem:[#allocation43_spill] sm:$0xff] }
 0x5da   : > { %v3766_v8 = vpop.permute.xlu1 %3765 }
 0x5db   : > { %v3842_v52 = vmul.bf16 %v3766_v8, %v19148_v0  ;;  %3893 = vrot.lane.b32.xlu0 %v3826_v35, %s18839_s28 }
 0x5dc   : > { %v3752_v53 = vpop.permute.xlu0 %3751 }
 0x5dd   : > { %v3835_v62 = vmul.bf16 %v3752_v53, %v19149_v29  ;;  %3925 = vrot.lane.b32.xlu1 %v3842_v52, %s18839_s28  ;;  %10826 = vmatmul.mubr.msk.bf16.gmra.mrb[92].mxu1 %vm2564_vm3, %v15024_v16  ;;  %v19159_v52 = vld [vmem:[#allocation45_spill] sm:$0xff] }
 0x5de   : > { %v3784_v14 = vpop.permute.xlu1 %3783  ;;  %4197 = vmatprep.mubr.bf16.mxu1 %v19118_v32 }
 0x5df   : > { %v3851_v5 = vmul.bf16 %v3784_v14, %v19149_v29  ;;  %10834 = vmatmul.mubr.msk.bf16.gmra.mrb[136].mxu0 %vm2564_vm3, %v15024_v16  ;;  %3911 = vrot.lane.b32.xlu0 %v3835_v62, %s18839_s28  ;;  %v19160_v62 = vld [vmem:[#allocation44_spill] sm:$0xff] }
 0x5e0   : > { %v3736_v33 = vpop.permute.xlu0 %3735  ;;  %4310 = vmatprep.mubr.bf16.mxu0 %v19118_v32 }
 0x5e1   : > { %v3827_v28 = vmul.bf16 %v3736_v33, %v19149_v29  ;;  %3943 = vrot.lane.b32.xlu1 %v3851_v5, %s18839_s28 }
 0x5e2   : > { %v3768_v54 = vpop.permute.xlu1 %3767 }
 0x5e3   : > { %v3843_v26 = vmul.bf16 %v3768_v54, %v19149_v29  ;;  %3895 = vrot.lane.b32.xlu0 %v3827_v28, %s18839_s28  ;;  %v19163_v54 = vld [vmem:[#allocation46_spill] sm:$0xff] }
 0x5e4   : > { %v3754_v1 = vpop.permute.xlu0 %3753 }
 0x5e5   : > { %v3836_v45 = vmul.bf16 %v3754_v1, %v19150_v31  ;;  %3927 = vrot.lane.b32.xlu1 %v3843_v26, %s18839_s28  ;;  %10827 = vmatmul.mubr.msk.bf16.gmra.mrb[96].mxu1 %vm2564_vm3, %v15027_v44 }
 0x5e6   : > { %v3786_v16 = vpop.permute.xlu1 %3785 }
 0x5e7   : > { %v3852_v36 = vmul.bf16 %v3786_v16, %v19150_v31  ;;  %10835 = vmatmul.mubr.msk.bf16.gmra.mrb[140].mxu0 %vm2564_vm3, %v15027_v44  ;;  %3913 = vrot.lane.b32.xlu0 %v3836_v45, %s18839_s28 }
 0x5e8   : > { %v3738_v51 = vpop.permute.xlu0 %3737 }
 0x5e9   : > { %v3828_v40 = vmul.bf16 %v3738_v51, %v19150_v31  ;;  %3945 = vrot.lane.b32.xlu1 %v3852_v36, %s18839_s28  ;;  %v19165_v36 = vld [vmem:[#allocation48_spill] sm:$0xff] }
 0x5ea   : > { %v3770_v37 = vpop.permute.xlu1 %3769 }
 0x5eb   : > { %v3844_v18 = vmul.bf16 %v3770_v37, %v19150_v31  ;;  %3897 = vrot.lane.b32.xlu0 %v3828_v40, %s18839_s28  ;;  %v19164_v31 = vld [vmem:[#allocation47_spill] sm:$0xff]  ;;  %v19166_v37 = vld [vmem:[#allocation49_spill] sm:$0xff] }
 0x5ec   : > { %v3756_v12 = vpop.permute.xlu0 %3755 }
 0x5ed   : > { %v3837_v50 = vmul.bf16 %v3756_v12, %v19151_v42  ;;  %3929 = vrot.lane.b32.xlu1 %v3844_v18, %s18839_s28 }
 0x5ee   : > { %v3788_v2 = vpop.permute.xlu1 %3787 }
 0x5ef   : > { %v3853_v44 = vmul.bf16 %v3788_v2, %v19151_v42  ;;  %3915 = vrot.lane.b32.xlu0 %v3837_v50, %s18839_s28 }
 0x5f0   : > { %v3740_v41 = vpop.permute.xlu0 %3739 }
 0x5f1   : > { %v3829_v55 = vmul.bf16 %v3740_v41, %v19151_v42  ;;  %3947 = vrot.lane.b32.xlu1 %v3853_v44, %s18839_s28  ;;  %v19168_v44 = vld [vmem:[#allocation51_spill] sm:$0xff] }
 0x5f2   : > { %v3772_v39 = vpop.permute.xlu1 %3771 }
 0x5f3   : > { %v3845_v48 = vmul.bf16 %v3772_v39, %v19151_v42  ;;  %3899 = vrot.lane.b32.xlu0 %v3829_v55, %s18839_s28  ;;  %v19167_v42 = vld [vmem:[#allocation50_spill] sm:$0xff]  ;;  %v19169_v39 = vld [vmem:[#allocation52_spill] sm:$0xff] }
 0x5f4   : > { %v3758_v3 = vpop.permute.xlu0 %3757 }
 0x5f5   : > { %v3838_v30 = vmul.bf16 %v3758_v3, %v14107_v9  ;;  %3931 = vrot.lane.b32.xlu1 %v3845_v48, %s18839_s28 }
 0x5f6   : > { %v3790_v61 = vpop.permute.xlu1 %3789 }
 0x5f7   : > { %v3854_v19 = vmul.bf16 %v3790_v61, %v14107_v9  ;;  %3917 = vrot.lane.b32.xlu0 %v3838_v30, %s18839_s28  ;;  %v19170_v30 = vld [vmem:[#allocation53_spill] sm:$0xff] }
 0x5f8   : > { %v15123_v57 = vpop.permute.xlu0 %3741 }
 0x5f9   : > { %3949 = vrot.lane.b32.xlu1 %v3854_v19, %s18839_s28  ;;  %v3830_v22 = vmul.bf16 %v15123_v57, %v14107_v9 }
 0x5fa   : > { %v15127_v7 = vpop.permute.xlu1 %3773 }
 0x622   : > { %v15115_v60 = vpop.f32.mrb[96].mxu0 }
 0x623   : > { %19152 = vst [vmem:[#allocation89_spill] sm:$0xff] %v15115_v60  ;;  %v15117_v21 = vpop.f32.mrb[97].mxu0 }
 0x624   : > { %19153 = vst [vmem:[#allocation24_spill] sm:$0xff] %v15117_v21 }
 0x62c   : > { %v15119_v13 = vpop.f32.mrb[98].mxu0 }
 0x62d   : > { %19154 = vst [vmem:[#allocation23_spill] sm:$0xff] %v15119_v13  ;;  %v15121_v11 = vpop.f32.mrb[99].mxu0 }
 0x62e   : > { %19155 = vst [vmem:[#allocation26_spill] sm:$0xff] %v15121_v11 }
 0x631   : > { %v3904_v15 = vpop.permute.xlu0 %3903 }
 0x632   : > { %v15125_v0 = vpop.f32.mrb[100].mxu0  ;;  %v3976_v35 = vsel %vm2564_vm3, %v3904_v15, %v19158_v34  ;;  %v19171_v15 = vld [vmem:[#allocation54_spill] sm:$0xff] }
 0x633   : > { %19156 = vst [vmem:[#allocation25_spill] sm:$0xff] %v15125_v0  ;;  %v15129_v63 = vpop.f32.mrb[101].mxu0  ;;  %v3936_v8 = vpop.permute.xlu1 %3935  ;;  %11280 = vmatprep.subr.bf16.mxu1 %v3976_v35 }
 0x634   : > { %19157 = vst [vmem:[#allocation28_spill] sm:$0xff] %v15129_v63  ;;  %v4024_v53 = vsel %vm2564_vm3, %v3936_v8, %v19159_v52  ;;  %v19172_v8 = vld [vmem:[#allocation55_spill] sm:$0xff] }
 0x635   : > { %11344 = vmatprep.subr.bf16.mxu0 %v4024_v53  ;;  %v3888_v29 = vpop.permute.xlu0 %3887 }
 0x636   : > { %v3952_v14 = vsel %vm2564_vm3, %v3888_v29, %v19160_v62  ;;  %v19173_v29 = vld [vmem:[#allocation56_spill] sm:$0xff] }
 0x637   : > { %v3920_v33 = vpop.permute.xlu1 %3919  ;;  %11281 = vmatpush3.bf16.msra.mxu1 %v3952_v14 }
 0x638   : > { %v4000_v26 = vsel %vm2564_vm3, %v3920_v33, %v19163_v54  ;;  %v19174_v33 = vld [vmem:[#allocation57_spill] sm:$0xff] }
 0x639   : > { %11345 = vmatpush3.bf16.msra.mxu0 %v4000_v26  ;;  %v3906_v1 = vpop.permute.xlu0 %3905 }
 0x63a   : > { %v15137_v5 = vpop.f32.mrb[102].mxu0  ;;  %v3979_v45 = vsel %vm2564_vm3, %v3906_v1, %v19164_v31  ;;  %v19175_v1 = vld [vmem:[#allocation58_spill] sm:$0xff] }
 0x63b   : > { %19161 = vst [vmem:[#allocation27_spill] sm:$0xff] %v15137_v5  ;;  %v15139_v28 = vpop.f32.mrb[103].mxu0  ;;  %v3938_v16 = vpop.permute.xlu1 %3937  ;;  %11282 = vmatprep.subr.bf16.mxu1 %v3979_v45 }
 0x63c   : > { %19162 = vst [vmem:[#allocation30_spill] sm:$0xff] %v15139_v28  ;;  %v4027_v51 = vsel %vm2564_vm3, %v3938_v16, %v19165_v36  ;;  %v19176_v16 = vld [vmem:[#allocation59_spill] sm:$0xff] }
 0x63d   : > { %11346 = vmatprep.subr.bf16.mxu0 %v4027_v51  ;;  %v3890_v40 = vpop.permute.xlu0 %3889 }
 0x63e   : > { %v3955_v18 = vsel %vm2564_vm3, %v3890_v40, %v19166_v37  ;;  %v19177_v40 = vld [vmem:[#allocation60_spill] sm:$0xff] }
 0x63f   : > { %v3922_v12 = vpop.permute.xlu1 %3921  ;;  %11283 = vmatpush3.bf16.msra.mxu1 %v3955_v18 }
 0x640   : > { %v4003_v50 = vsel %vm2564_vm3, %v3922_v12, %v19167_v42  ;;  %v19178_v12 = vld [vmem:[#allocation61_spill] sm:$0xff] }
 0x641   : > { %11347 = vmatpush3.bf16.msra.mxu0 %v4003_v50  ;;  %v3908_v2 = vpop.permute.xlu0 %3907 }
 0x642   : > { %v3982_v41 = vsel %vm2564_vm3, %v3908_v2, %v19168_v44  ;;  %v19179_v2 = vld [vmem:[#allocation62_spill] sm:$0xff] }
 0x643   : > { %v3940_v55 = vpop.permute.xlu1 %3939  ;;  %11284 = vmatprep.subr.bf16.mxu1 %v3982_v41 }
 0x644   : > { %v4030_v48 = vsel %vm2564_vm3, %v3940_v55, %v19169_v39  ;;  %v19180_v55 = vld [vmem:[#allocation63_spill] sm:$0xff] }
 0x645   : > { %11348 = vmatprep.subr.bf16.mxu0 %v4030_v48  ;;  %v3892_v3 = vpop.permute.xlu0 %3891 }
 0x646   : > { %v3958_v61 = vsel %vm2564_vm3, %v3892_v3, %v19170_v30  ;;  %v19181_v3 = vld [vmem:[#allocation64_spill] sm:$0xff] }
 0x647   : > { %v3924_v19 = vpop.permute.xlu1 %3923  ;;  %11285 = vmatpush3.bf16.msra.mxu1 %v3958_v61 }
 0x648   : > { %v4006_v34 = vsel %vm2564_vm3, %v3924_v19, %v19171_v15  ;;  %v19182_v19 = vld [vmem:[#allocation65_spill] sm:$0xff] }
 0x649   : > { %11349 = vmatpush3.bf16.msra.mxu0 %v4006_v34  ;;  %v3910_v35 = vpop.permute.xlu0 %3909 }
 0x64a   : > { %v3985_v52 = vsel %vm2564_vm3, %v3910_v35, %v19172_v8  ;;  %v19183_v35 = vld [vmem:[#allocation66_spill] sm:$0xff] }
 0x64b   : > { %v3942_v53 = vpop.permute.xlu1 %3941  ;;  %11286 = vmatprep.subr.bf16.mxu1 %v3985_v52 }
 0x64c   : > { %v4033_v62 = vsel %vm2564_vm3, %v3942_v53, %v19173_v29  ;;  %v19184_v53 = vld [vmem:[#allocation67_spill] sm:$0xff] }
 0x64d   : > { %11350 = vmatprep.subr.bf16.mxu0 %v4033_v62  ;;  %v3894_v14 = vpop.permute.xlu0 %3893 }
 0x64e   : > { %v3961_v54 = vsel %vm2564_vm3, %v3894_v14, %v19174_v33 }
 0x64f   : > { %v3926_v26 = vpop.permute.xlu1 %3925  ;;  %11287 = vmatpush3.bf16.msra.mxu1 %v3961_v54  ;;  %v19187_v54 = vld [vmem:[#allocation68_spill] sm:$0xff] }
 0x650   : > { %v4009_v31 = vsel %vm2564_vm3, %v3926_v26, %v19175_v1 }
 0x651   : > { %11351 = vmatpush3.bf16.msra.mxu0 %v4009_v31  ;;  %v3912_v45 = vpop.permute.xlu0 %3911  ;;  %v19188_v31 = vld [vmem:[#allocation69_spill] sm:$0xff] }
 0x652   : > { %v3988_v36 = vsel %vm2564_vm3, %v3912_v45, %v19176_v16 }
 0x653   : > { %v3944_v51 = vpop.permute.xlu1 %3943  ;;  %11288 = vmatprep.subr.bf16.mxu1 %v3988_v36  ;;  %v19189_v36 = vld [vmem:[#allocation70_spill] sm:$0xff] }
 0x654   : > { %v4036_v37 = vsel %vm2564_vm3, %v3944_v51, %v19177_v40 }
 0x655   : > { %11352 = vmatprep.subr.bf16.mxu0 %v4036_v37  ;;  %v3896_v18 = vpop.permute.xlu0 %3895  ;;  %v19190_v37 = vld [vmem:[#allocation71_spill] sm:$0xff] }
 0x656   : > { %v3964_v42 = vsel %vm2564_vm3, %v3896_v18, %v19178_v12 }
 0x657   : > { %v3928_v50 = vpop.permute.xlu1 %3927  ;;  %11289 = vmatpush3.bf16.msra.mxu1 %v3964_v42  ;;  %v19191_v42 = vld [vmem:[#allocation72_spill] sm:$0xff] }
 0x658   : > { %v4012_v44 = vsel %vm2564_vm3, %v3928_v50, %v19179_v2 }
 0x659   : > { %11353 = vmatpush3.bf16.msra.mxu0 %v4012_v44  ;;  %v3914_v41 = vpop.permute.xlu0 %3913 }
 0x65a   : > { %v3991_v39 = vsel %vm2564_vm3, %v3914_v41, %v19180_v55 }
 0x65b   : > { %v3946_v48 = vpop.permute.xlu1 %3945  ;;  %11290 = vmatprep.subr.bf16.mxu1 %v3991_v39 }
 0x65c   : > { %v4039_v30 = vsel %vm2564_vm3, %v3946_v48, %v19181_v3 }
 0x65d   : > { %11354 = vmatprep.subr.bf16.mxu0 %v4039_v30  ;;  %v3898_v61 = vpop.permute.xlu0 %3897  ;;  %v19198_v30 = vld [vmem:[#allocation74_spill] sm:$0xff] }
 0x65e   : > { %v3967_v15 = vsel %vm2564_vm3, %v3898_v61, %v19182_v19 }
 0x65f   : > { %v3930_v34 = vpop.permute.xlu1 %3929  ;;  %11291 = vmatpush3.bf16.msra.mxu1 %v3967_v15 }
 0x660   : > { %v4015_v8 = vsel %vm2564_vm3, %v3930_v34, %v19183_v35 }
 0x661   : > { %11355 = vmatpush3.bf16.msra.mxu0 %v4015_v8  ;;  %v3916_v52 = vpop.permute.xlu0 %3915 }
 0x662   : > { %v3994_v29 = vsel %vm2564_vm3, %v3916_v52, %v19184_v53 }
 0x663   : > { %v3948_v14 = vpop.permute.xlu1 %3947  ;;  %11292 = vmatprep.subr.bf16.mxu1 %v3994_v29 }
 0x664   : > { %v4042_v26 = vsel %vm2564_vm3, %v3948_v14, %v19187_v54 }
 0x665   : > { %11356 = vmatprep.subr.bf16.mxu0 %v4042_v26  ;;  %v3900_v1 = vpop.permute.xlu0 %3899 }
 0x666   : > { %v15185_v62 = vpop.f32.mrb[104].mxu0  ;;  %v3970_v45 = vsel %vm2564_vm3, %v3900_v1, %v19188_v31 }
 0x667   : > { %19185 = vst [vmem:[#allocation29_spill] sm:$0xff] %v15185_v62  ;;  %v15187_v33 = vpop.f32.mrb[105].mxu0  ;;  %v3932_v16 = vpop.permute.xlu1 %3931  ;;  %11293 = vmatpush3.bf16.msra.mxu1 %v3970_v45 }
 0x668   : > { %19186 = vst [vmem:[#allocation38_spill] sm:$0xff] %v15187_v33  ;;  %v4018_v51 = vsel %vm2564_vm3, %v3932_v16, %v19189_v36 }
 0x669   : > { %11357 = vmatpush3.bf16.msra.mxu0 %v4018_v51  ;;  %v3918_v40 = vpop.permute.xlu0 %3917 }
 0x66a   : > { %v3997_v18 = vsel %vm2564_vm3, %v3918_v40, %v19190_v37 }
 0x66b   : > { %v3950_v12 = vpop.permute.xlu1 %3949  ;;  %11294 = vmatprep.subr.bf16.mxu1 %v3997_v18 }
 0x66c   : > { %v4045_v50 = vsel %vm2564_vm3, %v3950_v12, %v19191_v42 }
 0x66d   : > { %11358 = vmatprep.subr.bf16.mxu0 %v4045_v50 }
 0x66e   : > { %v15199_v2 = vpop.f32.mrb[106].mxu0 }
 0x66f   : > { %19192 = vst [vmem:[#allocation32_spill] sm:$0xff] %v15199_v2  ;;  %v15201_v44 = vpop.f32.mrb[107].mxu0 }
 0x670   : > { %19193 = vst [vmem:[#allocation31_spill] sm:$0xff] %v15201_v44 }
 0x676   : > { %v15203_v41 = vpop.f32.mrb[108].mxu0 }
 0x677   : > { %19194 = vst [vmem:[#allocation34_spill] sm:$0xff] %v15203_v41  ;;  %v15205_v55 = vpop.f32.mrb[109].mxu0 }
 0x678   : > { %19195 = vst [vmem:[#allocation33_spill] sm:$0xff] %v15205_v55 }
 0x67e   : > { %v15207_v39 = vpop.f32.mrb[110].mxu0 }
 0x67f   : > { %19196 = vst [vmem:[#allocation40_spill] sm:$0xff] %v15207_v39  ;;  %v15209_v48 = vpop.f32.mrb[111].mxu0 }
 0x680   : > { %19197 = vst [vmem:[#allocation37_spill] sm:$0xff] %v15209_v48  ;;  %v4129_v3 = vpop.f32.mrb[68].mxu1 }
 0x681   : > { %v15212_v61 = vadd.f32 %v4129_v3, %v19198_v30  ;;  %v4131_v19 = vpop.f32.mrb[69].mxu1 }
 0x682   : > { %v15215_v15 = vadd.f32 %v4131_v19, %v19198_v30  ;;  %v4133_v34 = vpop.f32.mrb[70].mxu1  ;;  %v4242_v35 = vpop.f32.mrb[112].mxu0 }
 0x683   : > { %v15218_v8 = vadd.f32 %v4133_v34, %v19198_v30  ;;  %v15221_v52 = vadd.f32 %v4242_v35, %v19198_v30  ;;  %v4135_v53 = vpop.f32.mrb[71].mxu1  ;;  %v4244_v29 = vpop.f32.mrb[113].mxu0 }
 0x684   : > { %v4321_v14 = vmax.f32 %v15212_v61, %v15215_v15  ;;  %v15226_v54 = vadd.f32 %v4135_v53, %v19198_v30  ;;  %v4246_v26 = vpop.f32.mrb[114].mxu0  ;;  %v15233_v16 = vadd.f32 %v4244_v29, %v19198_v30 }
 0x685   : > { %v15229_v1 = vadd.f32 %v4246_v26, %v19198_v30  ;;  %v4248_v31 = vpop.f32.mrb[115].mxu0 }
 0x686   : > { %v4322_v45 = vmax.f32 %v4321_v14, %v15221_v52  ;;  %v4326_v36 = vmax.f32 %v15218_v8, %v15226_v54  ;;  %v15240_v37 = vadd.f32 %v4248_v31, %v19198_v30 }
 0x688   : > { %v4323_v51 = vmax.f32 %v4322_v45, %v15233_v16  ;;  %v4327_v40 = vmax.f32 %v4326_v36, %v15229_v1  ;;  %v4139_v18 = vpop.f32.mrb[72].mxu1 }
 0x689   : > { %v15243_v12 = vadd.f32 %v4139_v18, %v19198_v30  ;;  %v4141_v42 = vpop.f32.mrb[73].mxu1 }
 0x68a   : > { %v4328_v50 = vmax.f32 %v4327_v40, %v15240_v37  ;;  %v15247_v3 = vadd.f32 %v4141_v42, %v19198_v30  ;;  %v4143_v19 = vpop.f32.mrb[74].mxu1  ;;  %v4252_v34 = vpop.f32.mrb[116].mxu0  ;;  %4324 = vmax.xlane.f32.xlu0 %v4323_v51 }
 0x68b   : > { %v15250_v35 = vadd.f32 %v4143_v19, %v19198_v30  ;;  %v15253_v53 = vadd.f32 %v4252_v34, %v19198_v30  ;;  %v4145_v29 = vpop.f32.mrb[75].mxu1  ;;  %v4254_v14 = vpop.f32.mrb[117].mxu0 }
 0x68c   : > { %v4331_v26 = vmax.f32 %v15243_v12, %v15247_v3  ;;  %v15258_v31 = vadd.f32 %v4145_v29, %v19198_v30  ;;  %v4256_v45 = vpop.f32.mrb[118].mxu0  ;;  %4329 = vmax.xlane.f32.xlu1 %v4328_v50  ;;  %v15265_v18 = vadd.f32 %v4254_v14, %v19198_v30 }
 0x68d   : > { %v15261_v36 = vadd.f32 %v4256_v45, %v19198_v30  ;;  %v4258_v51 = vpop.f32.mrb[119].mxu0 }
 0x68e   : > { %v4332_v40 = vmax.f32 %v4331_v26, %v15253_v53  ;;  %v4336_v42 = vmax.f32 %v15250_v35, %v15258_v31  ;;  %v15272_v29 = vadd.f32 %v4258_v51, %v19198_v30 }
 0x690   : > { %v4333_v19 = vmax.f32 %v4332_v40, %v15265_v18  ;;  %v4337_v34 = vmax.f32 %v4336_v42, %v15261_v36  ;;  %v4149_v50 = vpop.f32.mrb[76].mxu1 }
 0x691   : > { %v15275_v45 = vadd.f32 %v4149_v50, %v19198_v30  ;;  %v4151_v32 = vpop.f32.mrb[77].mxu1 }
 0x692   : > { %v4338_v26 = vmax.f32 %v4337_v34, %v15272_v29  ;;  %v15279_v14 = vadd.f32 %v4151_v32, %v19198_v30  ;;  %v4153_v48 = vpop.f32.mrb[78].mxu1  ;;  %v4262_v43 = vpop.f32.mrb[120].mxu0  ;;  %4334 = vmax.xlane.f32.xlu0 %v4333_v19 }
 0x693   : > { %v15282_v40 = vadd.f32 %v4153_v48, %v19198_v30  ;;  %v15285_v42 = vadd.f32 %v4262_v43, %v19198_v30  ;;  %v4155_v51 = vpop.f32.mrb[79].mxu1  ;;  %v4264_v39 = vpop.f32.mrb[121].mxu0 }
 0x694   : > { %v4341_v50 = vmax.f32 %v15275_v45, %v15279_v14  ;;  %v15290_v58 = vadd.f32 %v4155_v51, %v19198_v30  ;;  %4339 = vmax.xlane.f32.xlu1 %v4338_v26  ;;  %v4266_v32 = vpop.f32.mrb[122].mxu0  ;;  %v15297_v55 = vadd.f32 %v4264_v39, %v19198_v30 }
 0x695   : > { %19199 = vst [vmem:[#allocation42_spill] sm:$0xff] %v15285_v42  ;;  %v15293_v34 = vadd.f32 %v4266_v32, %v19198_v30  ;;  %v4268_v19 = vpop.f32.mrb[123].mxu0 }
 0x696   : > { %v4342_v48 = vmax.f32 %v4341_v50, %v15285_v42  ;;  %v4346_v43 = vmax.f32 %v15282_v40, %v15290_v58  ;;  %v15304_v51 = vadd.f32 %v4268_v19, %v19198_v30 }
 0x698   : > { %v4343_v25 = vmax.f32 %v4342_v48, %v15297_v55  ;;  %v4347_v41 = vmax.f32 %v4346_v43, %v15293_v34  ;;  %v4159_v26 = vpop.f32.mrb[80].mxu1 }
 0x699   : > { %v15307_v32 = vadd.f32 %v4159_v26, %v19198_v30  ;;  %v4161_v49 = vpop.f32.mrb[81].mxu1 }
 0x69a   : > { %v4348_v50 = vmax.f32 %v4347_v41, %v15304_v51  ;;  %v15311_v39 = vadd.f32 %v4161_v49, %v19198_v30  ;;  %v4163_v44 = vpop.f32.mrb[82].mxu1  ;;  %v4272_v56 = vpop.f32.mrb[124].mxu0  ;;  %4344 = vmax.xlane.f32.xlu0 %v4343_v25 }
 0x69b   : > { %19200 = vst [vmem:[#allocation43_spill] sm:$0xff] %v15307_v32  ;;  %v15314_v48 = vadd.f32 %v4163_v44, %v19198_v30  ;;  %v15317_v43 = vadd.f32 %v4272_v56, %v19198_v30  ;;  %v4165_v19 = vpop.f32.mrb[83].mxu1  ;;  %v4274_v2 = vpop.f32.mrb[125].mxu0 }
 0x69c   : > { %v4351_v26 = vmax.f32 %v15307_v32, %v15311_v39  ;;  %v15322_v6 = vadd.f32 %v4165_v19, %v19198_v30  ;;  %v4276_v41 = vpop.f32.mrb[126].mxu0  ;;  %4349 = vmax.xlane.f32.xlu1 %v4348_v50  ;;  %v15329_v33 = vadd.f32 %v4274_v2, %v19198_v30 }
 0x69d   : > { %19201 = vst [vmem:[#allocation45_spill] sm:$0xff] %v15314_v48  ;;  %19202 = vst [vmem:[#allocation44_spill] sm:$0xff] %v15317_v43  ;;  %v15325_v49 = vadd.f32 %v4276_v41, %v19198_v30  ;;  %v4278_v25 = vpop.f32.mrb[127].mxu0 }
 0x69e   : > { %19203 = vst [vmem:[#allocation46_spill] sm:$0xff] %v15322_v6  ;;  %v4352_v44 = vmax.f32 %v4351_v26, %v15317_v43  ;;  %19205 = vst [vmem:[#allocation48_spill] sm:$0xff] %v15329_v33  ;;  %v4356_v56 = vmax.f32 %v15314_v48, %v15322_v6  ;;  %v15336_v19 = vadd.f32 %v4278_v25, %v19198_v30 }
 0x69f   : > { %19204 = vst [vmem:[#allocation47_spill] sm:$0xff] %v15325_v49 }
 0x6a0   : > { %v4353_v4 = vmax.f32 %v4352_v44, %v15329_v33  ;;  %v4357_v62 = vmax.f32 %v4356_v56, %v15325_v49  ;;  %19206 = vst [vmem:[#allocation49_spill] sm:$0xff] %v15336_v19  ;;  %v4169_v50 = vpop.f32.mrb[84].mxu1 }
 0x6a1   : > { %v4171_v38 = vpop.f32.mrb[85].mxu1  ;;  %v15350_v17 = vadd.f32 %v4169_v50, %v19198_v30 }
 0x6a2   : > { %v4358_v41 = vmax.f32 %v4357_v62, %v15336_v19  ;;  %v4173_v28 = vpop.f32.mrb[86].mxu1  ;;  %v4282_v47 = vpop.f32.mrb[128].mxu0  ;;  %4354 = vmax.xlane.f32.xlu0 %v4353_v4  ;;  %v3846_v4 = vmul.bf16 %v15127_v7, %v14107_v9 }
 0x6a3   : > { %v4175_v26 = vpop.f32.mrb[87].mxu1  ;;  %v4284_v2 = vpop.f32.mrb[129].mxu0  ;;  %v15356_v19 = vadd.f32 %v4173_v28, %v19198_v30  ;;  %v15368_v6 = vadd.f32 %v4282_v47, %v19198_v30 }
 0x6a4   : > { %4359 = vmax.xlane.f32.xlu1 %v4358_v41  ;;  %v4286_v5 = vpop.f32.mrb[130].mxu0  ;;  %v15359_v9 = vadd.f32 %v4175_v26, %v19198_v30 }
 0x6a5   : > { %v4288_v46 = vpop.f32.mrb[131].mxu0  ;;  %19208 = vst [vmem:[#allocation51_spill] sm:$0xff] %v15356_v19 }
 0x6a6   : > { %19209 = vst [vmem:[#allocation52_spill] sm:$0xff] %v15359_v9  ;;  %v4366_v28 = vmax.f32 %v15356_v19, %v15359_v9 }
 0x6a8   : > { %v4179_v63 = vpop.f32.mrb[88].mxu1 }
 0x6a9   : > { %v4181_v59 = vpop.f32.mrb[89].mxu1 }
 0x6aa   : > { %v4183_v44 = vpop.f32.mrb[90].mxu1  ;;  %v4292_v0 = vpop.f32.mrb[132].mxu0  ;;  %v15365_v57 = vadd.f32 %v4181_v59, %v19198_v30 }
 0x6ab   : > { %v4185_v56 = vpop.f32.mrb[91].mxu1  ;;  %v4294_v20 = vpop.f32.mrb[133].mxu0  ;;  %v15384_v59 = vadd.f32 %v4183_v44, %v19198_v30  ;;  %v15387_v47 = vadd.f32 %v4292_v0, %v19198_v30 }
 0x6ac   : > { %v4296_v25 = vpop.f32.mrb[134].mxu0  ;;  %19210 = vst [vmem:[#allocation53_spill] sm:$0xff] %v15365_v57 }
 0x6ad   : > { %v15339_v11 = vpop.f32.mrb[135].mxu0 }
 0x6b0   : > { %v4189_v23 = vpop.f32.mrb[92].mxu1 }
 0x6b1   : > { %v4191_v13 = vpop.f32.mrb[93].mxu1  ;;  %v15378_v26 = vadd.f32 %v4189_v23, %v19198_v30  ;;  %v15396_v23 = vadd.f32 %v4284_v2, %v19198_v30 }
 0x6b2   : > { %v4193_v62 = vpop.f32.mrb[94].mxu1  ;;  %v4302_v24 = vpop.f32.mrb[136].mxu0 }
 0x6b3   : > { %v4195_v21 = vpop.f32.mrb[95].mxu1  ;;  %v4304_v41 = vpop.f32.mrb[137].mxu0  ;;  %19211 = vst [vmem:[#allocation54_spill] sm:$0xff] %v15378_v26  ;;  %v15400_v19 = vadd.f32 %v4302_v24, %v19198_v30 }
 0x6b4   : > { %v4306_v27 = vpop.f32.mrb[138].mxu0 }
 0x6b5   : > { %3933 = vrot.lane.b32.xlu1 %v3846_v4, %s18839_s28  ;;  %v15344_v60 = vpop.f32.mrb[139].mxu0  ;;  %v15353_v4 = vadd.f32 %v4171_v38, %v19198_v30  ;;  %v15373_v38 = vadd.f32 %v4286_v5, %v19198_v30  ;;  %v15392_v5 = vadd.f32 %v4185_v56, %v19198_v30 }
 0x6b7   : > { %19207 = vst [vmem:[#allocation50_spill] sm:$0xff] %v15353_v4  ;;  %v4361_v50 = vmax.f32 %v15350_v17, %v15353_v4  ;;  %v4376_v2 = vmax.f32 %v15384_v59, %v15392_v5 }
 0x6b8   : > { %v4199_v43 = vpop.f32.mrb[96].mxu1  ;;  %3901 = vrot.lane.b32.xlu0 %v3830_v22, %s18839_s28  ;;  %v15362_v22 = vadd.f32 %v4179_v63, %v19198_v30  ;;  %v15381_v63 = vadd.f32 %v4191_v13, %v19198_v30  ;;  %v4367_v13 = vmax.f32 %v4366_v28, %v15373_v38  ;;  %v15418_v28 = vadd.f32 %v4288_v46, %v19198_v30 }
 0x6b9   : > { %v4201_v49 = vpop.f32.mrb[97].mxu1  ;;  %v4362_v9 = vmax.f32 %v4361_v50, %v15368_v6  ;;  %v15405_v44 = vadd.f32 %v4199_v43, %v19198_v30  ;;  %v15412_v50 = vadd.f32 %v4296_v25, %v19198_v30  ;;  %v15424_v43 = vadd.f32 %v4195_v21, %v19198_v30 }
 0x6ba   : > { %v4203_v32 = vpop.f32.mrb[98].mxu1  ;;  %v4312_v48 = vpop.f32.mrb[140].mxu0  ;;  %19212 = vst [vmem:[#allocation55_spill] sm:$0xff] %v15381_v63  ;;  %v4371_v4 = vmax.f32 %v15362_v22, %v15365_v57  ;;  %v4381_v0 = vmax.f32 %v15378_v26, %v15381_v63  ;;  %v15408_v57 = vadd.f32 %v4201_v49, %v19198_v30  ;;  %v15421_v63 = vadd.f32 %v4193_v62, %v19198_v30 }
 0x6bb   : > { %v4205_v10 = vpop.f32.mrb[99].mxu1  ;;  %v4314_v33 = vpop.f32.mrb[141].mxu0  ;;  %v4363_v24 = vmax.f32 %v4362_v9, %v15396_v23  ;;  %v15427_v49 = vadd.f32 %v4294_v20, %v19198_v30  ;;  %v4368_v25 = vmax.f32 %v4367_v13, %v15418_v28  ;;  %v15434_v9 = vadd.f32 %v4312_v48, %v19198_v30 }
 0x6bc   : > { %v4316_v42 = vpop.f32.mrb[142].mxu0  ;;  %v4372_v56 = vmax.f32 %v4371_v4, %v15387_v47  ;;  %v4382_v4 = vmax.f32 %v4381_v0, %v15400_v19  ;;  %v4391_v26 = vmax.f32 %v15405_v44, %v15408_v57  ;;  %v4377_v62 = vmax.f32 %v4376_v2, %v15412_v50 }
 0x6bd   : > { %v4318_v7 = vpop.f32.mrb[143].mxu0  ;;  %v15439_v21 = vadd.f32 %v4304_v41, %v19198_v30  ;;  %v15442_v20 = vadd.f32 %v4306_v27, %v19198_v30  ;;  %v4386_v13 = vmax.f32 %v15421_v63, %v15424_v43  ;;  %v15447_v0 = vadd.f32 %v4203_v32, %v19198_v30 }
 0x6be   : > { %v4373_v46 = vmax.f32 %v4372_v56, %v15427_v49  ;;  %v15450_v48 = vadd.f32 %v4205_v10, %v19198_v30  ;;  %v15454_v56 = vadd.f32 %v15339_v11, %v19198_v30  ;;  %v4392_v2 = vmax.f32 %v4391_v26, %v15434_v9 }
 0x6bf   : > { %v4383_v41 = vmax.f32 %v4382_v4, %v15439_v21  ;;  %v15463_v10 = vadd.f32 %v4314_v33, %v19198_v30  ;;  %v15470_v11 = vadd.f32 %v15344_v60, %v19198_v30 }
 0x6c0   : > { %v4378_v27 = vmax.f32 %v4377_v62, %v15454_v56  ;;  %v4396_v32 = vmax.f32 %v15447_v0, %v15450_v48  ;;  %v15476_v62 = vadd.f32 %v4318_v7, %v19198_v30 }
 0x6c1   : > { %v4393_v26 = vmax.f32 %v4392_v2, %v15463_v10 }
 0x6d7   : > { %4364 = vmax.xlane.f32.xlu0 %v4363_v24  ;;  %v4387_v24 = vmax.f32 %v4386_v13, %v15442_v20 }
 0x6d9   : > { %4369 = vmax.xlane.f32.xlu1 %v4368_v25  ;;  %v15466_v25 = vadd.f32 %v4316_v42, %v19198_v30  ;;  %v4388_v4 = vmax.f32 %v4387_v24, %v15470_v11 }
 0x6db   : > { %4374 = vmax.xlane.f32.xlu0 %v4373_v46  ;;  %v4397_v46 = vmax.f32 %v4396_v32, %v15466_v25 }
 0x6dd   : > { %4384 = vmax.xlane.f32.xlu1 %v4383_v41  ;;  %v4398_v33 = vmax.f32 %v4397_v46, %v15476_v62 }
 0x6df   : > { %4379 = vmax.xlane.f32.xlu0 %v4378_v27 }
 0x6e1   : > { %4394 = vmax.xlane.f32.xlu1 %v4393_v26 }
 0x6e3   : > { %4389 = vmax.xlane.f32.xlu0 %v4388_v4 }
 0x6e7   : > { %4399 = vmax.xlane.f32.xlu0 %v4398_v33 }
 0x717   : > { %v4325_v42 = vpop.xlane.xlu0 %4324 }
 0x718   : > { %v4402_v13 = vsub.f32 %v15215_v15, %v4325_v42  ;;  %v4404_v41 = vsub.f32 %v15233_v16, %v4325_v42  ;;  %v4401_v30 = vsub.f32 %v15212_v61, %v4325_v42  ;;  %v4403_v61 = vsub.f32 %v15221_v52, %v4325_v42 }
 0x719   : > { %v4330_v60 = vpop.xlane.xlu1 %4329 }
 0x71a   : > { %v4406_v2 = vsub.f32 %v15226_v54, %v4330_v60  ;;  %v4408_v27 = vsub.f32 %v15240_v37, %v4330_v60  ;;  %v4467_v24 = vmul.f32 1.442695, %v4402_v13  ;;  %v4471_v26 = vmul.f32 1.442695, %v4404_v41 }
 0x71b   : > { %v4405_v4 = vsub.f32 %v15218_v8, %v4330_v60  ;;  %v4407_v33 = vsub.f32 %v15229_v1, %v4330_v60  ;;  %v4465_v16 = vmul.f32 1.442695, %v4401_v30 }
 0x71c   : > { %v4475_v32 = vmul.f32 1.442695, %v4406_v2  ;;  %v4479_v7 = vmul.f32 1.442695, %v4408_v27  ;;  %12597 = vpow2.f32 %v4467_v24 }
 0x71d   : > { %v4473_v13 = vmul.f32 1.442695, %v4405_v4  ;;  %v4477_v2 = vmul.f32 1.442695, %v4407_v33 }
 0x71e   : > { %12599 = vpow2.f32 %v4475_v32 }
 0x71f   : > { %v4335_v46 = vpop.xlane.xlu0 %4334  ;;  %12601 = vpow2.f32 %v4471_v26 }
 0x720   : > { %12603 = vpow2.f32 %v4479_v7  ;;  %v4410_v54 = vsub.f32 %v15247_v3, %v4335_v46  ;;  %v4412_v8 = vsub.f32 %v15265_v18, %v4335_v46  ;;  %v4409_v1 = vsub.f32 %v15243_v12, %v4335_v46 }
 0x721   : > { %v4340_v15 = vpop.xlane.xlu1 %4339  ;;  %12605 = vpow2.f32 %v4465_v16 }
 0x722   : > { %v4414_v37 = vsub.f32 %v15258_v31, %v4340_v15  ;;  %v4416_v41 = vsub.f32 %v15272_v29, %v4340_v15  ;;  %v4483_v60 = vmul.f32 1.442695, %v4410_v54  ;;  %12607 = vpow2.f32 %v4473_v13 }
 0x723   : > { %v4413_v24 = vsub.f32 %v15250_v35, %v4340_v15  ;;  %v4469_v31 = vmul.f32 1.442695, %v4403_v61  ;;  %12609 = vpow2.f32 %v4477_v2  ;;  %v4415_v29 = vsub.f32 %v15261_v36, %v4340_v15 }
 0x724   : > { %v4491_v27 = vmul.f32 1.442695, %v4414_v37  ;;  %v4495_v32 = vmul.f32 1.442695, %v4416_v41  ;;  %v4487_v42 = vmul.f32 1.442695, %v4412_v8  ;;  %v4411_v36 = vsub.f32 %v15253_v53, %v4335_v46 }
 0x725   : > { %v4481_v30 = vmul.f32 1.442695, %v4409_v1  ;;  %v4489_v4 = vmul.f32 1.442695, %v4413_v24  ;;  %v4493_v15 = vmul.f32 1.442695, %v4415_v29 }
 0x726   : > { %v12598_v52 = vpop.eup %12597  ;;  %12611 = vpow2.f32 %v4491_v27  ;;  %v4485_v46 = vmul.f32 1.442695, %v4411_v36 }
 0x727   : > { %v15493_v3 = vpop.xlane.xlu0 %4344  ;;  %12613 = vpow2.f32 %v4483_v60 }
 0x728   : > { %v12600_v18 = vpop.eup %12599  ;;  %v4418_v12 = vsub.f32 %v15279_v14, %v15493_v3  ;;  %12615 = vpow2.f32 %v4495_v32  ;;  %v4420_v37 = vsub.f32 %v15297_v55, %v15493_v3 }
 0x729   : > { %v4350_v26 = vpop.xlane.xlu1 %4349  ;;  %v12602_v35 = vpop.eup %12601  ;;  %v4594_v16 = vpack.c.bf16 %v12600_v18, %v12598_v52  ;;  %12617 = vpow2.f32 %v4469_v31 }
 0x72a   : > { %v4422_v7 = vsub.f32 %v15290_v58, %v4350_v26  ;;  %v4424_v33 = vsub.f32 %v15304_v51, %v4350_v26  ;;  %v12604_v54 = vpop.eup %12603  ;;  %12619 = vpow2.f32 %v4487_v42  ;;  %v4417_v58 = vsub.f32 %v15275_v45, %v15493_v3  ;;  %v19215_v42 = vld [vmem:[#allocation77_spill] sm:$0xff] }
 0x72b   : > { %4657 = vmatprep.mubr.bf16.mxu1 %v4594_v16  ;;  %v4596_v14 = vpack.c.bf16 %v12604_v54, %v12602_v35  ;;  %12621 = vpow2.f32 %v4481_v30  ;;  %v4499_v41 = vmul.f32 1.442695, %v4418_v12  ;;  %v4421_v51 = vsub.f32 %v15282_v40, %v4350_v26  ;;  %v12606_v53 = vpop.eup %12605  ;;  %v19213_v40 = vld [vmem:[#allocation46_spill] sm:$0xff]  ;;  %v19217_v16 = vld [vmem:[#allocation48_spill] sm:$0xff] }
 0x72c   : > { %v4507_v13 = vmul.f32 1.442695, %v4422_v7  ;;  %12623 = vpow2.f32 %v4489_v4  ;;  %v4511_v2 = vmul.f32 1.442695, %v4424_v33  ;;  %v4423_v55 = vsub.f32 %v15293_v34, %v4350_v26  ;;  %v12608_v27 = vpop.eup %12607  ;;  %v19214_v34 = vld [vmem:[#allocation49_spill] sm:$0xff]  ;;  %v19216_v12 = vld [vmem:[#allocation42_spill] sm:$0xff] }
 0x72d   : > { %4754 = vmatprep.mubr.bf16.mxu0 %v4596_v14  ;;  %12625 = vpow2.f32 %v4493_v15  ;;  %v4503_v1 = vmul.f32 1.442695, %v4420_v37  ;;  %v12610_v60 = vpop.eup %12609  ;;  %v4497_v45 = vmul.f32 1.442695, %v4417_v58  ;;  %v4505_v52 = vmul.f32 1.442695, %v4421_v51 }
 0x72e   : > { %12627 = vpow2.f32 %v4507_v13  ;;  %v4419_v7 = vsub.f32 %v19216_v12, %v15493_v3  ;;  %v4509_v35 = vmul.f32 1.442695, %v4423_v55  ;;  %v4593_v4 = vpack.c.bf16 %v12608_v27, %v12606_v53  ;;  %v19218_v15 = vld [vmem:[#allocation79_spill] sm:$0xff]  ;;  %v13205_v13 = vld [vmem:[%s19096_s2] sm:$0xf] }
 0x72f   : > { %v15505_v61 = vpop.xlane.xlu0 %4354  ;;  %12629 = vpow2.f32 %v4499_v41  ;;  %v19219_v55 = vld [vmem:[#allocation45_spill] sm:$0xff] }
 0x730   : > { %v4426_v24 = vsub.f32 %v15311_v39, %v15505_v61  ;;  %v12612_v29 = vpop.eup %12611  ;;  %12631 = vpow2.f32 %v4511_v2  ;;  %v4428_v54 = vsub.f32 %v19217_v16, %v15505_v61 }
 0x731   : > { %v15509_v8 = vpop.xlane.xlu1 %4359  ;;  %v12614_v30 = vpop.eup %12613  ;;  %12633 = vpow2.f32 %v4485_v46  ;;  %v4501_v46 = vmul.f32 1.442695, %v4419_v7 }
 0x732   : > { %v4430_v32 = vsub.f32 %v19213_v40, %v15509_v8  ;;  %v4432_v26 = vsub.f32 %v19214_v34, %v15509_v8  ;;  %v12616_v33 = vpop.eup %12615  ;;  %12635 = vpow2.f32 %v4503_v1  ;;  %v4515_v14 = vmul.f32 1.442695, %v4426_v24  ;;  %v19220_v24 = vld [vmem:[#allocation43_spill] sm:$0xff] }
 0x733   : > { %v3902_v31 = vpop.permute.xlu0 %3901  ;;  %v12618_v3 = vpop.eup %12617  ;;  %12637 = vpow2.f32 %v4497_v45  ;;  %v4598_v58 = vpack.c.bf16 %v12612_v29, %v12614_v30  ;;  %v4429_v27 = vsub.f32 %v19219_v55, %v15509_v8  ;;  %v4425_v40 = vsub.f32 %v19220_v24, %v15505_v61 }
 0x734   : > { %v3973_v18 = vsel %vm2564_vm3, %v3902_v31, %v19215_v42  ;;  %v4523_v36 = vmul.f32 1.442695, %v4430_v32  ;;  %v12620_v41 = vpop.eup %12619  ;;  %12639 = vpow2.f32 %v4505_v52  ;;  %v4527_v51 = vmul.f32 1.442695, %v4432_v26  ;;  %v19221_v31 = vld [vmem:[#allocation47_spill] sm:$0xff]  ;;  %v19222_v26 = vld [vmem:[#allocation44_spill] sm:$0xff] }
 0x735   : > { %v3934_v39 = vpop.permute.xlu1 %3933  ;;  %11295 = vmatpush3.bf16.msra.mxu1 %v3973_v18  ;;  %v4595_v2 = vpack.c.bf16 %v12610_v60, %v12618_v3  ;;  %v12622_v53 = vpop.eup %12621  ;;  %12641 = vpow2.f32 %v4509_v35  ;;  %v4600_v1 = vpack.c.bf16 %v12616_v33, %v12620_v41  ;;  %v4519_v32 = vmul.f32 1.442695, %v4428_v54 }
 0x736   : > { %v4021_v37 = vsel %vm2564_vm3, %v3934_v39, %v19218_v15  ;;  %12168 = vmatprep.subr.msk.mxu1 %vm3558_vm4, %v13205_v13  ;;  %v12624_v45 = vpop.eup %12623  ;;  %12643 = vpow2.f32 %v4523_v36  ;;  %v4431_v29 = vsub.f32 %v19221_v31, %v15509_v8  ;;  %v4427_v42 = vsub.f32 %v19222_v26, %v15505_v61 }
 0x737   : > { %11359 = vmatpush3.bf16.msra.mxu0 %v4021_v37  ;;  %v12626_v60 = vpop.eup %12625  ;;  %12645 = vpow2.f32 %v4515_v14  ;;  %v4521_v18 = vmul.f32 1.442695, %v4429_v27  ;;  %v4513_v12 = vmul.f32 1.442695, %v4425_v40  ;;  %v4597_v7 = vpack.c.bf16 %v12624_v45, %v12622_v53 }
 0x738   : > { %4658 = vmatmul.mubr.bf16.vlgmr.msra.gmra.mrb[100].mxu1 %v4593_v4  ;;  %11910 = vmatprep.subr.msk.mxu0 %vm3558_vm4, %v13205_v13  ;;  %v12628_v52 = vpop.eup %12627  ;;  %12647 = vpow2.f32 %v4527_v51  ;;  %v4525_v39 = vmul.f32 1.442695, %v4431_v29  ;;  %v4517_v54 = vmul.f32 1.442695, %v4427_v42 }
 0x739   : > { %4665 = vmatprep.mubr.bf16.mxu1 %v4598_v58  ;;  %12169 = vmatpush3.msk.msra.mxu1 %vm3558_vm4, %v13205_v13  ;;  %v12630_v34 = vpop.eup %12629  ;;  %12649 = vpow2.f32 %v4501_v46 }
 0x73a   : > { %4755 = vmatmul.mubr.bf16.vlgmr.msra.gmra.mrb[144].mxu0 %v4595_v2  ;;  %v12632_v30 = vpop.eup %12631  ;;  %12651 = vpow2.f32 %v4519_v32  ;;  %v4602_v4 = vpack.c.bf16 %v12628_v52, %v12630_v34 }
 0x73b   : > { %4762 = vmatprep.mubr.bf16.mxu0 %v4600_v1  ;;  %11911 = vmatpush3.msk.msra.mxu0 %vm3558_vm4, %v13205_v13  ;;  %v12634_v35 = vpop.eup %12633  ;;  %12653 = vpow2.f32 %v4521_v18 }
 0x73c   : > { %v12636_v33 = vpop.eup %12635  ;;  %v4599_v8 = vpack.c.bf16 %v12626_v60, %v12634_v35  ;;  %12655 = vpow2.f32 %v4513_v12  ;;  %v19223_v60 = vld [vmem:[#allocation50_spill] sm:$0xff]  ;;  %v19225_v35 = vld [vmem:[#allocation52_spill] sm:$0xff] }
 0x73d   : > { %v12638_v16 = vpop.eup %12637  ;;  %v4604_v36 = vpack.c.bf16 %v12632_v30, %v12636_v33  ;;  %12657 = vpow2.f32 %v4525_v39  ;;  %v19224_v30 = vld [vmem:[#allocation51_spill] sm:$0xff] }
 0x73e   : > { %v12640_v15 = vpop.eup %12639  ;;  %12659 = vpow2.f32 %v4517_v54 }
 0x73f   : > { %v12642_v61 = vpop.eup %12641  ;;  %v4601_v14 = vpack.c.bf16 %v12640_v15, %v12638_v16 }
 0x740   : > { %4666 = vmatmul.mubr.bf16.gmra.mrb[104].mxu1 %v4597_v7  ;;  %v12644_v37 = vpop.eup %12643 }
 0x741   : > { %4673 = vmatprep.mubr.bf16.mxu1 %v4602_v4  ;;  %v12646_v13 = vpop.eup %12645 }
 0x742   : > { %4763 = vmatmul.mubr.bf16.gmra.mrb[148].mxu0 %v4599_v8  ;;  %v12648_v3 = vpop.eup %12647  ;;  %v4606_v41 = vpack.c.bf16 %v12644_v37, %v12646_v13 }
 0x743   : > { %4770 = vmatprep.mubr.bf16.mxu0 %v4604_v36  ;;  %v12650_v58 = vpop.eup %12649  ;;  %v19226_v36 = vld [vmem:[#allocation53_spill] sm:$0xff] }
 0x744   : > { %v12652_v51 = vpop.eup %12651  ;;  %v4603_v2 = vpack.c.bf16 %v12642_v61, %v12650_v58 }
 0x745   : > { %v4608_v53 = vpack.c.bf16 %v12648_v3, %v12652_v51  ;;  %v12654_v46 = vpop.eup %12653 }
 0x746   : > { %v12656_v55 = vpop.eup %12655 }
 0x747   : > { %v12658_v27 = vpop.eup %12657  ;;  %v4605_v1 = vpack.c.bf16 %v12654_v46, %v12656_v55  ;;  %v19227_v46 = vld [vmem:[#allocation54_spill] sm:$0xff] }
 0x748   : > { %4674 = vmatmul.mubr.bf16.gmra.mrb[108].mxu1 %v4601_v14  ;;  %v12660_v45 = vpop.eup %12659 }
 0x749   : > { %4681 = vmatprep.mubr.bf16.mxu1 %v4606_v41  ;;  %v4607_v24 = vpack.c.bf16 %v12658_v27, %v12660_v45 }
 0x74a   : > { %4771 = vmatmul.mubr.bf16.gmra.mrb[152].mxu0 %v4603_v2 }
 0x74b   : > { %4778 = vmatprep.mubr.bf16.mxu0 %v4608_v53 }
 0x750   : > { %4682 = vmatmul.mubr.bf16.gmra.mrb[112].mxu1 %v4605_v1 }
 0x752   : > { %4779 = vmatmul.mubr.bf16.gmra.mrb[156].mxu0 %v4607_v24 }
 0x764   : > { %v4365_v40 = vpop.xlane.xlu0 %4364 }
 0x765   : > { %v4433_v32 = vsub.f32 %v15350_v17, %v4365_v40  ;;  %v4434_v31 = vsub.f32 %v19223_v60, %v4365_v40  ;;  %v4435_v29 = vsub.f32 %v15368_v6, %v4365_v40  ;;  %v4436_v52 = vsub.f32 %v15396_v23, %v4365_v40 }
 0x766   : > { %v4370_v34 = vpop.xlane.xlu1 %4369 }
 0x767   : > { %v4529_v26 = vmul.f32 1.442695, %v4433_v32  ;;  %v4531_v42 = vmul.f32 1.442695, %v4434_v31  ;;  %v4533_v18 = vmul.f32 1.442695, %v4435_v29  ;;  %v4437_v12 = vsub.f32 %v19224_v30, %v4370_v34 }
 0x768   : > { %v4535_v7 = vmul.f32 1.442695, %v4436_v52  ;;  %v4438_v39 = vsub.f32 %v19225_v35, %v4370_v34  ;;  %v4439_v4 = vsub.f32 %v15373_v38, %v4370_v34  ;;  %v4440_v33 = vsub.f32 %v15418_v28, %v4370_v34  ;;  %v4375_v17 = vpop.xlane.xlu0 %4374 }
 0x769   : > { %12661 = vpow2.f32 %v4529_v26  ;;  %v4537_v8 = vmul.f32 1.442695, %v4437_v12  ;;  %v4441_v54 = vsub.f32 %v15362_v22, %v4375_v17  ;;  %v4442_v15 = vsub.f32 %v19226_v36, %v4375_v17 }
 0x76a   : > { %12663 = vpow2.f32 %v4531_v42  ;;  %v4539_v6 = vmul.f32 1.442695, %v4438_v39  ;;  %v4541_v23 = vmul.f32 1.442695, %v4439_v4  ;;  %v4543_v16 = vmul.f32 1.442695, %v4440_v33  ;;  %v4385_v13 = vpop.xlane.xlu1 %4384 }
 0x76b   : > { %12665 = vpow2.f32 %v4533_v18  ;;  %v4443_v38 = vsub.f32 %v15387_v47, %v4375_v17  ;;  %v4444_v28 = vsub.f32 %v15427_v49, %v4375_v17  ;;  %v4545_v37 = vmul.f32 1.442695, %v4441_v54  ;;  %v19228_v49 = vld [vmem:[#allocation55_spill] sm:$0xff] }
 0x76c   : > { %12667 = vpow2.f32 %v4535_v7  ;;  %v4380_v61 = vpop.xlane.xlu0 %4379  ;;  %v4547_v14 = vmul.f32 1.442695, %v4442_v15  ;;  %v4449_v55 = vsub.f32 %v19227_v46, %v4385_v13  ;;  %v4450_v1 = vsub.f32 %v19228_v49, %v4385_v13 }
 0x76d   : > { %12669 = vpow2.f32 %v4537_v8  ;;  %v4445_v3 = vsub.f32 %v15384_v59, %v4380_v61  ;;  %v4446_v58 = vsub.f32 %v15392_v5, %v4380_v61  ;;  %v4549_v51 = vmul.f32 1.442695, %v4443_v38 }
 0x76e   : > { %12671 = vpow2.f32 %v4539_v6  ;;  %v4447_v22 = vsub.f32 %v15412_v50, %v4380_v61  ;;  %v4551_v53 = vmul.f32 1.442695, %v4444_v28  ;;  %v4448_v47 = vsub.f32 %v15454_v56, %v4380_v61 }
 0x76f   : > { %12673 = vpow2.f32 %v4541_v23  ;;  %v4553_v45 = vmul.f32 1.442695, %v4445_v3  ;;  %v4451_v5 = vsub.f32 %v15400_v19, %v4385_v13  ;;  %v4555_v40 = vmul.f32 1.442695, %v4446_v58  ;;  %v15561_v19 = vpop.xlane.xlu1 %4394 }
 0x770   : > { %12675 = vpow2.f32 %v4543_v16  ;;  %v4390_v24 = vpop.xlane.xlu0 %4389  ;;  %v4557_v50 = vmul.f32 1.442695, %v4447_v22  ;;  %v4452_v31 = vsub.f32 %v15439_v21, %v4385_v13  ;;  %v4561_v29 = vmul.f32 1.442695, %v4449_v55 }
 0x771   : > { %12677 = vpow2.f32 %v4545_v37  ;;  %v4559_v56 = vmul.f32 1.442695, %v4448_v47  ;;  %v4563_v34 = vmul.f32 1.442695, %v4450_v1  ;;  %v4453_v26 = vsub.f32 %v15421_v63, %v4390_v24 }
 0x772   : > { %12679 = vpow2.f32 %v4547_v14  ;;  %v4565_v30 = vmul.f32 1.442695, %v4451_v5  ;;  %v4454_v12 = vsub.f32 %v15424_v43, %v4390_v24  ;;  %v4455_v35 = vsub.f32 %v15442_v20, %v4390_v24 }
 0x773   : > { %v12662_v41 = vpop.eup %12661  ;;  %12681 = vpow2.f32 %v4549_v51  ;;  %v4567_v33 = vmul.f32 1.442695, %v4452_v31  ;;  %v4456_v63 = vsub.f32 %v15470_v11, %v4390_v24  ;;  %v4458_v17 = vsub.f32 %v15408_v57, %v15561_v19 }
 0x774   : > { %v12664_v2 = vpop.eup %12663  ;;  %12683 = vpow2.f32 %v4551_v53  ;;  %v4400_v21 = vpop.xlane.xlu0 %4399  ;;  %v4569_v8 = vmul.f32 1.442695, %v4453_v26  ;;  %v4571_v43 = vmul.f32 1.442695, %v4454_v12  ;;  %v4460_v23 = vsub.f32 %v15463_v10, %v15561_v19 }
 0x775   : > { %v12666_v27 = vpop.eup %12665  ;;  %12685 = vpow2.f32 %v4553_v45  ;;  %v4462_v6 = vsub.f32 %v15450_v48, %v4400_v21  ;;  %v4573_v16 = vmul.f32 1.442695, %v4455_v35  ;;  %v4575_v11 = vmul.f32 1.442695, %v4456_v63 }
 0x776   : > { %v12668_v59 = vpop.eup %12667  ;;  %12687 = vpow2.f32 %v4555_v40  ;;  %v4464_v36 = vsub.f32 %v15476_v62, %v4400_v21  ;;  %v4579_v57 = vmul.f32 1.442695, %v4458_v17  ;;  %v4461_v61 = vsub.f32 %v15447_v0, %v4400_v21 }
 0x777   : > { %v12670_v32 = vpop.eup %12669  ;;  %12689 = vpow2.f32 %v4557_v50  ;;  %v4457_v48 = vsub.f32 %v15405_v44, %v15561_v19  ;;  %v4587_v28 = vmul.f32 1.442695, %v4462_v6  ;;  %v4583_v13 = vmul.f32 1.442695, %v4460_v23 }
 0x778   : > { %v12672_v60 = vpop.eup %12671  ;;  %v4609_v7 = vpack.c.bf16 %v12670_v32, %v12662_v41  ;;  %12691 = vpow2.f32 %v4559_v56  ;;  %v4463_v10 = vsub.f32 %v15466_v25, %v4400_v21  ;;  %v4591_v14 = vmul.f32 1.442695, %v4464_v36 }
 0x779   : > { %v12674_v52 = vpop.eup %12673  ;;  %v4610_v42 = vpack.c.bf16 %v12672_v60, %v12664_v2  ;;  %12693 = vpow2.f32 %v4561_v29  ;;  %v4459_v58 = vsub.f32 %v15434_v9, %v15561_v19  ;;  %v4585_v0 = vmul.f32 1.442695, %v4461_v61 }
 0x77a   : > { %v12676_v18 = vpop.eup %12675  ;;  %v4611_v4 = vpack.c.bf16 %v12674_v52, %v12666_v27  ;;  %12695 = vpow2.f32 %v4563_v34  ;;  %v4577_v22 = vmul.f32 1.442695, %v4457_v48  ;;  %v4589_v53 = vmul.f32 1.442695, %v4463_v10 }
 0x77b   : > { %4689 = vmatprep.mubr.bf16.mxu1 %v4610_v42  ;;  %v4612_v39 = vpack.c.bf16 %v12676_v18, %v12668_v59  ;;  %v12678_v20 = vpop.eup %12677  ;;  %12697 = vpow2.f32 %v4565_v30  ;;  %v4581_v27 = vmul.f32 1.442695, %v4459_v58 }
 0x77c   : > { %4690 = vmatmul.mubr.bf16.gmra.mrb[116].mxu1 %v4609_v7  ;;  %v12680_v54 = vpop.eup %12679  ;;  %12699 = vpow2.f32 %v4567_v33 }
 0x77d   : > { %4786 = vmatprep.mubr.bf16.mxu0 %v4612_v39  ;;  %v12682_v15 = vpop.eup %12681  ;;  %12701 = vpow2.f32 %v4569_v8 }
 0x77e   : > { %4787 = vmatmul.mubr.bf16.gmra.mrb[160].mxu0 %v4611_v4  ;;  %v12684_v38 = vpop.eup %12683  ;;  %12703 = vpow2.f32 %v4571_v43 }
 0x77f   : > { %v12686_v37 = vpop.eup %12685  ;;  %12705 = vpow2.f32 %v4573_v16 }
 0x780   : > { %v12688_v3 = vpop.eup %12687  ;;  %12707 = vpow2.f32 %v4575_v11  ;;  %v4613_v44 = vpack.c.bf16 %v12686_v37, %v12678_v20 }
 0x781   : > { %v12690_v62 = vpop.eup %12689  ;;  %12709 = vpow2.f32 %v4579_v57  ;;  %v4614_v41 = vpack.c.bf16 %v12688_v3, %v12680_v54 }
 0x782   : > { %v12692_v51 = vpop.eup %12691  ;;  %12711 = vpow2.f32 %v4587_v28  ;;  %v4615_v55 = vpack.c.bf16 %v12690_v62, %v12682_v15 }
 0x783   : > { %v12694_v2 = vpop.eup %12693  ;;  %12713 = vpow2.f32 %v4583_v13  ;;  %4697 = vmatprep.mubr.bf16.mxu1 %v4614_v41  ;;  %v4616_v46 = vpack.c.bf16 %v12692_v51, %v12684_v38 }
 0x784   : > { %v12696_v25 = vpop.eup %12695  ;;  %12715 = vpow2.f32 %v4591_v14  ;;  %4698 = vmatmul.mubr.bf16.gmra.mrb[120].mxu1 %v4613_v44 }
 0x785   : > { %v12698_v47 = vpop.eup %12697  ;;  %12717 = vpow2.f32 %v4585_v0  ;;  %4794 = vmatprep.mubr.bf16.mxu0 %v4616_v46 }
 0x786   : > { %v12700_v9 = vpop.eup %12699  ;;  %12719 = vpow2.f32 %v4577_v22  ;;  %4795 = vmatmul.mubr.bf16.gmra.mrb[164].mxu0 %v4615_v55 }
 0x787   : > { %v12702_v49 = vpop.eup %12701  ;;  %12721 = vpow2.f32 %v4589_v53 }
 0x788   : > { %v12704_v1 = vpop.eup %12703  ;;  %12723 = vpow2.f32 %v4581_v27  ;;  %v4617_v5 = vpack.c.bf16 %v12702_v49, %v12694_v2 }
 0x789   : > { %v12706_v45 = vpop.eup %12705  ;;  %v4618_v24 = vpack.c.bf16 %v12704_v1, %v12696_v25 }
 0x78a   : > { %v12708_v59 = vpop.eup %12707  ;;  %v4619_v60 = vpack.c.bf16 %v12706_v45, %v12698_v47 }
 0x78b   : > { %v12710_v40 = vpop.eup %12709  ;;  %4705 = vmatprep.mubr.bf16.mxu1 %v4618_v24  ;;  %v4620_v32 = vpack.c.bf16 %v12708_v59, %v12700_v9 }
 0x78c   : > { %v12712_v50 = vpop.eup %12711  ;;  %4706 = vmatmul.mubr.bf16.gmra.mrb[124].mxu1 %v4617_v5 }
 0x78d   : > { %v12714_v31 = vpop.eup %12713  ;;  %4802 = vmatprep.mubr.bf16.mxu0 %v4620_v32  ;;  %v4622_v29 = vpack.c.bf16 %v12712_v50, %v12710_v40 }
 0x78e   : > { %v12716_v56 = vpop.eup %12715  ;;  %4803 = vmatmul.mubr.bf16.gmra.mrb[168].mxu0 %v4619_v60 }
 0x78f   : > { %v12718_v52 = vpop.eup %12717  ;;  %4713 = vmatprep.mubr.bf16.mxu1 %v4622_v29  ;;  %v4624_v34 = vpack.c.bf16 %v12716_v56, %v12714_v31 }
 0x790   : > { %v12720_v26 = vpop.eup %12719 }
 0x791   : > { %v12722_v42 = vpop.eup %12721  ;;  %4810 = vmatprep.mubr.bf16.mxu0 %v4624_v34  ;;  %v4621_v18 = vpack.c.bf16 %v12718_v52, %v12720_v26 }
 0x792   : > { %v12724_v30 = vpop.eup %12723 }
 0x793   : > { %v4623_v19 = vpack.c.bf16 %v12722_v42, %v12724_v30 }
 0x794   : > { %4714 = vmatmul.mubr.bf16.gmra.mrb[128].mxu1 %v4621_v18 }
 0x796   : > { %4811 = vmatmul.mubr.bf16.gmra.mrb[172].mxu0 %v4623_v19 }
 0x80b   : > { %v11296_v12 = vpop.f32.mrb[100].mxu1 }
 0x80c   : > { %v11297_v7 = vpop.f32.mrb[101].mxu1 }
 0x80d   : > { %v11298_v35 = vadd.f32 %v11297_v7, %v11296_v12  ;;  %v11299_v21 = vpop.f32.mrb[102].mxu1  ;;  %v11360_v39 = vpop.f32.mrb[144].mxu0 }
 0x80e   : > { %v11300_v4 = vpop.f32.mrb[103].mxu1  ;;  %v11361_v33 = vpop.f32.mrb[145].mxu0 }
 0x80f   : > { %v11301_v63 = vadd.f32 %v11300_v4, %v11299_v21  ;;  %v11362_v17 = vadd.f32 %v11361_v33, %v11360_v39  ;;  %v11363_v8 = vpop.f32.mrb[146].mxu0 }
 0x810   : > { %v11364_v43 = vpop.f32.mrb[147].mxu0 }
 0x811   : > { %v15578_v6 = vadd.f32 %v11362_v17, %v11298_v35  ;;  %v11365_v20 = vadd.f32 %v11364_v43, %v11363_v8 }
 0x813   : > { %v4819_v23 = vadd.f32 1e-09, %v15578_v6  ;;  %v15581_v16 = vadd.f32 %v11365_v20, %v11301_v63  ;;  %v11302_v54 = vpop.f32.mrb[104].mxu1 }
 0x814   : > { %v11303_v11 = vpop.f32.mrb[105].mxu1 }
 0x815   : > { %12725 = vrcp.f32 %v4819_v23  ;;  %v4820_v36 = vadd.f32 1e-09, %v15581_v16  ;;  %v11304_v15 = vadd.f32 %v11303_v11, %v11302_v54  ;;  %v11305_v57 = vpop.f32.mrb[106].mxu1  ;;  %v11366_v61 = vpop.f32.mrb[148].mxu0 }
 0x816   : > { %v11306_v38 = vpop.f32.mrb[107].mxu1  ;;  %v11367_v48 = vpop.f32.mrb[149].mxu0 }
 0x817   : > { %12727 = vrcp.f32 %v4820_v36  ;;  %v11307_v28 = vadd.f32 %v11306_v38, %v11305_v57  ;;  %v11368_v37 = vadd.f32 %v11367_v48, %v11366_v61  ;;  %v11369_v13 = vpop.f32.mrb[150].mxu0 }
 0x818   : > { %v11370_v10 = vpop.f32.mrb[151].mxu0 }
 0x819   : > { %v15584_v3 = vadd.f32 %v11368_v37, %v11304_v15  ;;  %v11371_v14 = vadd.f32 %v11370_v10, %v11369_v13 }
 0x81b   : > { %v4821_v62 = vadd.f32 1e-09, %v15584_v3  ;;  %v15587_v58 = vadd.f32 %v11371_v14, %v11307_v28  ;;  %v11308_v0 = vpop.f32.mrb[108].mxu1 }
 0x81c   : > { %v11309_v41 = vpop.f32.mrb[109].mxu1 }
 0x81d   : > { %12729 = vrcp.f32 %v4821_v62  ;;  %v4822_v51 = vadd.f32 1e-09, %v15587_v58  ;;  %v11310_v22 = vadd.f32 %v11309_v41, %v11308_v0  ;;  %v11311_v44 = vpop.f32.mrb[110].mxu1  ;;  %v11372_v2 = vpop.f32.mrb[152].mxu0 }
 0x81e   : > { %v11312_v53 = vpop.f32.mrb[111].mxu1  ;;  %v11373_v46 = vpop.f32.mrb[153].mxu0 }
 0x81f   : > { %v12726_v25 = vpop.eup %12725  ;;  %v11313_v55 = vadd.f32 %v11312_v53, %v11311_v44  ;;  %v11374_v47 = vadd.f32 %v11373_v46, %v11372_v2  ;;  %v11375_v27 = vpop.f32.mrb[154].mxu0  ;;  %12731 = vrcp.f32 %v4822_v51 }
 0x820   : > { %v11376_v9 = vpop.f32.mrb[155].mxu0  ;;  %4867 = vrot.lane.b32.xlu1 %v12726_v25, %s18839_s28 }
 0x821   : > { %v12728_v49 = vpop.eup %12727  ;;  %v15591_v1 = vadd.f32 %v11374_v47, %v11310_v22  ;;  %v11377_v45 = vadd.f32 %v11376_v9, %v11375_v27 }
 0x822   : > { %4869 = vrot.lane.b32.xlu0 %v12728_v49, %s18839_s28 }
 0x823   : > { %v4823_v24 = vadd.f32 1e-09, %v15591_v1  ;;  %v15595_v59 = vadd.f32 %v11377_v45, %v11313_v55  ;;  %v11314_v5 = vpop.f32.mrb[112].mxu1 }
 0x824   : > { %v11315_v40 = vpop.f32.mrb[113].mxu1 }
 0x825   : > { %12733 = vrcp.f32 %v4823_v24  ;;  %v4824_v32 = vadd.f32 1e-09, %v15595_v59  ;;  %v11316_v50 = vadd.f32 %v11315_v40, %v11314_v5  ;;  %v11317_v60 = vpop.f32.mrb[114].mxu1  ;;  %v11378_v31 = vpop.f32.mrb[156].mxu0 }
 0x826   : > { %v11318_v29 = vpop.f32.mrb[115].mxu1  ;;  %v11379_v56 = vpop.f32.mrb[157].mxu0 }
 0x827   : > { %v12730_v52 = vpop.eup %12729  ;;  %12735 = vrcp.f32 %v4824_v32  ;;  %v11319_v34 = vadd.f32 %v11318_v29, %v11317_v60  ;;  %v11380_v26 = vadd.f32 %v11379_v56, %v11378_v31  ;;  %v11381_v42 = vpop.f32.mrb[158].mxu0 }
 0x828   : > { %v11382_v18 = vpop.f32.mrb[159].mxu0  ;;  %4871 = vrot.lane.b32.xlu1 %v12730_v52, %s18839_s28 }
 0x829   : > { %v15599_v30 = vadd.f32 %v11380_v26, %v11316_v50  ;;  %v11383_v19 = vadd.f32 %v11382_v18, %v11381_v42  ;;  %v12732_v12 = vpop.eup %12731 }
 0x82b   : > { %v4825_v7 = vadd.f32 1e-09, %v15599_v30  ;;  %v15602_v35 = vadd.f32 %v11383_v19, %v11319_v34 }
 0x82c   : > { %4873 = vrot.lane.b32.xlu1 %v12732_v12, %s18839_s28 }
 0x82d   : > { %12737 = vrcp.f32 %v4825_v7  ;;  %v4826_v21 = vadd.f32 1e-09, %v15602_v35 }
 0x82f   : > { %v12734_v39 = vpop.eup %12733  ;;  %12739 = vrcp.f32 %v4826_v21 }
 0x830   : > { %4875 = vrot.lane.b32.xlu0 %v12734_v39, %s18839_s28 }
 0x831   : > { %v12736_v4 = vpop.eup %12735 }
 0x832   : > { %4877 = vrot.lane.b32.xlu1 %v12736_v4, %s18839_s28 }
 0x837   : > { %v12738_v33 = vpop.eup %12737 }
 0x838   : > { %4879 = vrot.lane.b32.xlu0 %v12738_v33, %s18839_s28 }
 0x839   : > { %v12740_v63 = vpop.eup %12739 }
 0x83a   : > { %4881 = vrot.lane.b32.xlu1 %v12740_v63, %s18839_s28 }
 0x84f   : > { %v11320_v17 = vpop.f32.mrb[116].mxu1 }
 0x850   : > { %v11321_v8 = vpop.f32.mrb[117].mxu1 }
 0x851   : > { %v11384_v43 = vpop.f32.mrb[160].mxu0  ;;  %v11322_v20 = vadd.f32 %v11321_v8, %v11320_v17  ;;  %v11323_v23 = vpop.f32.mrb[118].mxu1 }
 0x852   : > { %v11385_v54 = vpop.f32.mrb[161].mxu0  ;;  %v11324_v11 = vpop.f32.mrb[119].mxu1 }
 0x853   : > { %v11386_v36 = vadd.f32 %v11385_v54, %v11384_v43  ;;  %v11387_v15 = vpop.f32.mrb[162].mxu0  ;;  %v11325_v57 = vadd.f32 %v11324_v11, %v11323_v23 }
 0x854   : > { %v11388_v61 = vpop.f32.mrb[163].mxu0 }
 0x855   : > { %v15610_v38 = vadd.f32 %v11386_v36, %v11322_v20  ;;  %v11389_v48 = vadd.f32 %v11388_v61, %v11387_v15 }
 0x857   : > { %v4827_v28 = vadd.f32 1e-09, %v15610_v38  ;;  %v15613_v37 = vadd.f32 %v11389_v48, %v11325_v57  ;;  %v11326_v10 = vpop.f32.mrb[120].mxu1 }
 0x858   : > { %v11327_v14 = vpop.f32.mrb[121].mxu1 }
 0x859   : > { %12741 = vrcp.f32 %v4827_v28  ;;  %v4828_v13 = vadd.f32 1e-09, %v15613_v37  ;;  %v11390_v62 = vpop.f32.mrb[164].mxu0  ;;  %v11328_v0 = vadd.f32 %v11327_v14, %v11326_v10  ;;  %v11329_v41 = vpop.f32.mrb[122].mxu1 }
 0x85a   : > { %v11391_v51 = vpop.f32.mrb[165].mxu0  ;;  %v11330_v22 = vpop.f32.mrb[123].mxu1 }
 0x85b   : > { %12743 = vrcp.f32 %v4828_v13  ;;  %v11392_v44 = vadd.f32 %v11391_v51, %v11390_v62  ;;  %v11393_v2 = vpop.f32.mrb[166].mxu0  ;;  %v11331_v53 = vadd.f32 %v11330_v22, %v11329_v41 }
 0x85c   : > { %v11394_v46 = vpop.f32.mrb[167].mxu0 }
 0x85d   : > { %v15616_v25 = vadd.f32 %v11392_v44, %v11328_v0  ;;  %v11395_v55 = vadd.f32 %v11394_v46, %v11393_v2 }
 0x85f   : > { %v4829_v27 = vadd.f32 1e-09, %v15616_v25  ;;  %v15619_v9 = vadd.f32 %v11395_v55, %v11331_v53  ;;  %v11332_v49 = vpop.f32.mrb[124].mxu1 }
 0x860   : > { %v11333_v45 = vpop.f32.mrb[125].mxu1 }
 0x861   : > { %12745 = vrcp.f32 %v4829_v27  ;;  %v4830_v5 = vadd.f32 1e-09, %v15619_v9  ;;  %v11396_v40 = vpop.f32.mrb[168].mxu0  ;;  %v11334_v32 = vadd.f32 %v11333_v45, %v11332_v49  ;;  %v11335_v50 = vpop.f32.mrb[126].mxu1 }
 0x862   : > { %v11397_v60 = vpop.f32.mrb[169].mxu0  ;;  %v11336_v31 = vpop.f32.mrb[127].mxu1 }
 0x863   : > { %v12742_v47 = vpop.eup %12741  ;;  %12747 = vrcp.f32 %v4830_v5  ;;  %v11398_v29 = vadd.f32 %v11397_v60, %v11396_v40  ;;  %v11399_v56 = vpop.f32.mrb[170].mxu0  ;;  %v11337_v52 = vadd.f32 %v11336_v31, %v11335_v50  ;;  %v12347_v40 = vld [vmem:[%s13623_s9 + $0x30] sm:$0xff]  }
 0x864   : > { %4883 = vrot.lane.b32.xlu0 %v12742_v47, %s18839_s28  ;;  %v11400_v34 = vpop.f32.mrb[171].mxu0  ;;  %11936 = vmatprep.subr.bf16.mxu0 %v12347_v40 }
 0x865   : > { %v12744_v24 = vpop.eup %12743  ;;  %v15624_v26 = vadd.f32 %v11398_v29, %v11334_v32  ;;  %v11401_v42 = vadd.f32 %v11400_v34, %v11399_v56  ;;  %v12348_v29 = vld [vmem:[%s13623_s9 + $0x38] sm:$0xff]   ;;  %s19261_s9 = sld [smem:[#allocation20_spill]] }
 0x866   : > { %4885 = vrot.lane.b32.xlu1 %v12744_v24, %s18839_s28 }
 0x867   : > { %v4831_v18 = vadd.f32 1e-09, %v15624_v26  ;;  %v15627_v19 = vadd.f32 %v11401_v42, %v11337_v52  ;;  %v11338_v12 = vpop.f32.mrb[128].mxu1 }
 0x868   : > { %v11339_v7 = vpop.f32.mrb[129].mxu1 }
 0x869   : > { %12749 = vrcp.f32 %v4831_v18  ;;  %v4832_v21 = vadd.f32 1e-09, %v15627_v19  ;;  %v11402_v39 = vpop.f32.mrb[172].mxu0  ;;  %v11340_v4 = vadd.f32 %v11339_v7, %v11338_v12  ;;  %v11341_v33 = vpop.f32.mrb[130].mxu1 }
 0x86a   : > { %v11403_v63 = vpop.f32.mrb[173].mxu0  ;;  %v11342_v17 = vpop.f32.mrb[131].mxu1 }
 0x86b   : > { %v12746_v8 = vpop.eup %12745  ;;  %12751 = vrcp.f32 %v4832_v21  ;;  %v11404_v43 = vadd.f32 %v11403_v63, %v11402_v39  ;;  %v11405_v20 = vpop.f32.mrb[174].mxu0  ;;  %v11343_v23 = vadd.f32 %v11342_v17, %v11341_v33 }
 0x86c   : > { %4887 = vrot.lane.b32.xlu0 %v12746_v8, %s18839_s28  ;;  %v11406_v54 = vpop.f32.mrb[175].mxu0 }
 0x86d   : > { %v12748_v11 = vpop.eup %12747  ;;  %v15631_v36 = vadd.f32 %v11404_v43, %v11340_v4  ;;  %v11407_v15 = vadd.f32 %v11406_v54, %v11405_v20  ;;  %v19230_v54 = vld [vmem:[#allocation89_spill] sm:$0xff] }
 0x86e   : > { %4889 = vrot.lane.b32.xlu1 %v12748_v11, %s18839_s28  ;;  %v15695_v11 = vld [vmem:[%s13638_s3 + $0x2] ss:$0 sm:$0xff] }
 0x86f   : > { %v4833_v57 = vadd.f32 1e-09, %v15631_v36  ;;  %v15635_v61 = vadd.f32 %v11407_v15, %v11343_v23  ;;  %v19229_v23 = vld [vmem:[#allocation75_spill] sm:$0xff]  ;;  %v19232_v15 = vld [vmem:[#allocation24_spill] sm:$0xff] }
 0x871   : > { %12753 = vrcp.f32 %v4833_v57  ;;  %v4834_v48 = vadd.f32 1e-09, %v15635_v61 }
 0x873   : > { %v12750_v28 = vpop.eup %12749  ;;  %12755 = vrcp.f32 %v4834_v48 }
 0x874   : > { %4891 = vrot.lane.b32.xlu0 %v12750_v28, %s18839_s28 }
 0x875   : > { %v12752_v13 = vpop.eup %12751 }
 0x876   : > { %4893 = vrot.lane.b32.xlu1 %v12752_v13, %s18839_s28 }
 0x87b   : > { %v12754_v10 = vpop.eup %12753 }
 0x87c   : > { %4895 = vrot.lane.b32.xlu0 %v12754_v10, %s18839_s28 }
 0x87d   : > { %v12756_v14 = vpop.eup %12755 }
 0x87e   : > { %4897 = vrot.lane.b32.xlu1 %v12756_v14, %s18839_s28  ;;  %s19282_s28 = sld [smem:[#allocation21_spill]] }
 0x892   : > { %v4868_v62 = vpop.permute.xlu1 %4867 }
 0x893   : > { %11912 = vmatprep.mubr.msk.f32.mxu0 %vm3525_vm5, %v4868_v62  ;;  %v19233_v62 = vld [vmem:[#allocation36_spill] sm:$0xff] }
 0x894   : > { %v4870_v0 = vpop.permute.xlu0 %4869 }
 0x895   : > { %11913 = vmatmul.mubr.msk.f32.vlgmr.msra.gmra.mrb[176].mxu0 %vm3525_vm5, %v4870_v0  ;;  %v19234_v0 = vld [vmem:[#allocation23_spill] sm:$0xff] }
 0x896   : > { %11937 = vmatpush3.bf16.msra.mxu0 %v12347_v40  ;;  %v19239_v40 = vld [vmem:[#allocation41_spill] sm:$0xff] }
 0x897   : > { %11938 = vmatprep.subr.bf16.mxu0 %v12348_v29 }
 0x89a   : > { %v4872_v41 = vpop.permute.xlu1 %4871  ;;  %11939 = vmatpush3.bf16.msra.mxu0 %v12348_v29 }
 0x89b   : > { %11915 = vmatprep.mubr.msk.f32.mxu0 %vm3525_vm5, %v4872_v41  ;;  %v3710_v41 = vmul.f32 %v19234_v0, %v19233_v62 }
 0x89e   : > { %v4874_v51 = vpop.permute.xlu1 %4873 }
 0x89f   : > { %11916 = vmatmul.mubr.msk.f32.gmra.mrb[178].mxu0 %vm3525_vm5, %v4874_v51  ;;  %v19235_v51 = vld [vmem:[#allocation82_spill] sm:$0xff] }
 0x8a2   : > { %v4876_v22 = vpop.permute.xlu0 %4875 }
 0x8a3   : > { %11918 = vmatprep.mubr.msk.f32.mxu0 %vm3525_vm5, %v4876_v22  ;;  %v19236_v22 = vld [vmem:[#allocation26_spill] sm:$0xff] }
 0x8a4   : > { %v4878_v44 = vpop.permute.xlu1 %4877 }
 0x8a5   : > { %11919 = vmatmul.mubr.msk.f32.gmra.mrb[180].mxu0 %vm3525_vm5, %v4878_v44  ;;  %v3709_v44 = vmul.f32 %v19236_v22, %v19235_v51  ;;  %v19254_v51 = vld [vmem:[#allocation34_spill] sm:$0xff] }
 0x8aa   : > { %v4880_v2 = vpop.permute.xlu0 %4879 }
 0x8ab   : > { %11921 = vmatprep.mubr.msk.f32.mxu1 %vm3525_vm5, %v4880_v2 }
 0x8ac   : > { %v4882_v53 = vpop.permute.xlu1 %4881 }
 0x8ad   : > { %11922 = vmatmul.mubr.msk.f32.vlgmr.msra.gmra.mrb[132].mxu1 %vm3525_vm5, %v4882_v53 }
 0x8d6   : > { %v4884_v46 = vpop.permute.xlu0 %4883 }
 0x8d7   : > { %11924 = vmatprep.mubr.msk.f32.mxu1 %vm3525_vm5, %v4884_v46 }
 0x8d8   : > { %v4886_v55 = vpop.permute.xlu1 %4885 }
 0x8d9   : > { %11925 = vmatmul.mubr.msk.f32.gmra.mrb[134].mxu1 %vm3525_vm5, %v4886_v55 }
 0x8de   : > { %v4888_v47 = vpop.permute.xlu0 %4887 }
 0x8df   : > { %11927 = vmatprep.mubr.msk.f32.mxu1 %vm3525_vm5, %v4888_v47 }
 0x8e0   : > { %v4890_v27 = vpop.permute.xlu1 %4889 }
 0x8e1   : > { %11928 = vmatmul.mubr.msk.f32.gmra.mrb[136].mxu1 %vm3525_vm5, %v4890_v27 }
 0x8e6   : > { %v4892_v49 = vpop.permute.xlu0 %4891 }
 0x8e7   : > { %11930 = vmatprep.mubr.msk.f32.mxu1 %vm3525_vm5, %v4892_v49  ;;  %v19237_v49 = vld [vmem:[#allocation78_spill] sm:$0xff] }
 0x8e8   : > { %v4894_v45 = vpop.permute.xlu1 %4893 }
 0x8e9   : > { %11931 = vmatmul.mubr.msk.f32.gmra.mrb[138].mxu1 %vm3525_vm5, %v4894_v45  ;;  %v19238_v45 = vld [vmem:[#allocation25_spill] sm:$0xff] }
 0x8ee   : > { %v4896_v24 = vpop.permute.xlu0 %4895 }
 0x8ef   : > { %11933 = vmatprep.mubr.msk.f32.mxu1 %vm3525_vm5, %v4896_v24  ;;  %v3712_v24 = vmul.f32 %v19238_v45, %v19237_v49 }
 0x8f0   : > { %v4898_v5 = vpop.permute.xlu1 %4897 }
 0x8f1   : > { %11934 = vmatmul.mubr.msk.f32.gmra.mrb[140].mxu1 %vm3525_vm5, %v4898_v5 }
 0x968   : > { %v11914_v32 = vpop.f32.mrb[176].mxu0 }
 0x969   : > { %v5077_v50 = vmul.f32 %v11914_v32, %v15581_v16  ;;  %v4997_v60 = vpop.f32.mrb[177].mxu0  ;;  %v19240_v32 = vld [vmem:[#allocation28_spill] sm:$0xff] }
 0x96a   : > { %v5076_v31 = vmul.f32 %v4997_v60, %v15578_v6 }
 0x96b   : > { %5110 = vrot.lane.b32.xlu1 %v5077_v50, %s18841_s13  ;;  %v3711_v50 = vmul.f32 %v19240_v32, %v19239_v40  ;;  %v19258_v40 = vld [vmem:[#allocation40_spill] sm:$0xff] }
 0x96c   : > { %5108 = vrot.lane.b32.xlu0 %v5076_v31, %s18841_s13 }
 0x972   : > { %v11917_v56 = vpop.f32.mrb[178].mxu0 }
 0x973   : > { %v5079_v52 = vmul.f32 %v11917_v56, %v15587_v58  ;;  %v5007_v34 = vpop.f32.mrb[179].mxu0 }
 0x974   : > { %v5078_v42 = vmul.f32 %v5007_v34, %v15584_v3 }
 0x975   : > { %5114 = vrot.lane.b32.xlu1 %v5079_v52, %s18841_s13 }
 0x976   : > { %5112 = vrot.lane.b32.xlu0 %v5078_v42, %s18841_s13 }
 0x978   : > { %v11920_v16 = vpop.f32.mrb[180].mxu0 }
 0x979   : > { %v5081_v6 = vmul.f32 %v11920_v16, %v15595_v59  ;;  %v5017_v18 = vpop.f32.mrb[181].mxu0  ;;  %v19241_v16 = vld [vmem:[#allocation39_spill] sm:$0xff] }
 0x97a   : > { %v5080_v12 = vmul.f32 %v5017_v18, %v15591_v1 }
 0x97b   : > { %5118 = vrot.lane.b32.xlu1 %v5081_v6, %s18841_s13  ;;  %v19242_v6 = vld [vmem:[#allocation27_spill] sm:$0xff] }
 0x97c   : > { %5116 = vrot.lane.b32.xlu0 %v5080_v12, %s18841_s13  ;;  %v3714_v18 = vmul.f32 %v19242_v6, %v19241_v16  ;;  %v19243_v12 = vld [vmem:[#allocation76_spill] sm:$0xff] }
 0x980   : > { %v11923_v7 = vpop.f32.mrb[132].mxu1 }
 0x981   : > { %v5083_v58 = vmul.f32 %v11923_v7, %v15602_v35  ;;  %v5027_v21 = vpop.f32.mrb[133].mxu1  ;;  %v19244_v7 = vld [vmem:[#allocation30_spill] sm:$0xff] }
 0x982   : > { %v5082_v3 = vmul.f32 %v5027_v21, %v15599_v30 }
 0x983   : > { %5122 = vrot.lane.b32.xlu1 %v5083_v58, %s18841_s13  ;;  %v3713_v58 = vmul.f32 %v19244_v7, %v19243_v12 }
 0x984   : > { %5120 = vrot.lane.b32.xlu0 %v5082_v3, %s18841_s13 }
 0x9ac   : > { %v11926_v39 = vpop.f32.mrb[134].mxu1 }
 0x9ad   : > { %v5085_v59 = vmul.f32 %v11926_v39, %v15613_v37  ;;  %v5037_v4 = vpop.f32.mrb[135].mxu1 }
 0x9ae   : > { %v5084_v1 = vmul.f32 %v5037_v4, %v15610_v38 }
 0x9af   : > { %5126 = vrot.lane.b32.xlu1 %v5085_v59, %s18841_s13 }
 0x9b0   : > { %5124 = vrot.lane.b32.xlu0 %v5084_v1, %s18841_s13 }
 0x9b4   : > { %v11929_v33 = vpop.f32.mrb[136].mxu1 }
 0x9b5   : > { %v5087_v35 = vmul.f32 %v11929_v33, %v15619_v9  ;;  %v5047_v63 = vpop.f32.mrb[137].mxu1 }
 0x9b6   : > { %v5086_v30 = vmul.f32 %v5047_v63, %v15616_v25  ;;  %v19246_v63 = vld [vmem:[#allocation29_spill] sm:$0xff] }
 0x9b7   : > { %5130 = vrot.lane.b32.xlu1 %v5087_v35, %s18841_s13  ;;  %v19245_v35 = vld [vmem:[#allocation35_spill] sm:$0xff] }
 0x9b8   : > { %5128 = vrot.lane.b32.xlu0 %v5086_v30, %s18841_s13  ;;  %v3716_v30 = vmul.f32 %v19246_v63, %v19245_v35  ;;  %v13208_v63 = vld [vmem:[#allocation2 + $0x8] sm:$0xff] }
 0x9bc   : > { %v11932_v17 = vpop.f32.mrb[138].mxu1 }
 0x9bd   : > { %v5089_v37 = vmul.f32 %v11932_v17, %v15627_v19  ;;  %v5057_v8 = vpop.f32.mrb[139].mxu1  ;;  %v3708_v19 = vmul.f32 %v19230_v54, %v19229_v23  ;;  %v19247_v17 = vld [vmem:[#allocation81_spill] sm:$0xff] }
 0x9be   : > { %v5088_v38 = vmul.f32 %v5057_v8, %v15624_v26  ;;  %v19231_v26 = vld [vmem:[#allocation83_spill] sm:$0xff] }
 0x9bf   : > { %5134 = vrot.lane.b32.xlu1 %v5089_v37, %s18841_s13  ;;  %v3707_v57 = vmul.f32 %v19232_v15, %v19231_v26  ;;  %v19248_v37 = vld [vmem:[#allocation38_spill] sm:$0xff]  ;;  %v19250_v26 = vld [vmem:[#allocation32_spill] sm:$0xff] }
 0x9c0   : > { %5132 = vrot.lane.b32.xlu0 %v5088_v38, %s18841_s13  ;;  %v3715_v8 = vmul.f32 %v19248_v37, %v19247_v17 }
 0x9c4   : > { %v11935_v43 = vpop.f32.mrb[140].mxu1 }
 0x9c5   : > { %v5091_v9 = vmul.f32 %v11935_v43, %v15635_v61  ;;  %v5067_v20 = vpop.f32.mrb[141].mxu1 }
 0x9c6   : > { %v5090_v25 = vmul.f32 %v5067_v20, %v15631_v36 }
 0x9c7   : > { %5138 = vrot.lane.b32.xlu1 %v5091_v9, %s18841_s13 }
 0x9c8   : > { %5136 = vrot.lane.b32.xlu0 %v5090_v25, %s18841_s13 }
 0x9dd   : > { %v5111_v48 = vpop.permute.xlu1 %5110 }
 0x9de   : > { %v5157_v28 = vsel %vm2564_vm3, %v3708_v19, %v5111_v48  ;;  %v5109_v13 = vpop.permute.xlu0 %5108  ;;  %v19249_v19 = vld [vmem:[#allocation84_spill] sm:$0xff]  ;;  %v19252_v48 = vld [vmem:[#allocation31_spill] sm:$0xff] }
 0x9df   : > { %v5179_v61 = vadd.f32 %v15695_v11, %v5157_v28  ;;  %v5156_v36 = vsel %vm2564_vm3, %v3707_v57, %v5109_v13  ;;  %v3718_v15 = vmul.f32 %v19250_v26, %v19249_v19  ;;  %v19251_v57 = vld [vmem:[#allocation80_spill] sm:$0xff] }
 0x9e0   : > { %v5178_v10 = vadd.f32 %v15695_v11, %v5156_v36  ;;  %v3717_v28 = vmul.f32 %v19252_v48, %v19251_v57 }
 0x9e2   : > { %v5194_v14 = vpack.c.bf16 %v5179_v61, %v5178_v10 }
 0x9e4   : > { %11940 = vmatprep.mubr.msk.bf16.mxu0 %vm1630_vm2, %v5194_v14 }
 0x9e7   : > { %v5115_v2 = vpop.permute.xlu1 %5114 }
 0x9e8   : > { %v5159_v53 = vsel %vm2564_vm3, %v3710_v41, %v5115_v2  ;;  %v5113_v46 = vpop.permute.xlu0 %5112  ;;  %v19253_v41 = vld [vmem:[#allocation86_spill] sm:$0xff]  ;;  %v19256_v2 = vld [vmem:[#allocation33_spill] sm:$0xff] }
 0x9e9   : > { %v5181_v55 = vadd.f32 %v15695_v11, %v5159_v53  ;;  %v5158_v47 = vsel %vm2564_vm3, %v3709_v44, %v5113_v46  ;;  %v3720_v22 = vmul.f32 %v19254_v51, %v19253_v41  ;;  %v19255_v44 = vld [vmem:[#allocation85_spill] sm:$0xff] }
 0x9ea   : > { %v5180_v27 = vadd.f32 %v15695_v11, %v5158_v47  ;;  %v3719_v53 = vmul.f32 %v19256_v2, %v19255_v44 }
 0x9ec   : > { %v5195_v5 = vpack.c.bf16 %v5181_v55, %v5180_v27 }
 0x9ed   : > { %v5119_v60 = vpop.permute.xlu1 %5118 }
 0x9ee   : > { %v5161_v31 = vsel %vm2564_vm3, %v3712_v24, %v5119_v60  ;;  %11941 = vmatmul.mubr.msk.bf16.vlgmr.msra.gmra.mrb[184].mxu0 %vm1630_vm2, %v5195_v5  ;;  %v5117_v29 = vpop.permute.xlu0 %5116  ;;  %v19257_v5 = vld [vmem:[#allocation88_spill] sm:$0xff]  ;;  %v19260_v60 = vld [vmem:[#allocation37_spill] sm:$0xff] }
 0x9ef   : > { %v5183_v56 = vadd.f32 %v15695_v11, %v5161_v31  ;;  %v5160_v52 = vsel %vm2564_vm3, %v3711_v50, %v5117_v29  ;;  %v3722_v32 = vmul.f32 %v19258_v40, %v19257_v5  ;;  %v19259_v50 = vld [vmem:[#allocation87_spill] sm:$0xff] }
 0x9f0   : > { %v5182_v34 = vadd.f32 %v15695_v11, %v5160_v52  ;;  %v3721_v31 = vmul.f32 %v19260_v60, %v19259_v50  ;;  %v13215_v5 = vld [vmem:[#allocation2 + $0x50] sm:$0xff] }
 0x9f2   : > { %v5196_v42 = vpack.c.bf16 %v5183_v56, %v5182_v34 }
 0x9f4   : > { %11944 = vmatprep.mubr.msk.bf16.mxu0 %vm1630_vm2, %v5196_v42 }
 0x9f5   : > { %v5123_v21 = vpop.permute.xlu1 %5122 }
 0x9f6   : > { %v5163_v3 = vsel %vm2564_vm3, %v3714_v18, %v5123_v21  ;;  %v5121_v39 = vpop.permute.xlu0 %5120  ;;  %v15768_v18 = vld [vmem:[%s13638_s3 + $0x3] ss:$0 sm:$0xff] }
 0x9f7   : > { %v5185_v59 = vadd.f32 %v15695_v11, %v5163_v3  ;;  %v5162_v4 = vsel %vm2564_vm3, %v3713_v58, %v5121_v39 }
 0x9f8   : > { %v5184_v1 = vadd.f32 %v15695_v11, %v5162_v4 }
 0x9fa   : > { %v5197_v33 = vpack.c.bf16 %v5185_v59, %v5184_v1  ;;  %v13206_v59 = vld [vmem:[#allocation2] sm:$0xff] }
 0x9fc   : > { %11945 = vmatmul.mubr.msk.bf16.gmra.mrb[188].mxu0 %vm1630_vm2, %v5197_v33  ;;  %v13207_v33 = vld [vmem:[#allocation2 + $0x10] sm:$0xff] }
 0xa21   : > { %v5127_v38 = vpop.permute.xlu1 %5126 }
 0xa22   : > { %v5165_v43 = vsel %vm2564_vm3, %v3716_v30, %v5127_v38  ;;  %v5125_v9 = vpop.permute.xlu0 %5124 }
 0xa23   : > { %v5187_v20 = vadd.f32 %v15695_v11, %v5165_v43  ;;  %v5164_v25 = vsel %vm2564_vm3, %v3715_v8, %v5125_v9  ;;  %v13209_v8 = vld [vmem:[#allocation2 + $0x18] sm:$0xff] }
 0xa24   : > { %v5186_v23 = vadd.f32 %v15695_v11, %v5164_v25 }
 0xa26   : > { %v5198_v54 = vpack.c.bf16 %v5187_v20, %v5186_v23 }
 0xa28   : > { %11948 = vmatprep.mubr.msk.bf16.mxu0 %vm1630_vm2, %v5198_v54 }
 0xa29   : > { %v5131_v13 = vpop.permute.xlu1 %5130 }
 0xa2a   : > { %v5167_v61 = vsel %vm2564_vm3, %v3718_v15, %v5131_v13  ;;  %v5129_v36 = vpop.permute.xlu0 %5128  ;;  %v13210_v15 = vld [vmem:[#allocation2 + $0x20] sm:$0xff]  ;;  %v13211_v13 = vld [vmem:[#allocation2 + $0x30] sm:$0xff] }
 0xa2b   : > { %v5189_v10 = vadd.f32 %v15695_v11, %v5167_v61  ;;  %v5166_v14 = vsel %vm2564_vm3, %v3717_v28, %v5129_v36  ;;  %v13212_v36 = vld [vmem:[#allocation2 + $0x28] sm:$0xff] }
 0xa2c   : > { %v5188_v62 = vadd.f32 %v15695_v11, %v5166_v14 }
 0xa2e   : > { %v5199_v0 = vpack.c.bf16 %v5189_v10, %v5188_v62  ;;  %v13213_v62 = vld [vmem:[#allocation2 + $0x38] sm:$0xff] }
 0xa30   : > { %11949 = vmatmul.mubr.msk.bf16.gmra.mrb[192].mxu0 %vm1630_vm2, %v5199_v0 }
 0xa31   : > { %v5135_v46 = vpop.permute.xlu1 %5134 }
 0xa32   : > { %v5169_v55 = vsel %vm2564_vm3, %v3720_v22, %v5135_v46  ;;  %v5133_v47 = vpop.permute.xlu0 %5132 }
 0xa33   : > { %v5191_v27 = vadd.f32 %v15695_v11, %v5169_v55  ;;  %v5168_v49 = vsel %vm2564_vm3, %v3719_v53, %v5133_v47 }
 0xa34   : > { %v5190_v45 = vadd.f32 %v15695_v11, %v5168_v49 }
 0xa36   : > { %v5200_v24 = vpack.c.bf16 %v5191_v27, %v5190_v45  ;;  %v13214_v27 = vld [vmem:[#allocation2 + $0x40] sm:$0xff] }
 0xa38   : > { %11952 = vmatprep.mubr.msk.bf16.mxu0 %vm1630_vm2, %v5200_v24 }
 0xa39   : > { %v5139_v29 = vpop.permute.xlu1 %5138 }
 0xa3a   : > { %v5171_v56 = vsel %vm2564_vm3, %v3722_v32, %v5139_v29  ;;  %v5137_v52 = vpop.permute.xlu0 %5136  ;;  %v13216_v32 = vld [vmem:[#allocation2 + $0x48] sm:$0xff] }
 0xa3b   : > { %v5193_v34 = vadd.f32 %v15695_v11, %v5171_v56  ;;  %v5170_v42 = vsel %vm2564_vm3, %v3721_v31, %v5137_v52  ;;  %v13217_v31 = vld [vmem:[#allocation2 + $0x58] sm:$0xff] }
 0xa3c   : > { %v5192_v16 = vadd.f32 %v15695_v11, %v5170_v42 }
 0xa3e   : > { %v5201_v6 = vpack.c.bf16 %v5193_v34, %v5192_v16 }
 0xa40   : > { %11953 = vmatmul.mubr.msk.bf16.gmra.mrb[196].mxu0 %vm1630_vm2, %v5201_v6 }
 0xac1   : > { %v11942_v12 = vpop.f32.mrb[184].mxu0 }
 0xac2   : > { %v5278_v7 = vpop.f32.mrb[185].mxu0  ;;  %v5287_v58 = vadd.f32 %v11942_v12, %v15768_v18 }
 0xac3   : > { %v5279_v21 = vadd.f32 %v15768_v18, %v5278_v7  ;;  %v11943_v3 = vpop.f32.mrb[186].mxu0 }
 0xac4   : > { %v5281_v39 = vpop.f32.mrb[187].mxu0  ;;  %v15775_v11 = vadd.f32 %v13207_v33, %v5287_v58  ;;  %v5290_v35 = vadd.f32 %v11943_v3, %v15768_v18 }
 0xac5   : > { %v15772_v4 = vadd.f32 %v13206_v59, %v5279_v21  ;;  %v5282_v1 = vadd.f32 %v15768_v18, %v5281_v39  ;;  %v13218_v21 = vld [vmem:[#allocation2 + $0x60] sm:$0xff] }
 0xac6   : > { %v15784_v38 = vadd.f32 %v13209_v8, %v5290_v35  ;;  %v5365_v43 = vsel %vm1630_vm2, %v15775_v11, 0.0  ;;  %v13220_v35 = vld [vmem:[#allocation2 + $0x68] sm:$0xff] }
 0xac7   : > { %v15778_v30 = vadd.f32 %v13208_v63, %v5282_v1  ;;  %v5359_v17 = vsel %vm1630_vm2, %v15772_v4, 0.0  ;;  %v13219_v1 = vld [vmem:[#allocation2 + $0x70] sm:$0xff] }
 0xac8   : > { %5360 = vadd.xlane.f32.xlu0 %v5359_v17  ;;  %v5368_v20 = vsel %vm1630_vm2, %v15784_v38, 0.0 }
 0xac9   : > { %v5362_v37 = vsel %vm1630_vm2, %v15778_v30, 0.0 }
 0xaca   : > { %5363 = vadd.xlane.f32.xlu1 %v5362_v37  ;;  %v13221_v37 = vld [vmem:[#allocation2 + $0x78] sm:$0xff] }
 0xacc   : > { %5366 = vadd.xlane.f32.xlu0 %v5365_v43 }
 0xacf   : > { %v11946_v9 = vpop.f32.mrb[188].mxu0 }
 0xad0   : > { %5369 = vadd.xlane.f32.xlu0 %v5368_v20  ;;  %v5294_v25 = vpop.f32.mrb[189].mxu0  ;;  %v5303_v23 = vadd.f32 %v11946_v9, %v15768_v18  ;;  %v15850_v20 = vld [vmem:[#allocation3] sm:$0xff] }
 0xad1   : > { %v5295_v54 = vadd.f32 %v15768_v18, %v5294_v25  ;;  %v11947_v19 = vpop.f32.mrb[190].mxu0  ;;  %v15852_v25 = vld [vmem:[#allocation3 + $0x8] sm:$0xff]  ;;  %12178 = vmatprep.subr.msk.bf16.mxu0 %vm1630_vm2, %v15850_v20 }
 0xad2   : > { %v5297_v26 = vpop.f32.mrb[191].mxu0  ;;  %v5306_v48 = vadd.f32 %v11947_v19, %v15768_v18  ;;  %v15796_v61 = vadd.f32 %v13211_v13, %v5303_v23  ;;  %v5832_v23 = vsel %vm1630_vm2, %v15850_v20, 0  ;;  %v15862_v19 = vld [vmem:[#allocation3 + $0x10] sm:$0xff] }
 0xad3   : > { %v15792_v57 = vadd.f32 %v13210_v15, %v5295_v54  ;;  %v5298_v28 = vadd.f32 %v15768_v18, %v5297_v26  ;;  %11977 = vmatpush3.bf16.xpose.msra.mxu0 %v5832_v23  ;;  %v5835_v54 = vsel %vm1630_vm2, %v15852_v25, 0  ;;  %v5838_v26 = vsel %vm1630_vm2, %v15862_v19, 0  ;;  %v15868_v15 = vld [vmem:[#allocation3 + $0x18] sm:$0xff]  ;;  %v12350_v23 = vld [vmem:[%s19261_s9 + $0x10] sm:$0xff]  }
 0xad4   : > { %v15802_v0 = vadd.f32 %v13213_v62, %v5306_v48  ;;  %v5377_v51 = vsel %vm1630_vm2, %v15796_v61, 0.0  ;;  %12179 = vmatprep.subr.msk.bf16.mxu0 %vm1630_vm2, %v15852_v25  ;;  %v5841_v48 = vsel %vm1630_vm2, %v15868_v15, 0  ;;  %11992 = vmatprep.mubr.msk.bf16.mxu0 %vm1630_vm2, %v12350_v23 }
 0xad5   : > { %v15798_v10 = vadd.f32 %v13212_v36, %v5298_v28  ;;  %v5371_v14 = vsel %vm1630_vm2, %v15792_v57, 0.0  ;;  %v15874_v28 = vld [vmem:[#allocation3 + $0x20] sm:$0xff] }
 0xad6   : > { %5372 = vadd.xlane.f32.xlu1 %v5371_v14  ;;  %v5380_v22 = vsel %vm1630_vm2, %v15802_v0, 0.0 }
 0xad7   : > { %v5374_v41 = vsel %vm1630_vm2, %v15798_v10, 0.0 }
 0xad8   : > { %5375 = vadd.xlane.f32.xlu0 %v5374_v41 }
 0xada   : > { %5378 = vadd.xlane.f32.xlu1 %v5377_v51  ;;  %v5844_v51 = vsel %vm1630_vm2, %v15874_v28, 0 }
 0xadb   : > { %11979 = vmatpush3.bf16.xpose.msra.mxu0 %v5835_v54  ;;  %v12352_v54 = vld [vmem:[%s19261_s9 + $0x8] sm:$0xff]  }
 0xadc   : > { %5381 = vadd.xlane.f32.xlu0 %v5380_v22  ;;  %12180 = vmatprep.subr.msk.bf16.mxu0 %vm1630_vm2, %v15862_v19 }
 0xae3   : > { %11981 = vmatpush3.bf16.xpose.msra.mxu0 %v5838_v26 }
 0xae4   : > { %12181 = vmatprep.subr.msk.bf16.mxu0 %vm1630_vm2, %v15868_v15 }
 0xaeb   : > { %11983 = vmatpush3.bf16.xpose.msra.mxu0 %v5841_v48  ;;  %v12351_v48 = vld [vmem:[%s19261_s9 + $0x18] sm:$0xff]  }
 0xaec   : > { %12182 = vmatprep.subr.msk.bf16.mxu0 %vm1630_vm2, %v15874_v28 }
 0xaf3   : > { %11985 = vmatpush3.bf16.xpose.msra.mxu0 %v5844_v51 }
 0xb03   : > { %v11950_v44 = vpop.f32.mrb[192].mxu0 }
 0xb04   : > { %v5310_v2 = vpop.f32.mrb[193].mxu0  ;;  %v5319_v53 = vadd.f32 %v11950_v44, %v15768_v18 }
 0xb05   : > { %v5311_v46 = vadd.f32 %v15768_v18, %v5310_v2  ;;  %v11951_v55 = vpop.f32.mrb[194].mxu0 }
 0xb06   : > { %v5313_v47 = vpop.f32.mrb[195].mxu0  ;;  %v5322_v45 = vadd.f32 %v11951_v55, %v15768_v18  ;;  %v15816_v40 = vadd.f32 %v13215_v5, %v5319_v53 }
 0xb07   : > { %v15812_v49 = vadd.f32 %v13214_v27, %v5311_v46  ;;  %v5314_v24 = vadd.f32 %v15768_v18, %v5313_v47 }
 0xb08   : > { %v15822_v29 = vadd.f32 %v13217_v31, %v5322_v45  ;;  %v5389_v52 = vsel %vm1630_vm2, %v15816_v40, 0.0 }
 0xb09   : > { %v15818_v50 = vadd.f32 %v13216_v32, %v5314_v24  ;;  %v5383_v60 = vsel %vm1630_vm2, %v15812_v49, 0.0 }
 0xb0a   : > { %5384 = vadd.xlane.f32.xlu1 %v5383_v60  ;;  %v5392_v34 = vsel %vm1630_vm2, %v15822_v29, 0.0 }
 0xb0b   : > { %v5386_v56 = vsel %vm1630_vm2, %v15818_v50, 0.0 }
 0xb0c   : > { %5387 = vadd.xlane.f32.xlu0 %v5386_v56 }
 0xb0e   : > { %5390 = vadd.xlane.f32.xlu1 %v5389_v52 }
 0xb10   : > { %5393 = vadd.xlane.f32.xlu0 %v5392_v34 }
 0xb13   : > { %v11954_v42 = vpop.f32.mrb[196].mxu0 }
 0xb14   : > { %v5326_v16 = vpop.f32.mrb[197].mxu0  ;;  %v5335_v6 = vadd.f32 %v11954_v42, %v15768_v18 }
 0xb15   : > { %v5327_v12 = vadd.f32 %v15768_v18, %v5326_v16  ;;  %v11955_v7 = vpop.f32.mrb[198].mxu0 }
 0xb16   : > { %v5329_v58 = vpop.f32.mrb[199].mxu0  ;;  %v5338_v39 = vadd.f32 %v11955_v7, %v15768_v18  ;;  %v15836_v33 = vadd.f32 %v13219_v1, %v5335_v6 }
 0xb17   : > { %v15832_v3 = vadd.f32 %v13218_v21, %v5327_v12  ;;  %v5330_v59 = vadd.f32 %v15768_v18, %v5329_v58 }
 0xb18   : > { %v15842_v8 = vadd.f32 %v13221_v37, %v5338_v39  ;;  %v5401_v18 = vsel %vm1630_vm2, %v15836_v33, 0.0  ;;  %v15934_v37 = vld [vmem:[#allocation3 + $0x30] sm:$0xff] }
 0xb19   : > { %v15838_v63 = vadd.f32 %v13220_v35, %v5330_v59  ;;  %v5395_v17 = vsel %vm1630_vm2, %v15832_v3, 0.0  ;;  %v15927_v35 = vld [vmem:[#allocation3 + $0x28] sm:$0xff] }
 0xb1a   : > { %5396 = vadd.xlane.f32.xlu1 %v5395_v17  ;;  %v5404_v9 = vsel %vm1630_vm2, %v15842_v8, 0.0  ;;  %12183 = vmatprep.subr.msk.bf16.mxu0 %vm1630_vm2, %v15927_v35  ;;  %v5847_v17 = vsel %vm1630_vm2, %v15927_v35, 0 }
 0xb1b   : > { %v5398_v43 = vsel %vm1630_vm2, %v15838_v63, 0.0  ;;  %11987 = vmatpush3.bf16.xpose.msra.mxu0 %v5847_v17 }
 0xb1c   : > { %5399 = vadd.xlane.f32.xlu0 %v5398_v43  ;;  %12184 = vmatprep.subr.msk.bf16.mxu0 %vm1630_vm2, %v15934_v37  ;;  %v5850_v43 = vsel %vm1630_vm2, %v15934_v37, 0 }
 0xb1e   : > { %5402 = vadd.xlane.f32.xlu1 %v5401_v18  ;;  %v15940_v18 = vld [vmem:[#allocation3 + $0x38] sm:$0xff] }
 0xb1f   : > { %v5853_v26 = vsel %vm1630_vm2, %v15940_v18, 0 }
 0xb20   : > { %5405 = vadd.xlane.f32.xlu0 %v5404_v9  ;;  %v12349_v9 = vld [vmem:[%s19261_s9] sm:$0xff]  }
 0xb21   : > { %11956 = vmatprep.subr.bf16.mxu1 %v12349_v9 }
 0xb22   : > { %11957 = vmatpush3.bf16.msra.mxu1 %v12349_v9 }
 0xb23   : > { %11989 = vmatpush3.bf16.xpose.msra.mxu0 %v5850_v43  ;;  %11958 = vmatprep.subr.bf16.mxu1 %v12352_v54  ;;  %v12353_v43 = vld [vmem:[%s19261_s9 + $0x20] sm:$0xff]  }
 0xb24   : > { %12185 = vmatprep.subr.msk.bf16.mxu0 %vm1630_vm2, %v15940_v18 }
 0xb26   : > { %11959 = vmatpush3.bf16.msra.mxu1 %v12352_v54 }
 0xb27   : > { %11996 = vmatprep.subr.bf16.mxu1 %v12353_v43 }
 0xb2b   : > { %11991 = vmatpush3.bf16.xpose.msra.mxu0 %v5853_v26 }
 0xb32   : > { %11993 = vmatmul.mubr.msk.bf16.vlgmr.msra.gmra.mrb[200].mxu0 %vm1630_vm2, %v12351_v48 }
 0xb55   : > { %v5361_v13 = vpop.xlane.xlu0 %5360 }
 0xb56   : > { %v5408_v36 = vmul.f32 0.03125, %v5361_v13  ;;  %v19262_v13 = vmov 0  }
 0xb57   : > { %v5364_v14 = vpop.xlane.xlu1 %5363  ;;  %6928 = vmatprep.mubr.bf16.mxu0 %v19262_v13 }
 0xb58   : > { %v15879_v62 = vsub.f32 %v15772_v4, %v5408_v36  ;;  %v5409_v41 = vmul.f32 0.03125, %v5364_v14 }
 0xb59   : > { %v5367_v22 = vpop.xlane.xlu0 %5366 }
 0xb5a   : > { %v15884_v44 = vsub.f32 %v15778_v30, %v5409_v41  ;;  %v5410_v2 = vmul.f32 0.03125, %v5367_v22  ;;  %v5440_v53 = vmul.f32 %v15879_v62, %v15879_v62 }
 0xb5c   : > { %v15889_v46 = vsub.f32 %v15775_v11, %v5410_v2  ;;  %v5456_v55 = vsel %vm1630_vm2, %v5440_v53, 0.0  ;;  %v5441_v4 = vmul.f32 %v15884_v44, %v15884_v44 }
 0xb5d   : > { %5457 = vadd.xlane.f32.xlu1 %v5456_v55  ;;  %v5370_v47 = vpop.xlane.xlu0 %5369 }
 0xb5e   : > { %v5411_v27 = vmul.f32 0.03125, %v5370_v47  ;;  %v5459_v45 = vsel %vm1630_vm2, %v5441_v4, 0.0  ;;  %v5442_v30 = vmul.f32 %v15889_v46, %v15889_v46 }
 0xb5f   : > { %5460 = vadd.xlane.f32.xlu0 %v5459_v45 }
 0xb60   : > { %v15898_v24 = vsub.f32 %v15784_v38, %v5411_v27  ;;  %v5462_v11 = vsel %vm1630_vm2, %v5442_v30, 0.0 }
 0xb61   : > { %5463 = vadd.xlane.f32.xlu1 %v5462_v11 }
 0xb62   : > { %v5443_v5 = vmul.f32 %v15898_v24, %v15898_v24 }
 0xb63   : > { %v5373_v32 = vpop.xlane.xlu1 %5372 }
 0xb64   : > { %v5412_v60 = vmul.f32 0.03125, %v5373_v32  ;;  %v5465_v31 = vsel %vm1630_vm2, %v5443_v5, 0.0 }
 0xb65   : > { %5466 = vadd.xlane.f32.xlu0 %v5465_v31  ;;  %v5376_v56 = vpop.xlane.xlu0 %5375 }
 0xb66   : > { %v15905_v52 = vsub.f32 %v15792_v57, %v5412_v60  ;;  %v5413_v34 = vmul.f32 0.03125, %v5376_v56 }
 0xb67   : > { %v5379_v42 = vpop.xlane.xlu1 %5378 }
 0xb68   : > { %v15908_v38 = vsub.f32 %v15798_v10, %v5413_v34  ;;  %v5414_v16 = vmul.f32 0.03125, %v5379_v42  ;;  %v5444_v6 = vmul.f32 %v15905_v52, %v15905_v52 }
 0xb69   : > { %v5382_v12 = vpop.xlane.xlu0 %5381 }
 0xb6a   : > { %v15913_v7 = vsub.f32 %v15796_v61, %v5414_v16  ;;  %v5415_v58 = vmul.f32 0.03125, %v5382_v12  ;;  %v5468_v21 = vsel %vm1630_vm2, %v5444_v6, 0.0  ;;  %v5445_v57 = vmul.f32 %v15908_v38, %v15908_v38 }
 0xb6b   : > { %5469 = vadd.xlane.f32.xlu1 %v5468_v21 }
 0xb6c   : > { %v15919_v39 = vsub.f32 %v15802_v0, %v5415_v58  ;;  %v5471_v10 = vsel %vm1630_vm2, %v5445_v57, 0.0  ;;  %v5446_v59 = vmul.f32 %v15913_v7, %v15913_v7 }
 0xb6d   : > { %5472 = vadd.xlane.f32.xlu0 %v5471_v10 }
 0xb6e   : > { %v5474_v61 = vsel %vm1630_vm2, %v5446_v59, 0.0  ;;  %v5447_v1 = vmul.f32 %v15919_v39, %v15919_v39 }
 0xb6f   : > { %5475 = vadd.xlane.f32.xlu1 %v5474_v61 }
 0xb70   : > { %v5477_v0 = vsel %vm1630_vm2, %v5447_v1, 0.0 }
 0xb71   : > { %5478 = vadd.xlane.f32.xlu0 %v5477_v0 }
 0xb97   : > { %v5385_v36 = vpop.xlane.xlu1 %5384 }
 0xb98   : > { %v5416_v14 = vmul.f32 0.03125, %v5385_v36 }
 0xb99   : > { %v5388_v41 = vpop.xlane.xlu0 %5387 }
 0xb9a   : > { %v15954_v51 = vsub.f32 %v15812_v49, %v5416_v14  ;;  %v5417_v22 = vmul.f32 0.03125, %v5388_v41 }
 0xb9b   : > { %v5391_v2 = vpop.xlane.xlu1 %5390 }
 0xb9c   : > { %v15957_v53 = vsub.f32 %v15818_v50, %v5417_v22  ;;  %v5418_v55 = vmul.f32 0.03125, %v5391_v2  ;;  %v5448_v4 = vmul.f32 %v15954_v51, %v15954_v51 }
 0xb9d   : > { %v5394_v47 = vpop.xlane.xlu0 %5393 }
 0xb9e   : > { %v15962_v27 = vsub.f32 %v15816_v40, %v5418_v55  ;;  %v5419_v45 = vmul.f32 0.03125, %v5394_v47  ;;  %v5480_v30 = vsel %vm1630_vm2, %v5448_v4, 0.0  ;;  %v5449_v49 = vmul.f32 %v15957_v53, %v15957_v53 }
 0xb9f   : > { %5481 = vadd.xlane.f32.xlu1 %v5480_v30 }
 0xba0   : > { %v15968_v11 = vsub.f32 %v15822_v29, %v5419_v45  ;;  %v5483_v50 = vsel %vm1630_vm2, %v5449_v49, 0.0  ;;  %v5450_v5 = vmul.f32 %v15962_v27, %v15962_v27  ;;  %v16003_v45 = vld [vmem:[%s13682_s8] ss:$0 sm:$0xff] }
 0xba1   : > { %5484 = vadd.xlane.f32.xlu0 %v5483_v50 }
 0xba2   : > { %v5486_v32 = vsel %vm1630_vm2, %v5450_v5, 0.0  ;;  %v5451_v40 = vmul.f32 %v15968_v11, %v15968_v11 }
 0xba3   : > { %5487 = vadd.xlane.f32.xlu1 %v5486_v32 }
 0xba4   : > { %v5489_v60 = vsel %vm1630_vm2, %v5451_v40, 0.0 }
 0xba5   : > { %5490 = vadd.xlane.f32.xlu0 %v5489_v60 }
 0xba7   : > { %v5397_v31 = vpop.xlane.xlu1 %5396 }
 0xba8   : > { %v5420_v56 = vmul.f32 0.03125, %v5397_v31 }
 0xba9   : > { %v5400_v34 = vpop.xlane.xlu0 %5399 }
 0xbaa   : > { %v15978_v29 = vsub.f32 %v15832_v3, %v5420_v56  ;;  %v5421_v42 = vmul.f32 0.03125, %v5400_v34 }
 0xbab   : > { %v5403_v16 = vpop.xlane.xlu1 %5402 }
 0xbac   : > { %v15981_v6 = vsub.f32 %v15838_v63, %v5421_v42  ;;  %v5422_v12 = vmul.f32 0.03125, %v5403_v16  ;;  %v5452_v58 = vmul.f32 %v15978_v29, %v15978_v29  ;;  %v16009_v42 = vld [vmem:[%s13687_s18] ss:$0 sm:$0xff] }
 0xbad   : > { %v5406_v21 = vpop.xlane.xlu0 %5405 }
 0xbae   : > { %v15986_v57 = vsub.f32 %v15836_v33, %v5422_v12  ;;  %v5423_v10 = vmul.f32 0.03125, %v5406_v21  ;;  %v5492_v59 = vsel %vm1630_vm2, %v5452_v58, 0.0  ;;  %v5453_v3 = vmul.f32 %v15981_v6, %v15981_v6 }
 0xbaf   : > { %5493 = vadd.xlane.f32.xlu1 %v5492_v59 }
 0xbb0   : > { %v15992_v61 = vsub.f32 %v15842_v8, %v5423_v10  ;;  %v5495_v63 = vsel %vm1630_vm2, %v5453_v3, 0.0  ;;  %v5454_v1 = vmul.f32 %v15986_v57, %v15986_v57 }
 0xbb1   : > { %5496 = vadd.xlane.f32.xlu0 %v5495_v63 }
 0xbb2   : > { %v5498_v0 = vsel %vm1630_vm2, %v5454_v1, 0.0  ;;  %v5455_v33 = vmul.f32 %v15992_v61, %v15992_v61 }
 0xbb3   : > { %5499 = vadd.xlane.f32.xlu1 %v5498_v0 }
 0xbb4   : > { %v5501_v17 = vsel %vm1630_vm2, %v5455_v33, 0.0 }
 0xbb5   : > { %5502 = vadd.xlane.f32.xlu0 %v5501_v17 }
 0xbea   : > { %v5458_v9 = vpop.xlane.xlu1 %5457 }
 0xbeb   : > { %v5504_v8 = vmul.f32 0.03125, %v5458_v9 }
 0xbec   : > { %v5461_v23 = vpop.xlane.xlu0 %5460 }
 0xbed   : > { %v5520_v54 = vadd.f32 1e-05, %v5504_v8  ;;  %v5505_v26 = vmul.f32 0.03125, %v5461_v23 }
 0xbee   : > { %v5464_v48 = vpop.xlane.xlu1 %5463 }
 0xbef   : > { %12757 = vrsqrt.f32 %v5520_v54  ;;  %v5521_v36 = vadd.f32 1e-05, %v5505_v26  ;;  %v5506_v14 = vmul.f32 0.03125, %v5464_v48  ;;  %v12354_v26 = vld [vmem:[%s19261_s9 + $0x28] sm:$0xff]  }
 0xbf1   : > { %12759 = vrsqrt.f32 %v5521_v36  ;;  %v5522_v41 = vadd.f32 1e-05, %v5506_v14 }
 0xbf2   : > { %v5467_v22 = vpop.xlane.xlu0 %5466 }
 0xbf3   : > { %12761 = vrsqrt.f32 %v5522_v41  ;;  %v5507_v2 = vmul.f32 0.03125, %v5467_v22 }
 0xbf5   : > { %v5523_v55 = vadd.f32 1e-05, %v5507_v2 }
 0xbf7   : > { %12763 = vrsqrt.f32 %v5523_v55 }
 0xbf8   : > { %v5470_v4 = vpop.xlane.xlu1 %5469 }
 0xbf9   : > { %v12758_v47 = vpop.eup %12757  ;;  %v5508_v30 = vmul.f32 0.03125, %v5470_v4 }
 0xbfa   : > { %v5473_v49 = vpop.xlane.xlu0 %5472  ;;  %v5552_v50 = vmul.f32 %v12758_v47, %v15879_v62 }
 0xbfb   : > { %v12760_v5 = vpop.eup %12759  ;;  %v5524_v32 = vadd.f32 1e-05, %v5508_v30  ;;  %v5509_v40 = vmul.f32 0.03125, %v5473_v49 }
 0xbfc   : > { %v5476_v60 = vpop.xlane.xlu1 %5475  ;;  %v5553_v31 = vmul.f32 %v12760_v5, %v15884_v44  ;;  %v5574_v56 = vmul.f32 %v16003_v45, %v5552_v50 }
 0xbfd   : > { %v12762_v34 = vpop.eup %12761  ;;  %12765 = vrsqrt.f32 %v5524_v32  ;;  %v5525_v16 = vadd.f32 1e-05, %v5509_v40  ;;  %v5510_v12 = vmul.f32 0.03125, %v5476_v60 }
 0xbfe   : > { %v5554_v58 = vmul.f32 %v12762_v34, %v15889_v46  ;;  %v5479_v21 = vpop.xlane.xlu0 %5478  ;;  %v5575_v10 = vmul.f32 %v16003_v45, %v5553_v31  ;;  %v16014_v3 = vadd.f32 %v16009_v42, %v5574_v56 }
 0xbff   : > { %12767 = vrsqrt.f32 %v5525_v16  ;;  %v5526_v62 = vadd.f32 1e-05, %v5510_v12  ;;  %v5511_v59 = vmul.f32 0.03125, %v5479_v21 }
 0xc00   : > { %19263 = vst [vmem:[#allocation56_spill] sm:$0xff] %v16014_v3  ;;  %v16017_v44 = vadd.f32 %v16009_v42, %v5575_v10  ;;  %v5576_v0 = vmul.f32 %v16003_v45, %v5554_v58 }
 0xc01   : > { %v12764_v63 = vpop.eup %12763  ;;  %12769 = vrsqrt.f32 %v5526_v62  ;;  %v5527_v1 = vadd.f32 1e-05, %v5511_v59 }
 0xc02   : > { %19264 = vst [vmem:[#allocation57_spill] sm:$0xff] %v16017_v44  ;;  %v5555_v46 = vmul.f32 %v12764_v63, %v15898_v24  ;;  %v5612_v33 = vpack.c.bf16 %v16017_v44, %v16014_v3  ;;  %v16026_v9 = vadd.f32 %v16009_v42, %v5576_v0 }
 0xc03   : > { %12771 = vrsqrt.f32 %v5527_v1 }
 0xc04   : > { %v5577_v17 = vmul.f32 %v16003_v45, %v5555_v46  ;;  %11960 = vmatprep.mubr.msk.bf16.mxu1 %vm1630_vm2, %v5612_v33  ;;  %19265 = vst [vmem:[#allocation58_spill] sm:$0xff] %v16026_v9 }
 0xc06   : > { %v16029_v8 = vadd.f32 %v16009_v42, %v5577_v17 }
 0xc07   : > { %v12766_v23 = vpop.eup %12765 }
 0xc08   : > { %19266 = vst [vmem:[#allocation59_spill] sm:$0xff] %v16029_v8  ;;  %v5613_v54 = vpack.c.bf16 %v16029_v8, %v16026_v9  ;;  %v5556_v24 = vmul.f32 %v12766_v23, %v15905_v52  ;;  %v12414_v9 = vld [vmem:[%s19311_s16 + $0xa8] sm:$0xff]  }
 0xc09   : > { %v12768_v48 = vpop.eup %12767 }
 0xc0a   : > { %11961 = vmatmul.mubr.msk.bf16.vlgmr.msra.gmra.mrb[144].mxu1 %vm1630_vm2, %v5613_v54  ;;  %v5557_v36 = vmul.f32 %v12768_v48, %v15908_v38  ;;  %v5578_v14 = vmul.f32 %v16003_v45, %v5556_v24 }
 0xc0b   : > { %v12770_v41 = vpop.eup %12769  ;;  %11997 = vmatpush3.bf16.msra.mxu1 %v12353_v43 }
 0xc0c   : > { %v5579_v22 = vmul.f32 %v16003_v45, %v5557_v36  ;;  %v5558_v2 = vmul.f32 %v12770_v41, %v15913_v7  ;;  %11998 = vmatprep.subr.bf16.mxu1 %v12354_v26  ;;  %v16041_v4 = vadd.f32 %v16009_v42, %v5578_v14 }
 0xc0d   : > { %v12772_v55 = vpop.eup %12771 }
 0xc0e   : > { %19267 = vst [vmem:[#allocation60_spill] sm:$0xff] %v16041_v4  ;;  %v16044_v52 = vadd.f32 %v16009_v42, %v5579_v22  ;;  %v5559_v47 = vmul.f32 %v12772_v55, %v15919_v39  ;;  %v5580_v38 = vmul.f32 %v16003_v45, %v5558_v2 }
 0xc0f   : > { %11999 = vmatpush3.bf16.msra.mxu1 %v12354_v26 }
 0xc10   : > { %19268 = vst [vmem:[#allocation61_spill] sm:$0xff] %v16044_v52  ;;  %v5614_v43 = vpack.c.bf16 %v16044_v52, %v16041_v4  ;;  %v5581_v30 = vmul.f32 %v16003_v45, %v5559_v47  ;;  %v16053_v7 = vadd.f32 %v16009_v42, %v5580_v38 }
 0xc12   : > { %11964 = vmatprep.mubr.msk.bf16.mxu1 %vm1630_vm2, %v5614_v43  ;;  %19269 = vst [vmem:[#allocation62_spill] sm:$0xff] %v16053_v7  ;;  %v16056_v49 = vadd.f32 %v16009_v42, %v5581_v30 }
 0xc14   : > { %19270 = vst [vmem:[#allocation63_spill] sm:$0xff] %v16056_v49  ;;  %v5615_v50 = vpack.c.bf16 %v16056_v49, %v16053_v7  ;;  %v12406_v49 = vld [vmem:[%s19311_s16 + $0x98] sm:$0xff]  }
 0xc16   : > { %11965 = vmatmul.mubr.msk.bf16.gmra.mrb[148].mxu1 %vm1630_vm2, %v5615_v50 }
 0xc2c   : > { %v5482_v39 = vpop.xlane.xlu1 %5481 }
 0xc2d   : > { %v5512_v5 = vmul.f32 0.03125, %v5482_v39 }
 0xc2e   : > { %v5485_v32 = vpop.xlane.xlu0 %5484 }
 0xc2f   : > { %v5528_v40 = vadd.f32 1e-05, %v5512_v5  ;;  %v5513_v60 = vmul.f32 0.03125, %v5485_v32 }
 0xc30   : > { %v5488_v31 = vpop.xlane.xlu1 %5487 }
 0xc31   : > { %12773 = vrsqrt.f32 %v5528_v40  ;;  %v5529_v56 = vadd.f32 1e-05, %v5513_v60  ;;  %v5514_v34 = vmul.f32 0.03125, %v5488_v31 }
 0xc32   : > { %v5491_v16 = vpop.xlane.xlu0 %5490 }
 0xc33   : > { %12775 = vrsqrt.f32 %v5529_v56  ;;  %v5530_v12 = vadd.f32 1e-05, %v5514_v34  ;;  %v5515_v58 = vmul.f32 0.03125, %v5491_v16 }
 0xc35   : > { %12777 = vrsqrt.f32 %v5530_v12  ;;  %v5531_v21 = vadd.f32 1e-05, %v5515_v58 }
 0xc37   : > { %12779 = vrsqrt.f32 %v5531_v21 }
 0xc3b   : > { %v12774_v10 = vpop.eup %12773 }
 0xc3c   : > { %v5494_v62 = vpop.xlane.xlu1 %5493  ;;  %v5560_v59 = vmul.f32 %v12774_v10, %v15954_v51 }
 0xc3d   : > { %v12776_v63 = vpop.eup %12775  ;;  %v5516_v1 = vmul.f32 0.03125, %v5494_v62 }
 0xc3e   : > { %v5497_v0 = vpop.xlane.xlu0 %5496  ;;  %v5561_v46 = vmul.f32 %v12776_v63, %v15957_v53  ;;  %v5582_v33 = vmul.f32 %v16003_v45, %v5560_v59 }
 0xc3f   : > { %v12778_v17 = vpop.eup %12777  ;;  %v5532_v23 = vadd.f32 1e-05, %v5516_v1  ;;  %v5517_v54 = vmul.f32 0.03125, %v5497_v0  ;;  %v16127_v1 = vld [vmem:[%s19279_s15 + $0x4] ss:$16 sps:$4 sm:$0xff]  }
 0xc40   : > { %v5500_v24 = vpop.xlane.xlu1 %5499  ;;  %v5583_v26 = vmul.f32 %v16003_v45, %v5561_v46  ;;  %v5562_v48 = vmul.f32 %v12778_v17, %v15962_v27  ;;  %v16067_v22 = vadd.f32 %v16009_v42, %v5582_v33 }
 0xc41   : > { %v12780_v36 = vpop.eup %12779  ;;  %12781 = vrsqrt.f32 %v5532_v23  ;;  %v5533_v14 = vadd.f32 1e-05, %v5517_v54  ;;  %v5518_v41 = vmul.f32 0.03125, %v5500_v24 }
 0xc42   : > { %v5503_v51 = vpop.xlane.xlu0 %5502  ;;  %19271 = vst [vmem:[#allocation64_spill] sm:$0xff] %v16067_v22  ;;  %v16070_v53 = vadd.f32 %v16009_v42, %v5583_v26  ;;  %v5563_v2 = vmul.f32 %v12780_v36, %v15968_v11  ;;  %v5584_v55 = vmul.f32 %v16003_v45, %v5562_v48  ;;  %v12391_v48 = vld [vmem:[%s19311_s16 + $0x40] sm:$0xff]  }
 0xc43   : > { %12783 = vrsqrt.f32 %v5533_v14  ;;  %v5534_v47 = vadd.f32 1e-05, %v5518_v41  ;;  %v5519_v38 = vmul.f32 0.03125, %v5503_v51  ;;  %v12366_v41 = vld [vmem:[%s19281_s6 + $0x48] sm:$0xff]  }
 0xc44   : > { %19272 = vst [vmem:[#allocation65_spill] sm:$0xff] %v16070_v53  ;;  %v5616_v27 = vpack.c.bf16 %v16070_v53, %v16067_v22  ;;  %v5585_v43 = vmul.f32 %v16003_v45, %v5563_v2  ;;  %v16079_v50 = vadd.f32 %v16009_v42, %v5584_v55  ;;  %v12367_v51 = vld [vmem:[%s19281_s6 + $0x88] sm:$0xff]   ;;  %v12369_v55 = vld [vmem:[%s19281_s6 + $0xd0] sm:$0xff]   ;;  %v12405_v22 = vld [vmem:[%s19311_s16 + $0x18] sm:$0xff]  }
 0xc45   : > { %12785 = vrsqrt.f32 %v5534_v47  ;;  %v5535_v30 = vadd.f32 1e-05, %v5519_v38  ;;  %v12368_v2 = vld [vmem:[%s19281_s6 + $0x8] sm:$0xff]   ;;  %v12370_v47 = vld [vmem:[%s19281_s6 + $0x50] sm:$0xff]  }
 0xc46   : > { %11968 = vmatprep.mubr.msk.bf16.mxu1 %vm1630_vm2, %v5616_v27  ;;  %19273 = vst [vmem:[#allocation66_spill] sm:$0xff] %v16079_v50  ;;  %v16082_v39 = vadd.f32 %v16009_v42, %v5585_v43  ;;  %v12371_v38 = vld [vmem:[%s19281_s6 + $0x90] sm:$0xff]   ;;  %v12373_v43 = vld [vmem:[%s19281_s6 + $0xd8] sm:$0xff]  }
 0xc47   : > { %12787 = vrsqrt.f32 %v5535_v30  ;;  %v12372_v27 = vld [vmem:[%s19281_s6 + $0x10] sm:$0xff]   ;;  %v12374_v30 = vld [vmem:[%s19281_s6 + $0x58] sm:$0xff]  }
 0xc48   : > { %19274 = vst [vmem:[#allocation67_spill] sm:$0xff] %v16082_v39  ;;  %v5617_v11 = vpack.c.bf16 %v16082_v39, %v16079_v50 }
 0xc4a   : > { %11969 = vmatmul.mubr.msk.bf16.gmra.mrb[152].mxu1 %vm1630_vm2, %v5617_v11  ;;  %v12375_v11 = vld [vmem:[%s19281_s6 + $0x98] sm:$0xff]  }
 0xc4b   : > { %v12782_v5 = vpop.eup %12781 }
 0xc4c   : > { %v5564_v32 = vmul.f32 %v12782_v5, %v15978_v29  ;;  %v12376_v5 = vld [vmem:[%s19281_s6 + $0x18] sm:$0xff]  }
 0xc4d   : > { %v12784_v40 = vpop.eup %12783 }
 0xc4e   : > { %v5565_v60 = vmul.f32 %v12784_v40, %v15981_v6  ;;  %v5586_v31 = vmul.f32 %v16003_v45, %v5564_v32  ;;  %v12377_v32 = vld [vmem:[%s19281_s6 + $0xe0] sm:$0xff]  }
 0xc4f   : > { %v12786_v56 = vpop.eup %12785  ;;  %v12378_v40 = vld [vmem:[%s19281_s6 + $0x60] sm:$0xff]  }
 0xc50   : > { %v5587_v34 = vmul.f32 %v16003_v45, %v5565_v60  ;;  %v5566_v16 = vmul.f32 %v12786_v56, %v15986_v57  ;;  %v16093_v58 = vadd.f32 %v16009_v42, %v5586_v31  ;;  %v12379_v60 = vld [vmem:[%s19281_s6 + $0xa0] sm:$0xff]   ;;  %v12381_v56 = vld [vmem:[%s19281_s6 + $0xe8] sm:$0xff]  }
 0xc51   : > { %v12788_v12 = vpop.eup %12787  ;;  %v12380_v31 = vld [vmem:[%s19281_s6 + $0x20] sm:$0xff]  }
 0xc52   : > { %19275 = vst [vmem:[#allocation68_spill] sm:$0xff] %v16093_v58  ;;  %v16096_v21 = vadd.f32 %v16009_v42, %v5587_v34  ;;  %v5567_v10 = vmul.f32 %v12788_v12, %v15992_v61  ;;  %v5588_v29 = vmul.f32 %v16003_v45, %v5566_v16  ;;  %v11994_v61 = vpop.f32.mrb[200].mxu0  ;;  %v12382_v34 = vld [vmem:[%s19281_s6 + $0x68] sm:$0xff]  }
 0xc53   : > { %v12383_v16 = vld [vmem:[%s19281_s6 + $0xa8] sm:$0xff]  }
 0xc54   : > { %19276 = vst [vmem:[#allocation69_spill] sm:$0xff] %v16096_v21  ;;  %v5618_v6 = vpack.c.bf16 %v16096_v21, %v16093_v58  ;;  %v5589_v62 = vmul.f32 %v16003_v45, %v5567_v10  ;;  %v16105_v57 = vadd.f32 %v16009_v42, %v5588_v29  ;;  %v5889_v45 = vpop.f32.mrb[201].mxu0  ;;  %v12384_v12 = vld [vmem:[%s19281_s6 + $0x28] sm:$0xff]   ;;  %v12385_v10 = vld [vmem:[%s19281_s6 + $0xf0] sm:$0xff]  }
 0xc55   : > { %v11995_v0 = vpop.f32.mrb[202].mxu0  ;;  %v12386_v29 = vld [vmem:[%s19281_s6 + $0x70] sm:$0xff]  }
 0xc56   : > { %11972 = vmatprep.mubr.msk.bf16.mxu1 %vm1630_vm2, %v5618_v6  ;;  %19277 = vst [vmem:[#allocation70_spill] sm:$0xff] %v16105_v57  ;;  %v16108_v59 = vadd.f32 %v16009_v42, %v5589_v62  ;;  %v16122_v42 = vld [vmem:[%s19279_s15] ss:$16 sps:$4 sm:$0xff]   ;;  %v5892_v46 = vpop.f32.mrb[203].mxu0 }
 0xc57   : > { %v5904_v33 = vpack.c.bf16 %v5892_v46, %v5889_v45  ;;  %v12387_v6 = vld [vmem:[%s19281_s6 + $0xb0] sm:$0xff]   ;;  %v16285_v45 = vld [vmem:[%s19282_s28] ss:$0 sm:$0xff] }
 0xc58   : > { %19278 = vst [vmem:[#allocation71_spill] sm:$0xff] %v16108_v59  ;;  %v5619_v63 = vpack.c.bf16 %v16108_v59, %v16105_v57  ;;  %v12388_v62 = vld [vmem:[%s19281_s6 + $0x30] sm:$0xff]  }
 0xc59   : > { %v6176_v17 = vmul.bf16 %v16127_v1, %v5904_v33  ;;  %v6175_v54 = vmul.bf16 %v16122_v42, %v5904_v33 }
 0xc5a   : > { %11973 = vmatmul.mubr.msk.bf16.gmra.mrb[156].mxu1 %vm1630_vm2, %v5619_v63  ;;  %v12389_v63 = vld [vmem:[%s19281_s6 + $0xf8] sm:$0xff]  }
 0xc5b   : > { %12000 = vmatprep.mubr.msk.bf16.mxu1 %vm1630_vm2, %v15850_v20  ;;  %v16132_v20 = vld [vmem:[%s19279_s15 + $0x8] ss:$16 sps:$4 sm:$0xff]   ;;  %6783 = vmatprep.subr.bf16.mxu1 %v6176_v17 }
 0xc5c   : > { %19280 = vst [vmem:[#allocation72_spill] sm:$0xff] %v16132_v20  ;;  %v6177_v24 = vmul.bf16 %v16132_v20, %v5904_v33 }
 0xc62   : > { %12001 = vmatmul.mubr.msk.bf16.vlgmr.msra.gmra.mrb[160].mxu1 %vm1630_vm2, %v15852_v25  ;;  %v16137_v25 = vld [vmem:[%s19279_s15 + $0xc] ss:$16 sps:$4 sm:$0xff]   ;;  %s19381_s15 = smov 112  }
 0xc63   : > { %12004 = vmatprep.mubr.msk.bf16.mxu1 %vm1630_vm2, %v15862_v19  ;;  %v16139_v19 = vpack.c.bf16 %v11995_v0, %v11994_v61  ;;  %v6178_v23 = vmul.bf16 %v16137_v25, %v5904_v33  ;;  %6784 = vmatpush1.bf16.msra.mxu1 %v6175_v54  ;;  %v12390_v61 = vld [vmem:[%s19281_s6 + $0x78] sm:$0xff]  }
 0xc65   : > { %6896 = vmatprep.subr.bf16.mxu0 %v6178_v23 }
 0xc66   : > { %6897 = vmatpush1.bf16.msra.mxu0 %v6177_v24 }
 0xc6a   : > { %12005 = vmatmul.mubr.msk.bf16.gmra.mrb[164].mxu1 %vm1630_vm2, %v15868_v15  ;;  %v12361_v15 = vld [vmem:[%s19281_s6 + $0x40] sm:$0xff]  }
 0xc6b   : > { %12008 = vmatprep.mubr.msk.bf16.mxu1 %vm1630_vm2, %v15874_v28  ;;  %6579 = vrot.lane.b32.xlu1 %v12361_v15, %s18841_s13  ;;  %v12362_v28 = vld [vmem:[%s19281_s6] sm:$0xff]  }
 0xc6f   : > { %6563 = vrot.lane.b32.xlu1 %v12362_v28, %s18841_s13 }
 0xc72   : > { %12009 = vmatmul.mubr.msk.bf16.gmra.mrb[168].mxu1 %vm1630_vm2, %v15927_v35  ;;  %v12363_v35 = vld [vmem:[%s19281_s6 + $0x80] sm:$0xff]  }
 0xc73   : > { %12012 = vmatprep.mubr.msk.bf16.mxu1 %vm1630_vm2, %v15934_v37  ;;  %v12364_v37 = vld [vmem:[%s19281_s6 + $0xc0] sm:$0xff]   ;;  %6595 = vrot.lane.b32.xlu1 %v12363_v35, %s18841_s13 }
 0xc74   : > { %6611 = vrot.lane.b32.xlu0 %v12364_v37, %s18841_s13 }
 0xc78   : > { %6581 = vrot.lane.b32.xlu0 %v12366_v41, %s18841_s13 }
 0xc7a   : > { %12013 = vmatmul.mubr.msk.bf16.gmra.mrb[172].mxu1 %vm1630_vm2, %v15940_v18  ;;  %v12365_v18 = vld [vmem:[%s19281_s6 + $0xc8] sm:$0xff]  }
 0xc7b   : > { %6815 = vmatprep.mubr.bf16.mxu1 %v19262_v13  ;;  %6613 = vrot.lane.b32.xlu1 %v12365_v18, %s18841_s13 }
 0xc7c   : > { %6565 = vrot.lane.b32.xlu0 %v12368_v2, %s18841_s13 }
 0xc7f   : > { %6597 = vrot.lane.b32.xlu1 %v12367_v51, %s18841_s13 }
 0xc80   : > { %6583 = vrot.lane.b32.xlu0 %v12370_v47, %s18841_s13 }
 0xc83   : > { %6615 = vrot.lane.b32.xlu1 %v12369_v55, %s18841_s13 }
 0xc84   : > { %6567 = vrot.lane.b32.xlu0 %v12372_v27, %s18841_s13 }
 0xc87   : > { %6599 = vrot.lane.b32.xlu1 %v12371_v38, %s18841_s13 }
 0xc88   : > { %6585 = vrot.lane.b32.xlu0 %v12374_v30, %s18841_s13 }
 0xc8b   : > { %6617 = vrot.lane.b32.xlu1 %v12373_v43, %s18841_s13 }
 0xc8c   : > { %6569 = vrot.lane.b32.xlu0 %v12376_v5, %s18841_s13 }
 0xc8f   : > { %6601 = vrot.lane.b32.xlu1 %v12375_v11, %s18841_s13 }
 0xc90   : > { %6587 = vrot.lane.b32.xlu0 %v12378_v40, %s18841_s13 }
 0xc93   : > { %6619 = vrot.lane.b32.xlu1 %v12377_v32, %s18841_s13 }
 0xc94   : > { %6571 = vrot.lane.b32.xlu0 %v12380_v31, %s18841_s13 }
 0xc97   : > { %6603 = vrot.lane.b32.xlu1 %v12379_v60, %s18841_s13 }
 0xc98   : > { %6589 = vrot.lane.b32.xlu0 %v12382_v34, %s18841_s13 }
 0xc9b   : > { %6621 = vrot.lane.b32.xlu1 %v12381_v56, %s18841_s13 }
 0xc9c   : > { %6573 = vrot.lane.b32.xlu0 %v12384_v12, %s18841_s13 }
 0xc9f   : > { %6605 = vrot.lane.b32.xlu1 %v12383_v16, %s18841_s13 }
 0xca0   : > { %6591 = vrot.lane.b32.xlu0 %v12386_v29, %s18841_s13 }
 0xca3   : > { %6623 = vrot.lane.b32.xlu1 %v12385_v10, %s18841_s13 }
 0xca4   : > { %6575 = vrot.lane.b32.xlu0 %v12388_v62, %s18841_s13 }
 0xca7   : > { %6607 = vrot.lane.b32.xlu1 %v12387_v6, %s18841_s13 }
 0xca8   : > { %6593 = vrot.lane.b32.xlu0 %v12390_v61, %s18841_s13 }
 0xcab   : > { %6625 = vrot.lane.b32.xlu1 %v12389_v63, %s18841_s13 }
 0xcdd   : > { %v11962_v0 = vpop.f32.mrb[144].mxu1  ;;  %v16327_v34 = vpop.permute.xlu1 %6579 }
 0xcde   : > { %v5737_v46 = vadd.f32 %v11962_v0, %v16285_v45  ;;  %v5728_v33 = vpop.f32.mrb[145].mxu1  ;;  %19287 = vst [vmem:[#allocation42_spill] sm:$0xff] %v16327_v34 }
 0xcdf   : > { %v5729_v17 = vadd.f32 %v16285_v45, %v5728_v33  ;;  %v11963_v23 = vpop.f32.mrb[146].mxu1 }
 0xce0   : > { %v5740_v54 = vadd.f32 %v11963_v23, %v16285_v45  ;;  %v5731_v24 = vpop.f32.mrb[147].mxu1  ;;  %v5793_v28 = vmul.f32 0.5, %v5737_v46 }
 0xce1   : > { %v5732_v15 = vadd.f32 %v16285_v45, %v5731_v24  ;;  %v5791_v37 = vmul.f32 0.5, %v5729_v17  ;;  %v16329_v16 = vpop.permute.xlu1 %6563 }
 0xce2   : > { %v5794_v35 = vmul.f32 0.5, %v5740_v54  ;;  %19288 = vst [vmem:[#allocation48_spill] sm:$0xff] %v16329_v16 }
 0xce3   : > { %v5792_v18 = vmul.f32 0.5, %v5732_v15 }
 0xce4   : > { %v16291_v41 = vpack.c.bf16 %v5794_v35, %v5793_v28 }
 0xce5   : > { %v16293_v51 = vpack.c.bf16 %v5792_v18, %v5791_v37  ;;  %v16331_v12 = vpop.permute.xlu1 %6595 }
 0xce6   : > { %19283 = vst [vmem:[#allocation74_spill] sm:$0xff] %v16291_v41  ;;  %19289 = vst [vmem:[#allocation79_spill] sm:$0xff] %v16331_v12  ;;  %v16333_v10 = vpop.permute.xlu0 %6611 }
 0xce7   : > { %19284 = vst [vmem:[#allocation46_spill] sm:$0xff] %v16293_v51  ;;  %10974 = vmatmul.mubr.msk.bf16.vlgmr.msra.gmra.mrb[176].mxu1 %vm2564_vm3, %v16293_v51  ;;  %10982 = vmatmul.mubr.msk.bf16.vlgmr.msra.gmra.mrb[204].mxu0 %vm2564_vm3, %v16293_v51  ;;  %19290 = vst [vmem:[#allocation45_spill] sm:$0xff] %v16333_v10 }
 0xce8   : > { %6825 = vmatprep.mubr.bf16.mxu1 %v19262_v13  ;;  %6938 = vmatprep.mubr.bf16.mxu0 %v19262_v13 }
 0xce9   : > { %v11966_v2 = vpop.f32.mrb[148].mxu1 }
 0xcea   : > { %v5753_v55 = vadd.f32 %v11966_v2, %v16285_v45  ;;  %v5744_v47 = vpop.f32.mrb[149].mxu1  ;;  %v16337_v6 = vpop.permute.xlu0 %6581 }
 0xceb   : > { %v5745_v38 = vadd.f32 %v16285_v45, %v5744_v47  ;;  %v11967_v27 = vpop.f32.mrb[150].mxu1  ;;  %19292 = vst [vmem:[#allocation47_spill] sm:$0xff] %v16337_v6 }
 0xcec   : > { %v5756_v43 = vadd.f32 %v11967_v27, %v16285_v45  ;;  %v5747_v30 = vpop.f32.mrb[151].mxu1  ;;  %v5797_v5 = vmul.f32 0.5, %v5753_v55 }
 0xced   : > { %v5748_v11 = vadd.f32 %v16285_v45, %v5747_v30  ;;  %v5795_v40 = vmul.f32 0.5, %v5745_v38  ;;  %v16335_v29 = vpop.permute.xlu1 %6613 }
 0xcee   : > { %v5798_v32 = vmul.f32 0.5, %v5756_v43  ;;  %19291 = vst [vmem:[#allocation43_spill] sm:$0xff] %v16335_v29  ;;  %v16341_v63 = vpop.permute.xlu0 %6565 }
 0xcef   : > { %v5796_v60 = vmul.f32 0.5, %v5748_v11  ;;  %10975 = vmatmul.mubr.msk.bf16.gmra.mrb[180].mxu1 %vm2564_vm3, %v16291_v41  ;;  %10983 = vmatmul.mubr.msk.bf16.gmra.mrb[208].mxu0 %vm2564_vm3, %v16291_v41  ;;  %19294 = vst [vmem:[#allocation50_spill] sm:$0xff] %v16341_v63 }
 0xcf0   : > { %v16309_v31 = vpack.c.bf16 %v5798_v32, %v5797_v5  ;;  %6835 = vmatprep.mubr.bf16.mxu1 %v19262_v13  ;;  %6948 = vmatprep.mubr.bf16.mxu0 %v19262_v13 }
 0xcf1   : > { %v16313_v56 = vpack.c.bf16 %v5796_v60, %v5795_v40  ;;  %v16339_v62 = vpop.permute.xlu1 %6597 }
 0xcf2   : > { %19285 = vst [vmem:[#allocation49_spill] sm:$0xff] %v16309_v31  ;;  %19293 = vst [vmem:[#allocation44_spill] sm:$0xff] %v16339_v62  ;;  %v16345_v0 = vpop.permute.xlu0 %6583 }
 0xcf3   : > { %19286 = vst [vmem:[#allocation77_spill] sm:$0xff] %v16313_v56  ;;  %19296 = vst [vmem:[#allocation52_spill] sm:$0xff] %v16345_v0 }
 0xcf5   : > { %v16343_v61 = vpop.permute.xlu1 %6615 }
 0xcf6   : > { %19295 = vst [vmem:[#allocation51_spill] sm:$0xff] %v16343_v61  ;;  %v16350_v54 = vpop.permute.xlu0 %6567 }
 0xcf7   : > { %10976 = vmatmul.mubr.msk.bf16.gmra.mrb[184].mxu1 %vm2564_vm3, %v16313_v56  ;;  %10984 = vmatmul.mubr.msk.bf16.gmra.mrb[212].mxu0 %vm2564_vm3, %v16313_v56  ;;  %19298 = vst [vmem:[#allocation54_spill] sm:$0xff] %v16350_v54 }
 0xcf8   : > { %6845 = vmatprep.mubr.bf16.mxu1 %v19262_v13  ;;  %6958 = vmatprep.mubr.bf16.mxu0 %v19262_v13 }
 0xcf9   : > { %v16347_v33 = vpop.permute.xlu1 %6599 }
 0xcfa   : > { %19297 = vst [vmem:[#allocation53_spill] sm:$0xff] %v16347_v33  ;;  %v16357_v27 = vpop.permute.xlu0 %6585 }
 0xcfb   : > { %19300 = vst [vmem:[#allocation75_spill] sm:$0xff] %v16357_v27 }
 0xcfd   : > { %v16355_v55 = vpop.permute.xlu1 %6617 }
 0xcfe   : > { %19299 = vst [vmem:[#allocation55_spill] sm:$0xff] %v16355_v55  ;;  %v16371_v5 = vpop.permute.xlu0 %6569 }
 0xcff   : > { %10977 = vmatmul.mubr.msk.bf16.gmra.mrb[188].mxu1 %vm2564_vm3, %v16309_v31  ;;  %10985 = vmatmul.mubr.msk.bf16.gmra.mrb[216].mxu0 %vm2564_vm3, %v16309_v31  ;;  %19304 = vst [vmem:[#allocation36_spill] sm:$0xff] %v16371_v5 }
 0xd00   : > { %6855 = vmatprep.mubr.bf16.mxu1 %v19262_v13  ;;  %6968 = vmatprep.mubr.bf16.mxu0 %v19262_v13 }
 0xd01   : > { %v16369_v11 = vpop.permute.xlu1 %6601 }
 0xd02   : > { %19303 = vst [vmem:[#allocation24_spill] sm:$0xff] %v16369_v11 }
 0xd1d   : > { %v11970_v46 = vpop.f32.mrb[152].mxu1 }
 0xd1e   : > { %v5769_v17 = vadd.f32 %v11970_v46, %v16285_v45  ;;  %v5760_v23 = vpop.f32.mrb[153].mxu1  ;;  %v16374_v46 = vpop.permute.xlu1 %6619 }
 0xd1f   : > { %v5761_v24 = vadd.f32 %v16285_v45, %v5760_v23  ;;  %v11971_v15 = vpop.f32.mrb[154].mxu1  ;;  %19305 = vst [vmem:[#allocation23_spill] sm:$0xff] %v16374_v46 }
 0xd20   : > { %v5772_v28 = vadd.f32 %v11971_v15, %v16285_v45  ;;  %v5763_v35 = vpop.f32.mrb[155].mxu1  ;;  %v5801_v18 = vmul.f32 0.5, %v5769_v17 }
 0xd21   : > { %v5764_v37 = vadd.f32 %v16285_v45, %v5763_v35  ;;  %v5799_v47 = vmul.f32 0.5, %v5761_v24  ;;  %v16381_v24 = vpop.permute.xlu0 %6587 }
 0xd22   : > { %v5802_v2 = vmul.f32 0.5, %v5772_v28  ;;  %19306 = vst [vmem:[#allocation82_spill] sm:$0xff] %v16381_v24 }
 0xd23   : > { %v5800_v38 = vmul.f32 0.5, %v5764_v37 }
 0xd24   : > { %v16359_v43 = vpack.c.bf16 %v5802_v2, %v5801_v18 }
 0xd25   : > { %v16361_v30 = vpack.c.bf16 %v5800_v38, %v5799_v47  ;;  %v16393_v36 = vpop.permute.xlu0 %6571 }
 0xd26   : > { %19301 = vst [vmem:[#allocation89_spill] sm:$0xff] %v16359_v43  ;;  %19310 = vst [vmem:[#allocation41_spill] sm:$0xff] %v16393_v36 }
 0xd27   : > { %19302 = vst [vmem:[#allocation83_spill] sm:$0xff] %v16361_v30  ;;  %10978 = vmatmul.mubr.msk.bf16.gmra.mrb[192].mxu1 %vm2564_vm3, %v16361_v30  ;;  %10986 = vmatmul.mubr.msk.bf16.gmra.mrb[220].mxu0 %vm2564_vm3, %v16361_v30 }
 0xd28   : > { %6865 = vmatprep.mubr.bf16.mxu1 %v19262_v13  ;;  %6978 = vmatprep.mubr.bf16.mxu0 %v19262_v13 }
 0xd29   : > { %v16437_v53 = vpop.permute.xlu0 %6589 }
 0xd2a   : > { %19315 = vst [vmem:[#allocation76_spill] sm:$0xff] %v16437_v53 }
 0xd2d   : > { %v11974_v32 = vpop.f32.mrb[156].mxu1 }
 0xd2e   : > { %v5785_v40 = vadd.f32 %v11974_v32, %v16285_v45  ;;  %v5776_v60 = vpop.f32.mrb[157].mxu1  ;;  %v16389_v32 = vpop.permute.xlu1 %6603 }
 0xd2f   : > { %v5777_v17 = vadd.f32 %v16285_v45, %v5776_v60  ;;  %v11975_v23 = vpop.f32.mrb[158].mxu1  ;;  %10979 = vmatmul.mubr.msk.bf16.gmra.mrb[196].mxu1 %vm2564_vm3, %v16359_v43  ;;  %10987 = vmatmul.mubr.msk.bf16.gmra.mrb[224].mxu0 %vm2564_vm3, %v16359_v43  ;;  %19308 = vst [vmem:[#allocation78_spill] sm:$0xff] %v16389_v32 }
 0xd30   : > { %v5788_v15 = vadd.f32 %v11975_v23, %v16285_v45  ;;  %v5779_v28 = vpop.f32.mrb[159].mxu1  ;;  %6875 = vmatprep.mubr.bf16.mxu1 %v19262_v13  ;;  %6988 = vmatprep.mubr.bf16.mxu0 %v19262_v13  ;;  %v5805_v37 = vmul.f32 0.5, %v5785_v40  ;;  %v12396_v40 = vld [vmem:[%s19311_s16 + $0xc8] sm:$0xff]  }
 0xd31   : > { %v5780_v35 = vadd.f32 %v16285_v45, %v5779_v28  ;;  %v5803_v2 = vmul.f32 0.5, %v5777_v17  ;;  %v12395_v45 = vld [vmem:[%s19311_s16 + $0x48] sm:$0xff]   ;;  %v12393_v28 = vld [vmem:[%s19311_s16] sm:$0xff]  }
 0xd32   : > { %v5806_v18 = vmul.f32 0.5, %v5788_v15  ;;  %v12392_v15 = vld [vmem:[%s19311_s16 + $0xc0] sm:$0xff]   ;;  %v16431_v57 = vpop.permute.xlu1 %6621 }
 0xd33   : > { %v5804_v47 = vmul.f32 0.5, %v5780_v35  ;;  %v12394_v35 = vld [vmem:[%s19311_s16 + $0x80] sm:$0xff]   ;;  %19314 = vst [vmem:[#allocation27_spill] sm:$0xff] %v16431_v57 }
 0xd34   : > { %v16387_v38 = vpack.c.bf16 %v5806_v18, %v5805_v37 }
 0xd35   : > { %v16391_v60 = vpack.c.bf16 %v5804_v47, %v5803_v2  ;;  %v12002_v14 = vpop.f32.mrb[160].mxu1  ;;  %v12397_v2 = vld [vmem:[%s19311_s16 + $0x8] sm:$0xff]  }
 0xd36   : > { %19307 = vst [vmem:[#allocation26_spill] sm:$0xff] %v16387_v38  ;;  %v5952_v23 = vpop.f32.mrb[161].mxu1  ;;  %v12398_v47 = vld [vmem:[%s19311_s16 + $0x88] sm:$0xff]   ;;  %v16483_v52 = vpop.permute.xlu1 %6605 }
 0xd37   : > { %19309 = vst [vmem:[#allocation25_spill] sm:$0xff] %v16391_v60  ;;  %10980 = vmatmul.mubr.msk.bf16.gmra.mrb[200].mxu1 %vm2564_vm3, %v16391_v60  ;;  %10988 = vmatmul.mubr.msk.bf16.gmra.mrb[228].mxu0 %vm2564_vm3, %v16391_v60  ;;  %v12003_v17 = vpop.f32.mrb[162].mxu1  ;;  %19317 = vst [vmem:[#allocation35_spill] sm:$0xff] %v16483_v52 }
 0xd38   : > { %6885 = vmatprep.mubr.bf16.mxu1 %v19262_v13  ;;  %6998 = vmatprep.mubr.bf16.mxu0 %v19262_v13  ;;  %v16419_v37 = vpack.c.bf16 %v12003_v17, %v12002_v14  ;;  %v5955_v18 = vpop.f32.mrb[163].mxu1 }
 0xd39   : > { %v16427_v26 = vpack.c.bf16 %v5955_v18, %v5952_v23 }
 0xd3a   : > { %19312 = vst [vmem:[#allocation28_spill] sm:$0xff] %v16419_v37  ;;  %v6380_v59 = vmul.bf16 %v12395_v45, %v16419_v37  ;;  %v6396_v21 = vmul.bf16 %v12396_v40, %v16419_v37  ;;  %v6372_v50 = vmul.bf16 %v12397_v2, %v16419_v37  ;;  %v6388_v23 = vmul.bf16 %v12398_v47, %v16419_v37  ;;  %v12399_v47 = vld [vmem:[%s19311_s16 + $0x50] sm:$0xff]  }
 0xd3b   : > { %19313 = vst [vmem:[#allocation39_spill] sm:$0xff] %v16427_v26  ;;  %v6379_v14 = vmul.bf16 %v12391_v48, %v16427_v26  ;;  %v6395_v17 = vmul.bf16 %v12392_v15, %v16427_v26  ;;  %v6371_v58 = vmul.bf16 %v12393_v28, %v16427_v26  ;;  %v6387_v39 = vmul.bf16 %v12394_v35, %v16427_v26 }
 0xd3c   : > { %v6665_v35 = vsel %vm2564_vm3, %v6380_v59, %v16337_v6  ;;  %v6729_v2 = vsel %vm2564_vm3, %v6396_v21, %v16335_v29  ;;  %v12400_v21 = vld [vmem:[%s19311_s16 + $0xd0] sm:$0xff]  }
 0xd3d   : > { %v12006_v18 = vpop.f32.mrb[164].mxu1  ;;  %v6661_v45 = vsel %vm2564_vm3, %v6379_v14, %v16327_v34  ;;  %v6725_v40 = vsel %vm2564_vm3, %v6395_v17, %v16333_v10  ;;  %v6629_v48 = vsel %vm2564_vm3, %v6371_v58, %v16329_v16  ;;  %v6693_v15 = vsel %vm2564_vm3, %v6387_v39, %v16331_v12  ;;  %v12403_v58 = vld [vmem:[%s19311_s16 + $0x58] sm:$0xff]   ;;  %v12401_v14 = vld [vmem:[%s19311_s16 + $0x10] sm:$0xff]  }
 0xd3e   : > { %v5968_v28 = vpop.f32.mrb[165].mxu1  ;;  %11465 = vmatprep.subr.bf16.mxu1 %v6661_v45  ;;  %11529 = vmatprep.subr.bf16.mxu0 %v6725_v40  ;;  %v12404_v39 = vld [vmem:[%s19311_s16 + $0xd8] sm:$0xff]   ;;  %v12402_v17 = vld [vmem:[%s19311_s16 + $0x90] sm:$0xff]  }
 0xd3f   : > { %10981 = vmatmul.mubr.msk.bf16.gmra.mrb[204].mxu1 %vm2564_vm3, %v16387_v38  ;;  %10989 = vmatmul.mubr.msk.bf16.gmra.mrb[232].mxu0 %vm2564_vm3, %v16387_v38  ;;  %v12007_v59 = vpop.f32.mrb[166].mxu1 }
 0xd40   : > { %v16475_v45 = vpack.c.bf16 %v12007_v59, %v12006_v18  ;;  %v5971_v40 = vpop.f32.mrb[167].mxu1  ;;  %11466 = vmatpush3.bf16.msra.mxu1 %v6629_v48  ;;  %11530 = vmatpush3.bf16.msra.mxu0 %v6693_v15  ;;  %v6633_v18 = vsel %vm2564_vm3, %v6372_v50, %v16341_v63  ;;  %v6697_v48 = vsel %vm2564_vm3, %v6388_v23, %v16339_v62  ;;  %v16491_v15 = vpop.permute.xlu0 %6573 }
 0xd41   : > { %v16485_v7 = vpack.c.bf16 %v5971_v40, %v5968_v28  ;;  %11467 = vmatprep.subr.bf16.mxu1 %v6665_v35  ;;  %11531 = vmatprep.subr.bf16.mxu0 %v6729_v2  ;;  %19319 = vst [vmem:[#allocation81_spill] sm:$0xff] %v16491_v15  ;;  %v12412_v40 = vld [vmem:[%s19311_s16 + $0xe8] sm:$0xff]  }
 0xd42   : > { %19316 = vst [vmem:[#allocation30_spill] sm:$0xff] %v16475_v45  ;;  %v6382_v59 = vmul.bf16 %v12403_v58, %v16475_v45  ;;  %v6398_v4 = vmul.bf16 %v12404_v39, %v16475_v45  ;;  %v6374_v50 = vmul.bf16 %v12405_v22, %v16475_v45  ;;  %v6390_v23 = vmul.bf16 %v12406_v49, %v16475_v45 }
 0xd43   : > { %19318 = vst [vmem:[#allocation29_spill] sm:$0xff] %v16485_v7  ;;  %v6381_v8 = vmul.bf16 %v12399_v47, %v16485_v7  ;;  %v6397_v44 = vmul.bf16 %v12400_v21, %v16485_v7  ;;  %v6373_v28 = vmul.bf16 %v12401_v14, %v16485_v7  ;;  %v6389_v35 = vmul.bf16 %v12402_v17, %v16485_v7  ;;  %v12411_v17 = vld [vmem:[%s19311_s16 + $0x68] sm:$0xff]  }
 0xd44   : > { %11468 = vmatpush3.bf16.msra.mxu1 %v6633_v18  ;;  %11532 = vmatpush3.bf16.msra.mxu0 %v6697_v48  ;;  %v6673_v22 = vsel %vm2564_vm3, %v6382_v59, %v16357_v27  ;;  %v6737_v49 = vsel %vm2564_vm3, %v6398_v4, %v16355_v55  ;;  %v12408_v48 = vld [vmem:[%s19311_s16 + $0xe0] sm:$0xff]   ;;  %v6641_v55 = vsel %vm2564_vm3, %v6374_v50, %v16371_v5 }
 0xd45   : > { %v12010_v2 = vpop.f32.mrb[168].mxu1  ;;  %v6669_v58 = vsel %vm2564_vm3, %v6381_v8, %v16345_v0  ;;  %v6733_v39 = vsel %vm2564_vm3, %v6397_v44, %v16343_v61  ;;  %v6637_v47 = vsel %vm2564_vm3, %v6373_v28, %v16350_v54  ;;  %v6701_v21 = vsel %vm2564_vm3, %v6389_v35, %v16347_v33  ;;  %v12407_v8 = vld [vmem:[%s19311_s16 + $0x60] sm:$0xff]   ;;  %v16516_v44 = vpop.permute.xlu1 %6623 }
 0xd46   : > { %v5984_v14 = vpop.f32.mrb[169].mxu1  ;;  %11469 = vmatprep.subr.bf16.mxu1 %v6669_v58  ;;  %11533 = vmatprep.subr.bf16.mxu0 %v6733_v39  ;;  %19320 = vst [vmem:[#allocation38_spill] sm:$0xff] %v16516_v44  ;;  %v12409_v4 = vld [vmem:[%s19311_s16 + $0x20] sm:$0xff]   ;;  %v16533_v28 = vpop.permute.xlu0 %6591  ;;  %v12413_v39 = vld [vmem:[%s19311_s16 + $0x28] sm:$0xff]  }
 0xd47   : > { %v12011_v18 = vpop.f32.mrb[170].mxu1  ;;  %v12410_v59 = vld [vmem:[%s19311_s16 + $0xa0] sm:$0xff]   ;;  %19321 = vst [vmem:[#allocation84_spill] sm:$0xff] %v16533_v28 }
 0xd48   : > { %v16535_v35 = vpack.c.bf16 %v12011_v18, %v12010_v2  ;;  %v5987_v58 = vpop.f32.mrb[171].mxu1  ;;  %11470 = vmatpush3.bf16.msra.mxu1 %v6637_v47  ;;  %11534 = vmatpush3.bf16.msra.mxu0 %v6701_v21  ;;  %v6705_v2 = vsel %vm2564_vm3, %v6390_v23, %v16369_v11 }
 0xd49   : > { %v16543_v3 = vpack.c.bf16 %v5987_v58, %v5984_v14  ;;  %11471 = vmatprep.subr.bf16.mxu1 %v6673_v22  ;;  %11535 = vmatprep.subr.bf16.mxu0 %v6737_v49  ;;  %v16557_v49 = vpop.permute.xlu1 %6607  ;;  %v12420_v58 = vld [vmem:[%s19311_s16 + $0xf8] sm:$0xff]  }
 0xd4a   : > { %19322 = vst [vmem:[#allocation32_spill] sm:$0xff] %v16535_v35  ;;  %v6384_v47 = vmul.bf16 %v12411_v17, %v16535_v35  ;;  %v6400_v21 = vmul.bf16 %v12412_v40, %v16535_v35  ;;  %v6376_v22 = vmul.bf16 %v12413_v39, %v16535_v35  ;;  %v6392_v50 = vmul.bf16 %v12414_v9, %v16535_v35 }
 0xd4b   : > { %19323 = vst [vmem:[#allocation80_spill] sm:$0xff] %v16543_v3  ;;  %v6383_v18 = vmul.bf16 %v12407_v8, %v16543_v3  ;;  %v6399_v27 = vmul.bf16 %v12408_v48, %v16543_v3  ;;  %v6375_v33 = vmul.bf16 %v12409_v4, %v16543_v3  ;;  %v6391_v14 = vmul.bf16 %v12410_v59, %v16543_v3  ;;  %v16567_v48 = vpop.permute.xlu0 %6575 }
 0xd4c   : > { %11472 = vmatpush3.bf16.msra.mxu1 %v6641_v55  ;;  %11536 = vmatpush3.bf16.msra.mxu0 %v6705_v2  ;;  %19324 = vst [vmem:[#allocation31_spill] sm:$0xff] %v16557_v49  ;;  %19325 = vst [vmem:[#allocation86_spill] sm:$0xff] %v16567_v48  ;;  %v6681_v9 = vsel %vm2564_vm3, %v6384_v47, %v16437_v53  ;;  %v6745_v59 = vsel %vm2564_vm3, %v6400_v21, %v16431_v57  ;;  %v12416_v2 = vld [vmem:[%s19311_s16 + $0xf0] sm:$0xff]  }
 0xd4d   : > { %v12014_v23 = vpop.f32.mrb[172].mxu1  ;;  %v6677_v17 = vsel %vm2564_vm3, %v6383_v18, %v16381_v24  ;;  %v6741_v8 = vsel %vm2564_vm3, %v6399_v27, %v16374_v46  ;;  %v6645_v40 = vsel %vm2564_vm3, %v6375_v33, %v16393_v36  ;;  %v6709_v55 = vsel %vm2564_vm3, %v6391_v14, %v16389_v32  ;;  %v12415_v27 = vld [vmem:[%s19311_s16 + $0x70] sm:$0xff]   ;;  %v12419_v33 = vld [vmem:[%s19311_s16 + $0x78] sm:$0xff]   ;;  %v16601_v36 = vpop.permute.xlu1 %6625 }
 0xd4e   : > { %v6000_v4 = vpop.f32.mrb[173].mxu1  ;;  %11473 = vmatprep.subr.bf16.mxu1 %v6677_v17  ;;  %11537 = vmatprep.subr.bf16.mxu0 %v6741_v8  ;;  %v12417_v47 = vld [vmem:[%s19311_s16 + $0x30] sm:$0xff]   ;;  %v6649_v8 = vsel %vm2564_vm3, %v6376_v22, %v16491_v15  ;;  %v6713_v57 = vsel %vm2564_vm3, %v6392_v50, %v16483_v52  ;;  %19327 = vst [vmem:[#allocation85_spill] sm:$0xff] %v16601_v36 }
 0xd4f   : > { %v12015_v39 = vpop.f32.mrb[174].mxu1  ;;  %v12418_v21 = vld [vmem:[%s19311_s16 + $0xb0] sm:$0xff]  }
 0xd50   : > { %v16591_v18 = vpack.c.bf16 %v12015_v39, %v12014_v23  ;;  %v6003_v14 = vpop.f32.mrb[175].mxu1  ;;  %11474 = vmatpush3.bf16.msra.mxu1 %v6645_v40  ;;  %11538 = vmatpush3.bf16.msra.mxu0 %v6709_v55  ;;  %v16605_v55 = vpop.permute.xlu0 %6593 }
 0xd51   : > { %v16593_v17 = vpack.c.bf16 %v6003_v14, %v6000_v4  ;;  %11475 = vmatprep.subr.bf16.mxu1 %v6681_v9  ;;  %11539 = vmatprep.subr.bf16.mxu0 %v6745_v59  ;;  %19328 = vst [vmem:[#allocation33_spill] sm:$0xff] %v16605_v55 }
 0xd52   : > { %v6386_v53 = vmul.bf16 %v12419_v33, %v16591_v18  ;;  %v6402_v32 = vmul.bf16 %v12420_v58, %v16591_v18  ;;  %v19329_v58 = vld [vmem:[#allocation22_spill] sm:$0xff] }
 0xd53   : > { %19326 = vst [vmem:[#allocation34_spill] sm:$0xff] %v16593_v17  ;;  %v6385_v23 = vmul.bf16 %v12415_v27, %v16593_v17  ;;  %v6401_v40 = vmul.bf16 %v12416_v2, %v16593_v17  ;;  %v6377_v4 = vmul.bf16 %v12417_v47, %v16593_v17  ;;  %v6393_v9 = vmul.bf16 %v12418_v21, %v16593_v17  ;;  %v19330_v47 = vld [vmem:[#allocation73_spill] sm:$0xff] }
 0xd54   : > { %11476 = vmatpush3.bf16.msra.mxu1 %v6649_v8  ;;  %11540 = vmatpush3.bf16.msra.mxu0 %v6713_v57  ;;  %v6689_v33 = vsel %vm2564_vm3, %v6386_v53, %v16605_v55  ;;  %v6753_v57 = vsel %vm2564_vm3, %v6402_v32, %v16601_v36  ;;  %v10679_v39 = vadd.f32 -1.0, %v19329_v58 }
 0xd55   : > { %v6685_v22 = vsel %vm2564_vm3, %v6385_v23, %v16533_v28  ;;  %v6749_v50 = vsel %vm2564_vm3, %v6401_v40, %v16516_v44  ;;  %v6653_v59 = vsel %vm2564_vm3, %v6377_v4, %v16567_v48  ;;  %v6717_v27 = vsel %vm2564_vm3, %v6393_v9, %v16557_v49 }
 0xd56   : > { %11477 = vmatprep.subr.bf16.mxu1 %v6685_v22  ;;  %11541 = vmatprep.subr.bf16.mxu0 %v6749_v50  ;;  %v1562_v2 = vmul.f32 1e+09, %v10679_v39 }
 0xd58   : > { %11478 = vmatpush3.bf16.msra.mxu1 %v6653_v59  ;;  %11542 = vmatpush3.bf16.msra.mxu0 %v6717_v27  ;;  %v16623_v21 = vrot.slane %v1562_v2, %v19330_v47 }
 0xd59   : > { %11479 = vmatprep.subr.bf16.mxu1 %v6689_v33  ;;  %11543 = vmatprep.subr.bf16.mxu0 %v6753_v57 }
 0xd5a   : > { %19331 = vst [vmem:[#allocation88_spill] sm:$0xff] %v16623_v21 }
 0xdba   : > { %v6817_v14 = vpop.f32.mrb[176].mxu1  ;;  %v6930_v8 = vpop.f32.mrb[204].mxu0 }
 0xdbb   : > { %v16626_v23 = vadd.f32 %v6817_v14, %v16623_v21  ;;  %v6819_v40 = vpop.f32.mrb[177].mxu1  ;;  %v6932_v53 = vpop.f32.mrb[205].mxu0  ;;  %v16635_v27 = vadd.f32 %v6930_v8, %v16623_v21 }
 0xdbc   : > { %v16629_v4 = vadd.f32 %v6819_v40, %v16623_v21  ;;  %v6821_v32 = vpop.f32.mrb[178].mxu1  ;;  %v6934_v9 = vpop.f32.mrb[206].mxu0  ;;  %v16643_v58 = vadd.f32 %v6932_v53, %v16623_v21 }
 0xdbd   : > { %v16632_v22 = vadd.f32 %v6821_v32, %v16623_v21  ;;  %v6823_v50 = vpop.f32.mrb[179].mxu1  ;;  %v6936_v59 = vpop.f32.mrb[207].mxu0  ;;  %v16647_v2 = vadd.f32 %v6934_v9, %v16623_v21 }
 0xdbe   : > { %v7009_v33 = vmax.f32 %v16626_v23, %v16629_v4  ;;  %v16640_v57 = vadd.f32 %v6823_v50, %v16623_v21  ;;  %v16653_v8 = vadd.f32 %v6936_v59, %v16623_v21 }
 0xdc0   : > { %v7010_v39 = vmax.f32 %v7009_v33, %v16635_v27  ;;  %v7014_v47 = vmax.f32 %v16632_v22, %v16640_v57 }
 0xdc2   : > { %v7011_v14 = vmax.f32 %v7010_v39, %v16643_v58  ;;  %v7015_v40 = vmax.f32 %v7014_v47, %v16647_v2  ;;  %v6827_v32 = vpop.f32.mrb[180].mxu1  ;;  %v6940_v50 = vpop.f32.mrb[208].mxu0 }
 0xdc3   : > { %v16657_v53 = vadd.f32 %v6827_v32, %v16623_v21  ;;  %v6829_v36 = vpop.f32.mrb[181].mxu1  ;;  %v6942_v33 = vpop.f32.mrb[209].mxu0  ;;  %v16667_v44 = vadd.f32 %v6940_v50, %v16623_v21 }
 0xdc4   : > { %v7016_v9 = vmax.f32 %v7015_v40, %v16653_v8  ;;  %v16661_v55 = vadd.f32 %v6829_v36, %v16623_v21  ;;  %v6831_v49 = vpop.f32.mrb[182].mxu1  ;;  %v6944_v48 = vpop.f32.mrb[210].mxu0  ;;  %7012 = vmax.xlane.f32.xlu0 %v7011_v14  ;;  %v16675_v36 = vadd.f32 %v6942_v33, %v16623_v21 }
 0xdc5   : > { %v16664_v59 = vadd.f32 %v6831_v49, %v16623_v21  ;;  %v6833_v39 = vpop.f32.mrb[183].mxu1  ;;  %v6946_v47 = vpop.f32.mrb[211].mxu0  ;;  %v16679_v49 = vadd.f32 %v6944_v48, %v16623_v21 }
 0xdc6   : > { %v7019_v32 = vmax.f32 %v16657_v53, %v16661_v55  ;;  %v16672_v28 = vadd.f32 %v6833_v39, %v16623_v21  ;;  %7017 = vmax.xlane.f32.xlu1 %v7016_v9  ;;  %v16685_v52 = vadd.f32 %v6946_v47, %v16623_v21 }
 0xdc8   : > { %v7020_v14 = vmax.f32 %v7019_v32, %v16667_v44  ;;  %v7024_v40 = vmax.f32 %v16664_v59, %v16672_v28 }
 0xdca   : > { %v7021_v50 = vmax.f32 %v7020_v14, %v16675_v36  ;;  %v7025_v39 = vmax.f32 %v7024_v40, %v16679_v49  ;;  %v6837_v15 = vpop.f32.mrb[184].mxu1  ;;  %v6950_v9 = vpop.f32.mrb[212].mxu0 }
 0xdcb   : > { %v16689_v33 = vadd.f32 %v6837_v15, %v16623_v21  ;;  %v6839_v46 = vpop.f32.mrb[185].mxu1  ;;  %v6952_v32 = vpop.f32.mrb[213].mxu0  ;;  %v16699_v54 = vadd.f32 %v6950_v9, %v16623_v21 }
 0xdcc   : > { %v7026_v48 = vmax.f32 %v7025_v39, %v16685_v52  ;;  %v16693_v24 = vadd.f32 %v6839_v46, %v16623_v21  ;;  %v6841_v11 = vpop.f32.mrb[186].mxu1  ;;  %v6954_v5 = vpop.f32.mrb[214].mxu0  ;;  %7022 = vmax.xlane.f32.xlu0 %v7021_v50  ;;  %v16707_v46 = vadd.f32 %v6952_v32, %v16623_v21 }
 0xdcd   : > { %v16696_v47 = vadd.f32 %v6841_v11, %v16623_v21  ;;  %v6843_v14 = vpop.f32.mrb[187].mxu1  ;;  %v6956_v40 = vpop.f32.mrb[215].mxu0  ;;  %v16711_v11 = vadd.f32 %v6954_v5, %v16623_v21 }
 0xdce   : > { %v7029_v15 = vmax.f32 %v16689_v33, %v16693_v24  ;;  %v16704_v61 = vadd.f32 %v6843_v14, %v16623_v21  ;;  %7027 = vmax.xlane.f32.xlu1 %v7026_v48  ;;  %v16717_v0 = vadd.f32 %v6956_v40, %v16623_v21 }
 0xdd0   : > { %v7030_v50 = vmax.f32 %v7029_v15, %v16699_v54  ;;  %v7034_v39 = vmax.f32 %v16696_v47, %v16704_v61 }
 0xdd2   : > { %v7031_v9 = vmax.f32 %v7030_v50, %v16707_v46  ;;  %v7035_v14 = vmax.f32 %v7034_v39, %v16711_v11  ;;  %v6847_v62 = vpop.f32.mrb[188].mxu1  ;;  %v6960_v48 = vpop.f32.mrb[216].mxu0 }
 0xdd3   : > { %v16721_v32 = vadd.f32 %v6847_v62, %v16623_v21  ;;  %v6849_v63 = vpop.f32.mrb[189].mxu1  ;;  %v6962_v15 = vpop.f32.mrb[217].mxu0  ;;  %v16731_v16 = vadd.f32 %v6960_v48, %v16623_v21 }
 0xdd4   : > { %v7036_v5 = vmax.f32 %v7035_v14, %v16717_v0  ;;  %v16725_v29 = vadd.f32 %v6849_v63, %v16623_v21  ;;  %v6851_v6 = vpop.f32.mrb[190].mxu1  ;;  %v6964_v12 = vpop.f32.mrb[218].mxu0  ;;  %7032 = vmax.xlane.f32.xlu0 %v7031_v9  ;;  %v16739_v63 = vadd.f32 %v6962_v15, %v16623_v21  ;;  %v12421_v15 = vld [vmem:[%s19281_s6 + $0xb8] sm:$0xff]  }
 0xdd5   : > { %v16728_v40 = vadd.f32 %v6851_v6, %v16623_v21  ;;  %v6853_v50 = vpop.f32.mrb[191].mxu1  ;;  %v6966_v39 = vpop.f32.mrb[219].mxu0  ;;  %v16743_v6 = vadd.f32 %v6964_v12, %v16623_v21  ;;  %v12422_v12 = vld [vmem:[%s19281_s6 + $0x38] sm:$0xff]  }
 0xdd6   : > { %v7039_v62 = vmax.f32 %v16721_v32, %v16725_v29  ;;  %v16736_v10 = vadd.f32 %v6853_v50, %v16623_v21  ;;  %7037 = vmax.xlane.f32.xlu1 %v7036_v5  ;;  %v16749_v34 = vadd.f32 %v6966_v39, %v16623_v21 }
 0xdd8   : > { %v7040_v9 = vmax.f32 %v7039_v62, %v16731_v16  ;;  %v7044_v14 = vmax.f32 %v16728_v40, %v16736_v10 }
 0xdda   : > { %v7041_v48 = vmax.f32 %v7040_v9, %v16739_v63  ;;  %v7045_v50 = vmax.f32 %v7044_v14, %v16743_v6 }
 0xddc   : > { %v7046_v5 = vmax.f32 %v7045_v50, %v16749_v34  ;;  %7042 = vmax.xlane.f32.xlu0 %v7041_v48 }
 0xdde   : > { %7047 = vmax.xlane.f32.xlu1 %v7046_v5 }
 0xdef   : > { %6609 = vrot.lane.b32.xlu1 %v12421_v15, %s19332_s4 }
 0xdf2   : > { %6577 = vrot.lane.b32.xlu0 %v12422_v12, %s19332_s4 }
 0xdfa   : > { %v6857_v39 = vpop.f32.mrb[192].mxu1  ;;  %v6970_v62 = vpop.f32.mrb[220].mxu0 }
 0xdfb   : > { %v6859_v9 = vpop.f32.mrb[193].mxu1  ;;  %v6972_v14 = vpop.f32.mrb[221].mxu0  ;;  %v16762_v35 = vadd.f32 %v6857_v39, %v16623_v21 }
 0xdfc   : > { %v6861_v17 = vpop.f32.mrb[194].mxu1  ;;  %v6974_v50 = vpop.f32.mrb[222].mxu0  ;;  %v16765_v3 = vadd.f32 %v6859_v9, %v16623_v21 }
 0xdfd   : > { %v6863_v48 = vpop.f32.mrb[195].mxu1  ;;  %v6976_v5 = vpop.f32.mrb[223].mxu0  ;;  %v16768_v45 = vadd.f32 %v6861_v17, %v16623_v21  ;;  %v16782_v17 = vadd.f32 %v6970_v62, %v16623_v21  ;;  %v16787_v31 = vadd.f32 %v6974_v50, %v16623_v21  ;;  %v16799_v62 = vadd.f32 %v6972_v14, %v16623_v21 }
 0xdfe   : > { %v16771_v15 = vadd.f32 %v6863_v48, %v16623_v21  ;;  %v7049_v37 = vmax.f32 %v16762_v35, %v16765_v3  ;;  %v16806_v50 = vadd.f32 %v6976_v5, %v16623_v21 }
 0xdff   : > { %19333 = vst [vmem:[#allocation40_spill] sm:$0xff] %v16768_v45  ;;  %19337 = vst [vmem:[#allocation90_spill] sm:$0xff] %v16782_v17 }
 0xe00   : > { %19334 = vst [vmem:[#allocation87_spill] sm:$0xff] %v16771_v15  ;;  %v7054_v48 = vmax.f32 %v16768_v45, %v16771_v15  ;;  %19338 = vst [vmem:[#allocation91_spill] sm:$0xff] %v16787_v31 }
 0xe02   : > { %v6867_v12 = vpop.f32.mrb[196].mxu1  ;;  %v6980_v7 = vpop.f32.mrb[224].mxu0  ;;  %v7055_v51 = vmax.f32 %v7054_v48, %v16787_v31 }
 0xe03   : > { %v16776_v26 = vadd.f32 %v6867_v12, %v16623_v21  ;;  %v6869_v20 = vpop.f32.mrb[197].mxu1  ;;  %v6982_v39 = vpop.f32.mrb[225].mxu0  ;;  %v7050_v12 = vmax.f32 %v7049_v37, %v16782_v17  ;;  %v16803_v13 = vadd.f32 %v6980_v7, %v16623_v21 }
 0xe04   : > { %v16779_v38 = vadd.f32 %v6869_v20, %v16623_v21  ;;  %v6871_v9 = vpop.f32.mrb[198].mxu1  ;;  %v6984_v60 = vpop.f32.mrb[226].mxu0  ;;  %v7056_v45 = vmax.f32 %v7055_v51, %v16806_v50  ;;  %v16820_v17 = vadd.f32 %v6982_v39, %v16623_v21 }
 0xe05   : > { %19335 = vst [vmem:[#allocation37_spill] sm:$0xff] %v16776_v26  ;;  %v6873_v43 = vpop.f32.mrb[199].mxu1  ;;  %v6986_v30 = vpop.f32.mrb[227].mxu0  ;;  %v16793_v20 = vadd.f32 %v6871_v9, %v16623_v21  ;;  %19341 = vst [vmem:[#allocation94_spill] sm:$0xff] %v16803_v13 }
 0xe06   : > { %19336 = vst [vmem:[#allocation22_spill] sm:$0xff] %v16779_v38  ;;  %v7059_v56 = vmax.f32 %v16776_v26, %v16779_v38  ;;  %v16796_v41 = vadd.f32 %v6873_v43, %v16623_v21  ;;  %v7051_v38 = vmax.f32 %v7050_v12, %v16799_v62 }
 0xe07   : > { %19339 = vst [vmem:[#allocation92_spill] sm:$0xff] %v16793_v20 }
 0xe08   : > { %19340 = vst [vmem:[#allocation93_spill] sm:$0xff] %v16796_v41  ;;  %v7060_v9 = vmax.f32 %v7059_v56, %v16803_v13  ;;  %v7064_v43 = vmax.f32 %v16793_v20, %v16796_v41  ;;  %v16823_v56 = vadd.f32 %v6984_v60, %v16623_v21 }
 0xe0a   : > { %v6877_v37 = vpop.f32.mrb[200].mxu1  ;;  %v6990_v15 = vpop.f32.mrb[228].mxu0  ;;  %v7061_v39 = vmax.f32 %v7060_v9, %v16820_v17  ;;  %v7065_v60 = vmax.f32 %v7064_v43, %v16823_v56 }
 0xe0b   : > { %v16813_v14 = vadd.f32 %v6877_v37, %v16623_v21  ;;  %v6879_v26 = vpop.f32.mrb[201].mxu1  ;;  %v6992_v48 = vpop.f32.mrb[229].mxu0  ;;  %v16829_v20 = vadd.f32 %v6990_v15, %v16623_v21  ;;  %v16845_v15 = vadd.f32 %v6986_v30, %v16623_v21 }
 0xe0c   : > { %v16816_v7 = vadd.f32 %v6879_v26, %v16623_v21  ;;  %v6881_v31 = vpop.f32.mrb[202].mxu1  ;;  %v6994_v5 = vpop.f32.mrb[230].mxu0 }
 0xe0d   : > { %v16826_v12 = vadd.f32 %v6881_v31, %v16623_v21  ;;  %v6883_v37 = vpop.f32.mrb[203].mxu1  ;;  %v6996_v41 = vpop.f32.mrb[231].mxu0  ;;  %19344 = vst [vmem:[#allocation97_spill] sm:$0xff] %v16829_v20  ;;  %v16839_v31 = vadd.f32 %v6992_v48, %v16623_v21 }
 0xe0e   : > { %19342 = vst [vmem:[#allocation95_spill] sm:$0xff] %v16816_v7  ;;  %v7069_v26 = vmax.f32 %v16813_v14, %v16816_v7  ;;  %v16834_v51 = vadd.f32 %v6883_v37, %v16623_v21  ;;  %v16848_v7 = vadd.f32 %v6994_v5, %v16623_v21 }
 0xe0f   : > { %19343 = vst [vmem:[#allocation96_spill] sm:$0xff] %v16826_v12  ;;  %19346 = vst [vmem:[#allocation99_spill] sm:$0xff] %v16839_v31 }
 0xe10   : > { %19345 = vst [vmem:[#allocation98_spill] sm:$0xff] %v16834_v51  ;;  %v7070_v13 = vmax.f32 %v7069_v26, %v16829_v20  ;;  %19347 = vst [vmem:[#allocation100_spill] sm:$0xff] %v16848_v7 }
 0xe11   : > { %7052 = vmax.xlane.f32.xlu0 %v7051_v38  ;;  %v7074_v38 = vmax.f32 %v16826_v12, %v16834_v51 }
 0xe12   : > { %v7071_v9 = vmax.f32 %v7070_v13, %v16839_v31  ;;  %v6887_v37 = vpop.f32.mrb[204].mxu1  ;;  %v7000_v43 = vpop.f32.mrb[232].mxu0 }
 0xe13   : > { %7057 = vmax.xlane.f32.xlu1 %v7056_v45  ;;  %v7066_v45 = vmax.f32 %v7065_v60, %v16845_v15  ;;  %v7075_v48 = vmax.f32 %v7074_v38, %v16848_v7  ;;  %v16854_v26 = vadd.f32 %v6887_v37, %v16623_v21  ;;  %v6889_v20 = vpop.f32.mrb[205].mxu1  ;;  %v7002_v51 = vpop.f32.mrb[233].mxu0  ;;  %v16866_v38 = vadd.f32 %v7000_v43, %v16623_v21 }
 0xe14   : > { %v16857_v30 = vadd.f32 %v6889_v20, %v16623_v21  ;;  %v6891_v12 = vpop.f32.mrb[206].mxu1  ;;  %v7004_v5 = vpop.f32.mrb[234].mxu0 }
 0xe15   : > { %7062 = vmax.xlane.f32.xlu0 %v7061_v39  ;;  %19348 = vst [vmem:[#allocation101_spill] sm:$0xff] %v16854_v26  ;;  %v16860_v39 = vadd.f32 %v6996_v41, %v16623_v21  ;;  %v16863_v13 = vadd.f32 %v6891_v12, %v16623_v21  ;;  %v6893_v60 = vpop.f32.mrb[207].mxu1  ;;  %v7006_v31 = vpop.f32.mrb[235].mxu0  ;;  %19350 = vst [vmem:[#allocation103_spill] sm:$0xff] %v16866_v38  ;;  %v16875_v41 = vadd.f32 %v7002_v51, %v16623_v21 }
 0xe16   : > { %v7079_v37 = vmax.f32 %v16854_v26, %v16857_v30  ;;  %v16871_v20 = vadd.f32 %v6893_v60, %v16623_v21  ;;  %v16879_v7 = vadd.f32 %v7004_v5, %v16623_v21  ;;  %v16885_v26 = vadd.f32 %v7006_v31, %v16623_v21 }
 0xe17   : > { %7072 = vmax.xlane.f32.xlu1 %v7071_v9  ;;  %19349 = vst [vmem:[#allocation102_spill] sm:$0xff] %v16863_v13  ;;  %v7076_v9 = vmax.f32 %v7075_v48, %v16860_v39  ;;  %19351 = vst [vmem:[#allocation104_spill] sm:$0xff] %v16875_v41 }
 0xe18   : > { %v7080_v12 = vmax.f32 %v7079_v37, %v16866_v38  ;;  %v7084_v43 = vmax.f32 %v16863_v13, %v16871_v20 }
 0xe19   : > { %7067 = vmax.xlane.f32.xlu0 %v7066_v45 }
 0xe1a   : > { %v7081_v45 = vmax.f32 %v7080_v12, %v16875_v41  ;;  %v7085_v60 = vmax.f32 %v7084_v43, %v16879_v7 }
 0xe1c   : > { %v7086_v48 = vmax.f32 %v7085_v60, %v16885_v26  ;;  %7082 = vmax.xlane.f32.xlu1 %v7081_v45 }
 0xe1d   : > { %7077 = vmax.xlane.f32.xlu0 %v7076_v9 }
 0xe21   : > { %7087 = vmax.xlane.f32.xlu0 %v7086_v48 }
 0xe51   : > { %v7013_v51 = vpop.xlane.xlu0 %7012 }
 0xe52   : > { %v7090_v37 = vsub.f32 %v16629_v4, %v7013_v51  ;;  %v7092_v38 = vsub.f32 %v16643_v58, %v7013_v51  ;;  %v7089_v21 = vsub.f32 %v16626_v23, %v7013_v51  ;;  %v7091_v23 = vsub.f32 %v16635_v27, %v7013_v51 }
 0xe53   : > { %v7018_v5 = vpop.xlane.xlu1 %7017 }
 0xe54   : > { %v7094_v13 = vsub.f32 %v16640_v57, %v7018_v5  ;;  %v7096_v9 = vsub.f32 %v16653_v8, %v7018_v5  ;;  %v7155_v12 = vmul.f32 1.442695, %v7090_v37  ;;  %v7159_v31 = vmul.f32 1.442695, %v7092_v38 }
 0xe55   : > { %v7093_v45 = vsub.f32 %v16632_v22, %v7018_v5  ;;  %v7095_v48 = vsub.f32 %v16647_v2, %v7018_v5  ;;  %v7153_v58 = vmul.f32 1.442695, %v7089_v21 }
 0xe56   : > { %v7163_v41 = vmul.f32 1.442695, %v7094_v13  ;;  %v7167_v43 = vmul.f32 1.442695, %v7096_v9  ;;  %12789 = vpow2.f32 %v7155_v12 }
 0xe57   : > { %v7161_v13 = vmul.f32 1.442695, %v7093_v45  ;;  %v7165_v37 = vmul.f32 1.442695, %v7095_v48 }
 0xe58   : > { %12791 = vpow2.f32 %v7163_v41 }
 0xe59   : > { %v7023_v60 = vpop.xlane.xlu0 %7022  ;;  %12793 = vpow2.f32 %v7159_v31 }
 0xe5a   : > { %12795 = vpow2.f32 %v7167_v43  ;;  %v7098_v57 = vsub.f32 %v16661_v55, %v7023_v60  ;;  %v7100_v22 = vsub.f32 %v16675_v36, %v7023_v60  ;;  %v7097_v2 = vsub.f32 %v16657_v53, %v7023_v60 }
 0xe5b   : > { %v7028_v4 = vpop.xlane.xlu1 %7027  ;;  %12797 = vpow2.f32 %v7153_v58 }
 0xe5c   : > { %v7102_v8 = vsub.f32 %v16672_v28, %v7028_v4  ;;  %v7104_v38 = vsub.f32 %v16685_v52, %v7028_v4  ;;  %v7171_v41 = vmul.f32 1.442695, %v7098_v57  ;;  %12799 = vpow2.f32 %v7161_v13 }
 0xe5d   : > { %v7101_v21 = vsub.f32 %v16664_v59, %v7028_v4  ;;  %v7157_v28 = vmul.f32 1.442695, %v7091_v23  ;;  %12801 = vpow2.f32 %v7165_v37  ;;  %v7103_v52 = vsub.f32 %v16679_v49, %v7028_v4 }
 0xe5e   : > { %v7179_v9 = vmul.f32 1.442695, %v7102_v8  ;;  %v7183_v5 = vmul.f32 1.442695, %v7104_v38  ;;  %v7175_v51 = vmul.f32 1.442695, %v7100_v22  ;;  %v7099_v49 = vsub.f32 %v16667_v44, %v7023_v60 }
 0xe5f   : > { %v7169_v31 = vmul.f32 1.442695, %v7097_v2  ;;  %v7177_v45 = vmul.f32 1.442695, %v7101_v21  ;;  %v7181_v4 = vmul.f32 1.442695, %v7103_v52 }
 0xe60   : > { %v12790_v27 = vpop.eup %12789  ;;  %12803 = vpow2.f32 %v7179_v9  ;;  %v7173_v22 = vmul.f32 1.442695, %v7099_v49 }
 0xe61   : > { %v16903_v55 = vpop.xlane.xlu0 %7032  ;;  %12805 = vpow2.f32 %v7171_v41 }
 0xe62   : > { %v12792_v36 = vpop.eup %12791  ;;  %v7106_v53 = vsub.f32 %v16693_v24, %v16903_v55  ;;  %12807 = vpow2.f32 %v7183_v5  ;;  %v7108_v8 = vsub.f32 %v16707_v46, %v16903_v55  ;;  %v7105_v44 = vsub.f32 %v16689_v33, %v16903_v55 }
 0xe63   : > { %v7038_v12 = vpop.xlane.xlu1 %7037  ;;  %v12794_v59 = vpop.eup %12793  ;;  %v7282_v58 = vpack.c.bf16 %v12792_v36, %v12790_v27  ;;  %12809 = vpow2.f32 %v7157_v28 }
 0xe64   : > { %v7110_v43 = vsub.f32 %v16704_v61, %v7038_v12  ;;  %v7112_v48 = vsub.f32 %v16717_v0, %v7038_v12  ;;  %v12796_v57 = vpop.eup %12795  ;;  %12811 = vpow2.f32 %v7175_v51  ;;  %v12423_v61 = vld [vmem:[%s19311_s16 + $0x38] sm:$0xff]   ;;  %v7187_v60 = vmul.f32 1.442695, %v7106_v53 }
 0xe65   : > { %7345 = vmatprep.mubr.bf16.mxu1 %v7282_v58  ;;  %v7284_v24 = vpack.c.bf16 %v12796_v57, %v12794_v59  ;;  %v12424_v0 = vld [vmem:[%s19311_s16 + $0xb8] sm:$0xff]   ;;  %12813 = vpow2.f32 %v7169_v31  ;;  %v7109_v46 = vsub.f32 %v16696_v47, %v7038_v12  ;;  %v12798_v37 = vpop.eup %12797  ;;  %v7111_v9 = vsub.f32 %v16711_v11, %v7038_v12  ;;  %v13222_v57 = vld [vmem:[%s19096_s2] sm:$0xf] }
 0xe66   : > { %v7195_v13 = vmul.f32 1.442695, %v7110_v43  ;;  %12815 = vpow2.f32 %v7177_v45  ;;  %v7199_v23 = vmul.f32 1.442695, %v7112_v48  ;;  %v12800_v41 = vpop.eup %12799  ;;  %v7191_v21 = vmul.f32 1.442695, %v7108_v8 }
 0xe67   : > { %7442 = vmatprep.mubr.bf16.mxu0 %v7284_v24  ;;  %12817 = vpow2.f32 %v7181_v4  ;;  %v6378_v33 = vmul.bf16 %v12423_v61, %v16591_v18  ;;  %v6394_v5 = vmul.bf16 %v12424_v0, %v16591_v18  ;;  %v12802_v28 = vpop.eup %12801  ;;  %v7185_v52 = vmul.f32 1.442695, %v7105_v44 }
 0xe68   : > { %12819 = vpow2.f32 %v7195_v13  ;;  %v7193_v12 = vmul.f32 1.442695, %v7109_v46  ;;  %v7107_v43 = vsub.f32 %v16699_v54, %v16903_v55 }
 0xe69   : > { %v16921_v38 = vpop.xlane.xlu0 %7042  ;;  %12821 = vpow2.f32 %v7187_v60 }
 0xe6a   : > { %v7114_v47 = vsub.f32 %v16725_v29, %v16921_v38  ;;  %v12804_v11 = vpop.eup %12803  ;;  %12823 = vpow2.f32 %v7199_v23  ;;  %v7197_v29 = vmul.f32 1.442695, %v7111_v9  ;;  %v7116_v48 = vsub.f32 %v16739_v63, %v16921_v38 }
 0xe6b   : > { %v16925_v2 = vpop.xlane.xlu1 %7047  ;;  %v12806_v53 = vpop.eup %12805  ;;  %12825 = vpow2.f32 %v7173_v22  ;;  %v19354_v63 = vmul.bf16 %v16127_v1, %v16139_v19  ;;  %v7189_v61 = vmul.f32 1.442695, %v7107_v43  ;;  %v7113_v46 = vsub.f32 %v16721_v32, %v16921_v38 }
 0xe6c   : > { %v7118_v27 = vsub.f32 %v16736_v10, %v16925_v2  ;;  %v7120_v36 = vsub.f32 %v16749_v34, %v16925_v2  ;;  %v7281_v10 = vpack.c.bf16 %v12800_v41, %v12798_v37  ;;  %v12808_v45 = vpop.eup %12807  ;;  %12827 = vpow2.f32 %v7191_v21 }
 0xe6d   : > { %v16933_v51 = vpop.permute.xlu0 %6577  ;;  %v12810_v54 = vpop.eup %12809  ;;  %12829 = vpow2.f32 %v7185_v52  ;;  %v7203_v55 = vmul.f32 1.442695, %v7114_v47  ;;  %v7286_v49 = vpack.c.bf16 %v12804_v11, %v12806_v53  ;;  %v7117_v0 = vsub.f32 %v16728_v40, %v16925_v2 }
 0xe6e   : > { %19352 = vst [vmem:[#allocation105_spill] sm:$0xff] %v16933_v51  ;;  %v6657_v31 = vsel %vm2564_vm3, %v6378_v33, %v16933_v51  ;;  %v7211_v58 = vmul.f32 1.442695, %v7118_v27  ;;  %v12812_v4 = vpop.eup %12811  ;;  %12831 = vpow2.f32 %v7193_v12  ;;  %v7215_v8 = vmul.f32 1.442695, %v7120_v36 }
 0xe6f   : > { %v16941_v59 = vpop.permute.xlu1 %6609  ;;  %11480 = vmatpush3.bf16.msra.mxu1 %v6657_v31  ;;  %v7283_v13 = vpack.c.bf16 %v12802_v28, %v12810_v54  ;;  %v12814_v24 = vpop.eup %12813  ;;  %12833 = vpow2.f32 %v7197_v29  ;;  %v7288_v44 = vpack.c.bf16 %v12808_v45, %v12812_v4  ;;  %v7207_v23 = vmul.f32 1.442695, %v7116_v48 }
 0xe70   : > { %19353 = vst [vmem:[#allocation106_spill] sm:$0xff] %v16941_v59  ;;  %v6721_v34 = vsel %vm2564_vm3, %v6394_v5, %v16941_v59  ;;  %12016 = vmatprep.subr.msk.mxu1 %vm3558_vm4, %v13222_v57  ;;  %v12816_v60 = vpop.eup %12815  ;;  %12835 = vpow2.f32 %v7211_v58  ;;  %v19355_v1 = vmul.bf16 %v16137_v25, %v16139_v19  ;;  %v7119_v40 = vsub.f32 %v16743_v6, %v16925_v2 }
 0xe71   : > { %11544 = vmatpush3.bf16.msra.mxu0 %v6721_v34  ;;  %v12818_v37 = vpop.eup %12817  ;;  %12837 = vpow2.f32 %v7203_v55  ;;  %v19356_v22 = vmul.bf16 %v16122_v42, %v16139_v19  ;;  %v7115_v41 = vsub.f32 %v16731_v16, %v16921_v38  ;;  %v7209_v21 = vmul.f32 1.442695, %v7117_v0 }
 0xe72   : > { %7346 = vmatmul.mubr.bf16.vlgmr.msra.gmra.mrb[208].mxu1 %v7281_v10  ;;  %8152 = vmatprep.subr.bf16.mxu0 %v19354_v63  ;;  %v12820_v9 = vpop.eup %12819  ;;  %12839 = vpow2.f32 %v7215_v8  ;;  %v7201_v33 = vmul.f32 1.442695, %v7113_v46  ;;  %v7285_v5 = vpack.c.bf16 %v12816_v60, %v12814_v24  ;;  %v7213_v52 = vmul.f32 1.442695, %v7119_v40  ;;  %v19359_v40 = vld [vmem:[#allocation87_spill] sm:$0xff] }
 0xe73   : > { %7353 = vmatprep.mubr.bf16.mxu1 %v7286_v49  ;;  %12017 = vmatpush3.msk.msra.mxu1 %vm3558_vm4, %v13222_v57  ;;  %v12822_v32 = vpop.eup %12821  ;;  %12841 = vpow2.f32 %v7189_v61  ;;  %v7205_v27 = vmul.f32 1.442695, %v7115_v41 }
 0xe74   : > { %7443 = vmatmul.mubr.bf16.vlgmr.msra.gmra.mrb[236].mxu0 %v7283_v13  ;;  %8265 = vmatprep.subr.bf16.mxu1 %v19355_v1  ;;  %v12824_v25 = vpop.eup %12823  ;;  %12843 = vpow2.f32 %v7207_v23  ;;  %v7290_v6 = vpack.c.bf16 %v12820_v9, %v12822_v32  ;;  %v19357_v13 = vld [vmem:[#allocation90_spill] sm:$0xff]  ;;  %v19358_v23 = vld [vmem:[#allocation40_spill] sm:$0xff]  ;;  %v19360_v9 = vld [vmem:[#allocation91_spill] sm:$0xff] }
 0xe75   : > { %7450 = vmatprep.mubr.bf16.mxu0 %v7288_v44  ;;  %8153 = vmatpush1.bf16.msra.mxu0 %v19356_v22  ;;  %v12826_v28 = vpop.eup %12825  ;;  %12845 = vpow2.f32 %v7209_v21 }
 0xe76   : > { %v12828_v2 = vpop.eup %12827  ;;  %v7287_v47 = vpack.c.bf16 %v12818_v37, %v12826_v28  ;;  %12847 = vpow2.f32 %v7201_v33  ;;  %v19361_v33 = vld [vmem:[#allocation37_spill] sm:$0xff]  ;;  %v19362_v28 = vld [vmem:[#allocation22_spill] sm:$0xff] }
 0xe77   : > { %v12830_v42 = vpop.eup %12829  ;;  %v7292_v11 = vpack.c.bf16 %v12824_v25, %v12828_v2  ;;  %12849 = vpow2.f32 %v7213_v52  ;;  %v19363_v2 = vld [vmem:[#allocation94_spill] sm:$0xff] }
 0xe78   : > { %v12832_v12 = vpop.eup %12831  ;;  %12851 = vpow2.f32 %v7205_v27 }
 0xe79   : > { %v12834_v16 = vpop.eup %12833  ;;  %v7289_v53 = vpack.c.bf16 %v12832_v12, %v12830_v42 }
 0xe7a   : > { %7354 = vmatmul.mubr.bf16.gmra.mrb[212].mxu1 %v7285_v5  ;;  %v12836_v38 = vpop.eup %12835 }
 0xe7b   : > { %7361 = vmatprep.mubr.bf16.mxu1 %v7290_v6  ;;  %v12838_v36 = vpop.eup %12837 }
 0xe7c   : > { %7451 = vmatmul.mubr.bf16.gmra.mrb[240].mxu0 %v7287_v47  ;;  %v12840_v31 = vpop.eup %12839  ;;  %v7294_v29 = vpack.c.bf16 %v12836_v38, %v12838_v36  ;;  %v19365_v38 = vld [vmem:[#allocation93_spill] sm:$0xff] }
 0xe7d   : > { %7458 = vmatprep.mubr.bf16.mxu0 %v7292_v11  ;;  %v12842_v43 = vpop.eup %12841  ;;  %v19364_v11 = vld [vmem:[#allocation92_spill] sm:$0xff] }
 0xe7e   : > { %v12844_v10 = vpop.eup %12843  ;;  %v7291_v45 = vpack.c.bf16 %v12834_v16, %v12842_v43 }
 0xe7f   : > { %v7296_v48 = vpack.c.bf16 %v12840_v31, %v12844_v10  ;;  %v12846_v58 = vpop.eup %12845 }
 0xe80   : > { %v12848_v34 = vpop.eup %12847 }
 0xe81   : > { %v12850_v57 = vpop.eup %12849  ;;  %v7293_v54 = vpack.c.bf16 %v12846_v58, %v12848_v34 }
 0xe82   : > { %7362 = vmatmul.mubr.bf16.gmra.mrb[216].mxu1 %v7289_v53  ;;  %v12852_v55 = vpop.eup %12851 }
 0xe83   : > { %7369 = vmatprep.mubr.bf16.mxu1 %v7294_v29  ;;  %v7295_v49 = vpack.c.bf16 %v12850_v57, %v12852_v55 }
 0xe84   : > { %7459 = vmatmul.mubr.bf16.gmra.mrb[244].mxu0 %v7291_v45 }
 0xe85   : > { %7466 = vmatprep.mubr.bf16.mxu0 %v7296_v48 }
 0xe8a   : > { %7370 = vmatmul.mubr.bf16.gmra.mrb[220].mxu1 %v7293_v54  ;;  %v19366_v54 = vld [vmem:[#allocation95_spill] sm:$0xff] }
 0xe8c   : > { %7467 = vmatmul.mubr.bf16.gmra.mrb[248].mxu0 %v7295_v49  ;;  %v19367_v49 = vld [vmem:[#allocation97_spill] sm:$0xff] }
 0xe9e   : > { %v7053_v4 = vpop.xlane.xlu0 %7052 }
 0xe9f   : > { %v7121_v8 = vsub.f32 %v16762_v35, %v7053_v4  ;;  %v7122_v63 = vsub.f32 %v16765_v3, %v7053_v4  ;;  %v7123_v24 = vsub.f32 %v19357_v13, %v7053_v4  ;;  %v7124_v61 = vsub.f32 %v16799_v62, %v7053_v4 }
 0xea0   : > { %v7058_v0 = vpop.xlane.xlu1 %7057 }
 0xea1   : > { %v7217_v44 = vmul.f32 1.442695, %v7121_v8  ;;  %v7219_v60 = vmul.f32 1.442695, %v7122_v63  ;;  %v7221_v46 = vmul.f32 1.442695, %v7123_v24  ;;  %v7125_v1 = vsub.f32 %v19358_v23, %v7058_v0 }
 0xea2   : > { %v7223_v37 = vmul.f32 1.442695, %v7124_v61  ;;  %v7126_v22 = vsub.f32 %v19359_v40, %v7058_v0  ;;  %v7127_v32 = vsub.f32 %v19360_v9, %v7058_v0  ;;  %v7128_v41 = vsub.f32 %v16806_v50, %v7058_v0  ;;  %v7063_v35 = vpop.xlane.xlu0 %7062  ;;  %v19368_v24 = vld [vmem:[#allocation99_spill] sm:$0xff]  ;;  %v19370_v9 = vld [vmem:[#allocation98_spill] sm:$0xff] }
 0xea3   : > { %12853 = vpow2.f32 %v7217_v44  ;;  %v7225_v3 = vmul.f32 1.442695, %v7125_v1  ;;  %v7129_v5 = vsub.f32 %v19361_v33, %v7063_v35  ;;  %v7130_v52 = vsub.f32 %v19362_v28, %v7063_v35  ;;  %v19369_v44 = vld [vmem:[#allocation96_spill] sm:$0xff] }
 0xea4   : > { %12855 = vpow2.f32 %v7219_v60  ;;  %v7227_v21 = vmul.f32 1.442695, %v7126_v22  ;;  %v7229_v62 = vmul.f32 1.442695, %v7127_v32  ;;  %v7231_v25 = vmul.f32 1.442695, %v7128_v41  ;;  %v7073_v27 = vpop.xlane.xlu1 %7072 }
 0xea5   : > { %12857 = vpow2.f32 %v7221_v46  ;;  %v7131_v47 = vsub.f32 %v19363_v2, %v7063_v35  ;;  %v7132_v50 = vsub.f32 %v16820_v17, %v7063_v35  ;;  %v7233_v42 = vmul.f32 1.442695, %v7129_v5  ;;  %v19371_v41 = vld [vmem:[#allocation100_spill] sm:$0xff] }
 0xea6   : > { %12859 = vpow2.f32 %v7223_v37  ;;  %v7068_v6 = vpop.xlane.xlu0 %7067  ;;  %v7235_v16 = vmul.f32 1.442695, %v7130_v52  ;;  %v7137_v45 = vsub.f32 %v16813_v14, %v7073_v27  ;;  %v7138_v55 = vsub.f32 %v19366_v54, %v7073_v27 }
 0xea7   : > { %12861 = vpow2.f32 %v7225_v3  ;;  %v7133_v12 = vsub.f32 %v19364_v11, %v7068_v6  ;;  %v7134_v36 = vsub.f32 %v19365_v38, %v7068_v6  ;;  %v7237_v53 = vmul.f32 1.442695, %v7131_v47  ;;  %v19372_v47 = vld [vmem:[#allocation104_spill] sm:$0xff] }
 0xea8   : > { %12863 = vpow2.f32 %v7227_v21  ;;  %v7135_v43 = vsub.f32 %v16823_v56, %v7068_v6  ;;  %v7239_v10 = vmul.f32 1.442695, %v7132_v50  ;;  %v7136_v48 = vsub.f32 %v16845_v15, %v7068_v6 }
 0xea9   : > { %12865 = vpow2.f32 %v7229_v62  ;;  %v7241_v17 = vmul.f32 1.442695, %v7133_v12  ;;  %v7139_v4 = vsub.f32 %v19367_v49, %v7073_v27  ;;  %v7243_v8 = vmul.f32 1.442695, %v7134_v36  ;;  %v7083_v22 = vpop.xlane.xlu1 %7082 }
 0xeaa   : > { %12867 = vpow2.f32 %v7231_v25  ;;  %v7078_v34 = vpop.xlane.xlu0 %7077  ;;  %v7245_v56 = vmul.f32 1.442695, %v7135_v43  ;;  %v7140_v14 = vsub.f32 %v19368_v24, %v7073_v27  ;;  %v7249_v61 = vmul.f32 1.442695, %v7137_v45 }
 0xeab   : > { %12869 = vpow2.f32 %v7233_v42  ;;  %v7247_v15 = vmul.f32 1.442695, %v7136_v48  ;;  %v7141_v60 = vsub.f32 %v19369_v44, %v7078_v34  ;;  %v7251_v37 = vmul.f32 1.442695, %v7138_v55 }
 0xeac   : > { %12871 = vpow2.f32 %v7235_v16  ;;  %v7253_v40 = vmul.f32 1.442695, %v7139_v4  ;;  %v7142_v32 = vsub.f32 %v19370_v9, %v7078_v34  ;;  %v7143_v35 = vsub.f32 %v19371_v41, %v7078_v34 }
 0xead   : > { %v12854_v31 = vpop.eup %12853  ;;  %12873 = vpow2.f32 %v7237_v53  ;;  %v7255_v25 = vmul.f32 1.442695, %v7140_v14  ;;  %v7144_v33 = vsub.f32 %v16860_v39, %v7078_v34  ;;  %v7146_v5 = vsub.f32 %v16857_v30, %v7083_v22  ;;  %v19373_v30 = vld [vmem:[#allocation102_spill] sm:$0xff] }
 0xeae   : > { %v12856_v29 = vpop.eup %12855  ;;  %12875 = vpow2.f32 %v7239_v10  ;;  %v7088_v3 = vpop.xlane.xlu0 %7087  ;;  %v7257_v28 = vmul.f32 1.442695, %v7141_v60  ;;  %v7259_v52 = vmul.f32 1.442695, %v7142_v32  ;;  %v7148_v50 = vsub.f32 %v19372_v47, %v7083_v22 }
 0xeaf   : > { %v12858_v58 = vpop.eup %12857  ;;  %12877 = vpow2.f32 %v7241_v17  ;;  %v7150_v6 = vsub.f32 %v16871_v20, %v7088_v3  ;;  %v7261_v42 = vmul.f32 1.442695, %v7143_v35  ;;  %v7263_v11 = vmul.f32 1.442695, %v7144_v33 }
 0xeb0   : > { %v12860_v57 = vpop.eup %12859  ;;  %12879 = vpow2.f32 %v7243_v8  ;;  %v7152_v39 = vsub.f32 %v16885_v26, %v7088_v3  ;;  %v7267_v16 = vmul.f32 1.442695, %v7146_v5  ;;  %v7149_v38 = vsub.f32 %v19373_v30, %v7088_v3  ;;  %v19375_v26 = vld [vmem:[#allocation103_spill] sm:$0xff] }
 0xeb1   : > { %v12862_v63 = vpop.eup %12861  ;;  %12881 = vpow2.f32 %v7245_v56  ;;  %v7275_v20 = vmul.f32 1.442695, %v7150_v6  ;;  %v7151_v10 = vsub.f32 %v16879_v7, %v7088_v3  ;;  %v7147_v17 = vsub.f32 %v19375_v26, %v7083_v22 }
 0xeb2   : > { %v12864_v13 = vpop.eup %12863  ;;  %v7297_v23 = vpack.c.bf16 %v12862_v63, %v12854_v31  ;;  %12883 = vpow2.f32 %v7247_v15  ;;  %v19374_v31 = vld [vmem:[#allocation101_spill] sm:$0xff]  ;;  %v7279_v48 = vmul.f32 1.442695, %v7152_v39  ;;  %v7273_v34 = vmul.f32 1.442695, %v7149_v38 }
 0xeb3   : > { %v12866_v0 = vpop.eup %12865  ;;  %v7298_v46 = vpack.c.bf16 %v12864_v13, %v12856_v29  ;;  %12885 = vpow2.f32 %v7249_v61  ;;  %v7145_v53 = vsub.f32 %v19374_v31, %v7083_v22  ;;  %v7271_v29 = vmul.f32 1.442695, %v7148_v50 }
 0xeb4   : > { %v12868_v1 = vpop.eup %12867  ;;  %v7299_v62 = vpack.c.bf16 %v12866_v0, %v12858_v58  ;;  %12887 = vpow2.f32 %v7251_v37  ;;  %v7277_v8 = vmul.f32 1.442695, %v7151_v10  ;;  %v7269_v24 = vmul.f32 1.442695, %v7147_v17 }
 0xeb5   : > { %7377 = vmatprep.mubr.bf16.mxu1 %v7298_v46  ;;  %v7300_v21 = vpack.c.bf16 %v12868_v1, %v12860_v57  ;;  %v12870_v2 = vpop.eup %12869  ;;  %12889 = vpow2.f32 %v7253_v40  ;;  %v7265_v55 = vmul.f32 1.442695, %v7145_v53  ;;  %v19376_v5 = vmov 0  }
 0xeb6   : > { %7378 = vmatmul.mubr.bf16.gmra.mrb[224].mxu1 %v7297_v23  ;;  %v12872_v27 = vpop.eup %12871  ;;  %12891 = vpow2.f32 %v7255_v25 }
 0xeb7   : > { %7474 = vmatprep.mubr.bf16.mxu0 %v7300_v21  ;;  %v12874_v12 = vpop.eup %12873  ;;  %12893 = vpow2.f32 %v7257_v28 }
 0xeb8   : > { %7475 = vmatmul.mubr.bf16.gmra.mrb[252].mxu0 %v7299_v62  ;;  %v12876_v36 = vpop.eup %12875  ;;  %12895 = vpow2.f32 %v7259_v52 }
 0xeb9   : > { %v12878_v43 = vpop.eup %12877  ;;  %12897 = vpow2.f32 %v7261_v42 }
 0xeba   : > { %v12880_v45 = vpop.eup %12879  ;;  %12899 = vpow2.f32 %v7263_v11  ;;  %v7301_v49 = vpack.c.bf16 %v12878_v43, %v12870_v2 }
 0xebb   : > { %v12882_v58 = vpop.eup %12881  ;;  %12901 = vpow2.f32 %v7267_v16  ;;  %v7302_v57 = vpack.c.bf16 %v12880_v45, %v12872_v27 }
 0xebc   : > { %v12884_v54 = vpop.eup %12883  ;;  %12903 = vpow2.f32 %v7275_v20  ;;  %v7303_v7 = vpack.c.bf16 %v12882_v58, %v12874_v12 }
 0xebd   : > { %v12886_v4 = vpop.eup %12885  ;;  %12905 = vpow2.f32 %v7271_v29  ;;  %7385 = vmatprep.mubr.bf16.mxu1 %v7302_v57  ;;  %v7304_v63 = vpack.c.bf16 %v12884_v54, %v12876_v36 }
 0xebe   : > { %v12888_v56 = vpop.eup %12887  ;;  %12907 = vpow2.f32 %v7279_v48  ;;  %7386 = vmatmul.mubr.bf16.gmra.mrb[228].mxu1 %v7301_v49 }
 0xebf   : > { %v12890_v13 = vpop.eup %12889  ;;  %12909 = vpow2.f32 %v7273_v34  ;;  %7482 = vmatprep.mubr.bf16.mxu0 %v7304_v63 }
 0xec0   : > { %v12892_v14 = vpop.eup %12891  ;;  %12911 = vpow2.f32 %v7265_v55  ;;  %7483 = vmatmul.mubr.bf16.gmra.mrb[0].mxu0 %v7303_v7 }
 0xec1   : > { %v12894_v61 = vpop.eup %12893  ;;  %12913 = vpow2.f32 %v7277_v8 }
 0xec2   : > { %v12896_v15 = vpop.eup %12895  ;;  %12915 = vpow2.f32 %v7269_v24  ;;  %v7305_v46 = vpack.c.bf16 %v12894_v61, %v12886_v4 }
 0xec3   : > { %v12898_v0 = vpop.eup %12897  ;;  %v7306_v44 = vpack.c.bf16 %v12896_v15, %v12888_v56 }
 0xec4   : > { %v12900_v60 = vpop.eup %12899  ;;  %v7307_v40 = vpack.c.bf16 %v12898_v0, %v12890_v13 }
 0xec5   : > { %v12902_v23 = vpop.eup %12901  ;;  %7393 = vmatprep.mubr.bf16.mxu1 %v7306_v44  ;;  %v7308_v1 = vpack.c.bf16 %v12900_v60, %v12892_v14 }
 0xec6   : > { %v12904_v37 = vpop.eup %12903  ;;  %7394 = vmatmul.mubr.bf16.gmra.mrb[232].mxu1 %v7305_v46 }
 0xec7   : > { %v12906_v22 = vpop.eup %12905  ;;  %7490 = vmatprep.mubr.bf16.mxu0 %v7308_v1  ;;  %v7310_v9 = vpack.c.bf16 %v12904_v37, %v12902_v23 }
 0xec8   : > { %v12908_v32 = vpop.eup %12907  ;;  %7491 = vmatmul.mubr.bf16.gmra.mrb[4].mxu0 %v7307_v40 }
 0xec9   : > { %v12910_v41 = vpop.eup %12909  ;;  %7401 = vmatprep.mubr.bf16.mxu1 %v7310_v9  ;;  %v7312_v35 = vpack.c.bf16 %v12908_v32, %v12906_v22 }
 0xeca   : > { %v12912_v3 = vpop.eup %12911 }
 0xecb   : > { %v12914_v21 = vpop.eup %12913  ;;  %7498 = vmatprep.mubr.bf16.mxu0 %v7312_v35  ;;  %v7309_v62 = vpack.c.bf16 %v12910_v41, %v12912_v3 }
 0xecc   : > { %v12916_v25 = vpop.eup %12915 }
 0xecd   : > { %v7311_v33 = vpack.c.bf16 %v12914_v21, %v12916_v25 }
 0xece   : > { %7402 = vmatmul.mubr.bf16.gmra.mrb[236].mxu1 %v7309_v62 }
 0xed0   : > { %7499 = vmatmul.mubr.bf16.gmra.mrb[8].mxu0 %v7311_v33 }
 0xed1   : > { %8184 = vmatprep.mubr.bf16.mxu0 %v19376_v5 }
 0xf45   : > { %v11481_v28 = vpop.f32.mrb[208].mxu1 }
 0xf46   : > { %v11482_v52 = vpop.f32.mrb[209].mxu1 }
 0xf47   : > { %v11483_v6 = vadd.f32 %v11482_v52, %v11481_v28  ;;  %v11484_v2 = vpop.f32.mrb[210].mxu1  ;;  %v11545_v47 = vpop.f32.mrb[236].mxu0 }
 0xf48   : > { %v11485_v50 = vpop.f32.mrb[211].mxu1  ;;  %v11546_v42 = vpop.f32.mrb[237].mxu0 }
 0xf49   : > { %v11486_v27 = vadd.f32 %v11485_v50, %v11484_v2  ;;  %v11547_v11 = vadd.f32 %v11546_v42, %v11545_v47  ;;  %v11548_v39 = vpop.f32.mrb[238].mxu0 }
 0xf4a   : > { %v11549_v12 = vpop.f32.mrb[239].mxu0 }
 0xf4b   : > { %v17002_v16 = vadd.f32 %v11547_v11, %v11483_v6  ;;  %v11550_v30 = vadd.f32 %v11549_v12, %v11548_v39 }
 0xf4d   : > { %19377 = vst [vmem:[#allocation90_spill] sm:$0xff] %v17002_v16  ;;  %v7507_v38 = vadd.f32 1e-09, %v17002_v16  ;;  %v17005_v36 = vadd.f32 %v11550_v30, %v11486_v27  ;;  %v11487_v31 = vpop.f32.mrb[212].mxu1 }
 0xf4e   : > { %v11488_v53 = vpop.f32.mrb[213].mxu1 }
 0xf4f   : > { %19378 = vst [vmem:[#allocation40_spill] sm:$0xff] %v17005_v36  ;;  %12917 = vrcp.f32 %v7507_v38  ;;  %v7508_v20 = vadd.f32 1e-09, %v17005_v36  ;;  %v11489_v43 = vadd.f32 %v11488_v53, %v11487_v31  ;;  %v11490_v29 = vpop.f32.mrb[214].mxu1  ;;  %v11551_v10 = vpop.f32.mrb[240].mxu0 }
 0xf50   : > { %v11491_v45 = vpop.f32.mrb[215].mxu1  ;;  %v11552_v48 = vpop.f32.mrb[241].mxu0 }
 0xf51   : > { %12919 = vrcp.f32 %v7508_v20  ;;  %v11492_v58 = vadd.f32 %v11491_v45, %v11490_v29  ;;  %v11553_v26 = vadd.f32 %v11552_v48, %v11551_v10  ;;  %v11554_v17 = vpop.f32.mrb[242].mxu0 }
 0xf52   : > { %v11555_v34 = vpop.f32.mrb[243].mxu0 }
 0xf53   : > { %v17008_v57 = vadd.f32 %v11553_v26, %v11489_v43  ;;  %v11556_v54 = vadd.f32 %v11555_v34, %v11554_v17 }
 0xf55   : > { %19379 = vst [vmem:[#allocation87_spill] sm:$0xff] %v17008_v57  ;;  %v7509_v55 = vadd.f32 1e-09, %v17008_v57  ;;  %v17011_v49 = vadd.f32 %v11556_v54, %v11492_v58  ;;  %v11493_v4 = vpop.f32.mrb[216].mxu1 }
 0xf56   : > { %v11494_v8 = vpop.f32.mrb[217].mxu1 }
 0xf57   : > { %19380 = vst [vmem:[#allocation91_spill] sm:$0xff] %v17011_v49  ;;  %12921 = vrcp.f32 %v7509_v55  ;;  %v7510_v63 = vadd.f32 1e-09, %v17011_v49  ;;  %v11495_v56 = vadd.f32 %v11494_v8, %v11493_v4  ;;  %v11496_v7 = vpop.f32.mrb[218].mxu1  ;;  %v11557_v13 = vpop.f32.mrb[244].mxu0 }
 0xf58   : > { %v11497_v24 = vpop.f32.mrb[219].mxu1  ;;  %v11558_v14 = vpop.f32.mrb[245].mxu0 }
 0xf59   : > { %v12918_v61 = vpop.eup %12917  ;;  %v11498_v15 = vadd.f32 %v11497_v24, %v11496_v7  ;;  %v11559_v0 = vadd.f32 %v11558_v14, %v11557_v13  ;;  %v11560_v44 = vpop.f32.mrb[246].mxu0  ;;  %12923 = vrcp.f32 %v7510_v63 }
 0xf5a   : > { %v11561_v60 = vpop.f32.mrb[247].mxu0  ;;  %7555 = vrot.lane.b32.xlu1 %v12918_v61, %s19381_s15 }
 0xf5b   : > { %v12920_v46 = vpop.eup %12919  ;;  %v17015_v23 = vadd.f32 %v11559_v0, %v11495_v56  ;;  %v11562_v1 = vadd.f32 %v11561_v60, %v11560_v44 }
 0xf5c   : > { %7557 = vrot.lane.b32.xlu0 %v12920_v46, %s19381_s15 }
 0xf5d   : > { %19382 = vst [vmem:[#allocation37_spill] sm:$0xff] %v17015_v23  ;;  %v7511_v37 = vadd.f32 1e-09, %v17015_v23  ;;  %v17019_v40 = vadd.f32 %v11562_v1, %v11498_v15  ;;  %v11499_v22 = vpop.f32.mrb[220].mxu1 }
 0xf5e   : > { %v11500_v9 = vpop.f32.mrb[221].mxu1 }
 0xf5f   : > { %19383 = vst [vmem:[#allocation22_spill] sm:$0xff] %v17019_v40  ;;  %12925 = vrcp.f32 %v7511_v37  ;;  %v7512_v32 = vadd.f32 1e-09, %v17019_v40  ;;  %v11501_v41 = vadd.f32 %v11500_v9, %v11499_v22  ;;  %v11502_v35 = vpop.f32.mrb[222].mxu1  ;;  %v11563_v3 = vpop.f32.mrb[248].mxu0 }
 0xf60   : > { %v11503_v21 = vpop.f32.mrb[223].mxu1  ;;  %v11564_v62 = vpop.f32.mrb[249].mxu0 }
 0xf61   : > { %v12922_v25 = vpop.eup %12921  ;;  %12927 = vrcp.f32 %v7512_v32  ;;  %v11504_v33 = vadd.f32 %v11503_v21, %v11502_v35  ;;  %v11565_v28 = vadd.f32 %v11564_v62, %v11563_v3  ;;  %v11566_v52 = vpop.f32.mrb[250].mxu0 }
 0xf62   : > { %v11567_v6 = vpop.f32.mrb[251].mxu0  ;;  %7559 = vrot.lane.b32.xlu1 %v12922_v25, %s19381_s15 }
 0xf63   : > { %v17023_v2 = vadd.f32 %v11565_v28, %v11501_v41  ;;  %v11568_v47 = vadd.f32 %v11567_v6, %v11566_v52  ;;  %v12924_v50 = vpop.eup %12923 }
 0xf65   : > { %19384 = vst [vmem:[#allocation94_spill] sm:$0xff] %v17023_v2  ;;  %v7513_v42 = vadd.f32 1e-09, %v17023_v2  ;;  %v17026_v27 = vadd.f32 %v11568_v47, %v11504_v33 }
 0xf66   : > { %7561 = vrot.lane.b32.xlu1 %v12924_v50, %s19381_s15 }
 0xf67   : > { %19385 = vst [vmem:[#allocation92_spill] sm:$0xff] %v17026_v27  ;;  %12929 = vrcp.f32 %v7513_v42  ;;  %v7514_v11 = vadd.f32 1e-09, %v17026_v27 }
 0xf69   : > { %v12926_v39 = vpop.eup %12925  ;;  %12931 = vrcp.f32 %v7514_v11 }
 0xf6a   : > { %7563 = vrot.lane.b32.xlu0 %v12926_v39, %s19381_s15 }
 0xf6b   : > { %v12928_v12 = vpop.eup %12927 }
 0xf6c   : > { %7565 = vrot.lane.b32.xlu1 %v12928_v12, %s19381_s15 }
 0xf71   : > { %v12930_v30 = vpop.eup %12929 }
 0xf72   : > { %7567 = vrot.lane.b32.xlu0 %v12930_v30, %s19381_s15 }
 0xf73   : > { %v12932_v38 = vpop.eup %12931 }
 0xf74   : > { %7569 = vrot.lane.b32.xlu1 %v12932_v38, %s19381_s15 }
 0xf89   : > { %v11505_v31 = vpop.f32.mrb[224].mxu1 }
 0xf8a   : > { %v11506_v53 = vpop.f32.mrb[225].mxu1 }
 0xf8b   : > { %v11569_v20 = vpop.f32.mrb[252].mxu0  ;;  %v11507_v43 = vadd.f32 %v11506_v53, %v11505_v31  ;;  %v11508_v29 = vpop.f32.mrb[226].mxu1 }
 0xf8c   : > { %v11570_v10 = vpop.f32.mrb[253].mxu0  ;;  %v11509_v45 = vpop.f32.mrb[227].mxu1 }
 0xf8d   : > { %v11571_v48 = vadd.f32 %v11570_v10, %v11569_v20  ;;  %v11572_v58 = vpop.f32.mrb[254].mxu0  ;;  %v11510_v26 = vadd.f32 %v11509_v45, %v11508_v29 }
 0xf8e   : > { %v11573_v17 = vpop.f32.mrb[255].mxu0 }
 0xf8f   : > { %v17034_v34 = vadd.f32 %v11571_v48, %v11507_v43  ;;  %v11574_v54 = vadd.f32 %v11573_v17, %v11572_v58 }
 0xf91   : > { %19386 = vst [vmem:[#allocation93_spill] sm:$0xff] %v17034_v34  ;;  %v7515_v55 = vadd.f32 1e-09, %v17034_v34  ;;  %v17037_v4 = vadd.f32 %v11574_v54, %v11510_v26  ;;  %v11511_v63 = vpop.f32.mrb[228].mxu1 }
 0xf92   : > { %v11512_v56 = vpop.f32.mrb[229].mxu1 }
 0xf93   : > { %19387 = vst [vmem:[#allocation95_spill] sm:$0xff] %v17037_v4  ;;  %12933 = vrcp.f32 %v7515_v55  ;;  %v7516_v8 = vadd.f32 1e-09, %v17037_v4  ;;  %v11575_v7 = vpop.f32.mrb[0].mxu0  ;;  %v11513_v13 = vadd.f32 %v11512_v56, %v11511_v63  ;;  %v11514_v24 = vpop.f32.mrb[230].mxu1 }
 0xf94   : > { %v11576_v14 = vpop.f32.mrb[1].mxu0  ;;  %v11515_v61 = vpop.f32.mrb[231].mxu1 }
 0xf95   : > { %12935 = vrcp.f32 %v7516_v8  ;;  %v11577_v15 = vadd.f32 %v11576_v14, %v11575_v7  ;;  %v11578_v0 = vpop.f32.mrb[2].mxu0  ;;  %v11516_v44 = vadd.f32 %v11515_v61, %v11514_v24 }
 0xf96   : > { %v11579_v60 = vpop.f32.mrb[3].mxu0 }
 0xf97   : > { %v17040_v46 = vadd.f32 %v11577_v15, %v11513_v13  ;;  %v11580_v1 = vadd.f32 %v11579_v60, %v11578_v0  ;;  %v19394_v15 = vld [vmem:[#allocation46_spill] sm:$0xff]  ;;  %v19397_v60 = vld [vmem:[#allocation49_spill] sm:$0xff] }
 0xf98   : > { %v19395_v0 = vld [vmem:[#allocation74_spill] sm:$0xff] }
 0xf99   : > { %19388 = vst [vmem:[#allocation97_spill] sm:$0xff] %v17040_v46  ;;  %v7517_v22 = vadd.f32 1e-09, %v17040_v46  ;;  %v17043_v9 = vadd.f32 %v11580_v1, %v11516_v44  ;;  %v11517_v32 = vpop.f32.mrb[232].mxu1  ;;  %v19396_v44 = vld [vmem:[#allocation77_spill] sm:$0xff]  ;;  %v19398_v1 = vld [vmem:[#allocation83_spill] sm:$0xff] }
 0xf9a   : > { %v11518_v41 = vpop.f32.mrb[233].mxu1 }
 0xf9b   : > { %19389 = vst [vmem:[#allocation99_spill] sm:$0xff] %v17043_v9  ;;  %12937 = vrcp.f32 %v7517_v22  ;;  %v7518_v3 = vadd.f32 1e-09, %v17043_v9  ;;  %v11581_v21 = vpop.f32.mrb[4].mxu0  ;;  %v11519_v62 = vadd.f32 %v11518_v41, %v11517_v32  ;;  %v11520_v25 = vpop.f32.mrb[234].mxu1  ;;  %v19400_v22 = vld [vmem:[#allocation25_spill] sm:$0xff] }
 0xf9c   : > { %v11582_v33 = vpop.f32.mrb[5].mxu0  ;;  %v11521_v28 = vpop.f32.mrb[235].mxu1  ;;  %v19401_v32 = vld [vmem:[#allocation26_spill] sm:$0xff] }
 0xf9d   : > { %v12934_v37 = vpop.eup %12933  ;;  %12939 = vrcp.f32 %v7518_v3  ;;  %v11583_v52 = vadd.f32 %v11582_v33, %v11581_v21  ;;  %v11584_v6 = vpop.f32.mrb[6].mxu0  ;;  %v11522_v47 = vadd.f32 %v11521_v28, %v11520_v25  ;;  %v13224_v21 = vld [vmem:[%s19311_s16 + $0xc0] sm:$0xff]  }
 0xf9e   : > { %7571 = vrot.lane.b32.xlu0 %v12934_v37, %s19381_s15  ;;  %v11585_v50 = vpop.f32.mrb[7].mxu0  ;;  %v19399_v37 = vld [vmem:[#allocation89_spill] sm:$0xff] }
 0xf9f   : > { %v12936_v35 = vpop.eup %12935  ;;  %v17048_v42 = vadd.f32 %v11583_v52, %v11519_v62  ;;  %v11586_v11 = vadd.f32 %v11585_v50, %v11584_v6  ;;  %v19402_v62 = vld [vmem:[#allocation72_spill] sm:$0xff]  ;;  %v13228_v6 = vld [vmem:[%s19311_s16 + $0xc8] sm:$0xff]  }
 0xfa0   : > { %7573 = vrot.lane.b32.xlu1 %v12936_v35, %s19381_s15  ;;  %v13223_v35 = vld [vmem:[%s19311_s16 + $0x40] sm:$0xff]   ;;  %v19403_v25 = vmul.bf16 %v19402_v62, %v16139_v19  ;;  %v13227_v19 = vld [vmem:[%s19311_s16 + $0x48] sm:$0xff]  }
 0xfa1   : > { %19390 = vst [vmem:[#allocation96_spill] sm:$0xff] %v17048_v42  ;;  %v7519_v39 = vadd.f32 1e-09, %v17048_v42  ;;  %v17051_v12 = vadd.f32 %v11586_v11, %v11522_v47  ;;  %v11523_v30 = vpop.f32.mrb[236].mxu1  ;;  %v13225_v33 = vld [vmem:[%s19311_s16] sm:$0xff]   ;;  %v13229_v50 = vld [vmem:[%s19311_s16 + $0x8] sm:$0xff]  }
 0xfa2   : > { %v11524_v38 = vpop.f32.mrb[237].mxu1  ;;  %v13226_v28 = vld [vmem:[%s19311_s16 + $0x80] sm:$0xff]   ;;  %v13230_v11 = vld [vmem:[%s19311_s16 + $0x88] sm:$0xff]  }
 0xfa3   : > { %19391 = vst [vmem:[#allocation98_spill] sm:$0xff] %v17051_v12  ;;  %12941 = vrcp.f32 %v7519_v39  ;;  %v7520_v31 = vadd.f32 1e-09, %v17051_v12  ;;  %v11587_v53 = vpop.f32.mrb[8].mxu0  ;;  %v11525_v20 = vadd.f32 %v11524_v38, %v11523_v30  ;;  %v11526_v43 = vpop.f32.mrb[238].mxu1  ;;  %v13231_v30 = vld [vmem:[%s19311_s16 + $0x50] sm:$0xff]  }
 0xfa4   : > { %v11588_v29 = vpop.f32.mrb[9].mxu0  ;;  %v11527_v10 = vpop.f32.mrb[239].mxu1 }
 0xfa5   : > { %v12938_v45 = vpop.eup %12937  ;;  %12943 = vrcp.f32 %v7520_v31  ;;  %v11589_v48 = vadd.f32 %v11588_v29, %v11587_v53  ;;  %v11590_v58 = vpop.f32.mrb[10].mxu0  ;;  %v11528_v26 = vadd.f32 %v11527_v10, %v11526_v43  ;;  %v13232_v31 = vld [vmem:[%s19311_s16 + $0xd0] sm:$0xff]   ;;  %v13235_v29 = vld [vmem:[%s19311_s16 + $0x58] sm:$0xff]  }
 0xfa6   : > { %7575 = vrot.lane.b32.xlu0 %v12938_v45, %s19381_s15  ;;  %v11591_v17 = vpop.f32.mrb[11].mxu0  ;;  %v13233_v53 = vld [vmem:[%s19311_s16 + $0x10] sm:$0xff]   ;;  %v13236_v45 = vld [vmem:[%s19311_s16 + $0xd8] sm:$0xff]  }
 0xfa7   : > { %v12940_v54 = vpop.eup %12939  ;;  %v17055_v55 = vadd.f32 %v11589_v48, %v11525_v20  ;;  %v11592_v8 = vadd.f32 %v11591_v17, %v11590_v58  ;;  %v13234_v20 = vld [vmem:[%s19311_s16 + $0x90] sm:$0xff]   ;;  %v13237_v48 = vld [vmem:[%s19311_s16 + $0x18] sm:$0xff]   ;;  %v13240_v17 = vld [vmem:[%s19311_s16 + $0xe0] sm:$0xff]  }
 0xfa8   : > { %7577 = vrot.lane.b32.xlu1 %v12940_v54, %s19381_s15  ;;  %v13238_v58 = vld [vmem:[%s19311_s16 + $0x98] sm:$0xff]   ;;  %v13241_v54 = vld [vmem:[%s19311_s16 + $0x20] sm:$0xff]  }
 0xfa9   : > { %19392 = vst [vmem:[#allocation100_spill] sm:$0xff] %v17055_v55  ;;  %v7521_v63 = vadd.f32 1e-09, %v17055_v55  ;;  %v17059_v56 = vadd.f32 %v11592_v8, %v11528_v26  ;;  %v13239_v26 = vld [vmem:[%s19311_s16 + $0x60] sm:$0xff]  }
 0xfaa   : > { %v13242_v8 = vld [vmem:[%s19311_s16 + $0xa0] sm:$0xff]  }
 0xfab   : > { %19393 = vst [vmem:[#allocation104_spill] sm:$0xff] %v17059_v56  ;;  %12945 = vrcp.f32 %v7521_v63  ;;  %v7522_v7 = vadd.f32 1e-09, %v17059_v56  ;;  %v13243_v63 = vld [vmem:[%s19311_s16 + $0x68] sm:$0xff]  }
 0xfad   : > { %v12942_v13 = vpop.eup %12941  ;;  %12947 = vrcp.f32 %v7522_v7  ;;  %v13244_v7 = vld [vmem:[%s19311_s16 + $0xe8] sm:$0xff]  }
 0xfae   : > { %7579 = vrot.lane.b32.xlu0 %v12942_v13, %s19381_s15  ;;  %v13245_v13 = vld [vmem:[%s19311_s16 + $0x28] sm:$0xff]  }
 0xfaf   : > { %v12944_v24 = vpop.eup %12943 }
 0xfb0   : > { %7581 = vrot.lane.b32.xlu1 %v12944_v24, %s19381_s15  ;;  %v13246_v24 = vld [vmem:[%s19311_s16 + $0xa8] sm:$0xff]  }
 0xfb5   : > { %v12946_v14 = vpop.eup %12945 }
 0xfb6   : > { %7583 = vrot.lane.b32.xlu0 %v12946_v14, %s19381_s15  ;;  %v13247_v14 = vld [vmem:[%s19311_s16 + $0x70] sm:$0xff]  }
 0xfb7   : > { %v12948_v61 = vpop.eup %12947 }
 0xfb8   : > { %7585 = vrot.lane.b32.xlu1 %v12948_v61, %s19381_s15  ;;  %v13248_v61 = vld [vmem:[%s19311_s16 + $0xf0] sm:$0xff]  }
 0xfba   : > { %8112 = vrot.lane.b32.xlu0 %v19394_v15, %s19381_s15  ;;  %v13249_v15 = vld [vmem:[%s19311_s16 + $0x30] sm:$0xff]  }
 0xfbc   : > { %8114 = vrot.lane.b32.xlu1 %v19395_v0, %s19381_s15  ;;  %v13250_v0 = vld [vmem:[%s19311_s16 + $0xb0] sm:$0xff]  }
 0xfbe   : > { %8116 = vrot.lane.b32.xlu0 %v19396_v44, %s19381_s15  ;;  %v13251_v44 = vld [vmem:[%s19311_s16 + $0x78] sm:$0xff]  }
 0xfc0   : > { %8118 = vrot.lane.b32.xlu1 %v19397_v60, %s19381_s15  ;;  %v13252_v60 = vld [vmem:[%s19311_s16 + $0xf8] sm:$0xff]  }
 0xfc2   : > { %8120 = vrot.lane.b32.xlu0 %v19398_v1, %s19381_s15  ;;  %v13253_v1 = vld [vmem:[%s19311_s16 + $0x38] sm:$0xff]  }
 0xfc4   : > { %8122 = vrot.lane.b32.xlu1 %v19399_v37, %s19381_s15  ;;  %v13254_v37 = vld [vmem:[%s19311_s16 + $0xb8] sm:$0xff]  }
 0xfc6   : > { %8124 = vrot.lane.b32.xlu0 %v19400_v22, %s19381_s15 }
 0xfc8   : > { %8126 = vrot.lane.b32.xlu1 %v19401_v32, %s19381_s15 }
 0xfca   : > { %7800 = vrot.lane.b32.xlu0 %v13223_v35, %s19332_s4 }
 0xfcc   : > { %v7556_v41 = vpop.permute.xlu1 %7555  ;;  %7832 = vrot.lane.b32.xlu1 %v13224_v21, %s19332_s4 }
 0xfcd   : > { %12018 = vmatprep.mubr.msk.f32.mxu1 %vm3525_vm5, %v7556_v41 }
 0xfce   : > { %v7558_v3 = vpop.permute.xlu0 %7557  ;;  %7784 = vrot.lane.b32.xlu0 %v13225_v33, %s19332_s4 }
 0xfcf   : > { %12019 = vmatmul.mubr.msk.f32.vlgmr.msra.gmra.mrb[142].mxu1 %vm3525_vm5, %v7558_v3 }
 0xfd0   : > { %8266 = vmatpush1.bf16.msra.mxu1 %v19403_v25  ;;  %7816 = vrot.lane.b32.xlu1 %v13226_v28, %s19332_s4 }
 0xfd2   : > { %7802 = vrot.lane.b32.xlu0 %v13227_v19, %s19332_s4 }
 0xfd4   : > { %v7560_v52 = vpop.permute.xlu1 %7559  ;;  %7834 = vrot.lane.b32.xlu1 %v13228_v6, %s19332_s4 }
 0xfd5   : > { %12021 = vmatprep.mubr.msk.f32.mxu1 %vm3525_vm5, %v7560_v52 }
 0xfd6   : > { %7786 = vrot.lane.b32.xlu0 %v13229_v50, %s19332_s4 }
 0xfd8   : > { %v7562_v47 = vpop.permute.xlu1 %7561  ;;  %7818 = vrot.lane.b32.xlu1 %v13230_v11, %s19332_s4 }
 0xfd9   : > { %12022 = vmatmul.mubr.msk.f32.gmra.mrb[240].mxu1 %vm3525_vm5, %v7562_v47 }
 0xfda   : > { %7804 = vrot.lane.b32.xlu0 %v13231_v30, %s19332_s4  ;;  %v19404_v30 = vld [vmem:[#allocation39_spill] sm:$0xff] }
 0xfdc   : > { %v7564_v39 = vpop.permute.xlu0 %7563  ;;  %7836 = vrot.lane.b32.xlu1 %v13232_v31, %s19332_s4 }
 0xfdd   : > { %12024 = vmatprep.mubr.msk.f32.mxu1 %vm3525_vm5, %v7564_v39 }
 0xfde   : > { %v7566_v38 = vpop.permute.xlu1 %7565  ;;  %7788 = vrot.lane.b32.xlu0 %v13233_v53, %s19332_s4 }
 0xfdf   : > { %12025 = vmatmul.mubr.msk.f32.gmra.mrb[242].mxu1 %vm3525_vm5, %v7566_v38 }
 0xfe0   : > { %7820 = vrot.lane.b32.xlu1 %v13234_v20, %s19332_s4 }
 0xfe2   : > { %7806 = vrot.lane.b32.xlu0 %v13235_v29, %s19332_s4 }
 0xfe4   : > { %v7568_v43 = vpop.permute.xlu0 %7567  ;;  %7838 = vrot.lane.b32.xlu1 %v13236_v45, %s19332_s4 }
 0xfe5   : > { %12027 = vmatprep.mubr.msk.f32.mxu1 %vm3525_vm5, %v7568_v43 }
 0xfe6   : > { %v7570_v10 = vpop.permute.xlu1 %7569  ;;  %7790 = vrot.lane.b32.xlu0 %v13237_v48, %s19332_s4  ;;  %v19405_v48 = vld [vmem:[#allocation28_spill] sm:$0xff] }
 0xfe7   : > { %12028 = vmatmul.mubr.msk.f32.gmra.mrb[244].mxu1 %vm3525_vm5, %v7570_v10 }
 0xfe8   : > { %7822 = vrot.lane.b32.xlu1 %v13238_v58, %s19332_s4 }
 0xfea   : > { %7808 = vrot.lane.b32.xlu0 %v13239_v26, %s19332_s4 }
 0xfec   : > { %7840 = vrot.lane.b32.xlu1 %v13240_v17, %s19332_s4 }
 0xfee   : > { %7792 = vrot.lane.b32.xlu0 %v13241_v54, %s19332_s4 }
 0xff0   : > { %7824 = vrot.lane.b32.xlu1 %v13242_v8, %s19332_s4 }
 0xff2   : > { %7810 = vrot.lane.b32.xlu0 %v13243_v63, %s19332_s4 }
 0xff4   : > { %7842 = vrot.lane.b32.xlu1 %v13244_v7, %s19332_s4 }
 0xff6   : > { %7794 = vrot.lane.b32.xlu0 %v13245_v13, %s19332_s4 }
 0xff8   : > { %7826 = vrot.lane.b32.xlu1 %v13246_v24, %s19332_s4  ;;  %v19406_v24 = vld [vmem:[#allocation29_spill] sm:$0xff] }
 0xffa   : > { %7812 = vrot.lane.b32.xlu0 %v13247_v14, %s19332_s4 }
 0xffc   : > { %7844 = vrot.lane.b32.xlu1 %v13248_v61, %s19332_s4 }
 0xffe   : > { %7796 = vrot.lane.b32.xlu0 %v13249_v15, %s19332_s4 }
0x1000   : > { %7828 = vrot.lane.b32.xlu1 %v13250_v0, %s19332_s4 }
0x1002   : > { %7814 = vrot.lane.b32.xlu0 %v13251_v44, %s19332_s4 }
0x1004   : > { %7846 = vrot.lane.b32.xlu1 %v13252_v60, %s19332_s4 }
0x1006   : > { %7798 = vrot.lane.b32.xlu0 %v13253_v1, %s19332_s4 }
0x1008   : > { %7830 = vrot.lane.b32.xlu1 %v13254_v37, %s19332_s4 }
0x1010   : > { %v7572_v22 = vpop.permute.xlu0 %7571 }
0x1011   : > { %12030 = vmatprep.mubr.msk.f32.mxu1 %vm3525_vm5, %v7572_v22  ;;  %v19407_v22 = vld [vmem:[#allocation30_spill] sm:$0xff] }
0x1012   : > { %v7574_v32 = vpop.permute.xlu1 %7573 }
0x1013   : > { %12031 = vmatmul.mubr.msk.f32.gmra.mrb[246].mxu1 %vm3525_vm5, %v7574_v32 }
0x1018   : > { %v7576_v41 = vpop.permute.xlu0 %7575 }
0x1019   : > { %12033 = vmatprep.mubr.msk.f32.mxu1 %vm3525_vm5, %v7576_v41 }
0x101a   : > { %v7578_v35 = vpop.permute.xlu1 %7577 }
0x101b   : > { %12034 = vmatmul.mubr.msk.f32.gmra.mrb[248].mxu1 %vm3525_vm5, %v7578_v35 }
0x1020   : > { %v7580_v3 = vpop.permute.xlu0 %7579 }
0x1021   : > { %12036 = vmatprep.mubr.msk.f32.mxu1 %vm3525_vm5, %v7580_v3 }
0x1022   : > { %v7582_v21 = vpop.permute.xlu1 %7581 }
0x1023   : > { %12037 = vmatmul.mubr.msk.f32.gmra.mrb[250].mxu1 %vm3525_vm5, %v7582_v21 }
0x1028   : > { %v7584_v62 = vpop.permute.xlu0 %7583 }
0x1029   : > { %12039 = vmatprep.mubr.msk.f32.mxu1 %vm3525_vm5, %v7584_v62 }
0x102a   : > { %v7586_v25 = vpop.permute.xlu1 %7585 }
0x102b   : > { %12040 = vmatmul.mubr.msk.f32.gmra.mrb[252].mxu1 %vm3525_vm5, %v7586_v25 }
0x102c   : > { %v8113_v33 = vpop.permute.xlu0 %8112  ;;  %8297 = vmatprep.mubr.bf16.mxu1 %v19376_v5 }
0x102d   : > { %11007 = vmatmul.mubr.msk.bf16.vlgmr.msra.gmra.mrb[12].mxu0 %vm2564_vm3, %v8113_v33 }
0x102e   : > { %v8115_v28 = vpop.permute.xlu1 %8114  ;;  %8194 = vmatprep.mubr.bf16.mxu0 %v19376_v5 }
0x102f   : > { %11015 = vmatmul.mubr.msk.bf16.vlgmr.msra.gmra.mrb[0].mxu1 %vm2564_vm3, %v8113_v33 }
0x1030   : > { %v8117_v52 = vpop.permute.xlu0 %8116  ;;  %8307 = vmatprep.mubr.bf16.mxu1 %v19376_v5 }
0x1032   : > { %v8119_v19 = vpop.permute.xlu1 %8118 }
0x1034   : > { %v8121_v6 = vpop.permute.xlu0 %8120 }
0x1035   : > { %11008 = vmatmul.mubr.msk.bf16.gmra.mrb[16].mxu0 %vm2564_vm3, %v8115_v28 }
0x1036   : > { %v8123_v47 = vpop.permute.xlu1 %8122  ;;  %8204 = vmatprep.mubr.bf16.mxu0 %v19376_v5 }
0x1037   : > { %11016 = vmatmul.mubr.msk.bf16.gmra.mrb[4].mxu1 %vm2564_vm3, %v8115_v28  ;;  %v19408_v28 = vld [vmem:[#allocation80_spill] sm:$0xff] }
0x1038   : > { %v17237_v50 = vpop.permute.xlu0 %8124  ;;  %8317 = vmatprep.mubr.bf16.mxu1 %v19376_v5 }
0x103a   : > { %v17240_v11 = vpop.permute.xlu1 %8126 }
0x103c   : > { %v7801_v39 = vpop.permute.xlu0 %7800 }
0x103d   : > { %v7888_v38 = vmul.bf16 %v7801_v39, %v19404_v30  ;;  %11009 = vmatmul.mubr.msk.bf16.gmra.mrb[20].mxu0 %vm2564_vm3, %v8117_v52 }
0x103e   : > { %v7833_v31 = vpop.permute.xlu1 %7832  ;;  %8214 = vmatprep.mubr.bf16.mxu0 %v19376_v5 }
0x103f   : > { %v7904_v53 = vmul.bf16 %v7833_v31, %v19404_v30  ;;  %11017 = vmatmul.mubr.msk.bf16.gmra.mrb[8].mxu1 %vm2564_vm3, %v8117_v52  ;;  %7960 = vrot.lane.b32.xlu0 %v7888_v38, %s19381_s15 }
0x1040   : > { %v7785_v20 = vpop.permute.xlu0 %7784  ;;  %8327 = vmatprep.mubr.bf16.mxu1 %v19376_v5 }
0x1041   : > { %v7880_v43 = vmul.bf16 %v7785_v20, %v19404_v30  ;;  %7992 = vrot.lane.b32.xlu1 %v7904_v53, %s19381_s15  ;;  %v19409_v53 = vld [vmem:[#allocation32_spill] sm:$0xff] }
0x1042   : > { %v7817_v29 = vpop.permute.xlu1 %7816 }
0x1043   : > { %v7896_v10 = vmul.bf16 %v7817_v29, %v19404_v30  ;;  %7944 = vrot.lane.b32.xlu0 %v7880_v43, %s19381_s15 }
0x1044   : > { %v7803_v45 = vpop.permute.xlu0 %7802 }
0x1045   : > { %v7889_v58 = vmul.bf16 %v7803_v45, %v19405_v48  ;;  %7976 = vrot.lane.b32.xlu1 %v7896_v10, %s19381_s15  ;;  %11010 = vmatmul.mubr.msk.bf16.gmra.mrb[24].mxu0 %vm2564_vm3, %v8119_v19 }
0x1046   : > { %v7835_v26 = vpop.permute.xlu1 %7834  ;;  %8224 = vmatprep.mubr.bf16.mxu0 %v19376_v5 }
0x1047   : > { %v7905_v17 = vmul.bf16 %v7835_v26, %v19405_v48  ;;  %11018 = vmatmul.mubr.msk.bf16.gmra.mrb[12].mxu1 %vm2564_vm3, %v8119_v19  ;;  %7962 = vrot.lane.b32.xlu0 %v7889_v58, %s19381_s15  ;;  %v19410_v58 = vld [vmem:[#allocation34_spill] sm:$0xff] }
0x1048   : > { %v7787_v54 = vpop.permute.xlu0 %7786  ;;  %8337 = vmatprep.mubr.bf16.mxu1 %v19376_v5 }
0x1049   : > { %v7881_v8 = vmul.bf16 %v7787_v54, %v19405_v48  ;;  %7994 = vrot.lane.b32.xlu1 %v7905_v17, %s19381_s15 }
0x104a   : > { %v7819_v63 = vpop.permute.xlu1 %7818 }
0x104b   : > { %v7897_v7 = vmul.bf16 %v7819_v63, %v19405_v48  ;;  %7946 = vrot.lane.b32.xlu0 %v7881_v8, %s19381_s15 }
0x104c   : > { %v7805_v13 = vpop.permute.xlu0 %7804 }
0x104d   : > { %v7890_v14 = vmul.bf16 %v7805_v13, %v19406_v24  ;;  %7978 = vrot.lane.b32.xlu1 %v7897_v7, %s19381_s15  ;;  %11011 = vmatmul.mubr.msk.bf16.gmra.mrb[28].mxu0 %vm2564_vm3, %v8121_v6 }
0x104e   : > { %v7837_v61 = vpop.permute.xlu1 %7836  ;;  %8234 = vmatprep.mubr.bf16.mxu0 %v19376_v5 }
0x104f   : > { %v7906_v15 = vmul.bf16 %v7837_v61, %v19406_v24  ;;  %11019 = vmatmul.mubr.msk.bf16.gmra.mrb[16].mxu1 %vm2564_vm3, %v8121_v6  ;;  %7964 = vrot.lane.b32.xlu0 %v7890_v14, %s19381_s15 }
0x1050   : > { %v7789_v0 = vpop.permute.xlu0 %7788  ;;  %8347 = vmatprep.mubr.bf16.mxu1 %v19376_v5 }
0x1051   : > { %v7882_v44 = vmul.bf16 %v7789_v0, %v19406_v24  ;;  %7996 = vrot.lane.b32.xlu1 %v7906_v15, %s19381_s15 }
0x1052   : > { %v7821_v60 = vpop.permute.xlu1 %7820 }
0x1053   : > { %v7898_v1 = vmul.bf16 %v7821_v60, %v19406_v24  ;;  %7948 = vrot.lane.b32.xlu0 %v7882_v44, %s19381_s15 }
0x1054   : > { %v7807_v37 = vpop.permute.xlu0 %7806 }
0x1055   : > { %v7891_v32 = vmul.bf16 %v7807_v37, %v19407_v22  ;;  %7980 = vrot.lane.b32.xlu1 %v7898_v1, %s19381_s15  ;;  %11012 = vmatmul.mubr.msk.bf16.gmra.mrb[32].mxu0 %vm2564_vm3, %v8123_v47 }
0x1056   : > { %v7839_v41 = vpop.permute.xlu1 %7838  ;;  %8244 = vmatprep.mubr.bf16.mxu0 %v19376_v5 }
0x1057   : > { %v7907_v35 = vmul.bf16 %v7839_v41, %v19407_v22  ;;  %11020 = vmatmul.mubr.msk.bf16.gmra.mrb[20].mxu1 %vm2564_vm3, %v8123_v47  ;;  %7966 = vrot.lane.b32.xlu0 %v7891_v32, %s19381_s15 }
0x1058   : > { %v7791_v3 = vpop.permute.xlu0 %7790  ;;  %8357 = vmatprep.mubr.bf16.mxu1 %v19376_v5 }
0x1059   : > { %v7883_v21 = vmul.bf16 %v7791_v3, %v19407_v22  ;;  %7998 = vrot.lane.b32.xlu1 %v7907_v35, %s19381_s15  ;;  %v19417_v35 = vld [vmem:[#allocation42_spill] sm:$0xff] }
0x105a   : > { %v7823_v62 = vpop.permute.xlu1 %7822 }
0x105b   : > { %v7899_v25 = vmul.bf16 %v7823_v62, %v19407_v22  ;;  %7950 = vrot.lane.b32.xlu0 %v7883_v21, %s19381_s15  ;;  %v19418_v62 = vld [vmem:[#allocation45_spill] sm:$0xff] }
0x105c   : > { %v7809_v33 = vpop.permute.xlu0 %7808 }
0x105d   : > { %v7892_v52 = vmul.bf16 %v7809_v33, %v19408_v28  ;;  %7982 = vrot.lane.b32.xlu1 %v7899_v25, %s19381_s15  ;;  %11013 = vmatmul.mubr.msk.bf16.gmra.mrb[36].mxu0 %vm2564_vm3, %v17237_v50 }
0x105e   : > { %v7841_v19 = vpop.permute.xlu1 %7840  ;;  %8254 = vmatprep.mubr.bf16.mxu0 %v19376_v5 }
0x105f   : > { %v7908_v6 = vmul.bf16 %v7841_v19, %v19408_v28  ;;  %11021 = vmatmul.mubr.msk.bf16.gmra.mrb[24].mxu1 %vm2564_vm3, %v17237_v50  ;;  %7968 = vrot.lane.b32.xlu0 %v7892_v52, %s19381_s15 }
0x1060   : > { %v7793_v47 = vpop.permute.xlu0 %7792  ;;  %8367 = vmatprep.mubr.bf16.mxu1 %v19376_v5 }
0x1061   : > { %v7884_v39 = vmul.bf16 %v7793_v47, %v19408_v28  ;;  %8000 = vrot.lane.b32.xlu1 %v7908_v6, %s19381_s15 }
0x1062   : > { %v7825_v30 = vpop.permute.xlu1 %7824 }
0x1063   : > { %v7900_v38 = vmul.bf16 %v7825_v30, %v19408_v28  ;;  %7952 = vrot.lane.b32.xlu0 %v7884_v39, %s19381_s15  ;;  %v19419_v28 = vld [vmem:[#allocation48_spill] sm:$0xff]  ;;  %v19422_v39 = vld [vmem:[#allocation79_spill] sm:$0xff] }
0x1064   : > { %v7811_v31 = vpop.permute.xlu0 %7810 }
0x1065   : > { %v7893_v20 = vmul.bf16 %v7811_v31, %v19409_v53  ;;  %7984 = vrot.lane.b32.xlu1 %v7900_v38, %s19381_s15  ;;  %11014 = vmatmul.mubr.msk.bf16.gmra.mrb[40].mxu0 %vm2564_vm3, %v17240_v11  ;;  %v19423_v31 = vld [vmem:[#allocation47_spill] sm:$0xff] }
0x1066   : > { %v7843_v50 = vpop.permute.xlu1 %7842 }
0x1067   : > { %v7909_v5 = vmul.bf16 %v7843_v50, %v19409_v53  ;;  %11022 = vmatmul.mubr.msk.bf16.gmra.mrb[28].mxu1 %vm2564_vm3, %v17240_v11  ;;  %7970 = vrot.lane.b32.xlu0 %v7893_v20, %s19381_s15  ;;  %v19424_v50 = vld [vmem:[#allocation43_spill] sm:$0xff] }
0x1068   : > { %v7795_v43 = vpop.permute.xlu0 %7794 }
0x1069   : > { %v7885_v29 = vmul.bf16 %v7795_v43, %v19409_v53  ;;  %8002 = vrot.lane.b32.xlu1 %v7909_v5, %s19381_s15 }
0x106a   : > { %v7827_v10 = vpop.permute.xlu1 %7826 }
0x106b   : > { %v7901_v45 = vmul.bf16 %v7827_v10, %v19409_v53  ;;  %7954 = vrot.lane.b32.xlu0 %v7885_v29, %s19381_s15  ;;  %v19425_v29 = vld [vmem:[#allocation50_spill] sm:$0xff] }
0x106c   : > { %v7813_v48 = vpop.permute.xlu0 %7812 }
0x106d   : > { %v7894_v26 = vmul.bf16 %v7813_v48, %v19410_v58  ;;  %7986 = vrot.lane.b32.xlu1 %v7901_v45, %s19381_s15  ;;  %v19426_v48 = vld [vmem:[#allocation44_spill] sm:$0xff] }
0x106e   : > { %v7845_v17 = vpop.permute.xlu1 %7844 }
0x106f   : > { %v7910_v11 = vmul.bf16 %v7845_v17, %v19410_v58  ;;  %7972 = vrot.lane.b32.xlu0 %v7894_v26, %s19381_s15  ;;  %v19427_v17 = vld [vmem:[#allocation52_spill] sm:$0xff] }
0x1070   : > { %v7797_v54 = vpop.permute.xlu0 %7796 }
0x1071   : > { %v7886_v8 = vmul.bf16 %v7797_v54, %v19410_v58  ;;  %8004 = vrot.lane.b32.xlu1 %v7910_v11, %s19381_s15 }
0x1072   : > { %v7829_v63 = vpop.permute.xlu1 %7828 }
0x1073   : > { %v7902_v7 = vmul.bf16 %v7829_v63, %v19410_v58  ;;  %7956 = vrot.lane.b32.xlu0 %v7886_v8, %s19381_s15  ;;  %v19428_v8 = vld [vmem:[#allocation51_spill] sm:$0xff] }
0x1074   : > { %v7815_v13 = vpop.permute.xlu0 %7814 }
0x1075   : > { %v7895_v24 = vmul.bf16 %v7815_v13, %v16591_v18  ;;  %7988 = vrot.lane.b32.xlu1 %v7902_v7, %s19381_s15  ;;  %v19429_v13 = vld [vmem:[#allocation54_spill] sm:$0xff] }
0x1076   : > { %v7847_v14 = vpop.permute.xlu1 %7846 }
0x1077   : > { %v7911_v61 = vmul.bf16 %v7847_v14, %v16591_v18  ;;  %7974 = vrot.lane.b32.xlu0 %v7895_v24, %s19381_s15 }
0x1078   : > { %v17336_v1 = vpop.permute.xlu0 %7798 }
0x1079   : > { %8006 = vrot.lane.b32.xlu1 %v7911_v61, %s19381_s15  ;;  %v19430_v61 = vld [vmem:[#allocation53_spill] sm:$0xff]  ;;  %v7887_v36 = vmul.bf16 %v17336_v1, %v16591_v18 }
0x107a   : > { %v17340_v22 = vpop.permute.xlu1 %7830 }
0x10a2   : > { %v17328_v15 = vpop.f32.mrb[142].mxu1 }
0x10a3   : > { %19411 = vst [vmem:[#allocation102_spill] sm:$0xff] %v17328_v15  ;;  %v17330_v0 = vpop.f32.mrb[143].mxu1 }
0x10a4   : > { %19412 = vst [vmem:[#allocation101_spill] sm:$0xff] %v17330_v0 }
0x10ac   : > { %v17332_v44 = vpop.f32.mrb[240].mxu1 }
0x10ad   : > { %19413 = vst [vmem:[#allocation103_spill] sm:$0xff] %v17332_v44  ;;  %v17334_v60 = vpop.f32.mrb[241].mxu1 }
0x10ae   : > { %19414 = vst [vmem:[#allocation46_spill] sm:$0xff] %v17334_v60 }
0x10b1   : > { %v7961_v41 = vpop.permute.xlu0 %7960 }
0x10b2   : > { %v17338_v37 = vpop.f32.mrb[242].mxu1  ;;  %v8033_v3 = vsel %vm2564_vm3, %v7961_v41, %v19417_v35 }
0x10b3   : > { %19415 = vst [vmem:[#allocation74_spill] sm:$0xff] %v17338_v37  ;;  %v17342_v32 = vpop.f32.mrb[243].mxu1  ;;  %v7993_v21 = vpop.permute.xlu1 %7992  ;;  %11610 = vmatprep.subr.bf16.mxu0 %v8033_v3  ;;  %v19431_v3 = vld [vmem:[#allocation75_spill] sm:$0xff] }
0x10b4   : > { %19416 = vst [vmem:[#allocation77_spill] sm:$0xff] %v17342_v32  ;;  %v8081_v25 = vsel %vm2564_vm3, %v7993_v21, %v19418_v62 }
0x10b5   : > { %11674 = vmatprep.subr.bf16.mxu1 %v8081_v25  ;;  %v7945_v33 = vpop.permute.xlu0 %7944  ;;  %v19432_v25 = vld [vmem:[#allocation55_spill] sm:$0xff] }
0x10b6   : > { %v8009_v52 = vsel %vm2564_vm3, %v7945_v33, %v19419_v28 }
0x10b7   : > { %v7977_v6 = vpop.permute.xlu1 %7976  ;;  %11611 = vmatpush3.bf16.msra.mxu0 %v8009_v52  ;;  %v19433_v52 = vld [vmem:[#allocation36_spill] sm:$0xff] }
0x10b8   : > { %v8057_v30 = vsel %vm2564_vm3, %v7977_v6, %v19422_v39 }
0x10b9   : > { %11675 = vmatpush3.bf16.msra.mxu1 %v8057_v30  ;;  %v7963_v38 = vpop.permute.xlu0 %7962  ;;  %v19434_v30 = vld [vmem:[#allocation24_spill] sm:$0xff] }
0x10ba   : > { %v17350_v19 = vpop.f32.mrb[244].mxu1  ;;  %v8036_v53 = vsel %vm2564_vm3, %v7963_v38, %v19423_v31 }
0x10bb   : > { %19420 = vst [vmem:[#allocation49_spill] sm:$0xff] %v17350_v19  ;;  %v17352_v47 = vpop.f32.mrb[245].mxu1  ;;  %v7995_v20 = vpop.permute.xlu1 %7994  ;;  %11612 = vmatprep.subr.bf16.mxu0 %v8036_v53  ;;  %v19435_v53 = vld [vmem:[#allocation82_spill] sm:$0xff] }
0x10bc   : > { %19421 = vst [vmem:[#allocation83_spill] sm:$0xff] %v17352_v47  ;;  %v8084_v5 = vsel %vm2564_vm3, %v7995_v20, %v19424_v50 }
0x10bd   : > { %11676 = vmatprep.subr.bf16.mxu1 %v8084_v5  ;;  %v7947_v43 = vpop.permute.xlu0 %7946  ;;  %v19436_v5 = vld [vmem:[#allocation23_spill] sm:$0xff] }
0x10be   : > { %v8012_v10 = vsel %vm2564_vm3, %v7947_v43, %v19425_v29 }
0x10bf   : > { %v7979_v45 = vpop.permute.xlu1 %7978  ;;  %11613 = vmatpush3.bf16.msra.mxu0 %v8012_v10  ;;  %v19437_v10 = vld [vmem:[#allocation41_spill] sm:$0xff] }
0x10c0   : > { %v8060_v58 = vsel %vm2564_vm3, %v7979_v45, %v19426_v48 }
0x10c1   : > { %11677 = vmatpush3.bf16.msra.mxu1 %v8060_v58  ;;  %v7965_v26 = vpop.permute.xlu0 %7964  ;;  %v19438_v58 = vld [vmem:[#allocation78_spill] sm:$0xff] }
0x10c2   : > { %v8039_v11 = vsel %vm2564_vm3, %v7965_v26, %v19427_v17 }
0x10c3   : > { %v7997_v54 = vpop.permute.xlu1 %7996  ;;  %11614 = vmatprep.subr.bf16.mxu0 %v8039_v11  ;;  %v19439_v11 = vld [vmem:[#allocation76_spill] sm:$0xff] }
0x10c4   : > { %v8087_v63 = vsel %vm2564_vm3, %v7997_v54, %v19428_v8 }
0x10c5   : > { %11678 = vmatprep.subr.bf16.mxu1 %v8087_v63  ;;  %v7949_v7 = vpop.permute.xlu0 %7948  ;;  %v19440_v63 = vld [vmem:[#allocation27_spill] sm:$0xff] }
0x10c6   : > { %v8015_v24 = vsel %vm2564_vm3, %v7949_v7, %v19429_v13 }
0x10c7   : > { %v7981_v14 = vpop.permute.xlu1 %7980  ;;  %11615 = vmatpush3.bf16.msra.mxu0 %v8015_v24  ;;  %v19441_v24 = vld [vmem:[#allocation81_spill] sm:$0xff] }
0x10c8   : > { %v8063_v41 = vsel %vm2564_vm3, %v7981_v14, %v19430_v61 }
0x10c9   : > { %11679 = vmatpush3.bf16.msra.mxu1 %v8063_v41  ;;  %v7967_v35 = vpop.permute.xlu0 %7966  ;;  %v19442_v41 = vld [vmem:[#allocation35_spill] sm:$0xff] }
0x10ca   : > { %v8042_v21 = vsel %vm2564_vm3, %v7967_v35, %v19431_v3 }
0x10cb   : > { %v7999_v62 = vpop.permute.xlu1 %7998  ;;  %11616 = vmatprep.subr.bf16.mxu0 %v8042_v21  ;;  %v19443_v21 = vld [vmem:[#allocation84_spill] sm:$0xff] }
0x10cc   : > { %v8090_v33 = vsel %vm2564_vm3, %v7999_v62, %v19432_v25 }
0x10cd   : > { %11680 = vmatprep.subr.bf16.mxu1 %v8090_v33  ;;  %v7951_v28 = vpop.permute.xlu0 %7950 }
0x10ce   : > { %v8018_v6 = vsel %vm2564_vm3, %v7951_v28, %v19433_v52  ;;  %v19446_v52 = vld [vmem:[#allocation38_spill] sm:$0xff] }
0x10cf   : > { %v7983_v39 = vpop.permute.xlu1 %7982  ;;  %11617 = vmatpush3.bf16.msra.mxu0 %v8018_v6 }
0x10d0   : > { %v8066_v38 = vsel %vm2564_vm3, %v7983_v39, %v19434_v30  ;;  %v19447_v30 = vld [vmem:[#allocation86_spill] sm:$0xff] }
0x10d1   : > { %11681 = vmatpush3.bf16.msra.mxu1 %v8066_v38  ;;  %v7969_v31 = vpop.permute.xlu0 %7968 }
0x10d2   : > { %v8045_v20 = vsel %vm2564_vm3, %v7969_v31, %v19435_v53  ;;  %v19448_v53 = vld [vmem:[#allocation31_spill] sm:$0xff] }
0x10d3   : > { %v8001_v50 = vpop.permute.xlu1 %8000  ;;  %11618 = vmatprep.subr.bf16.mxu0 %v8045_v20 }
0x10d4   : > { %v8093_v43 = vsel %vm2564_vm3, %v8001_v50, %v19436_v5  ;;  %v19449_v5 = vld [vmem:[#allocation33_spill] sm:$0xff] }
0x10d5   : > { %11682 = vmatprep.subr.bf16.mxu1 %v8093_v43  ;;  %v7953_v29 = vpop.permute.xlu0 %7952 }
0x10d6   : > { %v8021_v45 = vsel %vm2564_vm3, %v7953_v29, %v19437_v10  ;;  %v19450_v10 = vld [vmem:[#allocation85_spill] sm:$0xff] }
0x10d7   : > { %v7985_v48 = vpop.permute.xlu1 %7984  ;;  %11619 = vmatpush3.bf16.msra.mxu0 %v8021_v45 }
0x10d8   : > { %v8069_v26 = vsel %vm2564_vm3, %v7985_v48, %v19438_v58 }
0x10d9   : > { %11683 = vmatpush3.bf16.msra.mxu1 %v8069_v26  ;;  %v7971_v17 = vpop.permute.xlu0 %7970 }
0x10da   : > { %v8048_v54 = vsel %vm2564_vm3, %v7971_v17, %v19439_v11 }
0x10db   : > { %v8003_v8 = vpop.permute.xlu1 %8002  ;;  %11620 = vmatprep.subr.bf16.mxu0 %v8048_v54 }
0x10dc   : > { %v8096_v7 = vsel %vm2564_vm3, %v8003_v8, %v19440_v63  ;;  %v19457_v63 = vld [vmem:[#allocation88_spill] sm:$0xff] }
0x10dd   : > { %11684 = vmatprep.subr.bf16.mxu1 %v8096_v7  ;;  %v7955_v13 = vpop.permute.xlu0 %7954 }
0x10de   : > { %v8024_v14 = vsel %vm2564_vm3, %v7955_v13, %v19441_v24 }
0x10df   : > { %v7987_v61 = vpop.permute.xlu1 %7986  ;;  %11621 = vmatpush3.bf16.msra.mxu0 %v8024_v14 }
0x10e0   : > { %v8072_v35 = vsel %vm2564_vm3, %v7987_v61, %v19442_v41 }
0x10e1   : > { %11685 = vmatpush3.bf16.msra.mxu1 %v8072_v35  ;;  %v7973_v3 = vpop.permute.xlu0 %7972 }
0x10e2   : > { %v8051_v62 = vsel %vm2564_vm3, %v7973_v3, %v19443_v21 }
0x10e3   : > { %v8005_v33 = vpop.permute.xlu1 %8004  ;;  %11622 = vmatprep.subr.bf16.mxu0 %v8051_v62 }
0x10e4   : > { %v8099_v6 = vsel %vm2564_vm3, %v8005_v33, %v19446_v52 }
0x10e5   : > { %11686 = vmatprep.subr.bf16.mxu1 %v8099_v6  ;;  %v7957_v39 = vpop.permute.xlu0 %7956 }
0x10e6   : > { %v17398_v25 = vpop.f32.mrb[246].mxu1  ;;  %v8027_v38 = vsel %vm2564_vm3, %v7957_v39, %v19447_v30 }
0x10e7   : > { %19444 = vst [vmem:[#allocation89_spill] sm:$0xff] %v17398_v25  ;;  %v17400_v28 = vpop.f32.mrb[247].mxu1  ;;  %v7989_v31 = vpop.permute.xlu1 %7988  ;;  %11623 = vmatpush3.bf16.msra.mxu0 %v8027_v38 }
0x10e8   : > { %19445 = vst [vmem:[#allocation25_spill] sm:$0xff] %v17400_v28  ;;  %v8075_v20 = vsel %vm2564_vm3, %v7989_v31, %v19448_v53 }
0x10e9   : > { %11687 = vmatpush3.bf16.msra.mxu1 %v8075_v20  ;;  %v7975_v50 = vpop.permute.xlu0 %7974 }
0x10ea   : > { %v8054_v43 = vsel %vm2564_vm3, %v7975_v50, %v19449_v5 }
0x10eb   : > { %v8007_v29 = vpop.permute.xlu1 %8006  ;;  %11624 = vmatprep.subr.bf16.mxu0 %v8054_v43 }
0x10ec   : > { %v8102_v45 = vsel %vm2564_vm3, %v8007_v29, %v19450_v10 }
0x10ed   : > { %11688 = vmatprep.subr.bf16.mxu1 %v8102_v45 }
0x10ee   : > { %v17412_v48 = vpop.f32.mrb[248].mxu1 }
0x10ef   : > { %19451 = vst [vmem:[#allocation26_spill] sm:$0xff] %v17412_v48  ;;  %v17414_v58 = vpop.f32.mrb[249].mxu1 }
0x10f0   : > { %19452 = vst [vmem:[#allocation72_spill] sm:$0xff] %v17414_v58 }
0x10f6   : > { %v17416_v26 = vpop.f32.mrb[250].mxu1 }
0x10f7   : > { %19453 = vst [vmem:[#allocation39_spill] sm:$0xff] %v17416_v26  ;;  %v17418_v17 = vpop.f32.mrb[251].mxu1 }
0x10f8   : > { %19454 = vst [vmem:[#allocation28_spill] sm:$0xff] %v17418_v17 }
0x10fe   : > { %v17420_v11 = vpop.f32.mrb[252].mxu1 }
0x10ff   : > { %19455 = vst [vmem:[#allocation29_spill] sm:$0xff] %v17420_v11  ;;  %v17422_v54 = vpop.f32.mrb[253].mxu1 }
0x1100   : > { %19456 = vst [vmem:[#allocation30_spill] sm:$0xff] %v17422_v54  ;;  %v8186_v8 = vpop.f32.mrb[12].mxu0 }
0x1101   : > { %v17425_v7 = vadd.f32 %v8186_v8, %v19457_v63  ;;  %v8188_v13 = vpop.f32.mrb[13].mxu0 }
0x1102   : > { %v17428_v24 = vadd.f32 %v8188_v13, %v19457_v63  ;;  %v8190_v14 = vpop.f32.mrb[14].mxu0  ;;  %v8299_v61 = vpop.f32.mrb[0].mxu1 }
0x1103   : > { %v17431_v41 = vadd.f32 %v8190_v14, %v19457_v63  ;;  %v17434_v35 = vadd.f32 %v8299_v61, %v19457_v63  ;;  %v8192_v3 = vpop.f32.mrb[15].mxu0  ;;  %v8301_v21 = vpop.f32.mrb[1].mxu1 }
0x1104   : > { %v8378_v62 = vmax.f32 %v17425_v7, %v17428_v24  ;;  %v17439_v33 = vadd.f32 %v8192_v3, %v19457_v63  ;;  %v8303_v52 = vpop.f32.mrb[2].mxu1  ;;  %v17448_v31 = vadd.f32 %v8301_v21, %v19457_v63 }
0x1105   : > { %v17442_v6 = vadd.f32 %v8303_v52, %v19457_v63  ;;  %v8305_v39 = vpop.f32.mrb[3].mxu1 }
0x1106   : > { %v8379_v30 = vmax.f32 %v8378_v62, %v17434_v35  ;;  %v8383_v38 = vmax.f32 %v17431_v41, %v17439_v33  ;;  %v17453_v50 = vadd.f32 %v8305_v39, %v19457_v63 }
0x1108   : > { %v8380_v53 = vmax.f32 %v8379_v30, %v17448_v31  ;;  %v8384_v20 = vmax.f32 %v8383_v38, %v17442_v6  ;;  %v8196_v5 = vpop.f32.mrb[16].mxu0 }
0x1109   : > { %v17456_v43 = vadd.f32 %v8196_v5, %v19457_v63  ;;  %v8198_v29 = vpop.f32.mrb[17].mxu0 }
0x110a   : > { %v8385_v10 = vmax.f32 %v8384_v20, %v17453_v50  ;;  %v17460_v45 = vadd.f32 %v8198_v29, %v19457_v63  ;;  %v8200_v8 = vpop.f32.mrb[18].mxu0  ;;  %v8309_v13 = vpop.f32.mrb[4].mxu1  ;;  %8381 = vmax.xlane.f32.xlu0 %v8380_v53 }
0x110b   : > { %v17463_v14 = vadd.f32 %v8200_v8, %v19457_v63  ;;  %v17466_v61 = vadd.f32 %v8309_v13, %v19457_v63  ;;  %v8202_v3 = vpop.f32.mrb[19].mxu0  ;;  %v8311_v21 = vpop.f32.mrb[5].mxu1 }
0x110c   : > { %v8388_v62 = vmax.f32 %v17456_v43, %v17460_v45  ;;  %v17471_v52 = vadd.f32 %v8202_v3, %v19457_v63  ;;  %v8313_v39 = vpop.f32.mrb[6].mxu1  ;;  %8386 = vmax.xlane.f32.xlu1 %v8385_v10  ;;  %v17480_v5 = vadd.f32 %v8311_v21, %v19457_v63 }
0x110d   : > { %v17474_v30 = vadd.f32 %v8313_v39, %v19457_v63  ;;  %v8315_v38 = vpop.f32.mrb[7].mxu1 }
0x110e   : > { %v8389_v53 = vmax.f32 %v8388_v62, %v17466_v61  ;;  %v8393_v20 = vmax.f32 %v17463_v14, %v17471_v52  ;;  %v17485_v13 = vadd.f32 %v8315_v38, %v19457_v63 }
0x1110   : > { %v8390_v29 = vmax.f32 %v8389_v53, %v17480_v5  ;;  %v8394_v8 = vmax.f32 %v8393_v20, %v17474_v30  ;;  %v8206_v10 = vpop.f32.mrb[20].mxu0 }
0x1111   : > { %v17488_v3 = vadd.f32 %v8206_v10, %v19457_v63  ;;  %v8208_v39 = vpop.f32.mrb[21].mxu0 }
0x1112   : > { %v8395_v62 = vmax.f32 %v8394_v8, %v17485_v13  ;;  %v17492_v54 = vadd.f32 %v8208_v39, %v19457_v63  ;;  %v8210_v55 = vpop.f32.mrb[22].mxu0  ;;  %v8319_v21 = vpop.f32.mrb[8].mxu1  ;;  %8391 = vmax.xlane.f32.xlu0 %v8390_v29 }
0x1113   : > { %v17495_v53 = vadd.f32 %v8210_v55, %v19457_v63  ;;  %v17498_v20 = vadd.f32 %v8319_v21, %v19457_v63  ;;  %v8212_v38 = vpop.f32.mrb[23].mxu0  ;;  %v8321_v11 = vpop.f32.mrb[9].mxu1 }
0x1114   : > { %v8398_v10 = vmax.f32 %v17488_v3, %v17492_v54  ;;  %v17503_v56 = vadd.f32 %v8212_v38, %v19457_v63  ;;  %8396 = vmax.xlane.f32.xlu1 %v8395_v62  ;;  %v8323_v8 = vpop.f32.mrb[10].mxu1  ;;  %v17512_v17 = vadd.f32 %v8321_v11, %v19457_v63 }
0x1115   : > { %19458 = vst [vmem:[#allocation80_spill] sm:$0xff] %v17498_v20  ;;  %v17506_v39 = vadd.f32 %v8323_v8, %v19457_v63  ;;  %v8325_v29 = vpop.f32.mrb[11].mxu1 }
0x1116   : > { %v8399_v55 = vmax.f32 %v8398_v10, %v17498_v20  ;;  %v8403_v21 = vmax.f32 %v17495_v53, %v17503_v56  ;;  %v17517_v38 = vadd.f32 %v8325_v29, %v19457_v63 }
0x1118   : > { %v8400_v42 = vmax.f32 %v8399_v55, %v17512_v17  ;;  %v8404_v26 = vmax.f32 %v8403_v21, %v17506_v39  ;;  %v8216_v62 = vpop.f32.mrb[24].mxu0 }
0x1119   : > { %v17520_v8 = vadd.f32 %v8216_v62, %v19457_v63  ;;  %v8218_v12 = vpop.f32.mrb[25].mxu0 }
0x111a   : > { %v8405_v10 = vmax.f32 %v8404_v26, %v17517_v38  ;;  %v17524_v58 = vadd.f32 %v8218_v12, %v19457_v63  ;;  %v8220_v46 = vpop.f32.mrb[26].mxu0  ;;  %v8329_v11 = vpop.f32.mrb[12].mxu1  ;;  %8401 = vmax.xlane.f32.xlu0 %v8400_v42 }
0x111b   : > { %19459 = vst [vmem:[#allocation32_spill] sm:$0xff] %v17520_v8  ;;  %v17527_v55 = vadd.f32 %v8220_v46, %v19457_v63  ;;  %v17530_v21 = vadd.f32 %v8329_v11, %v19457_v63  ;;  %v8222_v29 = vpop.f32.mrb[27].mxu0  ;;  %v8331_v48 = vpop.f32.mrb[13].mxu1 }
0x111c   : > { %v8408_v62 = vmax.f32 %v17520_v8, %v17524_v58  ;;  %v17535_v9 = vadd.f32 %v8222_v29, %v19457_v63  ;;  %v8333_v26 = vpop.f32.mrb[14].mxu1  ;;  %8406 = vmax.xlane.f32.xlu1 %v8405_v10  ;;  %v17544_v28 = vadd.f32 %v8331_v48, %v19457_v63 }
0x111d   : > { %19460 = vst [vmem:[#allocation34_spill] sm:$0xff] %v17527_v55  ;;  %19461 = vst [vmem:[#allocation42_spill] sm:$0xff] %v17530_v21  ;;  %v17538_v12 = vadd.f32 %v8333_v26, %v19457_v63  ;;  %v8335_v42 = vpop.f32.mrb[15].mxu1 }
0x111e   : > { %19462 = vst [vmem:[#allocation45_spill] sm:$0xff] %v17535_v9  ;;  %v8409_v46 = vmax.f32 %v8408_v62, %v17530_v21  ;;  %v8413_v11 = vmax.f32 %v17527_v55, %v17535_v9  ;;  %19464 = vst [vmem:[#allocation79_spill] sm:$0xff] %v17544_v28  ;;  %v17549_v29 = vadd.f32 %v8335_v42, %v19457_v63 }
0x111f   : > { %19463 = vst [vmem:[#allocation48_spill] sm:$0xff] %v17538_v12 }
0x1120   : > { %v8410_v34 = vmax.f32 %v8409_v46, %v17544_v28  ;;  %v8414_v25 = vmax.f32 %v8413_v11, %v17538_v12  ;;  %19465 = vst [vmem:[#allocation47_spill] sm:$0xff] %v17549_v29  ;;  %v8226_v10 = vpop.f32.mrb[28].mxu0 }
0x1121   : > { %v8228_v4 = vpop.f32.mrb[29].mxu0  ;;  %v17563_v51 = vadd.f32 %v8226_v10, %v19457_v63 }
0x1122   : > { %v8415_v26 = vmax.f32 %v8414_v25, %v17549_v29  ;;  %v8230_v47 = vpop.f32.mrb[30].mxu0  ;;  %v8339_v2 = vpop.f32.mrb[16].mxu1  ;;  %8411 = vmax.xlane.f32.xlu0 %v8410_v34  ;;  %v7903_v34 = vmul.bf16 %v17340_v22, %v16591_v18 }
0x1123   : > { %v8232_v62 = vpop.f32.mrb[31].mxu0  ;;  %v8341_v19 = vpop.f32.mrb[17].mxu1  ;;  %v17569_v29 = vadd.f32 %v8230_v47, %v19457_v63  ;;  %v17583_v10 = vadd.f32 %v8339_v2, %v19457_v63 }
0x1124   : > { %8416 = vmax.xlane.f32.xlu1 %v8415_v26  ;;  %v8343_v27 = vpop.f32.mrb[18].mxu1  ;;  %v17572_v18 = vadd.f32 %v8232_v62, %v19457_v63 }
0x1125   : > { %v8345_v48 = vpop.f32.mrb[19].mxu1  ;;  %19467 = vst [vmem:[#allocation50_spill] sm:$0xff] %v17569_v29  ;;  %v17588_v47 = vadd.f32 %v8343_v27, %v19457_v63 }
0x1126   : > { %19468 = vst [vmem:[#allocation44_spill] sm:$0xff] %v17572_v18 }
0x1128   : > { %v8236_v32 = vpop.f32.mrb[32].mxu0 }
0x1129   : > { %v8238_v23 = vpop.f32.mrb[33].mxu0 }
0x112a   : > { %v8240_v46 = vpop.f32.mrb[34].mxu0  ;;  %v8349_v37 = vpop.f32.mrb[20].mxu1  ;;  %v17578_v1 = vadd.f32 %v8238_v23, %v19457_v63 }
0x112b   : > { %v8242_v11 = vpop.f32.mrb[35].mxu0  ;;  %v8351_v40 = vpop.f32.mrb[21].mxu1  ;;  %v17602_v2 = vadd.f32 %v8349_v37, %v19457_v63 }
0x112c   : > { %v8353_v42 = vpop.f32.mrb[22].mxu1  ;;  %19469 = vst [vmem:[#allocation52_spill] sm:$0xff] %v17578_v1 }
0x112d   : > { %v17552_v60 = vpop.f32.mrb[23].mxu1 }
0x1130   : > { %v8246_v57 = vpop.f32.mrb[36].mxu0 }
0x1131   : > { %v8248_v44 = vpop.f32.mrb[37].mxu0  ;;  %v17591_v62 = vadd.f32 %v8246_v57, %v19457_v63  ;;  %v17609_v57 = vadd.f32 %v8341_v19, %v19457_v63  ;;  %v17627_v19 = vadd.f32 %v8353_v42, %v19457_v63 }
0x1132   : > { %v8250_v25 = vpop.f32.mrb[38].mxu0  ;;  %v8359_v49 = vpop.f32.mrb[24].mxu1 }
0x1133   : > { %v8252_v0 = vpop.f32.mrb[39].mxu0  ;;  %v8361_v26 = vpop.f32.mrb[25].mxu1  ;;  %19470 = vst [vmem:[#allocation51_spill] sm:$0xff] %v17591_v62 }
0x1134   : > { %v8363_v16 = vpop.f32.mrb[26].mxu1 }
0x1135   : > { %7990 = vrot.lane.b32.xlu1 %v7903_v34, %s19381_s15  ;;  %v17557_v15 = vpop.f32.mrb[27].mxu1  ;;  %v17566_v34 = vadd.f32 %v8228_v4, %v19457_v63  ;;  %v8423_v4 = vmax.f32 %v17569_v29, %v17572_v18  ;;  %v17605_v18 = vadd.f32 %v8242_v11, %v19457_v63 }
0x1137   : > { %19466 = vst [vmem:[#allocation43_spill] sm:$0xff] %v17566_v34  ;;  %v8418_v9 = vmax.f32 %v17563_v51, %v17566_v34  ;;  %v17599_v34 = vadd.f32 %v8240_v46, %v19457_v63 }
0x1138   : > { %v8256_v21 = vpop.f32.mrb[40].mxu0  ;;  %7958 = vrot.lane.b32.xlu0 %v7887_v36, %s19381_s15  ;;  %v17575_v36 = vadd.f32 %v8236_v32, %v19457_v63  ;;  %v17594_v32 = vadd.f32 %v8248_v44, %v19457_v63  ;;  %v8424_v44 = vmax.f32 %v8423_v4, %v17588_v47 }
0x1139   : > { %v8258_v12 = vpop.f32.mrb[41].mxu0  ;;  %v8419_v27 = vmax.f32 %v8418_v9, %v17583_v10  ;;  %v17618_v46 = vadd.f32 %v8256_v21, %v19457_v63  ;;  %v8433_v9 = vmax.f32 %v17599_v34, %v17605_v18  ;;  %v17637_v21 = vadd.f32 %v8252_v0, %v19457_v63 }
0x113a   : > { %v8260_v8 = vpop.f32.mrb[42].mxu0  ;;  %v8369_v55 = vpop.f32.mrb[28].mxu1  ;;  %19471 = vst [vmem:[#allocation54_spill] sm:$0xff] %v17594_v32  ;;  %v8428_v23 = vmax.f32 %v17575_v36, %v17578_v1  ;;  %v8438_v29 = vmax.f32 %v17591_v62, %v17594_v32  ;;  %v17615_v1 = vadd.f32 %v8359_v49, %v19457_v63  ;;  %v17621_v37 = vadd.f32 %v8258_v12, %v19457_v63 }
0x113b   : > { %v8262_v59 = vpop.f32.mrb[43].mxu0  ;;  %v8371_v28 = vpop.f32.mrb[29].mxu1  ;;  %v8420_v4 = vmax.f32 %v8419_v27, %v17609_v57  ;;  %v17631_v32 = vadd.f32 %v8345_v48, %v19457_v63  ;;  %v17634_v49 = vadd.f32 %v8250_v25, %v19457_v63  ;;  %v17640_v12 = vadd.f32 %v8351_v40, %v19457_v63 }
0x113c   : > { %v8373_v20 = vpop.f32.mrb[30].mxu1  ;;  %v8429_v11 = vmax.f32 %v8428_v23, %v17602_v2  ;;  %v8439_v62 = vmax.f32 %v8438_v29, %v17615_v1  ;;  %v8448_v42 = vmax.f32 %v17618_v46, %v17621_v37  ;;  %v17647_v27 = vadd.f32 %v8369_v55, %v19457_v63 }
0x113d   : > { %v8375_v22 = vpop.f32.mrb[31].mxu1  ;;  %v8425_v23 = vmax.f32 %v8424_v44, %v17631_v32  ;;  %v8434_v25 = vmax.f32 %v8433_v9, %v17627_v19  ;;  %v17652_v0 = vadd.f32 %v8361_v26, %v19457_v63  ;;  %v8443_v40 = vmax.f32 %v17634_v49, %v17637_v21 }
0x113e   : > { %v8430_v48 = vmax.f32 %v8429_v11, %v17640_v12  ;;  %v17657_v44 = vadd.f32 %v8363_v16, %v19457_v63  ;;  %v17660_v29 = vadd.f32 %v8260_v8, %v19457_v63  ;;  %v17663_v55 = vadd.f32 %v8262_v59, %v19457_v63 }
0x113f   : > { %v17667_v11 = vadd.f32 %v17552_v60, %v19457_v63  ;;  %v8440_v26 = vmax.f32 %v8439_v62, %v17652_v0  ;;  %v8449_v9 = vmax.f32 %v8448_v42, %v17647_v27  ;;  %v17676_v59 = vadd.f32 %v8371_v28, %v19457_v63 }
0x1140   : > { %v8444_v16 = vmax.f32 %v8443_v40, %v17657_v44  ;;  %v8453_v8 = vmax.f32 %v17660_v29, %v17663_v55  ;;  %v17683_v60 = vadd.f32 %v17557_v15, %v19457_v63 }
0x1141   : > { %v8450_v62 = vmax.f32 %v8449_v9, %v17676_v59 }
0x1142   : > { %v8445_v42 = vmax.f32 %v8444_v16, %v17683_v60 }
0x1157   : > { %8421 = vmax.xlane.f32.xlu0 %v8420_v4  ;;  %v8435_v4 = vmax.f32 %v8434_v25, %v17667_v11  ;;  %v17689_v25 = vadd.f32 %v8375_v22, %v19457_v63 }
0x1159   : > { %8426 = vmax.xlane.f32.xlu1 %v8425_v23  ;;  %v17679_v23 = vadd.f32 %v8373_v20, %v19457_v63 }
0x115b   : > { %8431 = vmax.xlane.f32.xlu0 %v8430_v48  ;;  %v8454_v48 = vmax.f32 %v8453_v8, %v17679_v23 }
0x115d   : > { %8441 = vmax.xlane.f32.xlu1 %v8440_v26  ;;  %v8455_v28 = vmax.f32 %v8454_v48, %v17689_v25 }
0x115f   : > { %8436 = vmax.xlane.f32.xlu0 %v8435_v4 }
0x1161   : > { %8451 = vmax.xlane.f32.xlu1 %v8450_v62 }
0x1163   : > { %8446 = vmax.xlane.f32.xlu0 %v8445_v42 }
0x1167   : > { %8456 = vmax.xlane.f32.xlu0 %v8455_v28 }
0x1197   : > { %v8382_v20 = vpop.xlane.xlu0 %8381 }
0x1198   : > { %v8459_v15 = vsub.f32 %v17428_v24, %v8382_v20  ;;  %v8461_v4 = vsub.f32 %v17448_v31, %v8382_v20  ;;  %v8458_v63 = vsub.f32 %v17425_v7, %v8382_v20  ;;  %v8460_v7 = vsub.f32 %v17434_v35, %v8382_v20 }
0x1199   : > { %v8387_v40 = vpop.xlane.xlu1 %8386 }
0x119a   : > { %v8463_v26 = vsub.f32 %v17439_v33, %v8387_v40  ;;  %v8465_v9 = vsub.f32 %v17453_v50, %v8387_v40  ;;  %v8524_v8 = vmul.f32 1.442695, %v8459_v15  ;;  %v8528_v22 = vmul.f32 1.442695, %v8461_v4 }
0x119b   : > { %v8462_v42 = vsub.f32 %v17431_v41, %v8387_v40  ;;  %v8464_v24 = vsub.f32 %v17442_v6, %v8387_v40  ;;  %v8522_v50 = vmul.f32 1.442695, %v8458_v63 }
0x119c   : > { %v8532_v16 = vmul.f32 1.442695, %v8463_v26  ;;  %v8536_v62 = vmul.f32 1.442695, %v8465_v9 }
0x119d   : > { %v8530_v15 = vmul.f32 1.442695, %v8462_v42  ;;  %v8534_v9 = vmul.f32 1.442695, %v8464_v24 }
0x119e   : > { %12949 = vpow2.f32 %v8532_v16 }
0x119f   : > { %v8392_v48 = vpop.xlane.xlu0 %8391  ;;  %12951 = vpow2.f32 %v8524_v8 }
0x11a0   : > { %12953 = vpow2.f32 %v8536_v62  ;;  %v8467_v31 = vsub.f32 %v17460_v45, %v8392_v48  ;;  %v8469_v41 = vsub.f32 %v17480_v5, %v8392_v48  ;;  %v8466_v16 = vsub.f32 %v17456_v43, %v8392_v48 }
0x11a1   : > { %v8397_v28 = vpop.xlane.xlu1 %8396  ;;  %12955 = vpow2.f32 %v8528_v22  ;;  %v8526_v62 = vmul.f32 1.442695, %v8460_v7 }
0x11a2   : > { %v8471_v33 = vsub.f32 %v17471_v52, %v8397_v28  ;;  %v8473_v26 = vsub.f32 %v17485_v13, %v8397_v28  ;;  %12957 = vpow2.f32 %v8522_v50  ;;  %v8540_v6 = vmul.f32 1.442695, %v8467_v31 }
0x11a3   : > { %12959 = vpow2.f32 %v8530_v15  ;;  %v8470_v52 = vsub.f32 %v17463_v14, %v8397_v28  ;;  %v8472_v13 = vsub.f32 %v17474_v30, %v8397_v28  ;;  %v8544_v20 = vmul.f32 1.442695, %v8469_v41 }
0x11a4   : > { %v8548_v4 = vmul.f32 1.442695, %v8471_v33  ;;  %v8552_v40 = vmul.f32 1.442695, %v8473_v26  ;;  %12961 = vpow2.f32 %v8534_v9  ;;  %v8538_v63 = vmul.f32 1.442695, %v8466_v16 }
0x11a5   : > { %v8546_v42 = vmul.f32 1.442695, %v8470_v52  ;;  %v8468_v30 = vsub.f32 %v17466_v61, %v8392_v48  ;;  %v8550_v28 = vmul.f32 1.442695, %v8472_v13 }
0x11a6   : > { %12963 = vpow2.f32 %v8548_v4 }
0x11a7   : > { %v17706_v8 = vpop.xlane.xlu0 %8401  ;;  %12965 = vpow2.f32 %v8540_v6  ;;  %v8542_v41 = vmul.f32 1.442695, %v8468_v30 }
0x11a8   : > { %v12950_v35 = vpop.eup %12949  ;;  %v8475_v43 = vsub.f32 %v17492_v54, %v17706_v8  ;;  %12967 = vpow2.f32 %v8552_v40  ;;  %v8477_v31 = vsub.f32 %v17512_v17, %v17706_v8 }
0x11a9   : > { %v8407_v45 = vpop.xlane.xlu1 %8406  ;;  %v12952_v5 = vpop.eup %12951  ;;  %12969 = vpow2.f32 %v8526_v62 }
0x11aa   : > { %v8479_v22 = vsub.f32 %v17503_v56, %v8407_v45  ;;  %v12954_v14 = vpop.eup %12953  ;;  %v8481_v24 = vsub.f32 %v17517_v38, %v8407_v45  ;;  %v8651_v33 = vpack.c.bf16 %v12950_v35, %v12952_v5  ;;  %12971 = vpow2.f32 %v8544_v20  ;;  %v19473_v20 = vld [vmem:[#allocation47_spill] sm:$0xff] }
0x11ab   : > { %v12956_v50 = vpop.eup %12955  ;;  %12973 = vpow2.f32 %v8538_v63  ;;  %v8474_v56 = vsub.f32 %v17488_v3, %v17706_v8  ;;  %v8556_v38 = vmul.f32 1.442695, %v8475_v43  ;;  %v8478_v7 = vsub.f32 %v17495_v53, %v8407_v45  ;;  %v19472_v53 = vld [vmem:[#allocation45_spill] sm:$0xff] }
0x11ac   : > { %v8564_v15 = vmul.f32 1.442695, %v8479_v22  ;;  %8714 = vmatprep.mubr.bf16.mxu0 %v8651_v33  ;;  %v8653_v54 = vpack.c.bf16 %v12954_v14, %v12956_v50  ;;  %12975 = vpow2.f32 %v8546_v42  ;;  %v8568_v9 = vmul.f32 1.442695, %v8481_v24  ;;  %v12958_v48 = vpop.eup %12957  ;;  %v19475_v14 = vld [vmem:[#allocation80_spill] sm:$0xff]  ;;  %v19476_v33 = vld [vmem:[#allocation79_spill] sm:$0xff] }
0x11ad   : > { %12977 = vpow2.f32 %v8550_v28  ;;  %v8480_v17 = vsub.f32 %v17506_v39, %v8407_v45  ;;  %v12960_v4 = vpop.eup %12959  ;;  %v8560_v16 = vmul.f32 1.442695, %v8477_v31  ;;  %v8554_v40 = vmul.f32 1.442695, %v8474_v56  ;;  %v19474_v39 = vld [vmem:[#allocation105_spill] sm:$0xff]  ;;  %v19477_v28 = vld [vmem:[#allocation106_spill] sm:$0xff] }
0x11ae   : > { %8811 = vmatprep.mubr.bf16.mxu1 %v8653_v54  ;;  %12979 = vpow2.f32 %v8564_v15  ;;  %v12962_v52 = vpop.eup %12961  ;;  %v8562_v35 = vmul.f32 1.442695, %v8478_v7  ;;  %v8650_v22 = vpack.c.bf16 %v12960_v4, %v12958_v48  ;;  %v8476_v42 = vsub.f32 %v19475_v14, %v17706_v8  ;;  %v13255_v15 = vld [vmem:[%s19096_s2] sm:$0xf] }
0x11af   : > { %v17716_v26 = vpop.xlane.xlu0 %8411  ;;  %12981 = vpow2.f32 %v8556_v38 }
0x11b0   : > { %v8483_v3 = vsub.f32 %v17524_v58, %v17716_v26  ;;  %v12964_v13 = vpop.eup %12963  ;;  %12983 = vpow2.f32 %v8568_v9  ;;  %v8566_v58 = vmul.f32 1.442695, %v8480_v17  ;;  %v8485_v50 = vsub.f32 %v19476_v33, %v17716_v26  ;;  %v19478_v17 = vld [vmem:[#allocation34_spill] sm:$0xff] }
0x11b1   : > { %v17721_v61 = vpop.xlane.xlu1 %8416  ;;  %v12966_v43 = vpop.eup %12965  ;;  %12985 = vpow2.f32 %v8542_v41  ;;  %v8558_v41 = vmul.f32 1.442695, %v8476_v42 }
0x11b2   : > { %v8487_v62 = vsub.f32 %v19472_v53, %v17721_v61  ;;  %v8489_v5 = vsub.f32 %v19473_v20, %v17721_v61  ;;  %v12968_v24 = vpop.eup %12967  ;;  %12987 = vpow2.f32 %v8560_v16  ;;  %v8572_v8 = vmul.f32 1.442695, %v8483_v3 }
0x11b3   : > { %v7959_v6 = vpop.permute.xlu0 %7958  ;;  %v12970_v54 = vpop.eup %12969  ;;  %12989 = vpow2.f32 %v8554_v40  ;;  %v8655_v56 = vpack.c.bf16 %v12964_v13, %v12966_v43  ;;  %v8486_v4 = vsub.f32 %v19478_v17, %v17721_v61  ;;  %v19479_v40 = vld [vmem:[#allocation32_spill] sm:$0xff]  ;;  %v8576_v53 = vmul.f32 1.442695, %v8485_v50 }
0x11b4   : > { %v8030_v45 = vsel %vm2564_vm3, %v7959_v6, %v19474_v39  ;;  %v8580_v30 = vmul.f32 1.442695, %v8487_v62  ;;  %v12972_v38 = vpop.eup %12971  ;;  %v8652_v7 = vpack.c.bf16 %v12962_v52, %v12970_v54  ;;  %12991 = vpow2.f32 %v8562_v35  ;;  %v19480_v62 = vld [vmem:[#allocation48_spill] sm:$0xff] }
0x11b5   : > { %v7991_v63 = vpop.permute.xlu1 %7990  ;;  %11625 = vmatpush3.bf16.msra.mxu0 %v8030_v45  ;;  %v8584_v9 = vmul.f32 1.442695, %v8489_v5  ;;  %v12974_v48 = vpop.eup %12973  ;;  %12993 = vpow2.f32 %v8566_v58  ;;  %v8657_v16 = vpack.c.bf16 %v12968_v24, %v12972_v38  ;;  %v8482_v3 = vsub.f32 %v19479_v40, %v17716_v26  ;;  %v19481_v5 = vld [vmem:[#allocation42_spill] sm:$0xff] }
0x11b6   : > { %v8078_v31 = vsel %vm2564_vm3, %v7991_v63, %v19477_v28  ;;  %12042 = vmatprep.subr.msk.mxu0 %vm3558_vm4, %v13255_v15  ;;  %v12976_v6 = vpop.eup %12975  ;;  %12995 = vpow2.f32 %v8580_v30  ;;  %v8488_v13 = vsub.f32 %v19480_v62, %v17721_v61  ;;  %v8484_v39 = vsub.f32 %v19481_v5, %v17716_v26 }
0x11b7   : > { %11689 = vmatpush3.bf16.msra.mxu1 %v8078_v31  ;;  %v12978_v52 = vpop.eup %12977  ;;  %12997 = vpow2.f32 %v8572_v8  ;;  %v8578_v45 = vmul.f32 1.442695, %v8486_v4  ;;  %v8654_v43 = vpack.c.bf16 %v12976_v6, %v12974_v48 }
0x11b8   : > { %8715 = vmatmul.mubr.bf16.vlgmr.msra.gmra.mrb[44].mxu0 %v8650_v22  ;;  %v12980_v35 = vpop.eup %12979  ;;  %12999 = vpow2.f32 %v8584_v9  ;;  %v8570_v22 = vmul.f32 1.442695, %v8482_v3  ;;  %v8582_v42 = vmul.f32 1.442695, %v8488_v13  ;;  %v8574_v50 = vmul.f32 1.442695, %v8484_v39 }
0x11b9   : > { %8722 = vmatprep.mubr.bf16.mxu0 %v8655_v56  ;;  %12043 = vmatpush3.msk.msra.mxu0 %vm3558_vm4, %v13255_v15  ;;  %v12982_v20 = vpop.eup %12981  ;;  %13001 = vpow2.f32 %v8558_v41 }
0x11ba   : > { %8812 = vmatmul.mubr.bf16.vlgmr.msra.gmra.mrb[32].mxu1 %v8652_v7  ;;  %v12984_v63 = vpop.eup %12983  ;;  %13003 = vpow2.f32 %v8576_v53  ;;  %v8659_v58 = vpack.c.bf16 %v12980_v35, %v12982_v20 }
0x11bb   : > { %8819 = vmatprep.mubr.bf16.mxu1 %v8657_v16  ;;  %v12986_v14 = vpop.eup %12985  ;;  %13005 = vpow2.f32 %v8578_v45 }
0x11bc   : > { %v12988_v24 = vpop.eup %12987  ;;  %v8656_v33 = vpack.c.bf16 %v12978_v52, %v12986_v14  ;;  %13007 = vpow2.f32 %v8570_v22  ;;  %v19482_v52 = vld [vmem:[#allocation43_spill] sm:$0xff]  ;;  %v19484_v14 = vld [vmem:[#allocation44_spill] sm:$0xff] }
0x11bd   : > { %v12990_v61 = vpop.eup %12989  ;;  %v8661_v30 = vpack.c.bf16 %v12984_v63, %v12988_v24  ;;  %13009 = vpow2.f32 %v8582_v42  ;;  %v19483_v63 = vld [vmem:[#allocation50_spill] sm:$0xff] }
0x11be   : > { %v12992_v28 = vpop.eup %12991  ;;  %13011 = vpow2.f32 %v8574_v50 }
0x11bf   : > { %v12994_v26 = vpop.eup %12993  ;;  %v8658_v8 = vpack.c.bf16 %v12992_v28, %v12990_v61 }
0x11c0   : > { %8723 = vmatmul.mubr.bf16.gmra.mrb[48].mxu0 %v8654_v43  ;;  %v12996_v31 = vpop.eup %12995 }
0x11c1   : > { %8730 = vmatprep.mubr.bf16.mxu0 %v8659_v58  ;;  %v12998_v15 = vpop.eup %12997 }
0x11c2   : > { %8820 = vmatmul.mubr.bf16.gmra.mrb[36].mxu1 %v8656_v33  ;;  %v13000_v54 = vpop.eup %12999  ;;  %v8663_v38 = vpack.c.bf16 %v12996_v31, %v12998_v15 }
0x11c3   : > { %8827 = vmatprep.mubr.bf16.mxu1 %v8661_v30  ;;  %v13002_v56 = vpop.eup %13001  ;;  %v19485_v30 = vld [vmem:[#allocation52_spill] sm:$0xff] }
0x11c4   : > { %v13004_v7 = vpop.eup %13003  ;;  %v8660_v9 = vpack.c.bf16 %v12994_v26, %v13002_v56 }
0x11c5   : > { %v8665_v48 = vpack.c.bf16 %v13000_v54, %v13004_v7  ;;  %v13006_v41 = vpop.eup %13005 }
0x11c6   : > { %v13008_v17 = vpop.eup %13007 }
0x11c7   : > { %v13010_v4 = vpop.eup %13009  ;;  %v8662_v16 = vpack.c.bf16 %v13006_v41, %v13008_v17  ;;  %v19486_v41 = vld [vmem:[#allocation51_spill] sm:$0xff] }
0x11c8   : > { %8731 = vmatmul.mubr.bf16.gmra.mrb[52].mxu0 %v8658_v8  ;;  %v13012_v6 = vpop.eup %13011 }
0x11c9   : > { %8738 = vmatprep.mubr.bf16.mxu0 %v8663_v38  ;;  %v8664_v40 = vpack.c.bf16 %v13010_v4, %v13012_v6 }
0x11ca   : > { %8828 = vmatmul.mubr.bf16.gmra.mrb[40].mxu1 %v8660_v9 }
0x11cb   : > { %8835 = vmatprep.mubr.bf16.mxu1 %v8665_v48 }
0x11d0   : > { %8739 = vmatmul.mubr.bf16.gmra.mrb[56].mxu0 %v8662_v16 }
0x11d2   : > { %8836 = vmatmul.mubr.bf16.gmra.mrb[44].mxu1 %v8664_v40 }
0x11e4   : > { %v8422_v3 = vpop.xlane.xlu0 %8421 }
0x11e5   : > { %v8490_v53 = vsub.f32 %v17563_v51, %v8422_v3  ;;  %v8491_v62 = vsub.f32 %v19482_v52, %v8422_v3  ;;  %v8492_v13 = vsub.f32 %v17583_v10, %v8422_v3  ;;  %v8493_v35 = vsub.f32 %v17609_v57, %v8422_v3 }
0x11e6   : > { %v8427_v20 = vpop.xlane.xlu1 %8426 }
0x11e7   : > { %v8586_v5 = vmul.f32 1.442695, %v8490_v53  ;;  %v8588_v39 = vmul.f32 1.442695, %v8491_v62  ;;  %v8590_v45 = vmul.f32 1.442695, %v8492_v13  ;;  %v8494_v43 = vsub.f32 %v19483_v63, %v8427_v20 }
0x11e8   : > { %v8592_v22 = vmul.f32 1.442695, %v8493_v35  ;;  %v8495_v42 = vsub.f32 %v19484_v14, %v8427_v20  ;;  %v8496_v58 = vsub.f32 %v17588_v47, %v8427_v20  ;;  %v8497_v24 = vsub.f32 %v17631_v32, %v8427_v20  ;;  %v8432_v51 = vpop.xlane.xlu0 %8431 }
0x11e9   : > { %13013 = vpow2.f32 %v8586_v5  ;;  %v8594_v33 = vmul.f32 1.442695, %v8494_v43  ;;  %v8498_v50 = vsub.f32 %v17575_v36, %v8432_v51  ;;  %v8499_v28 = vsub.f32 %v19485_v30, %v8432_v51 }
0x11ea   : > { %13015 = vpow2.f32 %v8588_v39  ;;  %v8596_v10 = vmul.f32 1.442695, %v8495_v42  ;;  %v8598_v57 = vmul.f32 1.442695, %v8496_v58  ;;  %v8600_v61 = vmul.f32 1.442695, %v8497_v24  ;;  %v8442_v15 = vpop.xlane.xlu1 %8441 }
0x11eb   : > { %13017 = vpow2.f32 %v8590_v45  ;;  %v8500_v47 = vsub.f32 %v17602_v2, %v8432_v51  ;;  %v8501_v32 = vsub.f32 %v17640_v12, %v8432_v51  ;;  %v8602_v31 = vmul.f32 1.442695, %v8498_v50  ;;  %v19487_v12 = vld [vmem:[#allocation54_spill] sm:$0xff] }
0x11ec   : > { %13019 = vpow2.f32 %v8592_v22  ;;  %v8437_v26 = vpop.xlane.xlu0 %8436  ;;  %v8604_v8 = vmul.f32 1.442695, %v8499_v28  ;;  %v8506_v17 = vsub.f32 %v19486_v41, %v8442_v15  ;;  %v8507_v16 = vsub.f32 %v19487_v12, %v8442_v15 }
0x11ed   : > { %13021 = vpow2.f32 %v8594_v33  ;;  %v8502_v54 = vsub.f32 %v17599_v34, %v8437_v26  ;;  %v8503_v56 = vsub.f32 %v17605_v18, %v8437_v26  ;;  %v8606_v7 = vmul.f32 1.442695, %v8500_v47 }
0x11ee   : > { %13023 = vpow2.f32 %v8596_v10  ;;  %v8504_v36 = vsub.f32 %v17627_v19, %v8437_v26  ;;  %v8608_v48 = vmul.f32 1.442695, %v8501_v32  ;;  %v8505_v2 = vsub.f32 %v17667_v11, %v8437_v26  ;;  %v17772_v43 = vpop.xlane.xlu1 %8451 }
0x11ef   : > { %13025 = vpow2.f32 %v8598_v57  ;;  %v8610_v6 = vmul.f32 1.442695, %v8502_v54  ;;  %v8612_v3 = vmul.f32 1.442695, %v8503_v56  ;;  %v8508_v53 = vsub.f32 %v17615_v1, %v8442_v15 }
0x11f0   : > { %13027 = vpow2.f32 %v8600_v61  ;;  %v8447_v40 = vpop.xlane.xlu0 %8446  ;;  %v8614_v19 = vmul.f32 1.442695, %v8504_v36  ;;  %v8509_v62 = vsub.f32 %v17652_v0, %v8442_v15  ;;  %v8618_v13 = vmul.f32 1.442695, %v8506_v17 }
0x11f1   : > { %13029 = vpow2.f32 %v8602_v31  ;;  %v8616_v11 = vmul.f32 1.442695, %v8505_v2  ;;  %v8620_v5 = vmul.f32 1.442695, %v8507_v16  ;;  %v8510_v39 = vsub.f32 %v17634_v49, %v8447_v40 }
0x11f2   : > { %13031 = vpow2.f32 %v8604_v8  ;;  %v8511_v1 = vsub.f32 %v17637_v21, %v8447_v40  ;;  %v8622_v14 = vmul.f32 1.442695, %v8508_v53  ;;  %v8512_v0 = vsub.f32 %v17657_v44, %v8447_v40 }
0x11f3   : > { %v13014_v38 = vpop.eup %13013  ;;  %13033 = vpow2.f32 %v8606_v7  ;;  %v8624_v24 = vmul.f32 1.442695, %v8509_v62  ;;  %v8513_v51 = vsub.f32 %v17683_v60, %v8447_v40  ;;  %v8515_v49 = vsub.f32 %v17621_v37, %v17772_v43 }
0x11f4   : > { %v13016_v9 = vpop.eup %13015  ;;  %13035 = vpow2.f32 %v8608_v48  ;;  %v8457_v42 = vpop.xlane.xlu0 %8456  ;;  %v8626_v33 = vmul.f32 1.442695, %v8510_v39  ;;  %v8628_v21 = vmul.f32 1.442695, %v8511_v1  ;;  %v8517_v57 = vsub.f32 %v17676_v59, %v17772_v43 }
0x11f5   : > { %v13018_v4 = vpop.eup %13017  ;;  %13037 = vpow2.f32 %v8610_v6  ;;  %v8519_v10 = vsub.f32 %v17663_v55, %v8457_v42  ;;  %v8630_v61 = vmul.f32 1.442695, %v8512_v0  ;;  %v8632_v50 = vmul.f32 1.442695, %v8513_v51 }
0x11f6   : > { %v13020_v34 = vpop.eup %13019  ;;  %13039 = vpow2.f32 %v8612_v3  ;;  %v8521_v30 = vsub.f32 %v17689_v25, %v8457_v42  ;;  %v8636_v28 = vmul.f32 1.442695, %v8515_v49  ;;  %v8518_v26 = vsub.f32 %v17660_v29, %v8457_v42 }
0x11f7   : > { %v13022_v18 = vpop.eup %13021  ;;  %13041 = vpow2.f32 %v8614_v19  ;;  %v8514_v55 = vsub.f32 %v17618_v46, %v17772_v43  ;;  %v8644_v32 = vmul.f32 1.442695, %v8519_v10  ;;  %v8640_v15 = vmul.f32 1.442695, %v8517_v57 }
0x11f8   : > { %v13024_v52 = vpop.eup %13023  ;;  %v8666_v20 = vpack.c.bf16 %v13022_v18, %v13014_v38  ;;  %13043 = vpow2.f32 %v8616_v11  ;;  %v8520_v59 = vsub.f32 %v17679_v23, %v8457_v42  ;;  %v8648_v8 = vmul.f32 1.442695, %v8521_v30 }
0x11f9   : > { %v13026_v35 = vpop.eup %13025  ;;  %v8667_v22 = vpack.c.bf16 %v13024_v52, %v13016_v9  ;;  %13045 = vpow2.f32 %v8618_v13  ;;  %v8516_v56 = vsub.f32 %v17647_v27, %v17772_v43  ;;  %v8642_v29 = vmul.f32 1.442695, %v8518_v26 }
0x11fa   : > { %v13028_v45 = vpop.eup %13027  ;;  %v8668_v63 = vpack.c.bf16 %v13026_v35, %v13018_v4  ;;  %13047 = vpow2.f32 %v8620_v5  ;;  %v8634_v46 = vmul.f32 1.442695, %v8514_v55  ;;  %v8646_v48 = vmul.f32 1.442695, %v8520_v59 }
0x11fb   : > { %v8669_v58 = vpack.c.bf16 %v13028_v45, %v13020_v34  ;;  %8746 = vmatprep.mubr.bf16.mxu0 %v8667_v22  ;;  %v13030_v44 = vpop.eup %13029  ;;  %13049 = vpow2.f32 %v8622_v14  ;;  %v8638_v4 = vmul.f32 1.442695, %v8516_v56 }
0x11fc   : > { %8747 = vmatmul.mubr.bf16.gmra.mrb[60].mxu0 %v8666_v20  ;;  %v13032_v60 = vpop.eup %13031  ;;  %13051 = vpow2.f32 %v8624_v24 }
0x11fd   : > { %8843 = vmatprep.mubr.bf16.mxu1 %v8669_v58  ;;  %v13034_v37 = vpop.eup %13033  ;;  %13053 = vpow2.f32 %v8626_v33 }
0x11fe   : > { %8844 = vmatmul.mubr.bf16.gmra.mrb[48].mxu1 %v8668_v63  ;;  %v13036_v47 = vpop.eup %13035  ;;  %13055 = vpow2.f32 %v8628_v21 }
0x11ff   : > { %v13038_v31 = vpop.eup %13037  ;;  %13057 = vpow2.f32 %v8630_v61 }
0x1200   : > { %v13040_v54 = vpop.eup %13039  ;;  %13059 = vpow2.f32 %v8632_v50  ;;  %v8670_v36 = vpack.c.bf16 %v13038_v31, %v13030_v44 }
0x1201   : > { %v13042_v25 = vpop.eup %13041  ;;  %13061 = vpow2.f32 %v8636_v28  ;;  %v8671_v38 = vpack.c.bf16 %v13040_v54, %v13032_v60 }
0x1202   : > { %v13044_v7 = vpop.eup %13043  ;;  %13063 = vpow2.f32 %v8644_v32  ;;  %v8672_v17 = vpack.c.bf16 %v13042_v25, %v13034_v37 }
0x1203   : > { %v13046_v9 = vpop.eup %13045  ;;  %13065 = vpow2.f32 %v8640_v15  ;;  %8754 = vmatprep.mubr.bf16.mxu0 %v8671_v38  ;;  %v8673_v41 = vpack.c.bf16 %v13044_v7, %v13036_v47 }
0x1204   : > { %v13048_v23 = vpop.eup %13047  ;;  %13067 = vpow2.f32 %v8648_v8  ;;  %8755 = vmatmul.mubr.bf16.gmra.mrb[64].mxu0 %v8670_v36 }
0x1205   : > { %v13050_v2 = vpop.eup %13049  ;;  %13069 = vpow2.f32 %v8642_v29  ;;  %8851 = vmatprep.mubr.bf16.mxu1 %v8673_v41 }
0x1206   : > { %v13052_v27 = vpop.eup %13051  ;;  %13071 = vpow2.f32 %v8634_v46  ;;  %8852 = vmatmul.mubr.bf16.gmra.mrb[52].mxu1 %v8672_v17 }
0x1207   : > { %v13054_v12 = vpop.eup %13053  ;;  %13073 = vpow2.f32 %v8646_v48 }
0x1208   : > { %v13056_v16 = vpop.eup %13055  ;;  %13075 = vpow2.f32 %v8638_v4  ;;  %v8674_v3 = vpack.c.bf16 %v13054_v12, %v13046_v9 }
0x1209   : > { %v13058_v6 = vpop.eup %13057  ;;  %v8675_v40 = vpack.c.bf16 %v13056_v16, %v13048_v23 }
0x120a   : > { %v13060_v34 = vpop.eup %13059  ;;  %v8676_v52 = vpack.c.bf16 %v13058_v6, %v13050_v2 }
0x120b   : > { %v13062_v18 = vpop.eup %13061  ;;  %8762 = vmatprep.mubr.bf16.mxu0 %v8675_v40  ;;  %v8677_v53 = vpack.c.bf16 %v13060_v34, %v13052_v27 }
0x120c   : > { %v13064_v19 = vpop.eup %13063  ;;  %8763 = vmatmul.mubr.bf16.gmra.mrb[68].mxu0 %v8674_v3 }
0x120d   : > { %v13066_v62 = vpop.eup %13065  ;;  %8859 = vmatprep.mubr.bf16.mxu1 %v8677_v53  ;;  %v8679_v13 = vpack.c.bf16 %v13064_v19, %v13062_v18 }
0x120e   : > { %v13068_v11 = vpop.eup %13067  ;;  %8860 = vmatmul.mubr.bf16.gmra.mrb[56].mxu1 %v8676_v52 }
0x120f   : > { %v13070_v35 = vpop.eup %13069  ;;  %8770 = vmatprep.mubr.bf16.mxu0 %v8679_v13  ;;  %v8681_v20 = vpack.c.bf16 %v13068_v11, %v13066_v62 }
0x1210   : > { %v13072_v5 = vpop.eup %13071 }
0x1211   : > { %v13074_v39 = vpop.eup %13073  ;;  %8867 = vmatprep.mubr.bf16.mxu1 %v8681_v20  ;;  %v8678_v45 = vpack.c.bf16 %v13070_v35, %v13072_v5 }
0x1212   : > { %v13076_v63 = vpop.eup %13075 }
0x1213   : > { %v8680_v43 = vpack.c.bf16 %v13074_v39, %v13076_v63 }
0x1214   : > { %8771 = vmatmul.mubr.bf16.gmra.mrb[72].mxu0 %v8678_v45 }
0x1216   : > { %8868 = vmatmul.mubr.bf16.gmra.mrb[60].mxu1 %v8680_v43 }
0x128b   : > { %v11626_v1 = vpop.f32.mrb[44].mxu0 }
0x128c   : > { %v11627_v22 = vpop.f32.mrb[45].mxu0 }
0x128d   : > { %v11628_v14 = vadd.f32 %v11627_v22, %v11626_v1  ;;  %v11629_v0 = vpop.f32.mrb[46].mxu0  ;;  %v11690_v42 = vpop.f32.mrb[32].mxu1 }
0x128e   : > { %v11630_v58 = vpop.f32.mrb[47].mxu0  ;;  %v11691_v24 = vpop.f32.mrb[33].mxu1 }
0x128f   : > { %v11631_v51 = vadd.f32 %v11630_v58, %v11629_v0  ;;  %v11692_v49 = vadd.f32 %v11691_v24, %v11690_v42  ;;  %v11693_v33 = vpop.f32.mrb[34].mxu1 }
0x1290   : > { %v11694_v21 = vpop.f32.mrb[35].mxu1 }
0x1291   : > { %v17789_v10 = vadd.f32 %v11692_v49, %v11628_v14  ;;  %v11695_v44 = vadd.f32 %v11694_v21, %v11693_v33 }
0x1293   : > { %v8876_v57 = vadd.f32 1e-09, %v17789_v10  ;;  %v17792_v61 = vadd.f32 %v11695_v44, %v11631_v51  ;;  %v11632_v60 = vpop.f32.mrb[48].mxu0 }
0x1294   : > { %v11633_v50 = vpop.f32.mrb[49].mxu0 }
0x1295   : > { %13077 = vrcp.f32 %v8876_v57  ;;  %v8877_v30 = vadd.f32 1e-09, %v17792_v61  ;;  %v11634_v37 = vadd.f32 %v11633_v50, %v11632_v60  ;;  %v11635_v28 = vpop.f32.mrb[50].mxu0  ;;  %v11696_v26 = vpop.f32.mrb[36].mxu1 }
0x1296   : > { %v11636_v47 = vpop.f32.mrb[51].mxu0  ;;  %v11697_v55 = vpop.f32.mrb[37].mxu1 }
0x1297   : > { %13079 = vrcp.f32 %v8877_v30  ;;  %v11637_v32 = vadd.f32 %v11636_v47, %v11635_v28  ;;  %v11698_v31 = vadd.f32 %v11697_v55, %v11696_v26  ;;  %v11699_v15 = vpop.f32.mrb[38].mxu1 }
0x1298   : > { %v11700_v59 = vpop.f32.mrb[39].mxu1 }
0x1299   : > { %v17795_v54 = vadd.f32 %v11698_v31, %v11634_v37  ;;  %v11701_v8 = vadd.f32 %v11700_v59, %v11699_v15 }
0x129b   : > { %v8878_v25 = vadd.f32 1e-09, %v17795_v54  ;;  %v17798_v56 = vadd.f32 %v11701_v8, %v11637_v32  ;;  %v11638_v29 = vpop.f32.mrb[52].mxu0 }
0x129c   : > { %v11639_v38 = vpop.f32.mrb[53].mxu0 }
0x129d   : > { %13081 = vrcp.f32 %v8878_v25  ;;  %v8879_v7 = vadd.f32 1e-09, %v17798_v56  ;;  %v11640_v36 = vadd.f32 %v11639_v38, %v11638_v29  ;;  %v11641_v46 = vpop.f32.mrb[54].mxu0  ;;  %v11702_v9 = vpop.f32.mrb[40].mxu1 }
0x129e   : > { %v11642_v48 = vpop.f32.mrb[55].mxu0  ;;  %v11703_v41 = vpop.f32.mrb[41].mxu1 }
0x129f   : > { %v13078_v23 = vpop.eup %13077  ;;  %v11643_v17 = vadd.f32 %v11642_v48, %v11641_v46  ;;  %v11704_v2 = vadd.f32 %v11703_v41, %v11702_v9  ;;  %v11705_v4 = vpop.f32.mrb[42].mxu1  ;;  %13083 = vrcp.f32 %v8879_v7 }
0x12a0   : > { %v11706_v27 = vpop.f32.mrb[43].mxu1  ;;  %8924 = vrot.lane.b32.xlu1 %v13078_v23, %s19381_s15 }
0x12a1   : > { %v13080_v12 = vpop.eup %13079  ;;  %v17802_v16 = vadd.f32 %v11704_v2, %v11640_v36  ;;  %v11707_v6 = vadd.f32 %v11706_v27, %v11705_v4 }
0x12a2   : > { %8926 = vrot.lane.b32.xlu0 %v13080_v12, %s19381_s15 }
0x12a3   : > { %v8880_v40 = vadd.f32 1e-09, %v17802_v16  ;;  %v17806_v34 = vadd.f32 %v11707_v6, %v11643_v17  ;;  %v11644_v3 = vpop.f32.mrb[56].mxu0 }
0x12a4   : > { %v11645_v18 = vpop.f32.mrb[57].mxu0 }
0x12a5   : > { %13085 = vrcp.f32 %v8880_v40  ;;  %v8881_v53 = vadd.f32 1e-09, %v17806_v34  ;;  %v11646_v19 = vadd.f32 %v11645_v18, %v11644_v3  ;;  %v11647_v52 = vpop.f32.mrb[58].mxu0  ;;  %v11708_v62 = vpop.f32.mrb[44].mxu1 }
0x12a6   : > { %v11648_v13 = vpop.f32.mrb[59].mxu0  ;;  %v11709_v11 = vpop.f32.mrb[45].mxu1 }
0x12a7   : > { %v13082_v35 = vpop.eup %13081  ;;  %13087 = vrcp.f32 %v8881_v53  ;;  %v11649_v20 = vadd.f32 %v11648_v13, %v11647_v52  ;;  %v11710_v5 = vadd.f32 %v11709_v11, %v11708_v62  ;;  %v11711_v39 = vpop.f32.mrb[46].mxu1 }
0x12a8   : > { %v11712_v45 = vpop.f32.mrb[47].mxu1  ;;  %8928 = vrot.lane.b32.xlu1 %v13082_v35, %s19381_s15 }
0x12a9   : > { %v17810_v63 = vadd.f32 %v11710_v5, %v11646_v19  ;;  %v11713_v43 = vadd.f32 %v11712_v45, %v11711_v39  ;;  %v13084_v1 = vpop.eup %13083 }
0x12ab   : > { %v8882_v22 = vadd.f32 1e-09, %v17810_v63  ;;  %v17813_v14 = vadd.f32 %v11713_v43, %v11649_v20 }
0x12ac   : > { %8930 = vrot.lane.b32.xlu1 %v13084_v1, %s19381_s15 }
0x12ad   : > { %13089 = vrcp.f32 %v8882_v22  ;;  %v8883_v0 = vadd.f32 1e-09, %v17813_v14 }
0x12af   : > { %v13086_v42 = vpop.eup %13085  ;;  %13091 = vrcp.f32 %v8883_v0 }
0x12b0   : > { %8932 = vrot.lane.b32.xlu0 %v13086_v42, %s19381_s15 }
0x12b1   : > { %v13088_v58 = vpop.eup %13087 }
0x12b2   : > { %8934 = vrot.lane.b32.xlu1 %v13088_v58, %s19381_s15 }
0x12b7   : > { %v13090_v24 = vpop.eup %13089 }
0x12b8   : > { %8936 = vrot.lane.b32.xlu0 %v13090_v24, %s19381_s15 }
0x12b9   : > { %v13092_v51 = vpop.eup %13091 }
0x12ba   : > { %8938 = vrot.lane.b32.xlu1 %v13092_v51, %s19381_s15 }
0x12cf   : > { %v11650_v49 = vpop.f32.mrb[60].mxu0 }
0x12d0   : > { %v11651_v21 = vpop.f32.mrb[61].mxu0 }
0x12d1   : > { %v11714_v33 = vpop.f32.mrb[48].mxu1  ;;  %v11652_v44 = vadd.f32 %v11651_v21, %v11650_v49  ;;  %v11653_v60 = vpop.f32.mrb[62].mxu0 }
0x12d2   : > { %v11715_v57 = vpop.f32.mrb[49].mxu1  ;;  %v11654_v37 = vpop.f32.mrb[63].mxu0 }
0x12d3   : > { %v11716_v50 = vadd.f32 %v11715_v57, %v11714_v33  ;;  %v11717_v30 = vpop.f32.mrb[50].mxu1  ;;  %v11655_v28 = vadd.f32 %v11654_v37, %v11653_v60 }
0x12d4   : > { %v11718_v26 = vpop.f32.mrb[51].mxu1 }
0x12d5   : > { %v17821_v47 = vadd.f32 %v11716_v50, %v11652_v44  ;;  %v11719_v55 = vadd.f32 %v11718_v26, %v11717_v30 }
0x12d7   : > { %v8884_v32 = vadd.f32 1e-09, %v17821_v47  ;;  %v17824_v31 = vadd.f32 %v11719_v55, %v11655_v28  ;;  %v11656_v59 = vpop.f32.mrb[64].mxu0 }
0x12d8   : > { %v11657_v8 = vpop.f32.mrb[65].mxu0 }
0x12d9   : > { %13093 = vrcp.f32 %v8884_v32  ;;  %v8885_v15 = vadd.f32 1e-09, %v17824_v31  ;;  %v11720_v25 = vpop.f32.mrb[52].mxu1  ;;  %v11658_v29 = vadd.f32 %v11657_v8, %v11656_v59  ;;  %v11659_v38 = vpop.f32.mrb[66].mxu0 }
0x12da   : > { %v11721_v7 = vpop.f32.mrb[53].mxu1  ;;  %v11660_v36 = vpop.f32.mrb[67].mxu0 }
0x12db   : > { %13095 = vrcp.f32 %v8885_v15  ;;  %v11722_v46 = vadd.f32 %v11721_v7, %v11720_v25  ;;  %v11723_v9 = vpop.f32.mrb[54].mxu1  ;;  %v11661_v48 = vadd.f32 %v11660_v36, %v11659_v38 }
0x12dc   : > { %v11724_v41 = vpop.f32.mrb[55].mxu1 }
0x12dd   : > { %v17827_v23 = vadd.f32 %v11722_v46, %v11658_v29  ;;  %v11725_v17 = vadd.f32 %v11724_v41, %v11723_v9 }
0x12df   : > { %v8886_v4 = vadd.f32 1e-09, %v17827_v23  ;;  %v17830_v27 = vadd.f32 %v11725_v17, %v11661_v48  ;;  %v11662_v12 = vpop.f32.mrb[68].mxu0 }
0x12e0   : > { %v11663_v6 = vpop.f32.mrb[69].mxu0 }
0x12e1   : > { %13097 = vrcp.f32 %v8886_v4  ;;  %v8887_v3 = vadd.f32 1e-09, %v17830_v27  ;;  %v11726_v18 = vpop.f32.mrb[56].mxu1  ;;  %v11664_v53 = vadd.f32 %v11663_v6, %v11662_v12  ;;  %v11665_v19 = vpop.f32.mrb[70].mxu0 }
0x12e2   : > { %v11727_v52 = vpop.f32.mrb[57].mxu1  ;;  %v11666_v62 = vpop.f32.mrb[71].mxu0 }
0x12e3   : > { %v13094_v2 = vpop.eup %13093  ;;  %13099 = vrcp.f32 %v8887_v3  ;;  %v11728_v13 = vadd.f32 %v11727_v52, %v11726_v18  ;;  %v11729_v11 = vpop.f32.mrb[58].mxu1  ;;  %v11667_v35 = vadd.f32 %v11666_v62, %v11665_v19  ;;  %v12425_v18 = vld [vmem:[%s19261_s9 + $0x30] sm:$0xff]  }
0x12e4   : > { %8940 = vrot.lane.b32.xlu0 %v13094_v2, %s19381_s15  ;;  %v11730_v20 = vpop.f32.mrb[59].mxu1  ;;  %12068 = vmatprep.subr.bf16.mxu1 %v12425_v18 }
0x12e5   : > { %v13096_v40 = vpop.eup %13095  ;;  %v17835_v5 = vadd.f32 %v11728_v13, %v11664_v53  ;;  %v11731_v39 = vadd.f32 %v11730_v20, %v11729_v11  ;;  %12069 = vmatpush3.bf16.msra.mxu1 %v12425_v18  ;;  %v12426_v13 = vld [vmem:[%s19261_s9 + $0x38] sm:$0xff]   ;;  %v19498_v18 = vld [vmem:[#allocation37_spill] sm:$0xff]  ;;  %s19536_s9 = scalar_lea.vmem %s18699_s22, %s13580_s0 }
0x12e6   : > { %8942 = vrot.lane.b32.xlu1 %v13096_v40, %s19381_s15  ;;  %12070 = vmatprep.subr.bf16.mxu1 %v12426_v13 }
0x12e7   : > { %v8888_v45 = vadd.f32 1e-09, %v17835_v5  ;;  %v17838_v43 = vadd.f32 %v11731_v39, %v11667_v35  ;;  %v11668_v1 = vpop.f32.mrb[72].mxu0 }
0x12e8   : > { %v11669_v22 = vpop.f32.mrb[73].mxu0 }
0x12e9   : > { %13101 = vrcp.f32 %v8888_v45  ;;  %v8889_v0 = vadd.f32 1e-09, %v17838_v43  ;;  %v11732_v42 = vpop.f32.mrb[60].mxu1  ;;  %v11670_v58 = vadd.f32 %v11669_v22, %v11668_v1  ;;  %v11671_v24 = vpop.f32.mrb[74].mxu0  ;;  %12071 = vmatpush3.bf16.msra.mxu1 %v12426_v13 }
0x12ea   : > { %v11733_v51 = vpop.f32.mrb[61].mxu1  ;;  %v11672_v49 = vpop.f32.mrb[75].mxu0 }
0x12eb   : > { %v13098_v33 = vpop.eup %13097  ;;  %13103 = vrcp.f32 %v8889_v0  ;;  %v11734_v21 = vadd.f32 %v11733_v51, %v11732_v42  ;;  %v11735_v44 = vpop.f32.mrb[62].mxu1  ;;  %v11673_v57 = vadd.f32 %v11672_v49, %v11671_v24 }
0x12ec   : > { %8944 = vrot.lane.b32.xlu0 %v13098_v33, %s19381_s15  ;;  %v11736_v60 = vpop.f32.mrb[63].mxu1 }
0x12ed   : > { %v13100_v50 = vpop.eup %13099  ;;  %v17842_v30 = vadd.f32 %v11734_v21, %v11670_v58  ;;  %v11737_v37 = vadd.f32 %v11736_v60, %v11735_v44  ;;  %v19489_v60 = vld [vmem:[#allocation102_spill] sm:$0xff] }
0x12ee   : > { %8946 = vrot.lane.b32.xlu1 %v13100_v50, %s19381_s15  ;;  %v17906_v50 = vld [vmem:[%s19282_s28 + $0x2] ss:$0 sm:$0xff] }
0x12ef   : > { %v8890_v28 = vadd.f32 1e-09, %v17842_v30  ;;  %v17846_v26 = vadd.f32 %v11737_v37, %v11673_v57  ;;  %v19488_v57 = vld [vmem:[#allocation40_spill] sm:$0xff]  ;;  %v19491_v37 = vld [vmem:[#allocation101_spill] sm:$0xff] }
0x12f1   : > { %13105 = vrcp.f32 %v8890_v28  ;;  %v8891_v55 = vadd.f32 1e-09, %v17846_v26 }
0x12f3   : > { %v13102_v32 = vpop.eup %13101  ;;  %13107 = vrcp.f32 %v8891_v55 }
0x12f4   : > { %8948 = vrot.lane.b32.xlu0 %v13102_v32, %s19381_s15 }
0x12f5   : > { %v13104_v15 = vpop.eup %13103 }
0x12f6   : > { %8950 = vrot.lane.b32.xlu1 %v13104_v15, %s19381_s15 }
0x12fb   : > { %v13106_v59 = vpop.eup %13105 }
0x12fc   : > { %8952 = vrot.lane.b32.xlu0 %v13106_v59, %s19381_s15 }
0x12fd   : > { %v13108_v8 = vpop.eup %13107 }
0x12fe   : > { %8954 = vrot.lane.b32.xlu1 %v13108_v8, %s19381_s15  ;;  %s19537_s15 = scalar_lea.vmem %s18701_s24, %s13580_s0  ;;  %s19538_s0 = sld [smem:[#allocation127_spill]] (!%p11080_p1) }
0x1312   : > { %v8925_v25 = vpop.permute.xlu1 %8924 }
0x1313   : > { %12044 = vmatprep.mubr.msk.f32.mxu0 %vm3525_vm5, %v8925_v25  ;;  %v19492_v25 = vld [vmem:[#allocation91_spill] sm:$0xff] }
0x1314   : > { %v8927_v29 = vpop.permute.xlu0 %8926 }
0x1315   : > { %12045 = vmatmul.mubr.msk.f32.vlgmr.msra.gmra.mrb[182].mxu0 %vm3525_vm5, %v8927_v29  ;;  %v19493_v29 = vld [vmem:[#allocation103_spill] sm:$0xff] }
0x131a   : > { %v8929_v38 = vpop.permute.xlu1 %8928 }
0x131b   : > { %12047 = vmatprep.mubr.msk.f32.mxu0 %vm3525_vm5, %v8929_v38  ;;  %v7767_v38 = vmul.f32 %v19493_v29, %v19492_v25 }
0x131e   : > { %v8931_v7 = vpop.permute.xlu1 %8930 }
0x131f   : > { %12048 = vmatmul.mubr.msk.f32.gmra.mrb[76].mxu0 %vm3525_vm5, %v8931_v7  ;;  %v19494_v7 = vld [vmem:[#allocation87_spill] sm:$0xff] }
0x1322   : > { %v8933_v36 = vpop.permute.xlu0 %8932 }
0x1323   : > { %12050 = vmatprep.mubr.msk.f32.mxu0 %vm3525_vm5, %v8933_v36  ;;  %v19495_v36 = vld [vmem:[#allocation46_spill] sm:$0xff] }
0x1324   : > { %v8935_v46 = vpop.permute.xlu1 %8934 }
0x1325   : > { %12051 = vmatmul.mubr.msk.f32.gmra.mrb[78].mxu0 %vm3525_vm5, %v8935_v46  ;;  %v7766_v46 = vmul.f32 %v19495_v36, %v19494_v7  ;;  %v19513_v7 = vld [vmem:[#allocation39_spill] sm:$0xff] }
0x132a   : > { %v8937_v9 = vpop.permute.xlu0 %8936 }
0x132b   : > { %12053 = vmatprep.mubr.msk.f32.mxu0 %vm3525_vm5, %v8937_v9 }
0x132c   : > { %v8939_v48 = vpop.permute.xlu1 %8938 }
0x132d   : > { %12054 = vmatmul.mubr.msk.f32.gmra.mrb[80].mxu0 %vm3525_vm5, %v8939_v48 }
0x1356   : > { %v8941_v41 = vpop.permute.xlu0 %8940 }
0x1357   : > { %12056 = vmatprep.mubr.msk.f32.mxu0 %vm3525_vm5, %v8941_v41 }
0x1358   : > { %v8943_v17 = vpop.permute.xlu1 %8942 }
0x1359   : > { %12057 = vmatmul.mubr.msk.f32.gmra.mrb[82].mxu0 %vm3525_vm5, %v8943_v17 }
0x135e   : > { %v8945_v2 = vpop.permute.xlu0 %8944 }
0x135f   : > { %12059 = vmatprep.mubr.msk.f32.mxu0 %vm3525_vm5, %v8945_v2 }
0x1360   : > { %v8947_v4 = vpop.permute.xlu1 %8946 }
0x1361   : > { %12060 = vmatmul.mubr.msk.f32.gmra.mrb[84].mxu0 %vm3525_vm5, %v8947_v4 }
0x1366   : > { %v8949_v12 = vpop.permute.xlu0 %8948 }
0x1367   : > { %12062 = vmatprep.mubr.msk.f32.mxu0 %vm3525_vm5, %v8949_v12  ;;  %v19496_v12 = vld [vmem:[#allocation22_spill] sm:$0xff] }
0x1368   : > { %v8951_v6 = vpop.permute.xlu1 %8950 }
0x1369   : > { %12063 = vmatmul.mubr.msk.f32.gmra.mrb[86].mxu0 %vm3525_vm5, %v8951_v6  ;;  %v19497_v6 = vld [vmem:[#allocation74_spill] sm:$0xff] }
0x136e   : > { %v8953_v40 = vpop.permute.xlu0 %8952 }
0x136f   : > { %12065 = vmatprep.mubr.msk.f32.mxu0 %vm3525_vm5, %v8953_v40  ;;  %v7769_v40 = vmul.f32 %v19497_v6, %v19496_v12 }
0x1370   : > { %v8955_v3 = vpop.permute.xlu1 %8954 }
0x1371   : > { %12066 = vmatmul.mubr.msk.f32.gmra.mrb[88].mxu0 %vm3525_vm5, %v8955_v3 }
0x13e8   : > { %v12046_v53 = vpop.f32.mrb[182].mxu0 }
0x13e9   : > { %v9134_v19 = vmul.f32 %v12046_v53, %v17792_v61  ;;  %v9054_v52 = vpop.f32.mrb[183].mxu0  ;;  %v19499_v53 = vld [vmem:[#allocation77_spill] sm:$0xff] }
0x13ea   : > { %v9133_v62 = vmul.f32 %v9054_v52, %v17789_v10 }
0x13eb   : > { %9167 = vrot.lane.b32.xlu1 %v9134_v19, %s19332_s4  ;;  %v7768_v19 = vmul.f32 %v19499_v53, %v19498_v18  ;;  %v19517_v18 = vld [vmem:[#allocation29_spill] sm:$0xff] }
0x13ec   : > { %9165 = vrot.lane.b32.xlu0 %v9133_v62, %s19332_s4 }
0x13f2   : > { %v12049_v11 = vpop.f32.mrb[76].mxu0 }
0x13f3   : > { %v9136_v35 = vmul.f32 %v12049_v11, %v17798_v56  ;;  %v9064_v20 = vpop.f32.mrb[77].mxu0 }
0x13f4   : > { %v9135_v39 = vmul.f32 %v9064_v20, %v17795_v54 }
0x13f5   : > { %9171 = vrot.lane.b32.xlu1 %v9136_v35, %s19332_s4 }
0x13f6   : > { %9169 = vrot.lane.b32.xlu0 %v9135_v39, %s19332_s4 }
0x13f8   : > { %v12052_v61 = vpop.f32.mrb[78].mxu0 }
0x13f9   : > { %v9138_v10 = vmul.f32 %v12052_v61, %v17806_v34  ;;  %v9074_v45 = vpop.f32.mrb[79].mxu0  ;;  %v19500_v61 = vld [vmem:[#allocation92_spill] sm:$0xff] }
0x13fa   : > { %v9137_v1 = vmul.f32 %v9074_v45, %v17802_v16 }
0x13fb   : > { %9175 = vrot.lane.b32.xlu1 %v9138_v10, %s19332_s4  ;;  %v19501_v10 = vld [vmem:[#allocation49_spill] sm:$0xff] }
0x13fc   : > { %9173 = vrot.lane.b32.xlu0 %v9137_v1, %s19332_s4  ;;  %v7771_v45 = vmul.f32 %v19501_v10, %v19500_v61  ;;  %v19502_v1 = vld [vmem:[#allocation94_spill] sm:$0xff] }
0x1400   : > { %v12055_v22 = vpop.f32.mrb[80].mxu0 }
0x1401   : > { %v9140_v56 = vmul.f32 %v12055_v22, %v17813_v14  ;;  %v9084_v0 = vpop.f32.mrb[81].mxu0  ;;  %v19503_v22 = vld [vmem:[#allocation83_spill] sm:$0xff] }
0x1402   : > { %v9139_v54 = vmul.f32 %v9084_v0, %v17810_v63 }
0x1403   : > { %9179 = vrot.lane.b32.xlu1 %v9140_v56, %s19332_s4  ;;  %v7770_v56 = vmul.f32 %v19503_v22, %v19502_v1 }
0x1404   : > { %9177 = vrot.lane.b32.xlu0 %v9139_v54, %s19332_s4 }
0x142c   : > { %v12058_v42 = vpop.f32.mrb[82].mxu0 }
0x142d   : > { %v9142_v34 = vmul.f32 %v12058_v42, %v17824_v31  ;;  %v9094_v58 = vpop.f32.mrb[83].mxu0 }
0x142e   : > { %v9141_v16 = vmul.f32 %v9094_v58, %v17821_v47 }
0x142f   : > { %9183 = vrot.lane.b32.xlu1 %v9142_v34, %s19332_s4 }
0x1430   : > { %9181 = vrot.lane.b32.xlu0 %v9141_v16, %s19332_s4 }
0x1434   : > { %v12061_v24 = vpop.f32.mrb[84].mxu0 }
0x1435   : > { %v9144_v14 = vmul.f32 %v12061_v24, %v17830_v27  ;;  %v9104_v51 = vpop.f32.mrb[85].mxu0 }
0x1436   : > { %v9143_v63 = vmul.f32 %v9104_v51, %v17827_v23  ;;  %v19505_v51 = vld [vmem:[#allocation89_spill] sm:$0xff] }
0x1437   : > { %9187 = vrot.lane.b32.xlu1 %v9144_v14, %s19332_s4  ;;  %v19504_v14 = vld [vmem:[#allocation95_spill] sm:$0xff] }
0x1438   : > { %9185 = vrot.lane.b32.xlu0 %v9143_v63, %s19332_s4  ;;  %v7773_v63 = vmul.f32 %v19505_v51, %v19504_v14  ;;  %v19522_v51 = vld [vmem:[#allocation57_spill] sm:$0xff] }
0x143c   : > { %v12064_v49 = vpop.f32.mrb[86].mxu0 }
0x143d   : > { %v9146_v31 = vmul.f32 %v12064_v49, %v17838_v43  ;;  %v9114_v33 = vpop.f32.mrb[87].mxu0  ;;  %v7765_v43 = vmul.f32 %v19489_v60, %v19488_v57  ;;  %v19506_v49 = vld [vmem:[#allocation93_spill] sm:$0xff] }
0x143e   : > { %v9145_v47 = vmul.f32 %v9114_v33, %v17835_v5  ;;  %v19490_v5 = vld [vmem:[#allocation90_spill] sm:$0xff] }
0x143f   : > { %9191 = vrot.lane.b32.xlu1 %v9146_v31, %s19332_s4  ;;  %v7764_v28 = vmul.f32 %v19491_v37, %v19490_v5  ;;  %v19507_v31 = vld [vmem:[#allocation25_spill] sm:$0xff]  ;;  %v19509_v5 = vld [vmem:[#allocation26_spill] sm:$0xff] }
0x1440   : > { %9189 = vrot.lane.b32.xlu0 %v9145_v47, %s19332_s4  ;;  %v7772_v33 = vmul.f32 %v19507_v31, %v19506_v49 }
0x1444   : > { %v12067_v21 = vpop.f32.mrb[88].mxu0 }
0x1445   : > { %v9148_v27 = vmul.f32 %v12067_v21, %v17846_v26  ;;  %v9124_v44 = vpop.f32.mrb[89].mxu0 }
0x1446   : > { %v9147_v23 = vmul.f32 %v9124_v44, %v17842_v30 }
0x1447   : > { %9195 = vrot.lane.b32.xlu1 %v9148_v27, %s19332_s4 }
0x1448   : > { %9193 = vrot.lane.b32.xlu0 %v9147_v23, %s19332_s4 }
0x145d   : > { %v9168_v55 = vpop.permute.xlu1 %9167 }
0x145e   : > { %v9214_v32 = vsel %vm2564_vm3, %v7765_v43, %v9168_v55  ;;  %v9166_v15 = vpop.permute.xlu0 %9165  ;;  %v19508_v43 = vld [vmem:[#allocation99_spill] sm:$0xff]  ;;  %v19511_v55 = vld [vmem:[#allocation72_spill] sm:$0xff] }
0x145f   : > { %v9236_v26 = vadd.f32 %v17906_v50, %v9214_v32  ;;  %v9213_v30 = vsel %vm2564_vm3, %v7764_v28, %v9166_v15  ;;  %v7775_v37 = vmul.f32 %v19509_v5, %v19508_v43  ;;  %v19510_v28 = vld [vmem:[#allocation97_spill] sm:$0xff] }
0x1460   : > { %v9235_v59 = vadd.f32 %v17906_v50, %v9213_v30  ;;  %v7774_v32 = vmul.f32 %v19511_v55, %v19510_v28 }
0x1462   : > { %v9251_v8 = vpack.c.bf16 %v9236_v26, %v9235_v59 }
0x1464   : > { %12072 = vmatprep.mubr.msk.bf16.mxu1 %vm1630_vm2, %v9251_v8 }
0x1467   : > { %v9172_v9 = vpop.permute.xlu1 %9171 }
0x1468   : > { %v9216_v48 = vsel %vm2564_vm3, %v7767_v38, %v9172_v9  ;;  %v9170_v41 = vpop.permute.xlu0 %9169  ;;  %v19512_v38 = vld [vmem:[#allocation98_spill] sm:$0xff]  ;;  %v19515_v9 = vld [vmem:[#allocation28_spill] sm:$0xff] }
0x1469   : > { %v9238_v17 = vadd.f32 %v17906_v50, %v9216_v48  ;;  %v9215_v2 = vsel %vm2564_vm3, %v7766_v46, %v9170_v41  ;;  %v7777_v36 = vmul.f32 %v19513_v7, %v19512_v38  ;;  %v19514_v46 = vld [vmem:[#allocation96_spill] sm:$0xff] }
0x146a   : > { %v9237_v4 = vadd.f32 %v17906_v50, %v9215_v2  ;;  %v7776_v48 = vmul.f32 %v19515_v9, %v19514_v46 }
0x146c   : > { %v9252_v3 = vpack.c.bf16 %v9238_v17, %v9237_v4 }
0x146d   : > { %v9176_v52 = vpop.permute.xlu1 %9175 }
0x146e   : > { %v9218_v62 = vsel %vm2564_vm3, %v7769_v40, %v9176_v52  ;;  %12073 = vmatmul.mubr.msk.bf16.vlgmr.msra.gmra.mrb[64].mxu1 %vm1630_vm2, %v9252_v3  ;;  %v9174_v13 = vpop.permute.xlu0 %9173  ;;  %v19516_v3 = vld [vmem:[#allocation104_spill] sm:$0xff]  ;;  %v19519_v52 = vld [vmem:[#allocation30_spill] sm:$0xff] }
0x146f   : > { %v9240_v11 = vadd.f32 %v17906_v50, %v9218_v62  ;;  %v9217_v35 = vsel %vm2564_vm3, %v7768_v19, %v9174_v13  ;;  %v7779_v53 = vmul.f32 %v19517_v18, %v19516_v3  ;;  %v19518_v19 = vld [vmem:[#allocation100_spill] sm:$0xff]  ;;  %v19529_v3 = vld [vmem:[#allocation66_spill] sm:$0xff] }
0x1470   : > { %v9239_v20 = vadd.f32 %v17906_v50, %v9217_v35  ;;  %v7778_v62 = vmul.f32 %v19519_v52, %v19518_v19 }
0x1472   : > { %v9253_v39 = vpack.c.bf16 %v9240_v11, %v9239_v20 }
0x1474   : > { %12076 = vmatprep.mubr.msk.bf16.mxu1 %vm1630_vm2, %v9253_v39 }
0x1475   : > { %v9180_v0 = vpop.permute.xlu1 %9179 }
0x1476   : > { %v9220_v54 = vsel %vm2564_vm3, %v7771_v45, %v9180_v0  ;;  %v9178_v42 = vpop.permute.xlu0 %9177  ;;  %v17979_v45 = vld [vmem:[%s19282_s28 + $0x3] ss:$0 sm:$0xff] }
0x1477   : > { %v9242_v34 = vadd.f32 %v17906_v50, %v9220_v54  ;;  %v9219_v58 = vsel %vm2564_vm3, %v7770_v56, %v9178_v42 }
0x1478   : > { %v9241_v16 = vadd.f32 %v17906_v50, %v9219_v58 }
0x147a   : > { %v9254_v24 = vpack.c.bf16 %v9242_v34, %v9241_v16  ;;  %v19520_v34 = vld [vmem:[#allocation56_spill] sm:$0xff] }
0x147c   : > { %12077 = vmatmul.mubr.msk.bf16.gmra.mrb[68].mxu1 %vm1630_vm2, %v9254_v24  ;;  %v19521_v24 = vld [vmem:[#allocation58_spill] sm:$0xff] }
0x14a1   : > { %v9184_v47 = vpop.permute.xlu1 %9183 }
0x14a2   : > { %v9222_v21 = vsel %vm2564_vm3, %v7773_v63, %v9184_v47  ;;  %v9182_v27 = vpop.permute.xlu0 %9181 }
0x14a3   : > { %v9244_v44 = vadd.f32 %v17906_v50, %v9222_v21  ;;  %v9221_v23 = vsel %vm2564_vm3, %v7772_v33, %v9182_v27  ;;  %v19523_v33 = vld [vmem:[#allocation59_spill] sm:$0xff] }
0x14a4   : > { %v9243_v57 = vadd.f32 %v17906_v50, %v9221_v23 }
0x14a6   : > { %v9255_v60 = vpack.c.bf16 %v9244_v44, %v9243_v57 }
0x14a8   : > { %12080 = vmatprep.mubr.msk.bf16.mxu1 %vm1630_vm2, %v9255_v60 }
0x14a9   : > { %v9188_v15 = vpop.permute.xlu1 %9187 }
0x14aa   : > { %v9224_v26 = vsel %vm2564_vm3, %v7775_v37, %v9188_v15  ;;  %v9186_v30 = vpop.permute.xlu0 %9185  ;;  %v19524_v37 = vld [vmem:[#allocation60_spill] sm:$0xff]  ;;  %v19525_v15 = vld [vmem:[#allocation62_spill] sm:$0xff] }
0x14ab   : > { %v9246_v59 = vadd.f32 %v17906_v50, %v9224_v26  ;;  %v9223_v8 = vsel %vm2564_vm3, %v7774_v32, %v9186_v30  ;;  %v19526_v30 = vld [vmem:[#allocation61_spill] sm:$0xff] }
0x14ac   : > { %v9245_v25 = vadd.f32 %v17906_v50, %v9223_v8 }
0x14ae   : > { %v9256_v29 = vpack.c.bf16 %v9246_v59, %v9245_v25  ;;  %v19527_v25 = vld [vmem:[#allocation63_spill] sm:$0xff] }
0x14b0   : > { %12081 = vmatmul.mubr.msk.bf16.gmra.mrb[72].mxu1 %vm1630_vm2, %v9256_v29 }
0x14b1   : > { %v9192_v41 = vpop.permute.xlu1 %9191 }
0x14b2   : > { %v9226_v17 = vsel %vm2564_vm3, %v7777_v36, %v9192_v41  ;;  %v9190_v2 = vpop.permute.xlu0 %9189 }
0x14b3   : > { %v9248_v4 = vadd.f32 %v17906_v50, %v9226_v17  ;;  %v9225_v12 = vsel %vm2564_vm3, %v7776_v48, %v9190_v2 }
0x14b4   : > { %v9247_v6 = vadd.f32 %v17906_v50, %v9225_v12 }
0x14b6   : > { %v9257_v40 = vpack.c.bf16 %v9248_v4, %v9247_v6  ;;  %v19528_v4 = vld [vmem:[#allocation64_spill] sm:$0xff] }
0x14b8   : > { %12084 = vmatprep.mubr.msk.bf16.mxu1 %vm1630_vm2, %v9257_v40 }
0x14b9   : > { %v9196_v13 = vpop.permute.xlu1 %9195 }
0x14ba   : > { %v9228_v11 = vsel %vm2564_vm3, %v7779_v53, %v9196_v13  ;;  %v9194_v35 = vpop.permute.xlu0 %9193  ;;  %v19530_v53 = vld [vmem:[#allocation65_spill] sm:$0xff] }
0x14bb   : > { %v9250_v20 = vadd.f32 %v17906_v50, %v9228_v11  ;;  %v9227_v39 = vsel %vm2564_vm3, %v7778_v62, %v9194_v35  ;;  %v19531_v62 = vld [vmem:[#allocation67_spill] sm:$0xff] }
0x14bc   : > { %v9249_v61 = vadd.f32 %v17906_v50, %v9227_v39 }
0x14be   : > { %v9258_v10 = vpack.c.bf16 %v9250_v20, %v9249_v61 }
0x14c0   : > { %12085 = vmatmul.mubr.msk.bf16.gmra.mrb[76].mxu1 %vm1630_vm2, %v9258_v10 }
0x1541   : > { %v12074_v1 = vpop.f32.mrb[64].mxu1 }
0x1542   : > { %v9335_v22 = vpop.f32.mrb[65].mxu1  ;;  %v9344_v56 = vadd.f32 %v12074_v1, %v17979_v45 }
0x1543   : > { %v9336_v0 = vadd.f32 %v17979_v45, %v9335_v22  ;;  %v12075_v54 = vpop.f32.mrb[66].mxu1 }
0x1544   : > { %v9338_v42 = vpop.f32.mrb[67].mxu1  ;;  %v17988_v50 = vadd.f32 %v9344_v56, %v19521_v24  ;;  %v9347_v14 = vadd.f32 %v12075_v54, %v17979_v45 }
0x1545   : > { %v17984_v58 = vadd.f32 %v9336_v0, %v19520_v34  ;;  %v9339_v16 = vadd.f32 %v17979_v45, %v9338_v42  ;;  %v19532_v0 = vld [vmem:[#allocation68_spill] sm:$0xff] }
0x1546   : > { %v17999_v47 = vadd.f32 %v9347_v14, %v19523_v33  ;;  %v9424_v21 = vsel %vm1630_vm2, %v17988_v50, 0.0  ;;  %v19534_v14 = vld [vmem:[#allocation69_spill] sm:$0xff] }
0x1547   : > { %v17992_v63 = vadd.f32 %v9339_v16, %v19522_v51  ;;  %v9418_v49 = vsel %vm1630_vm2, %v17984_v58, 0.0  ;;  %v19533_v16 = vld [vmem:[#allocation70_spill] sm:$0xff] }
0x1548   : > { %9419 = vadd.xlane.f32.xlu0 %v9418_v49  ;;  %v9427_v44 = vsel %vm1630_vm2, %v17999_v47, 0.0 }
0x1549   : > { %v9421_v31 = vsel %vm1630_vm2, %v17992_v63, 0.0 }
0x154a   : > { %9422 = vadd.xlane.f32.xlu1 %v9421_v31  ;;  %v19535_v31 = vld [vmem:[#allocation71_spill] sm:$0xff] }
0x154c   : > { %9425 = vadd.xlane.f32.xlu0 %v9424_v21 }
0x154f   : > { %v12078_v27 = vpop.f32.mrb[68].mxu1 }
0x1550   : > { %9428 = vadd.xlane.f32.xlu0 %v9427_v44  ;;  %v9351_v23 = vpop.f32.mrb[69].mxu1  ;;  %v9360_v57 = vadd.f32 %v12078_v27, %v17979_v45 }
0x1551   : > { %v9352_v60 = vadd.f32 %v17979_v45, %v9351_v23  ;;  %v12079_v43 = vpop.f32.mrb[70].mxu1 }
0x1552   : > { %v9354_v5 = vpop.f32.mrb[71].mxu1  ;;  %v9363_v55 = vadd.f32 %v12079_v43, %v17979_v45  ;;  %v18013_v26 = vadd.f32 %v9360_v57, %v19525_v15 }
0x1553   : > { %v18008_v28 = vadd.f32 %v9352_v60, %v19524_v37  ;;  %v9355_v32 = vadd.f32 %v17979_v45, %v9354_v5 }
0x1554   : > { %v18021_v29 = vadd.f32 %v9363_v55, %v19527_v25  ;;  %v9436_v7 = vsel %vm1630_vm2, %v18013_v26, 0.0 }
0x1555   : > { %v18016_v59 = vadd.f32 %v9355_v32, %v19526_v30  ;;  %v9430_v8 = vsel %vm1630_vm2, %v18008_v28, 0.0 }
0x1556   : > { %9431 = vadd.xlane.f32.xlu1 %v9430_v8  ;;  %v9439_v36 = vsel %vm1630_vm2, %v18021_v29, 0.0 }
0x1557   : > { %v9433_v38 = vsel %vm1630_vm2, %v18016_v59, 0.0 }
0x1558   : > { %9434 = vadd.xlane.f32.xlu0 %v9433_v38 }
0x155a   : > { %9437 = vadd.xlane.f32.xlu1 %v9436_v7 }
0x155c   : > { %9440 = vadd.xlane.f32.xlu0 %v9439_v36 }
0x1583   : > { %v12082_v46 = vpop.f32.mrb[72].mxu1 }
0x1584   : > { %v9367_v9 = vpop.f32.mrb[73].mxu1  ;;  %v9376_v48 = vadd.f32 %v12082_v46, %v17979_v45 }
0x1585   : > { %v9368_v41 = vadd.f32 %v17979_v45, %v9367_v9  ;;  %v12083_v17 = vpop.f32.mrb[74].mxu1 }
0x1586   : > { %v9370_v2 = vpop.f32.mrb[75].mxu1  ;;  %v9379_v6 = vadd.f32 %v12083_v17, %v17979_v45  ;;  %v18037_v18 = vadd.f32 %v9376_v48, %v19529_v3 }
0x1587   : > { %v18032_v12 = vadd.f32 %v9368_v41, %v19528_v4  ;;  %v9371_v40 = vadd.f32 %v17979_v45, %v9370_v2 }
0x1588   : > { %v18045_v13 = vadd.f32 %v9379_v6, %v19531_v62  ;;  %v9448_v35 = vsel %vm1630_vm2, %v18037_v18, 0.0 }
0x1589   : > { %v18040_v19 = vadd.f32 %v9371_v40, %v19530_v53  ;;  %v9442_v52 = vsel %vm1630_vm2, %v18032_v12, 0.0 }
0x158a   : > { %9443 = vadd.xlane.f32.xlu1 %v9442_v52  ;;  %v9451_v20 = vsel %vm1630_vm2, %v18045_v13, 0.0 }
0x158b   : > { %v9445_v11 = vsel %vm1630_vm2, %v18040_v19, 0.0 }
0x158c   : > { %9446 = vadd.xlane.f32.xlu0 %v9445_v11 }
0x158e   : > { %9449 = vadd.xlane.f32.xlu1 %v9448_v35 }
0x1590   : > { %9452 = vadd.xlane.f32.xlu0 %v9451_v20 }
0x1593   : > { %v12086_v39 = vpop.f32.mrb[76].mxu1 }
0x1594   : > { %v9383_v61 = vpop.f32.mrb[77].mxu1  ;;  %v9392_v10 = vadd.f32 %v12086_v39, %v17979_v45 }
0x1595   : > { %v9384_v1 = vadd.f32 %v17979_v45, %v9383_v61  ;;  %v12087_v22 = vpop.f32.mrb[78].mxu1  ;;  %v12427_v61 = vld [vmem:[%s13692_s14] sm:$0xff]  }
0x1596   : > { %v9386_v56 = vpop.f32.mrb[79].mxu1  ;;  %v9395_v42 = vadd.f32 %v12087_v22, %v17979_v45  ;;  %v18061_v24 = vadd.f32 %v9392_v10, %v19533_v16  ;;  %12088 = vmatprep.subr.bf16.mxu0 %v12427_v61 }
0x1597   : > { %v18056_v54 = vadd.f32 %v9384_v1, %v19532_v0  ;;  %v9387_v34 = vadd.f32 %v17979_v45, %v9386_v56  ;;  %12089 = vmatpush3.bf16.msra.mxu0 %v12427_v61 }
0x1598   : > { %v18069_v33 = vadd.f32 %v9395_v42, %v19535_v31  ;;  %v9460_v45 = vsel %vm1630_vm2, %v18061_v24, 0.0 }
0x1599   : > { %v18064_v51 = vadd.f32 %v9387_v34, %v19534_v14  ;;  %v9454_v49 = vsel %vm1630_vm2, %v18056_v54, 0.0 }
0x159a   : > { %9455 = vadd.xlane.f32.xlu1 %v9454_v49  ;;  %v9463_v27 = vsel %vm1630_vm2, %v18069_v33, 0.0 }
0x159b   : > { %v9457_v21 = vsel %vm1630_vm2, %v18064_v51, 0.0 }
0x159c   : > { %9458 = vadd.xlane.f32.xlu0 %v9457_v21 }
0x159e   : > { %9461 = vadd.xlane.f32.xlu1 %v9460_v45 }
0x15a0   : > { %9464 = vadd.xlane.f32.xlu0 %v9463_v27 }
0x15d5   : > { %v9420_v44 = vpop.xlane.xlu0 %9419 }
0x15d6   : > { %v9466_v23 = vmul.f32 0.03125, %v9420_v44 }
0x15d7   : > { %v9423_v57 = vpop.xlane.xlu1 %9422 }
0x15d8   : > { %v18078_v60 = vsub.f32 %v17984_v58, %v9466_v23  ;;  %v9467_v43 = vmul.f32 0.03125, %v9423_v57 }
0x15d9   : > { %v9426_v5 = vpop.xlane.xlu0 %9425 }
0x15da   : > { %v18081_v37 = vsub.f32 %v17992_v63, %v9467_v43  ;;  %v9468_v55 = vmul.f32 0.03125, %v9426_v5  ;;  %v9498_v32 = vmul.f32 %v18078_v60, %v18078_v60 }
0x15dc   : > { %v18086_v15 = vsub.f32 %v17988_v50, %v9468_v55  ;;  %v9514_v30 = vsel %vm1630_vm2, %v9498_v32, 0.0  ;;  %v9499_v8 = vmul.f32 %v18081_v37, %v18081_v37 }
0x15dd   : > { %9515 = vadd.xlane.f32.xlu1 %v9514_v30  ;;  %v9429_v58 = vpop.xlane.xlu0 %9428 }
0x15de   : > { %v9469_v25 = vmul.f32 0.03125, %v9429_v58  ;;  %v9517_v38 = vsel %vm1630_vm2, %v9499_v8, 0.0  ;;  %v9500_v63 = vmul.f32 %v18086_v15, %v18086_v15 }
0x15df   : > { %9518 = vadd.xlane.f32.xlu0 %v9517_v38 }
0x15e0   : > { %v18095_v7 = vsub.f32 %v17999_v47, %v9469_v25  ;;  %v9520_v50 = vsel %vm1630_vm2, %v9500_v63, 0.0 }
0x15e1   : > { %9521 = vadd.xlane.f32.xlu1 %v9520_v50 }
0x15e2   : > { %v9501_v36 = vmul.f32 %v18095_v7, %v18095_v7 }
0x15e3   : > { %v9432_v46 = vpop.xlane.xlu1 %9431 }
0x15e4   : > { %v9470_v9 = vmul.f32 0.03125, %v9432_v46  ;;  %v9523_v48 = vsel %vm1630_vm2, %v9501_v36, 0.0 }
0x15e5   : > { %9524 = vadd.xlane.f32.xlu0 %v9523_v48  ;;  %v9435_v41 = vpop.xlane.xlu0 %9434 }
0x15e6   : > { %v18102_v17 = vsub.f32 %v18008_v28, %v9470_v9  ;;  %v9471_v2 = vmul.f32 0.03125, %v9435_v41 }
0x15e7   : > { %v9438_v4 = vpop.xlane.xlu1 %9437 }
0x15e8   : > { %v18105_v47 = vsub.f32 %v18016_v59, %v9471_v2  ;;  %v9472_v6 = vmul.f32 0.03125, %v9438_v4  ;;  %v9502_v40 = vmul.f32 %v18102_v17, %v18102_v17  ;;  %v12429_v2 = vld [vmem:[%s13697_s12] sm:$0xff]   ;;  %v12431_v4 = vld [vmem:[%s13697_s12 + $0x10] sm:$0xff]  }
0x15e9   : > { %v9441_v3 = vpop.xlane.xlu0 %9440  ;;  %12108 = vmatprep.subr.bf16.mxu1 %v12429_v2 }
0x15ea   : > { %v18110_v53 = vsub.f32 %v18013_v26, %v9472_v6  ;;  %v9473_v52 = vmul.f32 0.03125, %v9441_v3  ;;  %v9526_v62 = vsel %vm1630_vm2, %v9502_v40, 0.0  ;;  %v9503_v28 = vmul.f32 %v18105_v47, %v18105_v47  ;;  %12109 = vmatpush3.bf16.msra.mxu1 %v12429_v2  ;;  %v12432_v6 = vld [vmem:[%s13697_s12 + $0x18] sm:$0xff]   ;;  %v12433_v40 = vld [vmem:[%s13697_s12 + $0x20] sm:$0xff]  }
0x15eb   : > { %9527 = vadd.xlane.f32.xlu1 %v9526_v62 }
0x15ec   : > { %v18116_v59 = vsub.f32 %v18021_v29, %v9473_v52  ;;  %v9529_v11 = vsel %vm1630_vm2, %v9503_v28, 0.0  ;;  %v9504_v35 = vmul.f32 %v18110_v53, %v18110_v53  ;;  %v12428_v29 = vld [vmem:[%s13692_s14 + $0x8] sm:$0xff]  }
0x15ed   : > { %9530 = vadd.xlane.f32.xlu0 %v9529_v11  ;;  %12090 = vmatprep.subr.bf16.mxu0 %v12428_v29 }
0x15ee   : > { %v9532_v26 = vsel %vm1630_vm2, %v9504_v35, 0.0  ;;  %v9505_v20 = vmul.f32 %v18116_v59, %v18116_v59  ;;  %12091 = vmatpush3.bf16.msra.mxu0 %v12428_v29  ;;  %v12434_v35 = vld [vmem:[%s13697_s12 + $0x28] sm:$0xff]  }
0x15ef   : > { %9533 = vadd.xlane.f32.xlu1 %v9532_v26 }
0x15f0   : > { %v9535_v39 = vsel %vm1630_vm2, %v9505_v20, 0.0 }
0x15f1   : > { %9536 = vadd.xlane.f32.xlu0 %v9535_v39 }
0x1617   : > { %v9444_v10 = vpop.xlane.xlu1 %9443 }
0x1618   : > { %v9474_v1 = vmul.f32 0.03125, %v9444_v10 }
0x1619   : > { %v9447_v22 = vpop.xlane.xlu0 %9446 }
0x161a   : > { %v18128_v56 = vsub.f32 %v18032_v12, %v9474_v1  ;;  %v9475_v0 = vmul.f32 0.03125, %v9447_v22 }
0x161b   : > { %v9450_v42 = vpop.xlane.xlu1 %9449 }
0x161c   : > { %v18131_v34 = vsub.f32 %v18040_v19, %v9475_v0  ;;  %v9476_v16 = vmul.f32 0.03125, %v9450_v42  ;;  %v9506_v14 = vmul.f32 %v18128_v56, %v18128_v56  ;;  %v18182_v42 = vld [vmem:[%s13682_s8 + $0x1] ss:$0 sm:$0xff] }
0x161d   : > { %v9453_v49 = vpop.xlane.xlu0 %9452 }
0x161e   : > { %v18136_v31 = vsub.f32 %v18037_v18, %v9476_v16  ;;  %v9477_v21 = vmul.f32 0.03125, %v9453_v49  ;;  %v9538_v45 = vsel %vm1630_vm2, %v9506_v14, 0.0  ;;  %v9507_v12 = vmul.f32 %v18131_v34, %v18131_v34 }
0x161f   : > { %9539 = vadd.xlane.f32.xlu1 %v9538_v45 }
0x1620   : > { %v18142_v27 = vsub.f32 %v18045_v13, %v9477_v21  ;;  %v9541_v19 = vsel %vm1630_vm2, %v9507_v12, 0.0  ;;  %v9508_v44 = vmul.f32 %v18136_v31, %v18136_v31 }
0x1621   : > { %9542 = vadd.xlane.f32.xlu0 %v9541_v19 }
0x1622   : > { %v9544_v23 = vsel %vm1630_vm2, %v9508_v44, 0.0  ;;  %v9509_v18 = vmul.f32 %v18142_v27, %v18142_v27 }
0x1623   : > { %9545 = vadd.xlane.f32.xlu1 %v9544_v23 }
0x1624   : > { %v9547_v57 = vsel %vm1630_vm2, %v9509_v18, 0.0 }
0x1625   : > { %9548 = vadd.xlane.f32.xlu0 %v9547_v57  ;;  %v18188_v57 = vld [vmem:[%s13687_s18 + $0x1] ss:$0 sm:$0xff] }
0x1627   : > { %v9456_v43 = vpop.xlane.xlu1 %9455 }
0x1628   : > { %v9478_v5 = vmul.f32 0.03125, %v9456_v43 }
0x1629   : > { %v9459_v55 = vpop.xlane.xlu0 %9458 }
0x162a   : > { %v18152_v13 = vsub.f32 %v18056_v54, %v9478_v5  ;;  %v9479_v32 = vmul.f32 0.03125, %v9459_v55 }
0x162b   : > { %v9462_v30 = vpop.xlane.xlu1 %9461 }
0x162c   : > { %v18155_v8 = vsub.f32 %v18064_v51, %v9479_v32  ;;  %v9480_v58 = vmul.f32 0.03125, %v9462_v30  ;;  %v9510_v25 = vmul.f32 %v18152_v13, %v18152_v13 }
0x162d   : > { %v9465_v38 = vpop.xlane.xlu0 %9464 }
0x162e   : > { %v18160_v63 = vsub.f32 %v18061_v24, %v9480_v58  ;;  %v9481_v50 = vmul.f32 0.03125, %v9465_v38  ;;  %v9550_v36 = vsel %vm1630_vm2, %v9510_v25, 0.0  ;;  %v9511_v54 = vmul.f32 %v18155_v8, %v18155_v8 }
0x162f   : > { %9551 = vadd.xlane.f32.xlu1 %v9550_v36 }
0x1630   : > { %v18166_v51 = vsub.f32 %v18069_v33, %v9481_v50  ;;  %v9553_v46 = vsel %vm1630_vm2, %v9511_v54, 0.0  ;;  %v9512_v9 = vmul.f32 %v18160_v63, %v18160_v63  ;;  %v12430_v33 = vld [vmem:[%s13697_s12 + $0x8] sm:$0xff]  }
0x1631   : > { %9554 = vadd.xlane.f32.xlu0 %v9553_v46  ;;  %12110 = vmatprep.subr.bf16.mxu1 %v12430_v33 }
0x1632   : > { %v9556_v24 = vsel %vm1630_vm2, %v9512_v9, 0.0  ;;  %v9513_v48 = vmul.f32 %v18166_v51, %v18166_v51  ;;  %12111 = vmatpush3.bf16.msra.mxu1 %v12430_v33 }
0x1633   : > { %9557 = vadd.xlane.f32.xlu1 %v9556_v24  ;;  %12112 = vmatprep.subr.bf16.mxu1 %v12431_v4 }
0x1634   : > { %v9559_v41 = vsel %vm1630_vm2, %v9513_v48, 0.0 }
0x1635   : > { %9560 = vadd.xlane.f32.xlu0 %v9559_v41 }
0x1636   : > { %12113 = vmatpush3.bf16.msra.mxu1 %v12431_v4 }
0x1637   : > { %12114 = vmatprep.subr.bf16.mxu1 %v12432_v6 }
0x163a   : > { %12115 = vmatpush3.bf16.msra.mxu1 %v12432_v6 }
0x163b   : > { %12116 = vmatprep.subr.bf16.mxu1 %v12433_v40 }
0x163e   : > { %12117 = vmatpush3.bf16.msra.mxu1 %v12433_v40 }
0x163f   : > { %12118 = vmatprep.subr.bf16.mxu1 %v12434_v35 }
0x1642   : > { %12119 = vmatpush3.bf16.msra.mxu1 %v12434_v35 }
0x166a   : > { %v9516_v3 = vpop.xlane.xlu1 %9515 }
0x166b   : > { %v9562_v52 = vmul.f32 0.03125, %v9516_v3 }
0x166c   : > { %v9519_v62 = vpop.xlane.xlu0 %9518 }
0x166d   : > { %v9578_v28 = vadd.f32 1e-05, %v9562_v52  ;;  %v9563_v11 = vmul.f32 0.03125, %v9519_v62 }
0x166e   : > { %v9522_v26 = vpop.xlane.xlu1 %9521 }
0x166f   : > { %13109 = vrsqrt.f32 %v9578_v28  ;;  %v9579_v20 = vadd.f32 1e-05, %v9563_v11  ;;  %v9564_v39 = vmul.f32 0.03125, %v9522_v26 }
0x1671   : > { %13111 = vrsqrt.f32 %v9579_v20  ;;  %v9580_v61 = vadd.f32 1e-05, %v9564_v39 }
0x1672   : > { %v9525_v29 = vpop.xlane.xlu0 %9524 }
0x1673   : > { %13113 = vrsqrt.f32 %v9580_v61  ;;  %v9565_v10 = vmul.f32 0.03125, %v9525_v29 }
0x1675   : > { %v9581_v1 = vadd.f32 1e-05, %v9565_v10 }
0x1677   : > { %13115 = vrsqrt.f32 %v9581_v1 }
0x1678   : > { %v9528_v22 = vpop.xlane.xlu1 %9527 }
0x1679   : > { %v13110_v0 = vpop.eup %13109  ;;  %v9566_v16 = vmul.f32 0.03125, %v9528_v22 }
0x167a   : > { %v9610_v14 = vmul.f32 %v13110_v0, %v18078_v60  ;;  %v9531_v49 = vpop.xlane.xlu0 %9530 }
0x167b   : > { %v13112_v21 = vpop.eup %13111  ;;  %v9582_v45 = vadd.f32 1e-05, %v9566_v16  ;;  %v9567_v12 = vmul.f32 0.03125, %v9531_v49 }
0x167c   : > { %v9611_v19 = vmul.f32 %v13112_v21, %v18081_v37  ;;  %v9534_v44 = vpop.xlane.xlu1 %9533  ;;  %v9632_v23 = vmul.f32 %v18182_v42, %v9610_v14 }
0x167d   : > { %v13114_v18 = vpop.eup %13113  ;;  %13117 = vrsqrt.f32 %v9582_v45  ;;  %v9583_v43 = vadd.f32 1e-05, %v9567_v12  ;;  %v9568_v5 = vmul.f32 0.03125, %v9534_v44 }
0x167e   : > { %v9612_v55 = vmul.f32 %v13114_v18, %v18086_v15  ;;  %v9537_v32 = vpop.xlane.xlu0 %9536  ;;  %v9633_v60 = vmul.f32 %v18182_v42, %v9611_v19  ;;  %v18193_v25 = vadd.f32 %v18188_v57, %v9632_v23 }
0x167f   : > { %13119 = vrsqrt.f32 %v9583_v43  ;;  %v9584_v30 = vadd.f32 1e-05, %v9568_v5  ;;  %v9569_v58 = vmul.f32 0.03125, %v9537_v32 }
0x1680   : > { %v18196_v37 = vadd.f32 %v18188_v57, %v9633_v60  ;;  %v9634_v36 = vmul.f32 %v18182_v42, %v9612_v55 }
0x1681   : > { %v13116_v38 = vpop.eup %13115  ;;  %13121 = vrsqrt.f32 %v9584_v30  ;;  %v9585_v50 = vadd.f32 1e-05, %v9569_v58 }
0x1682   : > { %v9613_v54 = vmul.f32 %v13116_v38, %v18095_v7  ;;  %v9670_v15 = vpack.c.bf16 %v18196_v37, %v18193_v25  ;;  %v18205_v9 = vadd.f32 %v18188_v57, %v9634_v36 }
0x1683   : > { %13123 = vrsqrt.f32 %v9585_v50 }
0x1684   : > { %v9635_v46 = vmul.f32 %v18182_v42, %v9613_v54  ;;  %12092 = vmatprep.mubr.msk.bf16.mxu0 %vm1630_vm2, %v9670_v15 }
0x1686   : > { %v18208_v24 = vadd.f32 %v18188_v57, %v9635_v46 }
0x1687   : > { %v13118_v48 = vpop.eup %13117 }
0x1688   : > { %v9671_v41 = vpack.c.bf16 %v18208_v24, %v18205_v9  ;;  %v9614_v7 = vmul.f32 %v13118_v48, %v18102_v17 }
0x1689   : > { %v13120_v2 = vpop.eup %13119 }
0x168a   : > { %v9615_v33 = vmul.f32 %v13120_v2, %v18105_v47  ;;  %12093 = vmatmul.mubr.msk.bf16.vlgmr.msra.gmra.mrb[92].mxu0 %vm1630_vm2, %v9671_v41  ;;  %v9636_v4 = vmul.f32 %v18182_v42, %v9614_v7 }
0x168b   : > { %v13122_v6 = vpop.eup %13121 }
0x168c   : > { %v9616_v40 = vmul.f32 %v13122_v6, %v18110_v53  ;;  %v9637_v3 = vmul.f32 %v18182_v42, %v9615_v33  ;;  %v18221_v11 = vadd.f32 %v18188_v57, %v9636_v4 }
0x168d   : > { %v13124_v52 = vpop.eup %13123 }
0x168e   : > { %v9638_v62 = vmul.f32 %v18182_v42, %v9616_v40  ;;  %v9617_v28 = vmul.f32 %v13124_v52, %v18116_v59  ;;  %v18224_v17 = vadd.f32 %v18188_v57, %v9637_v3 }
0x1690   : > { %v9639_v47 = vmul.f32 %v18182_v42, %v9617_v28  ;;  %v9672_v35 = vpack.c.bf16 %v18224_v17, %v18221_v11  ;;  %v18230_v53 = vadd.f32 %v18188_v57, %v9638_v62 }
0x1692   : > { %v18233_v26 = vadd.f32 %v18188_v57, %v9639_v47  ;;  %12096 = vmatprep.mubr.msk.bf16.mxu0 %vm1630_vm2, %v9672_v35 }
0x1694   : > { %v9673_v59 = vpack.c.bf16 %v18233_v26, %v18230_v53 }
0x1696   : > { %12097 = vmatmul.mubr.msk.bf16.gmra.mrb[96].mxu0 %vm1630_vm2, %v9673_v59 }
0x16ac   : > { %v9540_v20 = vpop.xlane.xlu1 %9539 }
0x16ad   : > { %v9570_v39 = vmul.f32 0.03125, %v9540_v20 }
0x16ae   : > { %v9543_v61 = vpop.xlane.xlu0 %9542 }
0x16af   : > { %v9586_v29 = vadd.f32 1e-05, %v9570_v39  ;;  %v9571_v10 = vmul.f32 0.03125, %v9543_v61 }
0x16b0   : > { %v9546_v1 = vpop.xlane.xlu1 %9545 }
0x16b1   : > { %13125 = vrsqrt.f32 %v9586_v29  ;;  %v9587_v22 = vadd.f32 1e-05, %v9571_v10  ;;  %v9572_v0 = vmul.f32 0.03125, %v9546_v1 }
0x16b2   : > { %v9549_v16 = vpop.xlane.xlu0 %9548 }
0x16b3   : > { %13127 = vrsqrt.f32 %v9587_v22  ;;  %v9588_v14 = vadd.f32 1e-05, %v9572_v0  ;;  %v9573_v49 = vmul.f32 0.03125, %v9549_v16  ;;  %v12435_v22 = vld [vmem:[%s13697_s12 + $0x30] sm:$0xff]   ;;  %v12436_v0 = vld [vmem:[%s13697_s12 + $0x38] sm:$0xff]  }
0x16b4   : > { %12120 = vmatprep.subr.bf16.mxu1 %v12435_v22 }
0x16b5   : > { %13129 = vrsqrt.f32 %v9588_v14  ;;  %v9589_v21 = vadd.f32 1e-05, %v9573_v49  ;;  %12121 = vmatpush3.bf16.msra.mxu1 %v12435_v22 }
0x16b6   : > { %12122 = vmatprep.subr.bf16.mxu1 %v12436_v0 }
0x16b7   : > { %13131 = vrsqrt.f32 %v9589_v21 }
0x16b9   : > { %12123 = vmatpush3.bf16.msra.mxu1 %v12436_v0 }
0x16bb   : > { %v13126_v45 = vpop.eup %13125 }
0x16bc   : > { %v9618_v12 = vmul.f32 %v13126_v45, %v18128_v56  ;;  %v9552_v19 = vpop.xlane.xlu1 %9551 }
0x16bd   : > { %v13128_v44 = vpop.eup %13127  ;;  %v9574_v23 = vmul.f32 0.03125, %v9552_v19 }
0x16be   : > { %v9619_v18 = vmul.f32 %v13128_v44, %v18131_v34  ;;  %v9555_v43 = vpop.xlane.xlu0 %9554  ;;  %v9640_v5 = vmul.f32 %v18182_v42, %v9618_v12 }
0x16bf   : > { %v13130_v55 = vpop.eup %13129  ;;  %v9590_v32 = vadd.f32 1e-05, %v9574_v23  ;;  %v9575_v60 = vmul.f32 0.03125, %v9555_v43 }
0x16c0   : > { %v9620_v30 = vmul.f32 %v13130_v55, %v18136_v31  ;;  %v9558_v58 = vpop.xlane.xlu1 %9557  ;;  %v9641_v38 = vmul.f32 %v18182_v42, %v9619_v18  ;;  %v18247_v46 = vadd.f32 %v18188_v57, %v9640_v5 }
0x16c1   : > { %v13132_v50 = vpop.eup %13131  ;;  %13133 = vrsqrt.f32 %v9590_v32  ;;  %v9591_v36 = vadd.f32 1e-05, %v9575_v60  ;;  %v9576_v56 = vmul.f32 0.03125, %v9558_v58 }
0x16c2   : > { %v9642_v54 = vmul.f32 %v18182_v42, %v9620_v30  ;;  %v9621_v15 = vmul.f32 %v13132_v50, %v18142_v27  ;;  %v9561_v34 = vpop.xlane.xlu0 %9560  ;;  %v18250_v48 = vadd.f32 %v18188_v57, %v9641_v38 }
0x16c3   : > { %13135 = vrsqrt.f32 %v9591_v36  ;;  %v9592_v31 = vadd.f32 1e-05, %v9576_v56  ;;  %v9577_v41 = vmul.f32 0.03125, %v9561_v34 }
0x16c4   : > { %v9643_v7 = vmul.f32 %v18182_v42, %v9621_v15  ;;  %v9674_v2 = vpack.c.bf16 %v18250_v48, %v18247_v46  ;;  %v18256_v4 = vadd.f32 %v18188_v57, %v9642_v54 }
0x16c5   : > { %13137 = vrsqrt.f32 %v9592_v31  ;;  %v9593_v33 = vadd.f32 1e-05, %v9577_v41 }
0x16c6   : > { %v18259_v27 = vadd.f32 %v18188_v57, %v9643_v7  ;;  %12100 = vmatprep.mubr.msk.bf16.mxu0 %vm1630_vm2, %v9674_v2 }
0x16c7   : > { %13139 = vrsqrt.f32 %v9593_v33 }
0x16c8   : > { %v9675_v6 = vpack.c.bf16 %v18259_v27, %v18256_v4 }
0x16ca   : > { %12101 = vmatmul.mubr.msk.bf16.gmra.mrb[100].mxu0 %vm1630_vm2, %v9675_v6 }
0x16cb   : > { %v13134_v40 = vpop.eup %13133 }
0x16cc   : > { %v9622_v3 = vmul.f32 %v13134_v40, %v18152_v13 }
0x16cd   : > { %v13136_v52 = vpop.eup %13135 }
0x16ce   : > { %v9623_v62 = vmul.f32 %v13136_v52, %v18155_v8  ;;  %v9644_v28 = vmul.f32 %v18182_v42, %v9622_v3 }
0x16cf   : > { %v13138_v47 = vpop.eup %13137 }
0x16d0   : > { %v9624_v35 = vmul.f32 %v13138_v47, %v18160_v63  ;;  %v9645_v59 = vmul.f32 %v18182_v42, %v9623_v62  ;;  %v18273_v13 = vadd.f32 %v18188_v57, %v9644_v28 }
0x16d1   : > { %v13140_v20 = vpop.eup %13139 }
0x16d2   : > { %v9646_v39 = vmul.f32 %v18182_v42, %v9624_v35  ;;  %v9625_v61 = vmul.f32 %v13140_v20, %v18166_v51  ;;  %v18276_v8 = vadd.f32 %v18188_v57, %v9645_v59 }
0x16d4   : > { %v9647_v29 = vmul.f32 %v18182_v42, %v9625_v61  ;;  %v9676_v10 = vpack.c.bf16 %v18276_v8, %v18273_v13  ;;  %v18282_v63 = vadd.f32 %v18188_v57, %v9646_v39  ;;  %v11056_v42 = vld [vmem:[%s19536_s9] ss:$0 sm:$0xff] }
0x16d6   : > { %v18285_v1 = vadd.f32 %v18188_v57, %v9647_v29  ;;  %12104 = vmatprep.mubr.msk.bf16.mxu0 %vm1630_vm2, %v9676_v10 }
0x16d8   : > { %v9677_v51 = vpack.c.bf16 %v18285_v1, %v18282_v63 }
0x16da   : > { %12105 = vmatmul.mubr.msk.bf16.gmra.mrb[104].mxu0 %vm1630_vm2, %v9677_v51 }
0x175d   : > { %v12094_v57 = vpop.f32.mrb[92].mxu0 }
0x175e   : > { %v9768_v16 = vadd.f32 %v12094_v57, %v11056_v42  ;;  %v9759_v14 = vpop.f32.mrb[93].mxu0 }
0x175f   : > { %v9760_v49 = vadd.f32 %v11056_v42, %v9759_v14  ;;  %v12095_v21 = vpop.f32.mrb[94].mxu0 }
0x1760   : > { %v9771_v45 = vadd.f32 %v12095_v21, %v11056_v42  ;;  %v9762_v12 = vpop.f32.mrb[95].mxu0  ;;  %v9824_v44 = vmax.f32 %v9768_v16, 0.0 }
0x1761   : > { %v9763_v19 = vadd.f32 %v11056_v42, %v9762_v12  ;;  %v9822_v18 = vmax.f32 %v9760_v49, 0.0 }
0x1762   : > { %v9825_v23 = vmax.f32 %v9771_v45, 0.0 }
0x1763   : > { %v9823_v43 = vmax.f32 %v9763_v19, 0.0 }
0x1764   : > { %v9839_v5 = vpack.c.bf16 %v9825_v23, %v9824_v44  ;;  %v18303_v23 = vld [vmem:[%s19537_s15] ss:$0 sm:$0xff] }
0x1765   : > { %v9838_v55 = vpack.c.bf16 %v9823_v43, %v9822_v18 }
0x1767   : > { %12124 = vmatprep.mubr.bf16.mxu1 %v9838_v55 }
0x1768   : > { %12125 = vmatmul.mubr.bf16.vlgmr.msra.gmra.mrb[80].mxu1 %v9839_v5 }
0x1769   : > { %v12098_v32 = vpop.f32.mrb[96].mxu0 }
0x176a   : > { %v9784_v60 = vadd.f32 %v12098_v32, %v11056_v42  ;;  %v9775_v30 = vpop.f32.mrb[97].mxu0 }
0x176b   : > { %v9776_v58 = vadd.f32 %v11056_v42, %v9775_v30  ;;  %v12099_v38 = vpop.f32.mrb[98].mxu0 }
0x176c   : > { %v9787_v50 = vadd.f32 %v12099_v38, %v11056_v42  ;;  %v9778_v36 = vpop.f32.mrb[99].mxu0  ;;  %v9828_v54 = vmax.f32 %v9784_v60, 0.0 }
0x176d   : > { %v9779_v56 = vadd.f32 %v11056_v42, %v9778_v36  ;;  %v9826_v34 = vmax.f32 %v9776_v58, 0.0 }
0x176e   : > { %v9829_v15 = vmax.f32 %v9787_v50, 0.0 }
0x176f   : > { %v9827_v31 = vmax.f32 %v9779_v56, 0.0 }
0x1770   : > { %v9841_v41 = vpack.c.bf16 %v9829_v15, %v9828_v54 }
0x1771   : > { %v9840_v7 = vpack.c.bf16 %v9827_v31, %v9826_v34 }
0x1773   : > { %12128 = vmatprep.mubr.bf16.mxu1 %v9840_v7 }
0x1774   : > { %12129 = vmatmul.mubr.bf16.gmra.mrb[84].mxu1 %v9841_v41 }
0x179d   : > { %v12102_v2 = vpop.f32.mrb[100].mxu0 }
0x179e   : > { %v9800_v33 = vadd.f32 %v12102_v2, %v11056_v42  ;;  %v9791_v6 = vpop.f32.mrb[101].mxu0 }
0x179f   : > { %v9792_v40 = vadd.f32 %v11056_v42, %v9791_v6  ;;  %v12103_v3 = vpop.f32.mrb[102].mxu0 }
0x17a0   : > { %v9803_v52 = vadd.f32 %v12103_v3, %v11056_v42  ;;  %v9794_v62 = vpop.f32.mrb[103].mxu0  ;;  %v9832_v47 = vmax.f32 %v9800_v33, 0.0 }
0x17a1   : > { %v9795_v28 = vadd.f32 %v11056_v42, %v9794_v62  ;;  %v9830_v59 = vmax.f32 %v9792_v40, 0.0 }
0x17a2   : > { %v9833_v35 = vmax.f32 %v9803_v52, 0.0 }
0x17a3   : > { %v9831_v20 = vmax.f32 %v9795_v28, 0.0 }
0x17a4   : > { %v9843_v39 = vpack.c.bf16 %v9833_v35, %v9832_v47 }
0x17a5   : > { %v9842_v61 = vpack.c.bf16 %v9831_v20, %v9830_v59 }
0x17a7   : > { %12132 = vmatprep.mubr.bf16.mxu1 %v9842_v61 }
0x17a8   : > { %12133 = vmatmul.mubr.bf16.gmra.mrb[88].mxu1 %v9843_v39 }
0x17ad   : > { %v12106_v29 = vpop.f32.mrb[104].mxu0 }
0x17ae   : > { %v9816_v10 = vadd.f32 %v12106_v29, %v11056_v42  ;;  %v9807_v51 = vpop.f32.mrb[105].mxu0 }
0x17af   : > { %v9808_v22 = vadd.f32 %v11056_v42, %v9807_v51  ;;  %v12107_v0 = vpop.f32.mrb[106].mxu0 }
0x17b0   : > { %v9819_v57 = vadd.f32 %v12107_v0, %v11056_v42  ;;  %v9810_v16 = vpop.f32.mrb[107].mxu0  ;;  %v9836_v49 = vmax.f32 %v9816_v10, 0.0 }
0x17b1   : > { %v9811_v14 = vadd.f32 %v11056_v42, %v9810_v16  ;;  %v9834_v45 = vmax.f32 %v9808_v22, 0.0 }
0x17b2   : > { %v9837_v21 = vmax.f32 %v9819_v57, 0.0 }
0x17b3   : > { %v9835_v12 = vmax.f32 %v9811_v14, 0.0 }
0x17b4   : > { %v9845_v19 = vpack.c.bf16 %v9837_v21, %v9836_v49 }
0x17b5   : > { %v9844_v44 = vpack.c.bf16 %v9835_v12, %v9834_v45 }
0x17b7   : > { %12136 = vmatprep.mubr.bf16.mxu1 %v9844_v44 }
0x17b8   : > { %12137 = vmatmul.mubr.bf16.gmra.mrb[92].mxu1 %v9845_v19 }
0x183b   : > { %v12126_v18 = vpop.f32.mrb[80].mxu1 }
0x183c   : > { %v9960_v43 = vadd.f32 %v12126_v18, %v18303_v23  ;;  %v9951_v5 = vpop.f32.mrb[81].mxu1 }
0x183d   : > { %v9952_v42 = vadd.f32 %v18303_v23, %v9951_v5  ;;  %v12127_v55 = vpop.f32.mrb[82].mxu1 }
0x183e   : > { %v18308_v32 = vadd.f32 %v9960_v43, %v18205_v9  ;;  %v9963_v60 = vadd.f32 %v12127_v55, %v18303_v23  ;;  %v9954_v30 = vpop.f32.mrb[83].mxu1 }
0x183f   : > { %v9955_v58 = vadd.f32 %v18303_v23, %v9954_v30  ;;  %v18313_v38 = vadd.f32 %v9952_v42, %v18193_v25 }
0x1840   : > { %v18316_v50 = vadd.f32 %v9963_v60, %v18208_v24  ;;  %v10040_v36 = vsel %vm1630_vm2, %v18308_v32, 0.0 }
0x1841   : > { %10041 = vadd.xlane.f32.xlu1 %v10040_v36  ;;  %v18321_v56 = vadd.f32 %v9955_v58, %v18196_v37  ;;  %v10034_v54 = vsel %vm1630_vm2, %v18313_v38, 0.0 }
0x1842   : > { %v10043_v9 = vsel %vm1630_vm2, %v18316_v50, 0.0 }
0x1843   : > { %10044 = vadd.xlane.f32.xlu0 %v10043_v9  ;;  %v10037_v25 = vsel %vm1630_vm2, %v18321_v56, 0.0 }
0x1845   : > { %10035 = vadd.xlane.f32.xlu1 %v10034_v54 }
0x1847   : > { %10038 = vadd.xlane.f32.xlu0 %v10037_v25  ;;  %v12130_v24 = vpop.f32.mrb[84].mxu1 }
0x1848   : > { %v9976_v15 = vadd.f32 %v12130_v24, %v18303_v23  ;;  %v9967_v34 = vpop.f32.mrb[85].mxu1 }
0x1849   : > { %v9968_v31 = vadd.f32 %v18303_v23, %v9967_v34  ;;  %v12131_v37 = vpop.f32.mrb[86].mxu1 }
0x184a   : > { %v18332_v41 = vadd.f32 %v9976_v15, %v18230_v53  ;;  %v9979_v7 = vadd.f32 %v12131_v37, %v18303_v23  ;;  %v9970_v2 = vpop.f32.mrb[87].mxu1 }
0x184b   : > { %v9971_v33 = vadd.f32 %v18303_v23, %v9970_v2  ;;  %v18337_v6 = vadd.f32 %v9968_v31, %v18221_v11 }
0x184c   : > { %v18340_v40 = vadd.f32 %v9979_v7, %v18233_v26  ;;  %v10052_v3 = vsel %vm1630_vm2, %v18332_v41, 0.0 }
0x184d   : > { %10053 = vadd.xlane.f32.xlu1 %v10052_v3  ;;  %v18345_v52 = vadd.f32 %v9971_v33, %v18224_v17  ;;  %v10046_v62 = vsel %vm1630_vm2, %v18337_v6, 0.0 }
0x184e   : > { %v10055_v53 = vsel %vm1630_vm2, %v18340_v40, 0.0 }
0x184f   : > { %10056 = vadd.xlane.f32.xlu0 %v10055_v53  ;;  %v10049_v11 = vsel %vm1630_vm2, %v18345_v52, 0.0 }
0x1851   : > { %10047 = vadd.xlane.f32.xlu1 %v10046_v62 }
0x1853   : > { %10050 = vadd.xlane.f32.xlu0 %v10049_v11 }
0x187b   : > { %v12134_v26 = vpop.f32.mrb[88].mxu1 }
0x187c   : > { %v9992_v28 = vadd.f32 %v12134_v26, %v18303_v23  ;;  %v9983_v47 = vpop.f32.mrb[89].mxu1 }
0x187d   : > { %v9984_v35 = vadd.f32 %v18303_v23, %v9983_v47  ;;  %v12135_v17 = vpop.f32.mrb[90].mxu1 }
0x187e   : > { %v18356_v59 = vadd.f32 %v9992_v28, %v18256_v4  ;;  %v9995_v20 = vadd.f32 %v12135_v17, %v18303_v23  ;;  %v9986_v39 = vpop.f32.mrb[91].mxu1 }
0x187f   : > { %v9987_v61 = vadd.f32 %v18303_v23, %v9986_v39  ;;  %v18361_v29 = vadd.f32 %v9984_v35, %v18247_v46 }
0x1880   : > { %v18364_v10 = vadd.f32 %v9995_v20, %v18259_v27  ;;  %v10064_v51 = vsel %vm1630_vm2, %v18356_v59, 0.0 }
0x1881   : > { %10065 = vadd.xlane.f32.xlu1 %v10064_v51  ;;  %v18369_v22 = vadd.f32 %v9987_v61, %v18250_v48  ;;  %v10058_v0 = vsel %vm1630_vm2, %v18361_v29, 0.0 }
0x1882   : > { %v10067_v4 = vsel %vm1630_vm2, %v18364_v10, 0.0 }
0x1883   : > { %10068 = vadd.xlane.f32.xlu0 %v10067_v4  ;;  %v10061_v46 = vsel %vm1630_vm2, %v18369_v22, 0.0 }
0x1885   : > { %10059 = vadd.xlane.f32.xlu1 %v10058_v0 }
0x1887   : > { %10062 = vadd.xlane.f32.xlu0 %v10061_v46 }
0x188b   : > { %v12138_v27 = vpop.f32.mrb[92].mxu1 }
0x188c   : > { %v9999_v57 = vpop.f32.mrb[93].mxu1  ;;  %v10008_v16 = vadd.f32 %v12138_v27, %v18303_v23 }
0x188d   : > { %v10000_v14 = vadd.f32 %v18303_v23, %v9999_v57  ;;  %v12139_v48 = vpop.f32.mrb[94].mxu1 }
0x188e   : > { %v10002_v49 = vpop.f32.mrb[95].mxu1  ;;  %v10011_v45 = vadd.f32 %v12139_v48, %v18303_v23  ;;  %v18385_v19 = vadd.f32 %v10008_v16, %v18282_v63 }
0x188f   : > { %v18380_v21 = vadd.f32 %v10000_v14, %v18273_v13  ;;  %v10003_v12 = vadd.f32 %v18303_v23, %v10002_v49 }
0x1890   : > { %v18393_v43 = vadd.f32 %v10011_v45, %v18285_v1  ;;  %v10076_v23 = vsel %vm1630_vm2, %v18385_v19, 0.0 }
0x1891   : > { %v18388_v44 = vadd.f32 %v10003_v12, %v18276_v8  ;;  %v10070_v18 = vsel %vm1630_vm2, %v18380_v21, 0.0 }
0x1892   : > { %10071 = vadd.xlane.f32.xlu1 %v10070_v18  ;;  %v10079_v63 = vsel %vm1630_vm2, %v18393_v43, 0.0 }
0x1893   : > { %v10073_v13 = vsel %vm1630_vm2, %v18388_v44, 0.0 }
0x1894   : > { %10074 = vadd.xlane.f32.xlu0 %v10073_v13 }
0x1896   : > { %10077 = vadd.xlane.f32.xlu1 %v10076_v23 }
0x1898   : > { %10080 = vadd.xlane.f32.xlu0 %v10079_v63 }
0x18ce   : > { %v10042_v8 = vpop.xlane.xlu1 %10041 }
0x18cf   : > { %v10084_v5 = vmul.f32 0.03125, %v10042_v8 }
0x18d0   : > { %v10045_v42 = vpop.xlane.xlu0 %10044 }
0x18d1   : > { %v18402_v55 = vsub.f32 %v18308_v32, %v10084_v5  ;;  %v10085_v1 = vmul.f32 0.03125, %v10045_v42 }
0x18d2   : > { %v10036_v60 = vpop.xlane.xlu1 %10035 }
0x18d3   : > { %v18405_v30 = vsub.f32 %v18316_v50, %v10085_v1  ;;  %v10082_v58 = vmul.f32 0.03125, %v10036_v60  ;;  %v10116_v36 = vmul.f32 %v18402_v55, %v18402_v55 }
0x18d4   : > { %v10039_v9 = vpop.xlane.xlu0 %10038 }
0x18d5   : > { %v18410_v54 = vsub.f32 %v18313_v38, %v10082_v58  ;;  %v10083_v25 = vmul.f32 0.03125, %v10039_v9  ;;  %v10136_v24 = vsel %vm1630_vm2, %v10116_v36, 0.0  ;;  %v10117_v32 = vmul.f32 %v18405_v30, %v18405_v30 }
0x18d6   : > { %10137 = vadd.xlane.f32.xlu1 %v10136_v24 }
0x18d7   : > { %v18416_v15 = vsub.f32 %v18321_v56, %v10083_v25  ;;  %v10139_v50 = vsel %vm1630_vm2, %v10117_v32, 0.0  ;;  %v10114_v34 = vmul.f32 %v18410_v54, %v18410_v54 }
0x18d8   : > { %10140 = vadd.xlane.f32.xlu0 %v10139_v50 }
0x18d9   : > { %v10130_v31 = vsel %vm1630_vm2, %v10114_v34, 0.0  ;;  %v10115_v38 = vmul.f32 %v18416_v15, %v18416_v15 }
0x18da   : > { %v10054_v37 = vpop.xlane.xlu1 %10053  ;;  %10131 = vadd.xlane.f32.xlu1 %v10130_v31 }
0x18db   : > { %v10088_v7 = vmul.f32 0.03125, %v10054_v37  ;;  %v10133_v2 = vsel %vm1630_vm2, %v10115_v38, 0.0 }
0x18dc   : > { %10134 = vadd.xlane.f32.xlu0 %v10133_v2  ;;  %v10057_v33 = vpop.xlane.xlu0 %10056 }
0x18dd   : > { %v18426_v56 = vsub.f32 %v18332_v41, %v10088_v7  ;;  %v10089_v3 = vmul.f32 0.03125, %v10057_v33 }
0x18de   : > { %v10048_v53 = vpop.xlane.xlu1 %10047 }
0x18df   : > { %v18429_v62 = vsub.f32 %v18340_v40, %v10089_v3  ;;  %v10086_v11 = vmul.f32 0.03125, %v10048_v53  ;;  %v10120_v26 = vmul.f32 %v18426_v56, %v18426_v56 }
0x18e0   : > { %v10051_v28 = vpop.xlane.xlu0 %10050 }
0x18e1   : > { %v18434_v47 = vsub.f32 %v18337_v6, %v10086_v11  ;;  %v10087_v35 = vmul.f32 0.03125, %v10051_v28  ;;  %v10148_v17 = vsel %vm1630_vm2, %v10120_v26, 0.0  ;;  %v10121_v41 = vmul.f32 %v18429_v62, %v18429_v62 }
0x18e2   : > { %10149 = vadd.xlane.f32.xlu1 %v10148_v17 }
0x18e3   : > { %v18440_v20 = vsub.f32 %v18345_v52, %v10087_v35  ;;  %v10151_v40 = vsel %vm1630_vm2, %v10121_v41, 0.0  ;;  %v10118_v39 = vmul.f32 %v18434_v47, %v18434_v47 }
0x18e4   : > { %10152 = vadd.xlane.f32.xlu0 %v10151_v40 }
0x18e5   : > { %v10142_v61 = vsel %vm1630_vm2, %v10118_v39, 0.0  ;;  %v10119_v6 = vmul.f32 %v18440_v20, %v18440_v20 }
0x18e6   : > { %10143 = vadd.xlane.f32.xlu1 %v10142_v61 }
0x18e7   : > { %v10145_v51 = vsel %vm1630_vm2, %v10119_v6, 0.0 }
0x18e8   : > { %10146 = vadd.xlane.f32.xlu0 %v10145_v51 }
0x190e   : > { %v10066_v4 = vpop.xlane.xlu1 %10065 }
0x190f   : > { %v10092_v0 = vmul.f32 0.03125, %v10066_v4  ;;  %v18498_v4 = vld [vmem:[%s13682_s8 + $0x2] ss:$0 sm:$0xff] }
0x1910   : > { %v10069_v46 = vpop.xlane.xlu0 %10068 }
0x1911   : > { %v18450_v52 = vsub.f32 %v18356_v59, %v10092_v0  ;;  %v10093_v27 = vmul.f32 0.03125, %v10069_v46 }
0x1912   : > { %v10060_v57 = vpop.xlane.xlu1 %10059 }
0x1913   : > { %v18453_v16 = vsub.f32 %v18364_v10, %v10093_v27  ;;  %v10090_v14 = vmul.f32 0.03125, %v10060_v57  ;;  %v10124_v48 = vmul.f32 %v18450_v52, %v18450_v52 }
0x1914   : > { %v10063_v49 = vpop.xlane.xlu0 %10062 }
0x1915   : > { %v18458_v45 = vsub.f32 %v18361_v29, %v10090_v14  ;;  %v10091_v12 = vmul.f32 0.03125, %v10063_v49  ;;  %v10160_v18 = vsel %vm1630_vm2, %v10124_v48, 0.0  ;;  %v10125_v59 = vmul.f32 %v18453_v16, %v18453_v16  ;;  %v18502_v48 = vld [vmem:[%s13687_s18 + $0x2] ss:$0 sm:$0xff] }
0x1916   : > { %10161 = vadd.xlane.f32.xlu1 %v10160_v18 }
0x1917   : > { %v18464_v13 = vsub.f32 %v18369_v22, %v10091_v12  ;;  %v10163_v10 = vsel %vm1630_vm2, %v10125_v59, 0.0  ;;  %v10122_v23 = vmul.f32 %v18458_v45, %v18458_v45 }
0x1918   : > { %10164 = vadd.xlane.f32.xlu0 %v10163_v10 }
0x1919   : > { %v10154_v63 = vsel %vm1630_vm2, %v10122_v23, 0.0  ;;  %v10123_v29 = vmul.f32 %v18464_v13, %v18464_v13 }
0x191a   : > { %10155 = vadd.xlane.f32.xlu1 %v10154_v63 }
0x191b   : > { %v10157_v8 = vsel %vm1630_vm2, %v10123_v29, 0.0 }
0x191c   : > { %10158 = vadd.xlane.f32.xlu0 %v10157_v8 }
0x191f   : > { %v10072_v5 = vpop.xlane.xlu1 %10071 }
0x1920   : > { %v10094_v42 = vmul.f32 0.03125, %v10072_v5 }
0x1921   : > { %v10075_v1 = vpop.xlane.xlu0 %10074 }
0x1922   : > { %v18474_v22 = vsub.f32 %v18380_v21, %v10094_v42  ;;  %v10095_v60 = vmul.f32 0.03125, %v10075_v1 }
0x1923   : > { %v10078_v58 = vpop.xlane.xlu1 %10077 }
0x1924   : > { %v18477_v36 = vsub.f32 %v18388_v44, %v10095_v60  ;;  %v10096_v9 = vmul.f32 0.03125, %v10078_v58  ;;  %v10126_v25 = vmul.f32 %v18474_v22, %v18474_v22 }
0x1925   : > { %v10081_v24 = vpop.xlane.xlu0 %10080 }
0x1926   : > { %v18482_v32 = vsub.f32 %v18385_v19, %v10096_v9  ;;  %v10097_v50 = vmul.f32 0.03125, %v10081_v24  ;;  %v10166_v34 = vsel %vm1630_vm2, %v10126_v25, 0.0  ;;  %v10127_v21 = vmul.f32 %v18477_v36, %v18477_v36 }
0x1927   : > { %10167 = vadd.xlane.f32.xlu1 %v10166_v34 }
0x1928   : > { %v18488_v31 = vsub.f32 %v18393_v43, %v10097_v50  ;;  %v10169_v44 = vsel %vm1630_vm2, %v10127_v21, 0.0  ;;  %v10128_v38 = vmul.f32 %v18482_v32, %v18482_v32 }
0x1929   : > { %10170 = vadd.xlane.f32.xlu0 %v10169_v44 }
0x192a   : > { %v10172_v37 = vsel %vm1630_vm2, %v10128_v38, 0.0  ;;  %v10129_v19 = vmul.f32 %v18488_v31, %v18488_v31 }
0x192b   : > { %10173 = vadd.xlane.f32.xlu1 %v10172_v37 }
0x192c   : > { %v10175_v7 = vsel %vm1630_vm2, %v10129_v19, 0.0 }
0x192d   : > { %10176 = vadd.xlane.f32.xlu0 %v10175_v7 }
0x1963   : > { %v10138_v2 = vpop.xlane.xlu1 %10137 }
0x1964   : > { %v10180_v33 = vmul.f32 0.03125, %v10138_v2 }
0x1965   : > { %v10141_v3 = vpop.xlane.xlu0 %10140 }
0x1966   : > { %v10196_v43 = vadd.f32 1e-05, %v10180_v33  ;;  %v10181_v53 = vmul.f32 0.03125, %v10141_v3 }
0x1967   : > { %v10132_v11 = vpop.xlane.xlu1 %10131 }
0x1968   : > { %13141 = vrsqrt.f32 %v10196_v43  ;;  %v10197_v26 = vadd.f32 1e-05, %v10181_v53  ;;  %v10178_v28 = vmul.f32 0.03125, %v10132_v11 }
0x1969   : > { %v10135_v35 = vpop.xlane.xlu0 %10134 }
0x196a   : > { %13143 = vrsqrt.f32 %v10197_v26  ;;  %v10194_v17 = vadd.f32 1e-05, %v10178_v28  ;;  %v10179_v41 = vmul.f32 0.03125, %v10135_v35 }
0x196c   : > { %13145 = vrsqrt.f32 %v10194_v17  ;;  %v10195_v40 = vadd.f32 1e-05, %v10179_v41 }
0x196e   : > { %13147 = vrsqrt.f32 %v10195_v40 }
0x196f   : > { %v10150_v39 = vpop.xlane.xlu1 %10149 }
0x1970   : > { %v10184_v61 = vmul.f32 0.03125, %v10150_v39 }
0x1971   : > { %v10153_v6 = vpop.xlane.xlu0 %10152 }
0x1972   : > { %v13142_v51 = vpop.eup %13141  ;;  %v10200_v0 = vadd.f32 1e-05, %v10184_v61  ;;  %v10185_v46 = vmul.f32 0.03125, %v10153_v6 }
0x1973   : > { %v10228_v27 = vmul.f32 %v13142_v51, %v18402_v55  ;;  %v10144_v57 = vpop.xlane.xlu1 %10143 }
0x1974   : > { %v13144_v14 = vpop.eup %13143  ;;  %13149 = vrsqrt.f32 %v10200_v0  ;;  %v10201_v49 = vadd.f32 1e-05, %v10185_v46  ;;  %v10182_v12 = vmul.f32 0.03125, %v10144_v57 }
0x1975   : > { %v10250_v18 = vmul.f32 %v18498_v4, %v10228_v27  ;;  %v10229_v59 = vmul.f32 %v13144_v14, %v18405_v30  ;;  %v10147_v10 = vpop.xlane.xlu0 %10146 }
0x1976   : > { %v13146_v23 = vpop.eup %13145  ;;  %13151 = vrsqrt.f32 %v10201_v49  ;;  %v10198_v63 = vadd.f32 1e-05, %v10182_v12  ;;  %v10183_v29 = vmul.f32 0.03125, %v10147_v10 }
0x1977   : > { %v18507_v8 = vadd.f32 %v18502_v48, %v10250_v18  ;;  %v10251_v55 = vmul.f32 %v18498_v4, %v10229_v59  ;;  %v10226_v5 = vmul.f32 %v13146_v23, %v18410_v54 }
0x1978   : > { %v13148_v42 = vpop.eup %13147  ;;  %13153 = vrsqrt.f32 %v10198_v63  ;;  %v10199_v1 = vadd.f32 1e-05, %v10183_v29 }
0x1979   : > { %10288 = vst.msk [vmem:[#allocation2 + $0x10] sm:$0xff] %vm1630_vm2, %v18507_v8  ;;  %v18514_v30 = vadd.f32 %v18502_v48, %v10251_v55  ;;  %v10248_v60 = vmul.f32 %v18498_v4, %v10226_v5  ;;  %v10227_v58 = vmul.f32 %v13148_v42, %v18416_v15 }
0x197a   : > { %13155 = vrsqrt.f32 %v10199_v1 }
0x197b   : > { %10289 = vst.msk [vmem:[#allocation2 + $0x18] sm:$0xff] %vm1630_vm2, %v18514_v30  ;;  %v18521_v9 = vadd.f32 %v18502_v48, %v10248_v60  ;;  %v10249_v54 = vmul.f32 %v18498_v4, %v10227_v58 }
0x197d   : > { %10286 = vst.msk [vmem:[#allocation2] sm:$0xff] %vm1630_vm2, %v18521_v9  ;;  %v18527_v25 = vadd.f32 %v18502_v48, %v10249_v54 }
0x197e   : > { %v13150_v24 = vpop.eup %13149 }
0x197f   : > { %10287 = vst.msk [vmem:[#allocation2 + $0x8] sm:$0xff] %vm1630_vm2, %v18527_v25  ;;  %v10232_v15 = vmul.f32 %v13150_v24, %v18426_v56 }
0x1980   : > { %v13152_v50 = vpop.eup %13151 }
0x1981   : > { %v10254_v34 = vmul.f32 %v18498_v4, %v10232_v15  ;;  %v10233_v21 = vmul.f32 %v13152_v50, %v18429_v62 }
0x1982   : > { %v13154_v44 = vpop.eup %13153 }
0x1983   : > { %v18535_v38 = vadd.f32 %v18502_v48, %v10254_v34  ;;  %v10255_v37 = vmul.f32 %v18498_v4, %v10233_v21  ;;  %v10230_v19 = vmul.f32 %v13154_v44, %v18434_v47 }
0x1984   : > { %v13156_v7 = vpop.eup %13155 }
0x1985   : > { %10292 = vst.msk [vmem:[#allocation2 + $0x30] sm:$0xff] %vm1630_vm2, %v18535_v38  ;;  %v18542_v2 = vadd.f32 %v18502_v48, %v10255_v37  ;;  %v10252_v56 = vmul.f32 %v18498_v4, %v10230_v19  ;;  %v10231_v33 = vmul.f32 %v13156_v7, %v18440_v20 }
0x1987   : > { %10293 = vst.msk [vmem:[#allocation2 + $0x38] sm:$0xff] %vm1630_vm2, %v18542_v2  ;;  %v18549_v62 = vadd.f32 %v18502_v48, %v10252_v56  ;;  %v10253_v3 = vmul.f32 %v18498_v4, %v10231_v33 }
0x1989   : > { %10290 = vst.msk [vmem:[#allocation2 + $0x20] sm:$0xff] %vm1630_vm2, %v18549_v62  ;;  %v18555_v47 = vadd.f32 %v18502_v48, %v10253_v3 }
0x198b   : > { %10291 = vst.msk [vmem:[#allocation2 + $0x28] sm:$0xff] %vm1630_vm2, %v18555_v47 }
0x19a3   : > { %v10162_v43 = vpop.xlane.xlu1 %10161 }
0x19a4   : > { %v10188_v53 = vmul.f32 0.03125, %v10162_v43 }
0x19a5   : > { %v10165_v20 = vpop.xlane.xlu0 %10164 }
0x19a6   : > { %v10204_v11 = vadd.f32 1e-05, %v10188_v53  ;;  %v10189_v26 = vmul.f32 0.03125, %v10165_v20 }
0x19a7   : > { %v10156_v28 = vpop.xlane.xlu1 %10155 }
0x19a8   : > { %13157 = vrsqrt.f32 %v10204_v11  ;;  %v10205_v35 = vadd.f32 1e-05, %v10189_v26  ;;  %v10186_v17 = vmul.f32 0.03125, %v10156_v28  ;;  %v10315_v26 = vld [vmem:[#allocation4] sm:$0x1] (!%p11080_p1)  ;;  %v13359_v28 = vmov (!%p11080_p1), 0  }
0x19a9   : > { %v10159_v41 = vpop.xlane.xlu0 %10158  ;;  %13256 = vset.pattern.permute.xlu0 (!%p11080_p1), %v13359_v28 }
0x19aa   : > { %13159 = vrsqrt.f32 %v10205_v35  ;;  %v10202_v40 = vadd.f32 1e-05, %v10186_v17  ;;  %v10187_v39 = vmul.f32 0.03125, %v10159_v41  ;;  %10318 = vperm.xlu0 (!%p11080_p1), %13256, %v10315_v26   ;;  %v10310_v17 = vpack.c.bf16 (!%p11080_p1), %v18542_v2, %v18535_v38 }
0x19ac   : > { %13161 = vrsqrt.f32 %v10202_v40  ;;  %v10203_v61 = vadd.f32 1e-05, %v10187_v39 }
0x19ae   : > { %13163 = vrsqrt.f32 %v10203_v61  ;;  %v10306_v61 = vld [vmem:[%s19538_s0] sm:$0x1] (!%p11080_p1) }
0x19b2   : > { %v13158_v6 = vpop.eup %13157 }
0x19b3   : > { %v10236_v51 = vmul.f32 %v13158_v6, %v18450_v52 }
0x19b4   : > { %v13160_v0 = vpop.eup %13159  ;;  %v10168_v46 = vpop.xlane.xlu1 %10167 }
0x19b5   : > { %v10258_v27 = vmul.f32 %v18498_v4, %v10236_v51  ;;  %v10237_v57 = vmul.f32 %v13160_v0, %v18453_v16  ;;  %v10190_v14 = vmul.f32 0.03125, %v10168_v46  ;;  %v19539_v51 = vld [vmem:[#allocation73_spill] sm:$0xff] (!%p11080_p1) }
0x19b6   : > { %v13162_v49 = vpop.eup %13161  ;;  %v10171_v12 = vpop.xlane.xlu0 %10170 }
0x19b7   : > { %v18563_v18 = vadd.f32 %v18502_v48, %v10258_v27  ;;  %v10259_v59 = vmul.f32 %v18498_v4, %v10237_v57  ;;  %v10234_v10 = vmul.f32 %v13162_v49, %v18458_v45  ;;  %v10206_v23 = vadd.f32 1e-05, %v10190_v14  ;;  %v19540_v49 = vld [vmem:[#allocation19_spill] sm:$0xff] (!%p11080_p1) }
0x19b8   : > { %v13164_v63 = vpop.eup %13163  ;;  %v10191_v29 = vmul.f32 0.03125, %v10171_v12  ;;  %v10174_v52 = vpop.xlane.xlu1 %10173 }
0x19b9   : > { %10296 = vst.msk [vmem:[#allocation2 + $0x50] sm:$0xff] %vm1630_vm2, %v18563_v18  ;;  %v18570_v55 = vadd.f32 %v18502_v48, %v10259_v59  ;;  %v10256_v16 = vmul.f32 %v18498_v4, %v10234_v10  ;;  %v10235_v5 = vmul.f32 %v13164_v63, %v18464_v13  ;;  %13165 = vrsqrt.f32 %v10206_v23 }
0x19ba   : > { %v10207_v42 = vadd.f32 1e-05, %v10191_v29  ;;  %v10192_v1 = vmul.f32 0.03125, %v10174_v52  ;;  %v10177_v60 = vpop.xlane.xlu0 %10176 }
0x19bb   : > { %10297 = vst.msk [vmem:[#allocation2 + $0x58] sm:$0xff] %vm1630_vm2, %v18570_v55  ;;  %v10278_v45 = vadd.f32 %v18502_v48, %v10256_v16  ;;  %v10257_v58 = vmul.f32 %v18498_v4, %v10235_v5  ;;  %v10193_v54 = vmul.f32 0.03125, %v10177_v60  ;;  %v10312_v40 = vpack.c.bf16 (!%p11080_p1), %v18570_v55, %v18563_v18 }
0x19bc   : > { %13167 = vrsqrt.f32 %v10207_v42  ;;  %v10208_v24 = vadd.f32 1e-05, %v10192_v1 }
0x19bd   : > { %10294 = vst.msk [vmem:[#allocation2 + $0x40] sm:$0xff] %vm1630_vm2, %v10278_v45  ;;  %v10279_v15 = vadd.f32 %v18502_v48, %v10257_v58  ;;  %v10209_v50 = vadd.f32 1e-05, %v10193_v54 }
0x19be   : > { %13169 = vrsqrt.f32 %v10208_v24 }
0x19bf   : > { %10295 = vst.msk [vmem:[#allocation2 + $0x48] sm:$0xff] %vm1630_vm2, %v10279_v15  ;;  %13171 = vrsqrt.f32 %v10209_v50 }
0x19c3   : > { %v13166_v13 = vpop.eup %13165 }
0x19c4   : > { %v10238_v34 = vmul.f32 %v13166_v13, %v18474_v22 }
0x19c6   : > { %v13168_v21 = vpop.eup %13167  ;;  %v10260_v44 = vmul.f32 %v18498_v4, %v10238_v34 }
0x19c7   : > { %v10239_v37 = vmul.f32 %v13168_v21, %v18477_v36 }
0x19c8   : > { %v13170_v19 = vpop.eup %13169  ;;  %v10282_v7 = vadd.f32 %v18502_v48, %v10260_v44 }
0x19c9   : > { %v13172_v56 = vpop.eup %13171  ;;  %v10261_v33 = vmul.f32 %v18498_v4, %v10239_v37  ;;  %v10240_v3 = vmul.f32 %v13170_v19, %v18482_v32  ;;  %v10307_v32 = vpack.c.bf16 (!%p11080_p1), %v18527_v25, %v18521_v9  ;;  %v10309_v9 = vpack.c.bf16 (!%p11080_p1), %v18555_v47, %v18549_v62 }
0x19ca   : > { %10298 = vst.msk [vmem:[#allocation2 + $0x60] sm:$0xff] %vm1630_vm2, %v10282_v7  ;;  %v10241_v43 = vmul.f32 %v13172_v56, %v18488_v31  ;;  %10305 = sbr.rel (%p11080_p1) target bundleno = 6885 (0x1ae5), region = 136  ;;  %v13357_v31 = vmov (!%p11080_p1), 0.0   ;;  %v10344_v62 = vsel (!%p11080_p1), %vm1630_vm2, %v10312_v40, 0 }
0x19cb   : > { %v10283_v53 = vadd.f32 %v18502_v48, %v10261_v33  ;;  %v10262_v22 = vmul.f32 %v18498_v4, %v10240_v3  ;;  %12140 = vmatprep.subr.bf16.mxu0 (!%p11080_p1), %v13357_v31  ;;  %12156 = vmatprep.mubr.msk.bf16.mxu0 (!%p11080_p1), %vm13358_vm6, %v13357_v31  ;;  %v10335_v25 = vsel (!%p11080_p1), %vm1630_vm2, %v10309_v9, 0 }
0x19cc   : > { %v10263_v20 = vmul.f32 %v18498_v4, %v10241_v43  ;;  %v10329_v4 = vsel (!%p11080_p1), %vm1630_vm2, %v10307_v32, 0 }
0x19cd   : > { %10299 = vst.msk [vmem:[#allocation2 + $0x68] sm:$0xff] %vm1630_vm2, %v10283_v53  ;;  %v10284_v36 = vadd.f32 %v18502_v48, %v10262_v22  ;;  %12141 = vmatpush3.bf16.xpose.msra.mxu0 (!%p11080_p1), %v10329_v4  ;;  %v10313_v47 = vpack.c.bf16 (!%p11080_p1), %v10283_v53, %v10282_v7 }
0x19ce   : > { %v10285_v11 = vadd.f32 %v18502_v48, %v10263_v20  ;;  %12142 = vmatprep.subr.bf16.mxu0 (!%p11080_p1), %v13357_v31  ;;  %v10308_v48 = vpack.c.bf16 (!%p11080_p1), %v18514_v30, %v18507_v8  ;;  %v10338_v8 = vsel (!%p11080_p1), %vm1630_vm2, %v10310_v17, 0  ;;  %v10311_v30 = vpack.c.bf16 (!%p11080_p1), %v10279_v15, %v10278_v45 }
0x19cf   : > { %10300 = vst.msk [vmem:[#allocation2 + $0x70] sm:$0xff] %vm1630_vm2, %v10284_v36  ;;  %v10347_v39 = vsel (!%p11080_p1), %vm1630_vm2, %v10313_v47, 0 }
0x19d0   : > { %10301 = vst.msk [vmem:[#allocation2 + $0x78] sm:$0xff] %vm1630_vm2, %v10285_v11  ;;  %v10332_v35 = vsel (!%p11080_p1), %vm1630_vm2, %v10308_v48, 0  ;;  %v10341_v41 = vsel (!%p11080_p1), %vm1630_vm2, %v10311_v30, 0  ;;  %v10314_v38 = vpack.c.bf16 (!%p11080_p1), %v10285_v11, %v10284_v36 }
0x19d2   : > { %v10350_v2 = vsel %vm1630_vm2, %v10314_v38, 0 }
0x19d5   : > { %12143 = vmatpush3.bf16.xpose.msra.mxu0 %v10332_v35 }
0x19d6   : > { %12144 = vmatprep.subr.bf16.mxu0 %v13357_v31 }
0x19dd   : > { %12145 = vmatpush3.bf16.xpose.msra.mxu0 %v10335_v25 }
0x19de   : > { %12146 = vmatprep.subr.bf16.mxu0 %v13357_v31 }
0x19e5   : > { %12147 = vmatpush3.bf16.xpose.msra.mxu0 %v10338_v8 }
0x19e6   : > { %12148 = vmatprep.subr.bf16.mxu0 %v13357_v31 }
0x19ed   : > { %12149 = vmatpush3.bf16.xpose.msra.mxu0 %v10341_v41 }
0x19ee   : > { %12150 = vmatprep.subr.bf16.mxu0 %v13357_v31 }
0x19f5   : > { %12151 = vmatpush3.bf16.xpose.msra.mxu0 %v10344_v62 }
0x19f6   : > { %12152 = vmatprep.subr.bf16.mxu0 %v13357_v31 }
0x19fd   : > { %12153 = vmatpush3.bf16.xpose.msra.mxu0 %v10347_v39 }
0x19fe   : > { %12154 = vmatprep.subr.bf16.mxu0 %v13357_v31 }
0x1a05   : > { %12155 = vmatpush3.bf16.xpose.msra.mxu0 %v10350_v2 }
0x1a0c   : > { %12157 = vmatmul.mubr.msk.bf16.vlgmr.msra.gmra.mrb[0].mxu0 %vm1630_vm2, %v10306_v61 }
0x1a29   : > { %v10319_v6 = vpop.permute.xlu0 %10318 }
0x1a2a   : > { %v10324_v0 = vrot.slane %v10319_v6, %v19539_v51 }
0x1adf   : > { %v10386_v46 = vpop.f32.mrb[0].mxu0 }
0x1ae0   : > { %v10387_v27 = vadd.f32 %v10386_v46, %v10324_v0  ;;  %v12158_v57 = vpop.f32.mrb[1].mxu0 }
0x1ae1   : > { %v10389_v14 = vpop.f32.mrb[2].mxu0 }
0x1ae2   : > { %v10392_v12 = vmul.f32 %v10387_v27, %v19540_v49  ;;  %v12159_v18 = vpop.f32.mrb[3].mxu0 }
0x1ae4   : > { %10393 = vst [vmem:[%s13705_s19] sm:$0x1] %v10392_v12 }
0x1ae5 PF: > { %s19541_s8 = sld [smem:[#allocation10_spill]]  ;;  %s10407_s10 = sshll.u32 %s13705_s19, 4  ;;  %s10408_s10 = int_to_ptr.vmem [resolvable:$true] %s10407_s10 }
0x1ae6   : > { %s19543_s3 = sld [smem:[#allocation128_spill]]  ;;  %s19544_s7 = sand.u32 1, %s13327_s30  }
0x1ae7   : > { %s10395_s13 = scalar_lea.sflag [#allocation6], %s19544_s7  ;;  %s13257_s14 = scalar_lea.vmem %s10408_s10, 16 }
0x1ae8   : > { %p13258_p2 = scmp.ne.s32.totalorder %s10408_s10, %s13257_s14  ;;  %s13360_s28 = smov [#allocation5]  }
0x1ae9   : > { %s13261_s9 = sshll.u32 %s13360_s28, 4  ;;  %s13262_s9 = int_to_ptr.vmem [resolvable:$false] %s13261_s9 }
0x1aea   : > { %p13259_p4 = pnand %p13258_p2, %p13553_p3  ;;  %s13263_s12 = scalar_lea.vmem %s13262_s9, 32 }
0x1aeb   : > { %s11082_s1 = sshll.u32 %s19541_s8, 4  ;;  %p13264_p6 = scmp.lt.s32.totalorder %s10408_s10, %s13262_s9 }
0x1aec   : > { %s18627_s11 = scalar_lea.hbm %s19543_s3, %s11082_s1  ;;  %p13260_p5 = pneg %p13259_p4 }
0x1aed   : > { %p13265_p7 = scmp.lt.s32.totalorder %s13263_s12, %s13257_s14 }
0x1aef   : > { %p13266_p8 = por %p13265_p7, %p13264_p6 }
0x1af1   : > { %p13267_p10 = pnand %p13266_p8, %p13260_p5 }
0x1af3   : > { %13270 = shalt.err (!%p13267_p10)
}
0x1af4   : > { %s13271_s19 = scalar_lea.hbm %s18627_s11, 16  ;;  %s13275_s18 = scalar_lea.hbm %s19543_s3, 32 }
0x1af5   : > { %p13272_p11 = scmp.ne.s32.totalorder %s18627_s11, %s13271_s19  ;;  %p13276_p0 = scmp.lt.u32.totalorder %s18627_s11, %s19543_s3 }
0x1af6   : > { %p13277_p1 = scmp.lt.u32.totalorder %s13275_s18, %s13271_s19  ;;  %p13279_p4 = scmp.lt.u32.totalorder %s13271_s19, %s18627_s11 }
0x1af7   : > { %p13273_p12 = pnand %p13272_p11, %p13553_p3 }
0x1af8   : > { %p13278_p2 = por %p13277_p1, %p13276_p0 }
0x1af9   : > { %p13274_p13 = pneg %p13273_p12 }
0x1afa   : > { %p13280_p5 = por %p13279_p4, %p13278_p2 }
0x1afc   : > { %p13281_p6 = pnand %p13280_p5, %p13274_p13 }
0x1afe   : > { %13284 = shalt.err (!%p13281_p6)
}
0x1aff   : > { %12187 = dma.vmem_to_hbm [thread:$0]  (%p13553_p3), %s10408_s10, 16, %s18627_s11, %s10395_s13  }
0x1b00 PF: > { %s19545_s8 = sld [smem:[#allocation13_spill]]  ;;  %s19546_s1 = sld [smem:[#allocation8_spill]] }
0x1b06   : > { %p12193_p7 = scmp.ge.s32.totalorder %s19545_s8, 2  ;;  %s10419_s25 = sand.u32 1, %s19546_s1  }
0x1b07   : > { %s10420_s7 = scalar_lea.sflag [#allocation6], %s10419_s25 }
0x1b08   : > { %p12190_p8 = pnand %p12193_p7, %p13563_p9 }
0x1b0a   : > { %13318 = dma.done.wait (!%p12190_p8), %s10420_s7, 16  }
0x1b0b   : > { %13320 = vsyncadd (!%p12190_p8), %s10420_s7, 4294967280  ;;  %s42_s29 = sadd.s32 1, %s19545_s8   ;;  %s19548_s14 = sld [smem:[#allocation9_spill]] }
0x1b0c   : > { %p39_p10 = scmp.ge.s32.totalorder %s42_s29, 6   ;;  %s19549_s9 = sld [smem:[#allocation18_spill]] }
0x1b0d   : > { %s19550_s5 = sld [smem:[#allocation11_spill]]  ;;  %s19551_s28 = sld [smem:[#allocation12_spill]] }
0x1b0e   : > { %s19552_s0 = sld [smem:[#allocation14_spill]]  ;;  %s19553_s10 = sld [smem:[#allocation16_spill]] }
0x1b0f   : > { %s19554_s8 = smov %s13327_s30  ;;  %41 = sbr.rel (!%p39_p10) target bundleno = 28 (0x1c), region = 230 }
0x1b11   : > { %s19555_s30 = smov %s19548_s14 }
0x1b16   :  { %10424 = vsyncpa [#allocation6], 1 }
0x1b17   :  { %10426 = vsyncpa [#allocation6 + $0x1], 1 }

</bundles_post_ra>
